<compile_context>
chip_gen: v7x
topology: tpu7x:2x2x1
jax: 0.10.0
libtpu: 0.0.40
codegen_flags: <defaults>
</compile_context>

<pallas_src>
import jax
import jax.numpy as jnp
from jax.experimental import pallas as pl
from jax.experimental.pallas import tpu as pltpu

C1, C2, C3, C4, C5 = 64, 128, 1024, 512, 256   # conv1/conv2/conv3/linear1/linear2 widths
LANES = 128                                    # TPU lane width


def _round_up(v, m):
    return (v + m - 1) // m * m


def transform_net_kernel(x_ref, w1_ref, w2_ref, w3_ref, w4_ref, w5_ref, w6_ref,
                         bias_ref, out_ref, acc_ref):
    n = pl.program_id(1)
    kkpad = out_ref.shape[1]

    # Static (trace-time) offsets into the fused bias column.  All offsets are
    # multiples of 8 (sublane-aligned slices): 0, 64, 192, 1216, 1728, 1984.
    offs = [0]
    for c in (C1, C2, C3, C4, C5, kkpad):
        offs.append(offs[-1] + c)

    @pl.when(n == 0)
    def _init():
        acc_ref[...] = jnp.full_like(acc_ref, -jnp.inf)

    # ---- conv1/conv2: 1x1 conv == matmul (BN folded, bias+ReLU in f32) -------
    # NCW layout: channels on sublanes, points (TILE_N) on lanes.
    x = x_ref[0]                                                     # (K, T) bf16
    b1 = bias_ref[offs[0]:offs[1]]                                   # (64, 1)  f32
    b2 = bias_ref[offs[1]:offs[2]]                                   # (128, 1) f32

    h = jnp.dot(w1_ref[...], x, preferred_element_type=jnp.float32)   # (64, T)
    h = jnp.maximum(h + b1, 0.0).astype(jnp.bfloat16)
    h = jnp.dot(w2_ref[...], h, preferred_element_type=jnp.float32)   # (128, T)
    h = jnp.maximum(h + b2, 0.0).astype(jnp.bfloat16)

    # ---- conv3: matmul ONLY.  Bias + ReLU are deferred past the max ----------
    h = jnp.dot(w3_ref[...], h, preferred_element_type=jnp.float32)   # (1024, T) pre-act

    # ---- lane-wide running max (VPU only; no per-tile XLU reduce) ------------
    t = h[:, 0:LANES]
    for c in range(1, h.shape[1] // LANES):                           # static unrolled
        t = jnp.maximum(t, h[:, c * LANES:(c + 1) * LANES])
    acc_ref[...] = jnp.maximum(acc_ref[...], t)                       # (1024, 128)

    # ---- MLP tail + store: once per batch row, on the last point tile --------
    @pl.when(n == pl.num_programs(1) - 1)
    def _tail():
        b3 = bias_ref[offs[2]:offs[3]]                                # (1024, 1)
        b4 = bias_ref[offs[3]:offs[4]]                                # (512, 1)
        b5 = bias_ref[offs[4]:offs[5]]                                # (256, 1)
        b6 = bias_ref[offs[5]:offs[6]]                                # (kkpad, 1)
        # Single cross-lane reduce per batch row, then the deferred bias + ReLU.
        g = jnp.max(acc_ref[...], axis=1, keepdims=True)              # (1024, 1) f32
        g = jnp.maximum(g + b3, 0.0)
        f = jnp.maximum(
            jnp.dot(w4_ref[...], g.astype(jnp.bfloat16),
                    preferred_element_type=jnp.float32) + b4, 0.0)    # (512, 1)
        f = jnp.maximum(
            jnp.dot(w5_ref[...], f.astype(jnp.bfloat16),
                    preferred_element_type=jnp.float32) + b5, 0.0)    # (256, 1)
        f = jnp.dot(w6_ref[...], f.astype(jnp.bfloat16),
                    preferred_element_type=jnp.float32) + b6          # (kkpad, 1)
        out_ref[0] = f


def _fold_bn(w, b, bn, eps=1e-5):
    """Fold eval-mode BatchNorm1d into an (out, in) weight and (out,) bias."""
    if bn is None:
        return w, b
    gamma, beta, mean, var = bn
    scale = gamma / jnp.sqrt(var + eps)
    return w * scale[:, None], (b - mean) * scale + beta


def init_transform_net_params(key, K):
    """PyTorch-layout (out, in) weights / (out,) biases.  conv1-3 and linear1-2 carry
    non-identity eval-mode BatchNorm1d statistics (gamma, beta, mean, var) so the BN
    fold is actually exercised; linear3 has no BN / activation."""
    dims = [(K, C1), (C1, C2), (C2, C3), (C3, C4), (C4, C5), (C5, K * K)]
    keys = jax.random.split(key, 6 * len(dims))
    params = []
    for i, (din, dout) in enumerate(dims):
        ks = keys[6 * i:6 * i + 6]
        w = jax.random.normal(ks[0], (dout, din), jnp.float32) * 0.05
        b = jax.random.normal(ks[1], (dout,), jnp.float32) * 0.05
        if i < 5:
            gamma = 1.0 + 0.2 * jax.random.normal(ks[2], (dout,), jnp.float32)
            beta = 0.1 * jax.random.normal(ks[3], (dout,), jnp.float32)
            mean = 0.1 * jax.random.normal(ks[4], (dout,), jnp.float32)
            var = jax.nn.softplus(jax.random.normal(ks[5], (dout,), jnp.float32)) + 0.5
            params.append((w, b, (gamma, beta, mean, var)))
        else:
            params.append((w, b, None))
    return params


def transform_net_forward(x_ncw, params, K, tile_n=None):
    """x_ncw: (B, K, N) float32 (NCW, as the PyTorch module expects) -> (B, K, K) f32."""
    B, Kc, N = x_ncw.shape
    assert Kc == K
    assert N % 128 == 0, "point count N must be a multiple of 128 (lane width)"
    kk = K * K
    kkpad = _round_up(kk, 128)

    # ---- point-tile ladder: biggest lane-aligned tile that fits everywhere ----
    # Capped at 1024 so the (1024, T) f32 slab + weights fit v7x's 64 MiB VMEM;
    # v5e/v6e (128 MiB) could take 2048 but 1024 amortizes the per-step overhead fine.
    if tile_n is None:
        for t in (1024, 512, 256, 128):
            if N % t == 0:
                tile_n = t
                break
    assert N % tile_n == 0 and tile_n % 128 == 0
    n_tiles = N // tile_n

    # ---- fold BN, build kernel operands: bf16 weights, one fused f32 bias column ----
    folded = [_fold_bn(w, b, bn) for (w, b, bn) in params]
    (w1, b1), (w2, b2), (w3, b3), (w4, b4), (w5, b5), (w6, b6) = folded
    w6p = jnp.zeros((kkpad, C5), jnp.float32).at[:kk].set(w6)
    b6p = jnp.zeros((kkpad,), jnp.float32).at[:kk].set(b6)
    bias_all = jnp.concatenate([b1, b2, b3, b4, b5, b6p]).reshape(-1, 1)  # (1984+kkpad, 1)
    w1b, w2b, w3b, w4b, w5b, w6pb = (w.astype(jnp.bfloat16)
                                     for w in (w1, w2, w3, w4, w5, w6p))
    x_bf = x_ncw.astype(jnp.bfloat16)

    flops = (2 * B * N * (K * C1 + C1 * C2 + C2 * C3)
             + 2 * B * (C3 * C4 + C4 * C5 + C5 * kkpad))
    bytes_accessed = (x_bf.size * 2
                      + (w1b.size + w2b.size + w3b.size
                         + w4b.size + w5b.size + w6pb.size) * 2
                      + bias_all.size * 4
                      + B * kkpad * 4)

    out = pl.pallas_call(
        transform_net_kernel,
        out_shape=jax.ShapeDtypeStruct((B, kkpad, 1), jnp.float32),
        grid_spec=pltpu.PrefetchScalarGridSpec(
            num_scalar_prefetch=0,
            grid=(B, n_tiles),
            in_specs=[
                pl.BlockSpec((1, K, tile_n), lambda b, n: (b, 0, n)),       # x tile
                pl.BlockSpec((C1, K), lambda b, n: (0, 0)),                 # conv1 W (bf16)
                pl.BlockSpec((C2, C1), lambda b, n: (0, 0)),                # conv2 W
                pl.BlockSpec((C3, C2), lambda b, n: (0, 0)),                # conv3 W
                pl.BlockSpec((C4, C3), lambda b, n: (0, 0)),                # linear1 W (bf16)
                pl.BlockSpec((C5, C4), lambda b, n: (0, 0)),                # linear2 W (bf16)
                pl.BlockSpec((kkpad, C5), lambda b, n: (0, 0)),             # linear3 W (padded)
                pl.BlockSpec((bias_all.shape[0], 1), lambda b, n: (0, 0)),  # fused biases
            ],
            out_specs=pl.BlockSpec((1, kkpad, 1), lambda b, n: (b, 0, 0)),
            scratch_shapes=[pltpu.VMEM((C3, LANES), jnp.float32)],          # lane-wide max acc
        ),
        compiler_params=pltpu.CompilerParams(
            # Batch axis "parallel": with B >= 2 (even, as in the demo) v7x's two
            # TensorCores both get work; near-neutral on v5e/v6e.
            dimension_semantics=("parallel", "arbitrary"),
            # Right-sized: working set is ~8-19 MiB depending on K/tile; 32 MiB is
            # comfortable headroom without pressuring v7x's 64 MiB physical VMEM.
            vmem_limit_bytes=32 << 20,
        ),
        cost_estimate=pl.CostEstimate(flops=int(flops), transcendentals=0,
                                      bytes_accessed=int(bytes_accessed)),
    )(x_bf, w1b, w2b, w3b, w4b, w5b, w6pb, bias_all)

    # Identity add + final reshape on the tiny (B, K*K) result stays in the wrapper.
    out2d = out.reshape(B, kkpad)[:, :kk] + jnp.eye(K, dtype=jnp.float32).reshape(1, kk)
    return out2d.reshape(B, K, K)


def transform_net_reference(x_ncw, params, K, eps=1e-5):
    """Pure-JAX f32 reference of the PyTorch forward, applying eval-mode BatchNorm1d
    explicitly (unfolded) so the kernel's BN fold is validated."""
    def bn_apply(y, bn):
        if bn is None:
            return y
        gamma, beta, mean, var = bn
        return (y - mean) / jnp.sqrt(var + eps) * gamma + beta

    h = jnp.transpose(x_ncw, (0, 2, 1))                                # (B, N, K)
    for w, b, bn in params[:3]:                                        # conv1..conv3
        h = jnp.einsum('bnc,dc->bnd', h, w) + b
        h = jnp.maximum(bn_apply(h, bn), 0.0)
    f = jnp.max(h, axis=1)                                             # (B, 1024)
    for idx, (w, b, bn) in enumerate(params[3:]):                      # linear1..linear3
        f = bn_apply(f @ w.T + b, bn)
        if idx < 2:
            f = jnp.maximum(f, 0.0)
    f = f + jnp.eye(K, dtype=jnp.float32).reshape(1, K * K)
    return f.reshape(-1, K, K)


if __name__ == "__main__":
    K = 3          # transform dimension (3 for the input T-Net; 64 also supported)
    B = 2          # batch (even, so v7x's two TensorCores both get work)
    N = 256        # number of points

    key = jax.random.PRNGKey(0)
    k_param, k_x = jax.random.split(key)
    params = init_transform_net_params(k_param, K)
    x = jax.random.normal(k_x, (B, K, N), jnp.float32)                 # NCW, like PyTorch

    # tile_n=128 -> 2 point tiles: exercises the lane-wide running-max accumulator and
    # the pl.when-gated (deferred bias/ReLU) MLP tail on a small problem.
    out = transform_net_forward(x, params, K, tile_n=128)
    out = jax.block_until_ready(out)
    assert out.shape == (B, K, K) and out.dtype == jnp.float32

    ref = transform_net_reference(x, params, K)
    err = float(jnp.max(jnp.abs(out - ref)))
    scale = float(jnp.max(jnp.abs(ref)))
    assert err <= 5e-2 * max(1.0, scale), \
        f"kernel/reference mismatch: max abs err = {err}, ref scale = {scale}"
    print("KERNEL_OK")
</pallas_src>

<mosaic_0001>
module attributes {stable_mosaic.version = 11 : i64} {
  func.func @transform_net_kernel(%arg0: i32, %arg1: i32, %arg2: memref<1x3x128xbf16, #tpu.memory_space<vmem>>, %arg3: memref<64x3xbf16, #tpu.memory_space<vmem>>, %arg4: memref<128x64xbf16, #tpu.memory_space<vmem>>, %arg5: memref<1024x128xbf16, #tpu.memory_space<vmem>>, %arg6: memref<512x1024xbf16, #tpu.memory_space<vmem>>, %arg7: memref<256x512xbf16, #tpu.memory_space<vmem>>, %arg8: memref<128x256xbf16, #tpu.memory_space<vmem>>, %arg9: memref<2112x1xf32, #tpu.memory_space<vmem>>, %arg10: memref<1x128x1xf32, #tpu.memory_space<vmem>>, %arg11: memref<1024x128xf32, #tpu.memory_space<vmem>>) attributes {dimension_semantics = [#tpu.dimension_semantics<parallel>, #tpu.dimension_semantics<arbitrary>], iteration_bounds = array<i64: 2, 2>, scalar_prefetch = 0 : i64, scratch_operands = 1 : i64, tpu.core_type = #tpu.core_type<tc>, window_params = [{transform_indices = @transform_0, window_bounds = array<i64: 1, 3, 128>}, {pipeline_mode = #tpu.pipeline_mode<synchronous>, transform_indices = @transform_1, window_bounds = array<i64: 64, 3>}, {pipeline_mode = #tpu.pipeline_mode<synchronous>, transform_indices = @transform_2, window_bounds = array<i64: 128, 64>}, {pipeline_mode = #tpu.pipeline_mode<synchronous>, transform_indices = @transform_3, window_bounds = array<i64: 1024, 128>}, {pipeline_mode = #tpu.pipeline_mode<synchronous>, transform_indices = @transform_4, window_bounds = array<i64: 512, 1024>}, {pipeline_mode = #tpu.pipeline_mode<synchronous>, transform_indices = @transform_5, window_bounds = array<i64: 256, 512>}, {pipeline_mode = #tpu.pipeline_mode<synchronous>, transform_indices = @transform_6, window_bounds = array<i64: 128, 256>}, {pipeline_mode = #tpu.pipeline_mode<synchronous>, transform_indices = @transform_7, window_bounds = array<i64: 2112, 1>}, {transform_indices = @transform_8, window_bounds = array<i64: 1, 128, 1>}]} {
    %c0_i32 = arith.constant 0 : i32
    %0 = arith.cmpi eq, %arg1, %c0_i32 : i32
    %1 = arith.extui %0 : i1 to i32
    %c0_i32_0 = arith.constant 0 : i32
    %2 = arith.cmpi ne, %1, %c0_i32_0 : i32
    scf.if %2 {
      %cst_21 = arith.constant 0xFF800000 : f32
      %29 = vector.broadcast %cst_21 : f32 to vector<1024x128xf32>
      %c0_22 = arith.constant 0 : index
      %c0_23 = arith.constant 0 : index
      %30 = vector.load %arg11[%c0_22, %c0_23] : memref<1024x128xf32, #tpu.memory_space<vmem>>, vector<1024x128xf32>
      tpu.vector_store %arg11[%c0_22, %c0_23], %29 {strides = array<i32>} : memref<1024x128xf32, #tpu.memory_space<vmem>>, vector<1024x128xf32>,
    } else {
    }
    %c0 = arith.constant 0 : index
    %c0_1 = arith.constant 0 : index
    %c0_2 = arith.constant 0 : index
    %3 = vector.load %arg2[%c0, %c0_1, %c0_2] : memref<1x3x128xbf16, #tpu.memory_space<vmem>>, vector<1x3x128xbf16>
    %4 = vector.shape_cast %3 : vector<1x3x128xbf16> to vector<3x128xbf16>
    %c0_3 = arith.constant 0 : index
    %c0_4 = arith.constant 0 : index
    %5 = vector.load %arg9[%c0_3, %c0_4] : memref<2112x1xf32, #tpu.memory_space<vmem>>, vector<64x1xf32>
    %c64 = arith.constant 64 : index
    %c0_5 = arith.constant 0 : index
    %6 = vector.load %arg9[%c64, %c0_5] : memref<2112x1xf32, #tpu.memory_space<vmem>>, vector<128x1xf32>
    %c0_6 = arith.constant 0 : index
    %c0_7 = arith.constant 0 : index
    %7 = vector.load %arg3[%c0_6, %c0_7] : memref<64x3xbf16, #tpu.memory_space<vmem>>, vector<64x3xbf16>
    %cst = arith.constant dense<0.000000e+00> : vector<64x128xf32>
    %8 = tpu.matmul %7, %4, %cst {dimension_numbers = #tpu.dot_dimension_numbers<[1], [0], [0], [1], [0, 0, 1, 1], [], []>} : vector<64x3xbf16>, vector<3x128xbf16>, vector<64x128xf32> -> vector<64x128xf32>
    %9 = vector.broadcast %5 : vector<64x1xf32> to vector<64x128xf32>
    %10 = arith.addf %8, %9 : vector<64x128xf32>
    %cst_8 = arith.constant 0.000000e+00 : f32
    %11 = vector.broadcast %cst_8 : f32 to vector<64x128xf32>
    %12 = arith.maximumf %10, %11 : vector<64x128xf32>
    %13 = arith.truncf %12 : vector<64x128xf32> to vector<64x128xbf16>
    %c0_9 = arith.constant 0 : index
    %c0_10 = arith.constant 0 : index
    %14 = vector.load %arg4[%c0_9, %c0_10] : memref<128x64xbf16, #tpu.memory_space<vmem>>, vector<128x64xbf16>
    %cst_11 = arith.constant dense<0.000000e+00> : vector<128x128xf32>
    %15 = tpu.matmul %14, %13, %cst_11 {dimension_numbers = #tpu.dot_dimension_numbers<[1], [0], [0], [1], [0, 0, 1, 1], [], []>} : vector<128x64xbf16>, vector<64x128xbf16>, vector<128x128xf32> -> vector<128x128xf32>
    %16 = vector.broadcast %6 : vector<128x1xf32> to vector<128x128xf32>
    %17 = arith.addf %15, %16 : vector<128x128xf32>
    %cst_12 = arith.constant 0.000000e+00 : f32
    %18 = vector.broadcast %cst_12 : f32 to vector<128x128xf32>
    %19 = arith.maximumf %17, %18 : vector<128x128xf32>
    %20 = arith.truncf %19 : vector<128x128xf32> to vector<128x128xbf16>
    %c0_13 = arith.constant 0 : index
    %c0_14 = arith.constant 0 : index
    %21 = vector.load %arg5[%c0_13, %c0_14] : memref<1024x128xbf16, #tpu.memory_space<vmem>>, vector<1024x128xbf16>
    %cst_15 = arith.constant dense<0.000000e+00> : vector<1024x128xf32>
    %22 = tpu.matmul %21, %20, %cst_15 {dimension_numbers = #tpu.dot_dimension_numbers<[1], [0], [0], [1], [0, 0, 1, 1], [], []>} : vector<1024x128xbf16>, vector<128x128xbf16>, vector<1024x128xf32> -> vector<1024x128xf32>
    %c0_16 = arith.constant 0 : index
    %c0_17 = arith.constant 0 : index
    %23 = vector.load %arg11[%c0_16, %c0_17] : memref<1024x128xf32, #tpu.memory_space<vmem>>, vector<1024x128xf32>
    %24 = arith.maximumf %23, %22 : vector<1024x128xf32>
    %c0_18 = arith.constant 0 : index
    %c0_19 = arith.constant 0 : index
    %25 = vector.load %arg11[%c0_18, %c0_19] : memref<1024x128xf32, #tpu.memory_space<vmem>>, vector<1024x128xf32>
    tpu.vector_store %arg11[%c0_18, %c0_19], %24 {strides = array<i32>} : memref<1024x128xf32, #tpu.memory_space<vmem>>, vector<1024x128xf32>,
    %c1_i32 = arith.constant 1 : i32
    %26 = arith.cmpi eq, %arg1, %c1_i32 : i32
    %27 = arith.extui %26 : i1 to i32
    %c0_i32_20 = arith.constant 0 : i32
    %28 = arith.cmpi ne, %27, %c0_i32_20 : i32
    scf.if %28 {
      %c192 = arith.constant 192 : index
      %c0_21 = arith.constant 0 : index
      %29 = vector.load %arg9[%c192, %c0_21] : memref<2112x1xf32, #tpu.memory_space<vmem>>, vector<1024x1xf32>
      %c1216 = arith.constant 1216 : index
      %c0_22 = arith.constant 0 : index
      %30 = vector.load %arg9[%c1216, %c0_22] : memref<2112x1xf32, #tpu.memory_space<vmem>>, vector<512x1xf32>
      %c1728 = arith.constant 1728 : index
      %c0_23 = arith.constant 0 : index
      %31 = vector.load %arg9[%c1728, %c0_23] : memref<2112x1xf32, #tpu.memory_space<vmem>>, vector<256x1xf32>
      %c1984 = arith.constant 1984 : index
      %c0_24 = arith.constant 0 : index
      %32 = vector.load %arg9[%c1984, %c0_24] : memref<2112x1xf32, #tpu.memory_space<vmem>>, vector<128x1xf32>
      %c0_25 = arith.constant 0 : index
      %c0_26 = arith.constant 0 : index
      %33 = vector.load %arg11[%c0_25, %c0_26] : memref<1024x128xf32, #tpu.memory_space<vmem>>, vector<1024x128xf32>
      %cst_27 = arith.constant dense<0xFF800000> : vector<1024xf32>
      %34 = vector.multi_reduction <maximumf>, %33, %cst_27 [1] : vector<1024x128xf32> to vector<1024xf32>
      %35 = vector.shape_cast %34 : vector<1024xf32> to vector<1024x1xf32>
      %36 = arith.addf %35, %29 : vector<1024x1xf32>
      %cst_28 = arith.constant 0.000000e+00 : f32
      %37 = vector.broadcast %cst_28 : f32 to vector<1024x1xf32>
      %38 = arith.maximumf %36, %37 : vector<1024x1xf32>
      %c0_29 = arith.constant 0 : index
      %c0_30 = arith.constant 0 : index
      %39 = vector.load %arg6[%c0_29, %c0_30] : memref<512x1024xbf16, #tpu.memory_space<vmem>>, vector<512x1024xbf16>
      %40 = arith.truncf %38 : vector<1024x1xf32> to vector<1024x1xbf16>
      %cst_31 = arith.constant dense<0.000000e+00> : vector<512x1xf32>
      %41 = tpu.matmul %39, %40, %cst_31 {dimension_numbers = #tpu.dot_dimension_numbers<[1], [0], [0], [1], [0, 0, 1, 1], [], []>} : vector<512x1024xbf16>, vector<1024x1xbf16>, vector<512x1xf32> -> vector<512x1xf32>
      %42 = arith.addf %41, %30 : vector<512x1xf32>
      %cst_32 = arith.constant 0.000000e+00 : f32
      %43 = vector.broadcast %cst_32 : f32 to vector<512x1xf32>
      %44 = arith.maximumf %42, %43 : vector<512x1xf32>
      %c0_33 = arith.constant 0 : index
      %c0_34 = arith.constant 0 : index
      %45 = vector.load %arg7[%c0_33, %c0_34] : memref<256x512xbf16, #tpu.memory_space<vmem>>, vector<256x512xbf16>
      %46 = arith.truncf %44 : vector<512x1xf32> to vector<512x1xbf16>
      %cst_35 = arith.constant dense<0.000000e+00> : vector<256x1xf32>
      %47 = tpu.matmul %45, %46, %cst_35 {dimension_numbers = #tpu.dot_dimension_numbers<[1], [0], [0], [1], [0, 0, 1, 1], [], []>} : vector<256x512xbf16>, vector<512x1xbf16>, vector<256x1xf32> -> vector<256x1xf32>
      %48 = arith.addf %47, %31 : vector<256x1xf32>
      %cst_36 = arith.constant 0.000000e+00 : f32
      %49 = vector.broadcast %cst_36 : f32 to vector<256x1xf32>
      %50 = arith.maximumf %48, %49 : vector<256x1xf32>
      %c0_37 = arith.constant 0 : index
      %c0_38 = arith.constant 0 : index
      %51 = vector.load %arg8[%c0_37, %c0_38] : memref<128x256xbf16, #tpu.memory_space<vmem>>, vector<128x256xbf16>
      %52 = arith.truncf %50 : vector<256x1xf32> to vector<256x1xbf16>
      %cst_39 = arith.constant dense<0.000000e+00> : vector<128x1xf32>
      %53 = tpu.matmul %51, %52, %cst_39 {dimension_numbers = #tpu.dot_dimension_numbers<[1], [0], [0], [1], [0, 0, 1, 1], [], []>} : vector<128x256xbf16>, vector<256x1xbf16>, vector<128x1xf32> -> vector<128x1xf32>
      %54 = arith.addf %53, %32 : vector<128x1xf32>
      %c0_40 = arith.constant 0 : index
      %c0_41 = arith.constant 0 : index
      %c0_42 = arith.constant 0 : index
      %55 = vector.load %arg10[%c0_40, %c0_41, %c0_42] : memref<1x128x1xf32, #tpu.memory_space<vmem>>, vector<1x128x1xf32>
      %56 = vector.shape_cast %55 : vector<1x128x1xf32> to vector<128x1xf32>
      %57 = vector.shape_cast %54 : vector<128x1xf32> to vector<1x128x1xf32>
      tpu.vector_store %arg10[%c0_40, %c0_41, %c0_42], %57 {strides = array<i32>} : memref<1x128x1xf32, #tpu.memory_space<vmem>>, vector<1x128x1xf32>,
    } else {
    }
    return
  }
  func.func @transform_0(%arg0: i32, %arg1: i32) -> (i32, i32, i32) {
    %c0_i32 = arith.constant 0 : i32
    %c0_i32_0 = arith.constant 0 : i32
    return %arg0, %c0_i32, %arg1 : i32, i32, i32
  }
  func.func @transform_1(%arg0: i32, %arg1: i32) -> (i32, i32) {
    %c0_i32 = arith.constant 0 : i32
    %c0_i32_0 = arith.constant 0 : i32
    %c0_i32_1 = arith.constant 0 : i32
    return %c0_i32, %c0_i32_0 : i32, i32
  }
  func.func @transform_2(%arg0: i32, %arg1: i32) -> (i32, i32) {
    %c0_i32 = arith.constant 0 : i32
    %c0_i32_0 = arith.constant 0 : i32
    %c0_i32_1 = arith.constant 0 : i32
    return %c0_i32, %c0_i32_0 : i32, i32
  }
  func.func @transform_3(%arg0: i32, %arg1: i32) -> (i32, i32) {
    %c0_i32 = arith.constant 0 : i32
    %c0_i32_0 = arith.constant 0 : i32
    %c0_i32_1 = arith.constant 0 : i32
    return %c0_i32, %c0_i32_0 : i32, i32
  }
  func.func @transform_4(%arg0: i32, %arg1: i32) -> (i32, i32) {
    %c0_i32 = arith.constant 0 : i32
    %c0_i32_0 = arith.constant 0 : i32
    %c0_i32_1 = arith.constant 0 : i32
    return %c0_i32, %c0_i32_0 : i32, i32
  }
  func.func @transform_5(%arg0: i32, %arg1: i32) -> (i32, i32) {
    %c0_i32 = arith.constant 0 : i32
    %c0_i32_0 = arith.constant 0 : i32
    %c0_i32_1 = arith.constant 0 : i32
    return %c0_i32, %c0_i32_0 : i32, i32
  }
  func.func @transform_6(%arg0: i32, %arg1: i32) -> (i32, i32) {
    %c0_i32 = arith.constant 0 : i32
    %c0_i32_0 = arith.constant 0 : i32
    %c0_i32_1 = arith.constant 0 : i32
    return %c0_i32, %c0_i32_0 : i32, i32
  }
  func.func @transform_7(%arg0: i32, %arg1: i32) -> (i32, i32) {
    %c0_i32 = arith.constant 0 : i32
    %c0_i32_0 = arith.constant 0 : i32
    %c0_i32_1 = arith.constant 0 : i32
    return %c0_i32, %c0_i32_0 : i32, i32
  }
  func.func @transform_8(%arg0: i32, %arg1: i32) -> (i32, i32, i32) {
    %c0_i32 = arith.constant 0 : i32
    %c0_i32_0 = arith.constant 0 : i32
    %c0_i32_1 = arith.constant 0 : i32
    return %arg0, %c0_i32, %c0_i32_0 : i32, i32, i32
  }
}

</mosaic_0001>

<bundles_post_ra>
// kernel: tpu_custom_call.1
= control target key start
LH: loop header
LB: loop body
LE: loop exit
PB: predicated region body
PF: predicated region fallthrough
CT: control target
= control target key end

     0   :  { %13 = vsyncpa [#allocation4], 0  ;;  %s11532_s0 = inlined_call_operand.vmem [shape: bf16[2,3,256], index: 0, kind: input, shape index: {}]   ;;  %s11533_s1 = inlined_call_operand.vmem [shape: bf16[64,3], index: 1, kind: input, shape index: {}]   ;;  %s11534_s2 = inlined_call_operand.vmem [shape: bf16[128,64], index: 2, kind: input, shape index: {}]   ;;  %s11535_s3 = inlined_call_operand.hbm [shape: bf16[1024,128], index: 3, kind: input, shape index: {}]   ;;  %s11536_s4 = inlined_call_operand.vmem [shape: bf16[512,1024], index: 4, kind: input, shape index: {}]   ;;  %s11537_s5 = inlined_call_operand.hbm [shape: bf16[256,512], index: 5, kind: input, shape index: {}]   ;;  %s11538_s6 = inlined_call_operand.vmem [shape: bf16[128,256], index: 6, kind: input, shape index: {}]   ;;  %s11539_s7 = inlined_call_operand.vmem [shape: f32[2112,1], index: 7, kind: input, shape index: {}]   ;;  %s11540_s8 = inlined_call_operand.vmem [shape: f32[2,128,1], index: 8, kind: output, shape index: {}]  }
   0x1   :  { %14 = vsyncpa [#allocation6], 0  ;;  %s9055_s27 = smov 0   ;;  %s9057_s28 = smov 0  }
   0x2   :  { %s9059_s29 = smov 0   ;;  %s9061_s30 = smov 0  }
   0x3   :  { %s9063_s9 = smov 0  }
   0x4 LB: > { %s7200_s10 = sadd.s32 4294967295, %s8998_s9   ;;  %s29_s11 = sadd.s32 1, %s8990_s29  ;;  %s8998_s9 = sphi %s9063_s9, %s20_s9   ;;  %s8994_s30 = sphi %s9061_s30, %s11574_s30   ;;  %s8990_s29 = sphi %s9059_s29, %s11573_s29   ;;  %s8986_s28 = sphi %s9057_s28, %s11572_s28   ;;  %s8982_s27 = sphi %s9055_s27, %s11571_s27  }
   0x5   : > { %p30_p0 = scmp.ge.s32.totalorder %s29_s11, 2  ;;  %s32_s12 = sadd.s32 1, %s8994_s30 }
   0x6   : > { %p7202_p1 = scmp.ge.s32.totalorder %s8998_s9, 1  ;;  %p238_p2 = scmp.lt.s32.totalorder %s8998_s9, 5 }
   0x7   : > { %s11576_s11 = smov (%p30_p0, %s29_s11), 0  ;;  %s11578_s12 = smov (!%p30_p0, %s32_s12), %s8994_s30 }
   0x8   : > { %11544 = sst [smem:[#allocation9_spill]] %s11576_s11  ;;  %p9088_p3 = pnand %p7202_p1, %p238_p2 }
   0x9   : > { %p34_p4 = scmp.ge.s32.totalorder %s11578_s12, 2  ;;  %p9092_p5 = scmp.eq.s32.totalorder %s7200_s10, 0 }
   0xa   : > { %s11545_s13 = scalar_select %p9088_p3, 1, 0 }
   0xb   : > { %s11546_s14 = scalar_select %p9092_p5, 1, 0 }
   0xc   : > { %p8637_p6 = pneg %p9088_p3  ;;  %s11580_s12 = smov (%p34_p4, %s11578_s12), 0 }
   0xd   : > { %11547 = sst [smem:[#allocation10_spill]] %s11580_s12  ;;  %s9000_s15 = smov [#allocation3]  }
   0xe   : > { %s256_s16 = sshll.u32 %s9000_s15, 4  ;;  %p9102_p7 = pnand %p9092_p5, %p8637_p6  ;;  %s257_s16 = int_to_ptr.vmem [resolvable:$true] %s256_s16 }
   0xf   : > { %s8896_s20 = scalar_lea.hbm %s11535_s3, 8192 }
  0x10   : > { %p8897_p8 = scmp.ne.s32.totalorder %s11535_s3, %s8896_s20  ;;  %p8898_p9 = pneg %p9102_p7 }
  0x11   : > { %p8903_p12 = scmp.lt.u32.totalorder %s8896_s20, %s11535_s3 }
  0x12   : > { %p8899_p10 = pnand %p8898_p9, %p8897_p8 }
  0x14   : > { %p8900_p11 = pneg %p8899_p10 }
  0x16   : > { %p8905_p13 = pnand %p8903_p12, %p8900_p11 }
  0x18   : > { %8908 = shalt.err (!%p8905_p13)
}
  0x19   : > { %s8909_s25 = scalar_lea.vmem %s257_s16, 8192  ;;  %p8917_p4 = scmp.lt.s32.totalorder %s257_s16, %s257_s16 }
  0x1a   : > { %p8910_p0 = scmp.ne.s32.totalorder %s257_s16, %s8909_s25  ;;  %p8918_p6 = scmp.lt.s32.totalorder %s8909_s25, %s8909_s25 }
  0x1c   : > { %p8912_p1 = pnand %p8910_p0, %p8898_p9  ;;  %p8919_p5 = por %p8918_p6, %p8917_p4 }
  0x1e   : > { %p8913_p2 = pneg %p8912_p1 }
  0x20   : > { %p8920_p3 = pnand %p8919_p5, %p8913_p2 }
  0x22   : > { %8923 = shalt.err (!%p8920_p3)
}
  0x23   : > { %s9001_s26 = smov 64   ;;  %s9002_s10 = smov 4  }
  0x24   : > { %8640 = dma.hbm_to_vmem [thread:$0]  (!%p9102_p7), %s11535_s3, 8192, %s257_s16, [#allocation4], %s9001_s26, %s9001_s26, %s9002_s10  }
  0x25   : > { %s9003_s19 = smov [#allocation5]   ;;  %s8924_s23 = scalar_lea.hbm %s11537_s5, 8192 }
  0x26   : > { %s272_s20 = sshll.u32 %s9003_s19, 4  ;;  %p8925_p3 = scmp.ne.s32.totalorder %s11537_s5, %s8924_s23  ;;  %s273_s20 = int_to_ptr.vmem [resolvable:$true] %s272_s20 }
  0x27   : > { %p8931_p10 = scmp.lt.u32.totalorder %s8924_s23, %s11537_s5 }
  0x28   : > { %p8927_p5 = pnand %p8925_p3, %p8898_p9 }
  0x2a   : > { %p8928_p8 = pneg %p8927_p5 }
  0x2c   : > { %p8933_p11 = pnand %p8931_p10, %p8928_p8 }
  0x2e   : > { %8936 = shalt.err (!%p8933_p11)
}
  0x2f   : > { %s8937_s16 = scalar_lea.vmem %s273_s20, 8192  ;;  %p8945_p1 = scmp.lt.s32.totalorder %s273_s20, %s273_s20 }
  0x30   : > { %p8938_p12 = scmp.ne.s32.totalorder %s273_s20, %s8937_s16  ;;  %p8946_p2 = scmp.lt.s32.totalorder %s8937_s16, %s8937_s16 }
  0x32   : > { %p8940_p13 = pnand %p8938_p12, %p8898_p9  ;;  %p8947_p4 = por %p8946_p2, %p8945_p1 }
  0x34   : > { %p8941_p0 = pneg %p8940_p13 }
  0x36   : > { %p8948_p6 = pnand %p8947_p4, %p8941_p0 }
  0x38   : > { %8951 = shalt.err (!%p8948_p6)
}
  0x39   : > { %s9004_s26 = smov 256   ;;  %s9005_s10 = smov 16  }
  0x3a   : > { %8643 = dma.hbm_to_vmem [thread:$0]  (!%p9102_p7), %s11537_s5, 8192, %s273_s20, [#allocation6], %s9004_s26, %s9004_s26, %s9005_s10  }
  0x3b   : > { %p11549_p3 = scmp.ne.s32.totalorder %s11545_s13, 0 }
  0x3c   : > { %p11550_p5 = scmp.ne.s32.totalorder (!%p11549_p3), %s11546_s14, 0 }
  0x3d   : > { %305 = sbr.rel (%p11549_p3) target bundleno = 2712 (0xa98), region = 52 }
  0x44   : > { %8973 = dma.done.wait (%p11550_p5), [#allocation4], 8192  }
  0x45   : > { %8975 = vsyncadd (%p11550_p5), [#allocation4], 4294959104 }
  0x46   : > { %8977 = dma.done.wait (%p11550_p5), [#allocation6], 8192  }
  0x47   : > { %8979 = vsyncadd (%p11550_p5), [#allocation6], 4294959104  ;;  %p346_p7 = scmp.lt.s32.totalorder %s8986_s28, 1  ;;  %p348_p9 = scmp.lt.s32.totalorder %s8982_s27, 1 }
  0x48   : > { %p7213_p8 = scmp.ne.s32.totalorder %s8982_s27, 0 }
  0x49   : > { %s11582_s28 = smov (!%p346_p7, %s8986_s28), 1  ;;  %v9006_v0 = vmov (!%p7213_p8), -inf  }
  0x4a   : > { %s349_s13 = scalar_select %p348_p9, %s8982_s27, 1 }
  0x4b   : > { %s7209_s17 = sshll.u32 %s11582_s28, 1  ;;  %s7641_s15 = sshll.u32 %s11582_s28, 7  ;;  %364 = vst [vmem:[#allocation2] sm:$0xff] (!%p7213_p8), %v9006_v0  ;;  %365 = vst [vmem:[#allocation2 + $0x8] sm:$0xff] (!%p7213_p8), %v9006_v0 }
  0x4c   : > { %s351_s18 = sadd.s32 %s7209_s17, %s349_s13  ;;  %s9165_s21 = scalar_lea.vmem %s11540_s8, %s7641_s15  ;;  %366 = vst [vmem:[#allocation2 + $0x10] sm:$0xff] (!%p7213_p8), %v9006_v0  ;;  %367 = vst [vmem:[#allocation2 + $0x18] sm:$0xff] (!%p7213_p8), %v9006_v0 }
  0x4d   : > { %s7210_s22 = sshll.u32 %s351_s18, 1  ;;  %363 = sbr.rel (%p7213_p8) target bundleno = 139 (0x8b), region = 64  ;;  %368 = vst [vmem:[#allocation2 + $0x20] sm:$0xff] (!%p7213_p8), %v9006_v0  ;;  %369 = vst [vmem:[#allocation2 + $0x28] sm:$0xff] (!%p7213_p8), %v9006_v0 }
  0x4e   : > { %s9170_s24 = scalar_lea.vmem %s11532_s0, %s7210_s22  ;;  %370 = vst [vmem:[#allocation2 + $0x30] sm:$0xff] (!%p7213_p8), %v9006_v0  ;;  %371 = vst [vmem:[#allocation2 + $0x38] sm:$0xff] (!%p7213_p8), %v9006_v0 }
  0x4f   : > { %372 = vst [vmem:[#allocation2 + $0x40] sm:$0xff] (!%p7213_p8), %v9006_v0  ;;  %373 = vst [vmem:[#allocation2 + $0x48] sm:$0xff] (!%p7213_p8), %v9006_v0 }
  0x50   : > { %374 = vst [vmem:[#allocation2 + $0x50] sm:$0xff] (!%p7213_p8), %v9006_v0  ;;  %375 = vst [vmem:[#allocation2 + $0x58] sm:$0xff] (!%p7213_p8), %v9006_v0 }
  0x51   : > { %376 = vst [vmem:[#allocation2 + $0x60] sm:$0xff] (!%p7213_p8), %v9006_v0  ;;  %377 = vst [vmem:[#allocation2 + $0x68] sm:$0xff] (!%p7213_p8), %v9006_v0 }
  0x52   : > { %378 = vst [vmem:[#allocation2 + $0x70] sm:$0xff] (!%p7213_p8), %v9006_v0  ;;  %379 = vst [vmem:[#allocation2 + $0x78] sm:$0xff] (!%p7213_p8), %v9006_v0 }
  0x53   : > { %380 = vst [vmem:[#allocation2 + $0x80] sm:$0xff] (!%p7213_p8), %v9006_v0  ;;  %381 = vst [vmem:[#allocation2 + $0x88] sm:$0xff] (!%p7213_p8), %v9006_v0 }
  0x54   : > { %382 = vst [vmem:[#allocation2 + $0x90] sm:$0xff] %v9006_v0  ;;  %383 = vst [vmem:[#allocation2 + $0x98] sm:$0xff] %v9006_v0 }
  0x55   : > { %384 = vst [vmem:[#allocation2 + $0xa0] sm:$0xff] %v9006_v0  ;;  %385 = vst [vmem:[#allocation2 + $0xa8] sm:$0xff] %v9006_v0 }
  0x56   : > { %386 = vst [vmem:[#allocation2 + $0xb0] sm:$0xff] %v9006_v0  ;;  %387 = vst [vmem:[#allocation2 + $0xb8] sm:$0xff] %v9006_v0 }
  0x57   : > { %388 = vst [vmem:[#allocation2 + $0xc0] sm:$0xff] %v9006_v0  ;;  %389 = vst [vmem:[#allocation2 + $0xc8] sm:$0xff] %v9006_v0 }
  0x58   : > { %390 = vst [vmem:[#allocation2 + $0xd0] sm:$0xff] %v9006_v0  ;;  %391 = vst [vmem:[#allocation2 + $0xd8] sm:$0xff] %v9006_v0 }
  0x59   : > { %392 = vst [vmem:[#allocation2 + $0xe0] sm:$0xff] %v9006_v0  ;;  %393 = vst [vmem:[#allocation2 + $0xe8] sm:$0xff] %v9006_v0 }
  0x5a   : > { %394 = vst [vmem:[#allocation2 + $0xf0] sm:$0xff] %v9006_v0  ;;  %395 = vst [vmem:[#allocation2 + $0xf8] sm:$0xff] %v9006_v0 }
  0x5b   : > { %396 = vst [vmem:[#allocation2 + $0x100] sm:$0xff] %v9006_v0  ;;  %397 = vst [vmem:[#allocation2 + $0x108] sm:$0xff] %v9006_v0 }
  0x5c   : > { %398 = vst [vmem:[#allocation2 + $0x110] sm:$0xff] %v9006_v0  ;;  %399 = vst [vmem:[#allocation2 + $0x118] sm:$0xff] %v9006_v0 }
  0x5d   : > { %400 = vst [vmem:[#allocation2 + $0x120] sm:$0xff] %v9006_v0  ;;  %401 = vst [vmem:[#allocation2 + $0x128] sm:$0xff] %v9006_v0 }
  0x5e   : > { %402 = vst [vmem:[#allocation2 + $0x130] sm:$0xff] %v9006_v0  ;;  %403 = vst [vmem:[#allocation2 + $0x138] sm:$0xff] %v9006_v0 }
  0x5f   : > { %404 = vst [vmem:[#allocation2 + $0x140] sm:$0xff] %v9006_v0  ;;  %405 = vst [vmem:[#allocation2 + $0x148] sm:$0xff] %v9006_v0 }
  0x60   : > { %406 = vst [vmem:[#allocation2 + $0x150] sm:$0xff] %v9006_v0  ;;  %407 = vst [vmem:[#allocation2 + $0x158] sm:$0xff] %v9006_v0 }
  0x61   : > { %408 = vst [vmem:[#allocation2 + $0x160] sm:$0xff] %v9006_v0  ;;  %409 = vst [vmem:[#allocation2 + $0x168] sm:$0xff] %v9006_v0 }
  0x62   : > { %410 = vst [vmem:[#allocation2 + $0x170] sm:$0xff] %v9006_v0  ;;  %411 = vst [vmem:[#allocation2 + $0x178] sm:$0xff] %v9006_v0 }
  0x63   : > { %412 = vst [vmem:[#allocation2 + $0x180] sm:$0xff] %v9006_v0  ;;  %413 = vst [vmem:[#allocation2 + $0x188] sm:$0xff] %v9006_v0 }
  0x64   : > { %414 = vst [vmem:[#allocation2 + $0x190] sm:$0xff] %v9006_v0  ;;  %415 = vst [vmem:[#allocation2 + $0x198] sm:$0xff] %v9006_v0 }
  0x65   : > { %416 = vst [vmem:[#allocation2 + $0x1a0] sm:$0xff] %v9006_v0  ;;  %417 = vst [vmem:[#allocation2 + $0x1a8] sm:$0xff] %v9006_v0 }
  0x66   : > { %418 = vst [vmem:[#allocation2 + $0x1b0] sm:$0xff] %v9006_v0  ;;  %419 = vst [vmem:[#allocation2 + $0x1b8] sm:$0xff] %v9006_v0 }
  0x67   : > { %420 = vst [vmem:[#allocation2 + $0x1c0] sm:$0xff] %v9006_v0  ;;  %421 = vst [vmem:[#allocation2 + $0x1c8] sm:$0xff] %v9006_v0 }
  0x68   : > { %422 = vst [vmem:[#allocation2 + $0x1d0] sm:$0xff] %v9006_v0  ;;  %423 = vst [vmem:[#allocation2 + $0x1d8] sm:$0xff] %v9006_v0 }
  0x69   : > { %424 = vst [vmem:[#allocation2 + $0x1e0] sm:$0xff] %v9006_v0  ;;  %425 = vst [vmem:[#allocation2 + $0x1e8] sm:$0xff] %v9006_v0 }
  0x6a   : > { %426 = vst [vmem:[#allocation2 + $0x1f0] sm:$0xff] %v9006_v0  ;;  %427 = vst [vmem:[#allocation2 + $0x1f8] sm:$0xff] %v9006_v0 }
  0x6b   : > { %428 = vst [vmem:[#allocation2 + $0x200] sm:$0xff] %v9006_v0  ;;  %429 = vst [vmem:[#allocation2 + $0x208] sm:$0xff] %v9006_v0 }
  0x6c   : > { %430 = vst [vmem:[#allocation2 + $0x210] sm:$0xff] %v9006_v0  ;;  %431 = vst [vmem:[#allocation2 + $0x218] sm:$0xff] %v9006_v0 }
  0x6d   : > { %432 = vst [vmem:[#allocation2 + $0x220] sm:$0xff] %v9006_v0  ;;  %433 = vst [vmem:[#allocation2 + $0x228] sm:$0xff] %v9006_v0 }
  0x6e   : > { %434 = vst [vmem:[#allocation2 + $0x230] sm:$0xff] %v9006_v0  ;;  %435 = vst [vmem:[#allocation2 + $0x238] sm:$0xff] %v9006_v0 }
  0x6f   : > { %436 = vst [vmem:[#allocation2 + $0x240] sm:$0xff] %v9006_v0  ;;  %437 = vst [vmem:[#allocation2 + $0x248] sm:$0xff] %v9006_v0 }
  0x70   : > { %438 = vst [vmem:[#allocation2 + $0x250] sm:$0xff] %v9006_v0  ;;  %439 = vst [vmem:[#allocation2 + $0x258] sm:$0xff] %v9006_v0 }
  0x71   : > { %440 = vst [vmem:[#allocation2 + $0x260] sm:$0xff] %v9006_v0  ;;  %441 = vst [vmem:[#allocation2 + $0x268] sm:$0xff] %v9006_v0 }
  0x72   : > { %442 = vst [vmem:[#allocation2 + $0x270] sm:$0xff] %v9006_v0  ;;  %443 = vst [vmem:[#allocation2 + $0x278] sm:$0xff] %v9006_v0 }
  0x73   : > { %444 = vst [vmem:[#allocation2 + $0x280] sm:$0xff] %v9006_v0  ;;  %445 = vst [vmem:[#allocation2 + $0x288] sm:$0xff] %v9006_v0 }
  0x74   : > { %446 = vst [vmem:[#allocation2 + $0x290] sm:$0xff] %v9006_v0  ;;  %447 = vst [vmem:[#allocation2 + $0x298] sm:$0xff] %v9006_v0 }
  0x75   : > { %448 = vst [vmem:[#allocation2 + $0x2a0] sm:$0xff] %v9006_v0  ;;  %449 = vst [vmem:[#allocation2 + $0x2a8] sm:$0xff] %v9006_v0 }
  0x76   : > { %450 = vst [vmem:[#allocation2 + $0x2b0] sm:$0xff] %v9006_v0  ;;  %451 = vst [vmem:[#allocation2 + $0x2b8] sm:$0xff] %v9006_v0 }
  0x77   : > { %452 = vst [vmem:[#allocation2 + $0x2c0] sm:$0xff] %v9006_v0  ;;  %453 = vst [vmem:[#allocation2 + $0x2c8] sm:$0xff] %v9006_v0 }
  0x78   : > { %454 = vst [vmem:[#allocation2 + $0x2d0] sm:$0xff] %v9006_v0  ;;  %455 = vst [vmem:[#allocation2 + $0x2d8] sm:$0xff] %v9006_v0 }
  0x79   : > { %456 = vst [vmem:[#allocation2 + $0x2e0] sm:$0xff] %v9006_v0  ;;  %457 = vst [vmem:[#allocation2 + $0x2e8] sm:$0xff] %v9006_v0 }
  0x7a   : > { %458 = vst [vmem:[#allocation2 + $0x2f0] sm:$0xff] %v9006_v0  ;;  %459 = vst [vmem:[#allocation2 + $0x2f8] sm:$0xff] %v9006_v0 }
  0x7b   : > { %460 = vst [vmem:[#allocation2 + $0x300] sm:$0xff] %v9006_v0  ;;  %461 = vst [vmem:[#allocation2 + $0x308] sm:$0xff] %v9006_v0 }
  0x7c   : > { %462 = vst [vmem:[#allocation2 + $0x310] sm:$0xff] %v9006_v0  ;;  %463 = vst [vmem:[#allocation2 + $0x318] sm:$0xff] %v9006_v0 }
  0x7d   : > { %464 = vst [vmem:[#allocation2 + $0x320] sm:$0xff] %v9006_v0  ;;  %465 = vst [vmem:[#allocation2 + $0x328] sm:$0xff] %v9006_v0 }
  0x7e   : > { %466 = vst [vmem:[#allocation2 + $0x330] sm:$0xff] %v9006_v0  ;;  %467 = vst [vmem:[#allocation2 + $0x338] sm:$0xff] %v9006_v0 }
  0x7f   : > { %468 = vst [vmem:[#allocation2 + $0x340] sm:$0xff] %v9006_v0  ;;  %469 = vst [vmem:[#allocation2 + $0x348] sm:$0xff] %v9006_v0 }
  0x80   : > { %470 = vst [vmem:[#allocation2 + $0x350] sm:$0xff] %v9006_v0  ;;  %471 = vst [vmem:[#allocation2 + $0x358] sm:$0xff] %v9006_v0 }
  0x81   : > { %472 = vst [vmem:[#allocation2 + $0x360] sm:$0xff] %v9006_v0  ;;  %473 = vst [vmem:[#allocation2 + $0x368] sm:$0xff] %v9006_v0 }
  0x82   : > { %474 = vst [vmem:[#allocation2 + $0x370] sm:$0xff] %v9006_v0  ;;  %475 = vst [vmem:[#allocation2 + $0x378] sm:$0xff] %v9006_v0 }
  0x83   : > { %476 = vst [vmem:[#allocation2 + $0x380] sm:$0xff] %v9006_v0  ;;  %477 = vst [vmem:[#allocation2 + $0x388] sm:$0xff] %v9006_v0 }
  0x84   : > { %478 = vst [vmem:[#allocation2 + $0x390] sm:$0xff] %v9006_v0  ;;  %479 = vst [vmem:[#allocation2 + $0x398] sm:$0xff] %v9006_v0 }
  0x85   : > { %480 = vst [vmem:[#allocation2 + $0x3a0] sm:$0xff] %v9006_v0  ;;  %481 = vst [vmem:[#allocation2 + $0x3a8] sm:$0xff] %v9006_v0 }
  0x86   : > { %482 = vst [vmem:[#allocation2 + $0x3b0] sm:$0xff] %v9006_v0  ;;  %483 = vst [vmem:[#allocation2 + $0x3b8] sm:$0xff] %v9006_v0 }
  0x87   : > { %484 = vst [vmem:[#allocation2 + $0x3c0] sm:$0xff] %v9006_v0  ;;  %485 = vst [vmem:[#allocation2 + $0x3c8] sm:$0xff] %v9006_v0 }
  0x88   : > { %486 = vst [vmem:[#allocation2 + $0x3d0] sm:$0xff] %v9006_v0  ;;  %487 = vst [vmem:[#allocation2 + $0x3d8] sm:$0xff] %v9006_v0 }
  0x89   : > { %488 = vst [vmem:[#allocation2 + $0x3e0] sm:$0xff] %v9006_v0  ;;  %489 = vst [vmem:[#allocation2 + $0x3e8] sm:$0xff] %v9006_v0 }
  0x8a   : > { %490 = vst [vmem:[#allocation2 + $0x3f0] sm:$0xff] %v9006_v0  ;;  %491 = vst [vmem:[#allocation2 + $0x3f8] sm:$0xff] %v9006_v0 }
  0x8b PF: > { %v492_v1 = vld [vmem:[%s9170_s24] sm:$0x3]  ;;  %vm598_vm0 = vcmask 1040384   ;;  %vm599_vm1 = vcmask 1041408   ;;  %v9007_v3 = vmov 65535   ;;  %vm585_vm2 = vcmask 23552  }
  0x8c   : > { %v8700_v2 = vld [vmem:[%s11533_s1] sm:$0xff]   ;;  %v600_v4 = vsel %vm598_vm0, 4294967295, %v9007_v3  ;;  %v9008_v7 = vmov 0   ;;  %v8701_v8 = vld [vmem:[%s11533_s1 + $0x8] sm:$0xff]   ;;  %v495_v10 = vld [vmem:[%s11539_s7 + $0x10] sm:$0xff]  ;;  %vm818_vm3 = vcmask 523264  }
  0x8d   : > { %v601_v5 = vsel %vm599_vm1, %v600_v4, 0  ;;  %8021 = vmatprep.mubr.msk.bf16.mxu0 %vm585_vm2, %v8700_v2  ;;  %8698 = vset.pattern.permute.xlu0 %v9008_v7  ;;  %v493_v9 = vld [vmem:[%s11539_s7] sm:$0xff]  ;;  %v8702_v11 = vld [vmem:[%s11533_s1 + $0x10] sm:$0xff]   ;;  %v494_v12 = vld [vmem:[%s11539_s7 + $0x8] sm:$0xff]  ;;  %p7302_p10 = scmp.ne.s32.totalorder %s8982_s27, 1 }
  0x8e   : > { %v603_v6 = vand.u32 %v601_v5, %v492_v1  ;;  %8699 = vset.pattern.permute.xlu1 %v9008_v7  ;;  %527 = vperm.xlu0 %8698, %v493_v9   ;;  %v496_v13 = vld [vmem:[%s11539_s7 + $0x18] sm:$0xff]  ;;  %v497_v14 = vld [vmem:[%s11539_s7 + $0x20] sm:$0xff]  ;;  %v498_v16 = vld [vmem:[%s11539_s7 + $0x28] sm:$0xff] }
  0x8f   : > { %537 = vperm.xlu1 %8699, %v495_v10   ;;  %v8703_v15 = vld [vmem:[%s11533_s1 + $0x18] sm:$0xff]   ;;  %v499_v17 = vld [vmem:[%s11539_s7 + $0x30] sm:$0xff]  ;;  %v501_v19 = vld [vmem:[%s11539_s7 + $0x40] sm:$0xff] }
  0x90   : > { %8019 = vmatprep.subr.bf16.mxu0 %v603_v6  ;;  %v500_v18 = vld [vmem:[%s11539_s7 + $0x38] sm:$0xff]  ;;  %v502_v20 = vld [vmem:[%s11539_s7 + $0x48] sm:$0xff]  ;;  %v503_v21 = vld [vmem:[%s11539_s7 + $0x50] sm:$0xff] }
  0x91   : > { %8020 = vmatpush3.bf16.msra.mxu0 %v603_v6  ;;  %v504_v22 = vld [vmem:[%s11539_s7 + $0x58] sm:$0xff]  ;;  %v505_v23 = vld [vmem:[%s11539_s7 + $0x60] sm:$0xff]  ;;  %v506_v24 = vld [vmem:[%s11539_s7 + $0x68] sm:$0xff] }
  0x92   : > { %532 = vperm.xlu0 %8698, %v494_v12   ;;  %v507_v25 = vld [vmem:[%s11539_s7 + $0x70] sm:$0xff]  ;;  %v508_v26 = vld [vmem:[%s11539_s7 + $0x78] sm:$0xff]  ;;  %v509_v27 = vld [vmem:[%s11539_s7 + $0x80] sm:$0xff] }
  0x93   : > { %542 = vperm.xlu1 %8699, %v496_v13   ;;  %v510_v28 = vld [vmem:[%s11539_s7 + $0x88] sm:$0xff]  ;;  %v511_v29 = vld [vmem:[%s11539_s7 + $0x90] sm:$0xff]  ;;  %v512_v30 = vld [vmem:[%s11539_s7 + $0x98] sm:$0xff] }
  0x94   : > { %8022 = vmatmul.mubr.msk.bf16.vlgmr.msra.gmra.mrb[0].mxu0 %vm585_vm2, %v8701_v8  ;;  %v513_v31 = vld [vmem:[%s11539_s7 + $0xa0] sm:$0xff]  ;;  %v514_v32 = vld [vmem:[%s11539_s7 + $0xa8] sm:$0xff]  ;;  %v515_v33 = vld [vmem:[%s11539_s7 + $0xb0] sm:$0xff] }
  0x95   : > { %8025 = vmatprep.mubr.msk.bf16.mxu0 %vm585_vm2, %v8702_v11  ;;  %v516_v34 = vld [vmem:[%s11539_s7 + $0xb8] sm:$0xff]  ;;  %v8704_v35 = vld [vmem:[%s11534_s2] sm:$0xff]   ;;  %v8705_v8 = vld [vmem:[%s11534_s2 + $0x8] sm:$0xff]  }
  0x96   : > { %547 = vperm.xlu0 %8698, %v497_v14   ;;  %8037 = vmatprep.mubr.msk.bf16.mxu1 %vm818_vm3, %v8704_v35  ;;  %v8706_v9 = vld [vmem:[%s11534_s2 + $0x10] sm:$0xff]   ;;  %v8707_v10 = vld [vmem:[%s11534_s2 + $0x18] sm:$0xff]   ;;  %v8708_v11 = vld [vmem:[%s11534_s2 + $0x20] sm:$0xff]  }
  0x97   : > { %552 = vperm.xlu1 %8699, %v498_v16   ;;  %v8709_v12 = vld [vmem:[%s11534_s2 + $0x28] sm:$0xff]   ;;  %v8710_v13 = vld [vmem:[%s11534_s2 + $0x30] sm:$0xff]   ;;  %v8711_v14 = vld [vmem:[%s11534_s2 + $0x38] sm:$0xff]  }
  0x98   : > { %v8716_v16 = vld [vmem:[#allocation3 + $0x110] sm:$0xff]  }
  0x9a   : > { %557 = vperm.xlu0 %8698, %v499_v17  }
  0x9b   : > { %562 = vperm.xlu1 %8699, %v500_v18  }
  0x9c   : > { %8026 = vmatmul.mubr.msk.bf16.gmra.mrb[4].mxu0 %vm585_vm2, %v8703_v15  ;;  %v8712_v15 = vld [vmem:[#allocation3] sm:$0xff]  }
  0x9d   : > { %8069 = vmatprep.mubr.bf16.mxu0 %v8712_v15 }
  0x9e   : > { %700 = vperm.xlu0 %8698, %v501_v19  }
  0x9f   : > { %705 = vperm.xlu1 %8699, %v502_v20  }
  0xa2   : > { %710 = vperm.xlu0 %8698, %v503_v21  }
  0xa3   : > { %715 = vperm.xlu1 %8699, %v504_v22  }
  0xa6   : > { %720 = vperm.xlu0 %8698, %v505_v23  }
  0xa7   : > { %725 = vperm.xlu1 %8699, %v506_v24  }
  0xaa   : > { %730 = vperm.xlu0 %8698, %v507_v25  }
  0xab   : > { %735 = vperm.xlu1 %8699, %v508_v26  }
  0xae   : > { %740 = vperm.xlu0 %8698, %v509_v27  }
  0xaf   : > { %745 = vperm.xlu1 %8699, %v510_v28  }
  0xb2   : > { %750 = vperm.xlu0 %8698, %v511_v29  }
  0xb3   : > { %755 = vperm.xlu1 %8699, %v512_v30  }
  0xb6   : > { %760 = vperm.xlu0 %8698, %v513_v31  }
  0xb7   : > { %765 = vperm.xlu1 %8699, %v514_v32  }
  0xba   : > { %770 = vperm.xlu0 %8698, %v515_v33  }
  0xbb   : > { %775 = vperm.xlu1 %8699, %v516_v34  }
 0x10d   : > { %v528_v36 = vpop.permute.xlu0 %527 }
 0x10e   : > { %v538_v37 = vpop.permute.xlu1 %537 }
 0x111   : > { %v533_v38 = vpop.permute.xlu0 %532 }
 0x112   : > { %v543_v39 = vpop.permute.xlu1 %542 }
 0x115   : > { %v548_v43 = vpop.permute.xlu0 %547 }
 0x116   : > { %v553_v48 = vpop.permute.xlu1 %552 }
 0x119   : > { %v558_v55 = vpop.permute.xlu0 %557 }
 0x11a   : > { %v563_v60 = vpop.permute.xlu1 %562 }
 0x11d   : > { %v701_v17 = vpop.permute.xlu0 %700 }
 0x11e   : > { %v706_v18 = vpop.permute.xlu1 %705 }
 0x121   : > { %v711_v19 = vpop.permute.xlu0 %710 }
 0x122   : > { %v716_v20 = vpop.permute.xlu1 %715 }
 0x125   : > { %v721_v21 = vpop.permute.xlu0 %720 }
 0x126   : > { %v726_v22 = vpop.permute.xlu1 %725 }
 0x129   : > { %v731_v23 = vpop.permute.xlu0 %730 }
 0x12a   : > { %v736_v27 = vpop.permute.xlu1 %735 }
 0x12d   : > { %v741_v35 = vpop.permute.xlu0 %740 }
 0x167   : > { %v8023_v40 = vpop.f32.mrb[0].mxu0 }
 0x168   : > { %v648_v41 = vadd.f32 %v8023_v40, %v538_v37  ;;  %v639_v42 = vpop.f32.mrb[1].mxu0 }
 0x169   : > { %v640_v44 = vadd.f32 %v639_v42, %v528_v36  ;;  %v8024_v45 = vpop.f32.mrb[2].mxu0 }
 0x16a   : > { %v651_v46 = vadd.f32 %v8024_v45, %v543_v39  ;;  %v642_v47 = vpop.f32.mrb[3].mxu0  ;;  %v672_v50 = vmax.f32 %v648_v41, 0.0  ;;  %v746_v39 = vpop.permute.xlu1 %745 }
 0x16b   : > { %v643_v49 = vadd.f32 %v642_v47, %v533_v38  ;;  %v670_v52 = vmax.f32 %v640_v44, 0.0 }
 0x16c   : > { %v673_v51 = vmax.f32 %v651_v46, 0.0 }
 0x16d   : > { %v671_v53 = vmax.f32 %v643_v49, 0.0 }
 0x16e   : > { %v679_v54 = vpack.c.bf16 %v673_v51, %v672_v50 }
 0x16f   : > { %v8027_v56 = vpop.f32.mrb[4].mxu0  ;;  %v678_v57 = vpack.c.bf16 %v671_v53, %v670_v52  ;;  %v756_v52 = vpop.permute.xlu1 %755 }
 0x170   : > { %v664_v58 = vadd.f32 %v8027_v56, %v558_v55  ;;  %v655_v59 = vpop.f32.mrb[5].mxu0 }
 0x171   : > { %v656_v61 = vadd.f32 %v655_v59, %v548_v43  ;;  %v8028_v62 = vpop.f32.mrb[6].mxu0  ;;  %8029 = vmatprep.subr.bf16.mxu1 %v678_v57 }
 0x172   : > { %v667_v63 = vadd.f32 %v8028_v62, %v563_v60  ;;  %v658_v0 = vpop.f32.mrb[7].mxu0  ;;  %8030 = vmatpush3.bf16.msra.mxu1 %v678_v57  ;;  %v676_v2 = vmax.f32 %v664_v58, 0.0 }
 0x173   : > { %v659_v1 = vadd.f32 %v658_v0, %v553_v48  ;;  %8031 = vmatprep.subr.bf16.mxu1 %v679_v54  ;;  %v674_v4 = vmax.f32 %v656_v61, 0.0  ;;  %v751_v48 = vpop.permute.xlu0 %750 }
 0x174   : > { %v677_v3 = vmax.f32 %v667_v63, 0.0 }
 0x175   : > { %v675_v5 = vmax.f32 %v659_v1, 0.0  ;;  %v766_v1 = vpop.permute.xlu1 %765 }
 0x176   : > { %v681_v6 = vpack.c.bf16 %v677_v3, %v676_v2  ;;  %8032 = vmatpush3.bf16.msra.mxu1 %v679_v54 }
 0x177   : > { %v680_v7 = vpack.c.bf16 %v675_v5, %v674_v4  ;;  %v761_v60 = vpop.permute.xlu0 %760 }
 0x179   : > { %8033 = vmatprep.subr.bf16.mxu1 %v680_v7 }
 0x17a   : > { %8034 = vmatpush3.bf16.msra.mxu1 %v680_v7 }
 0x17b   : > { %8035 = vmatprep.subr.bf16.mxu1 %v681_v6 }
 0x17e   : > { %8036 = vmatpush3.bf16.msra.mxu1 %v681_v6 }
 0x181   : > { %8038 = vmatmul.mubr.msk.bf16.vlgmr.msra.gmra.mrb[0].mxu1 %vm818_vm3, %v8705_v8  ;;  %v771_v8 = vpop.permute.xlu0 %770 }
 0x182   : > { %8041 = vmatprep.mubr.msk.bf16.mxu1 %vm818_vm3, %v8706_v9 }
 0x189   : > { %8042 = vmatmul.mubr.msk.bf16.gmra.mrb[4].mxu1 %vm818_vm3, %v8707_v10 }
 0x18a   : > { %8045 = vmatprep.mubr.msk.bf16.mxu1 %vm818_vm3, %v8708_v11 }
 0x191   : > { %8046 = vmatmul.mubr.msk.bf16.gmra.mrb[8].mxu1 %vm818_vm3, %v8709_v12 }
 0x192   : > { %8049 = vmatprep.mubr.msk.bf16.mxu1 %vm818_vm3, %v8710_v13  ;;  %v776_v13 = vpop.permute.xlu1 %775 }
 0x199   : > { %8050 = vmatmul.mubr.msk.bf16.gmra.mrb[12].mxu1 %vm818_vm3, %v8711_v14 }
 0x19a   : > { %8137 = vmatprep.mubr.bf16.mxu1 %v8716_v16 }
 0x254   : > { %v8039_v24 = vpop.f32.mrb[0].mxu1 }
 0x255   : > { %v886_v25 = vadd.f32 %v8039_v24, %v711_v19  ;;  %v877_v26 = vpop.f32.mrb[1].mxu1 }
 0x256   : > { %v878_v28 = vadd.f32 %v877_v26, %v701_v17  ;;  %v8040_v29 = vpop.f32.mrb[2].mxu1  ;;  %v8717_v26 = vld [vmem:[#allocation3 + $0x118] sm:$0xff]  }
 0x257   : > { %v889_v30 = vadd.f32 %v8040_v29, %v716_v20  ;;  %v880_v31 = vpop.f32.mrb[3].mxu1  ;;  %v942_v33 = vmax.f32 %v886_v25, 0.0  ;;  %v8713_v25 = vld [vmem:[#allocation3 + $0x8] sm:$0xff]   ;;  %v8715_v29 = vld [vmem:[#allocation3 + $0x18] sm:$0xff]  }
 0x258   : > { %v881_v32 = vadd.f32 %v880_v31, %v706_v18  ;;  %v940_v36 = vmax.f32 %v878_v28, 0.0  ;;  %v8720_v28 = vld [vmem:[#allocation3 + $0x120] sm:$0xff]  }
 0x259   : > { %v943_v34 = vmax.f32 %v889_v30, 0.0  ;;  %v8721_v30 = vld [vmem:[#allocation3 + $0x128] sm:$0xff]   ;;  %v8718_v31 = vld [vmem:[#allocation3 + $0x20] sm:$0xff]  }
 0x25a   : > { %v941_v37 = vmax.f32 %v881_v32, 0.0  ;;  %v8724_v32 = vld [vmem:[#allocation3 + $0x130] sm:$0xff]  }
 0x25b   : > { %v957_v38 = vpack.c.bf16 %v943_v34, %v942_v33  ;;  %v8719_v33 = vld [vmem:[#allocation3 + $0x28] sm:$0xff]   ;;  %v8725_v34 = vld [vmem:[#allocation3 + $0x138] sm:$0xff]  }
 0x25c   : > { %v956_v40 = vpack.c.bf16 %v941_v37, %v940_v36  ;;  %v8043_v41 = vpop.f32.mrb[4].mxu1  ;;  %v8728_v36 = vld [vmem:[#allocation3 + $0x140] sm:$0xff]   ;;  %v8723_v37 = vld [vmem:[#allocation3 + $0x38] sm:$0xff]  }
 0x25d   : > { %v902_v42 = vadd.f32 %v8043_v41, %v731_v23  ;;  %v893_v43 = vpop.f32.mrb[5].mxu1  ;;  %v8727_v41 = vld [vmem:[#allocation3 + $0x48] sm:$0xff]  }
 0x25e   : > { %v894_v44 = vadd.f32 %v893_v43, %v721_v21  ;;  %v8044_v45 = vpop.f32.mrb[6].mxu1  ;;  %8053 = vmatprep.subr.bf16.mxu0 %v956_v40  ;;  %8197 = vmatprep.subr.bf16.mxu1 %v956_v40  ;;  %v8730_v43 = vld [vmem:[#allocation3 + $0x50] sm:$0xff]  }
 0x25f   : > { %v905_v46 = vadd.f32 %v8044_v45, %v736_v27  ;;  %v896_v47 = vpop.f32.mrb[7].mxu1  ;;  %8054 = vmatpush3.bf16.msra.mxu0 %v956_v40  ;;  %8205 = vmatpush3.bf16.msra.mxu1 %v956_v40  ;;  %v946_v50 = vmax.f32 %v902_v42, 0.0  ;;  %v8714_v27 = vld [vmem:[#allocation3 + $0x10] sm:$0xff]   ;;  %v8733_v42 = vld [vmem:[#allocation3 + $0x158] sm:$0xff]  }
 0x260   : > { %v897_v49 = vadd.f32 %v896_v47, %v726_v22  ;;  %8055 = vmatprep.subr.bf16.mxu0 %v957_v38  ;;  %8198 = vmatprep.subr.bf16.mxu1 %v957_v38  ;;  %v944_v53 = vmax.f32 %v894_v44, 0.0  ;;  %v8732_v40 = vld [vmem:[#allocation3 + $0x150] sm:$0xff]   ;;  %v8736_v44 = vld [vmem:[#allocation3 + $0x160] sm:$0xff]   ;;  %v8731_v45 = vld [vmem:[#allocation3 + $0x58] sm:$0xff]  }
 0x261   : > { %v947_v51 = vmax.f32 %v905_v46, 0.0  ;;  %v8737_v46 = vld [vmem:[#allocation3 + $0x168] sm:$0xff]   ;;  %v8734_v47 = vld [vmem:[#allocation3 + $0x60] sm:$0xff]  }
 0x262   : > { %v945_v54 = vmax.f32 %v897_v49, 0.0  ;;  %v8735_v49 = vld [vmem:[#allocation3 + $0x68] sm:$0xff]  }
 0x263   : > { %v959_v55 = vpack.c.bf16 %v947_v51, %v946_v50  ;;  %8056 = vmatpush3.bf16.msra.mxu0 %v957_v38  ;;  %8206 = vmatpush3.bf16.msra.mxu1 %v957_v38  ;;  %v8729_v38 = vld [vmem:[#allocation3 + $0x148] sm:$0xff]   ;;  %v8741_v50 = vld [vmem:[#allocation3 + $0x178] sm:$0xff]   ;;  %v8738_v51 = vld [vmem:[#allocation3 + $0x70] sm:$0xff]  }
 0x264   : > { %v958_v56 = vpack.c.bf16 %v945_v54, %v944_v53  ;;  %v8047_v57 = vpop.f32.mrb[8].mxu1  ;;  %v8739_v53 = vld [vmem:[#allocation3 + $0x78] sm:$0xff]   ;;  %v8745_v54 = vld [vmem:[#allocation3 + $0x188] sm:$0xff]  }
 0x265   : > { %v918_v58 = vadd.f32 %v8047_v57, %v751_v48  ;;  %v909_v59 = vpop.f32.mrb[9].mxu1  ;;  %v8740_v48 = vld [vmem:[#allocation3 + $0x170] sm:$0xff]   ;;  %v8743_v57 = vld [vmem:[#allocation3 + $0x88] sm:$0xff]  }
 0x266   : > { %v910_v61 = vadd.f32 %v909_v59, %v741_v35  ;;  %v8048_v62 = vpop.f32.mrb[10].mxu1  ;;  %8057 = vmatprep.subr.bf16.mxu0 %v958_v56  ;;  %8199 = vmatprep.subr.bf16.mxu1 %v958_v56  ;;  %v8722_v35 = vld [vmem:[#allocation3 + $0x30] sm:$0xff]  }
 0x267   : > { %v921_v63 = vadd.f32 %v8048_v62, %v756_v52  ;;  %v912_v0 = vpop.f32.mrb[11].mxu1  ;;  %8058 = vmatpush3.bf16.msra.mxu0 %v958_v56  ;;  %8207 = vmatpush3.bf16.msra.mxu1 %v958_v56  ;;  %v950_v3 = vmax.f32 %v918_v58, 0.0  ;;  %v8744_v52 = vld [vmem:[#allocation3 + $0x180] sm:$0xff]   ;;  %v8748_v56 = vld [vmem:[#allocation3 + $0x190] sm:$0xff]   ;;  %v8749_v58 = vld [vmem:[#allocation3 + $0x198] sm:$0xff]  }
 0x268   : > { %v913_v2 = vadd.f32 %v912_v0, %v746_v39  ;;  %8059 = vmatprep.subr.bf16.mxu0 %v959_v55  ;;  %8200 = vmatprep.subr.bf16.mxu1 %v959_v55  ;;  %v948_v5 = vmax.f32 %v910_v61, 0.0  ;;  %v8726_v39 = vld [vmem:[#allocation3 + $0x40] sm:$0xff]   ;;  %v8746_v59 = vld [vmem:[#allocation3 + $0x90] sm:$0xff]   ;;  %v8747_v61 = vld [vmem:[#allocation3 + $0x98] sm:$0xff]  }
 0x269   : > { %v951_v4 = vmax.f32 %v921_v63, 0.0  ;;  %v8753_v62 = vld [vmem:[#allocation3 + $0x1a8] sm:$0xff]   ;;  %v8750_v63 = vld [vmem:[#allocation3 + $0xa0] sm:$0xff]   ;;  %v8756_v0 = vld [vmem:[#allocation3 + $0x1b0] sm:$0xff]  }
 0x26a   : > { %v949_v6 = vmax.f32 %v913_v2, 0.0  ;;  %v8757_v2 = vld [vmem:[#allocation3 + $0x1b8] sm:$0xff]  }
 0x26b   : > { %v961_v7 = vpack.c.bf16 %v951_v4, %v950_v3  ;;  %8060 = vmatpush3.bf16.msra.mxu0 %v959_v55  ;;  %8208 = vmatpush3.bf16.msra.mxu1 %v959_v55  ;;  %v8742_v55 = vld [vmem:[#allocation3 + $0x80] sm:$0xff]   ;;  %v8754_v3 = vld [vmem:[#allocation3 + $0xb0] sm:$0xff]  }
 0x26c   : > { %v960_v9 = vpack.c.bf16 %v949_v6, %v948_v5  ;;  %v8051_v10 = vpop.f32.mrb[12].mxu1  ;;  %v8760_v4 = vld [vmem:[#allocation3 + $0x1c0] sm:$0xff]   ;;  %v8755_v5 = vld [vmem:[#allocation3 + $0xb8] sm:$0xff]   ;;  %v8761_v6 = vld [vmem:[#allocation3 + $0x1c8] sm:$0xff]  }
 0x26d   : > { %v934_v11 = vadd.f32 %v8051_v10, %v771_v8  ;;  %v925_v12 = vpop.f32.mrb[13].mxu1  ;;  %v8764_v8 = vld [vmem:[#allocation3 + $0x1d0] sm:$0xff]   ;;  %v8765_v10 = vld [vmem:[#allocation3 + $0x1d8] sm:$0xff]  }
 0x26e   : > { %v926_v14 = vadd.f32 %v925_v12, %v761_v60  ;;  %v8052_v15 = vpop.f32.mrb[14].mxu1  ;;  %8061 = vmatprep.subr.bf16.mxu0 %v960_v9  ;;  %8201 = vmatprep.subr.bf16.mxu1 %v960_v9  ;;  %v8752_v60 = vld [vmem:[#allocation3 + $0x1a0] sm:$0xff]  }
 0x26f   : > { %v937_v16 = vadd.f32 %v8052_v15, %v776_v13  ;;  %v928_v17 = vpop.f32.mrb[15].mxu1  ;;  %8062 = vmatpush3.bf16.msra.mxu0 %v960_v9  ;;  %8209 = vmatpush3.bf16.msra.mxu1 %v960_v9  ;;  %v954_v19 = vmax.f32 %v934_v11, 0.0  ;;  %v8759_v9 = vld [vmem:[#allocation3 + $0xc8] sm:$0xff]   ;;  %v8762_v11 = vld [vmem:[#allocation3 + $0xd0] sm:$0xff]   ;;  %v8768_v12 = vld [vmem:[#allocation3 + $0x1e0] sm:$0xff]  }
 0x270   : > { %v929_v18 = vadd.f32 %v928_v17, %v766_v1  ;;  %8063 = vmatprep.subr.bf16.mxu0 %v961_v7  ;;  %8202 = vmatprep.subr.bf16.mxu1 %v961_v7  ;;  %v952_v21 = vmax.f32 %v926_v14, 0.0  ;;  %v8751_v1 = vld [vmem:[#allocation3 + $0xa8] sm:$0xff]   ;;  %v8763_v13 = vld [vmem:[#allocation3 + $0xd8] sm:$0xff]   ;;  %v8766_v15 = vld [vmem:[#allocation3 + $0xe0] sm:$0xff]  }
 0x271   : > { %v955_v20 = vmax.f32 %v937_v16, 0.0  ;;  %v8769_v14 = vld [vmem:[#allocation3 + $0x1e8] sm:$0xff]   ;;  %v8772_v16 = vld [vmem:[#allocation3 + $0x1f0] sm:$0xff]  }
 0x272   : > { %v953_v22 = vmax.f32 %v929_v18, 0.0  ;;  %v8767_v17 = vld [vmem:[#allocation3 + $0xe8] sm:$0xff]   ;;  %v8773_v18 = vld [vmem:[#allocation3 + $0x1f8] sm:$0xff]  }
 0x273   : > { %v963_v23 = vpack.c.bf16 %v955_v20, %v954_v19  ;;  %8064 = vmatpush3.bf16.msra.mxu0 %v961_v7  ;;  %8210 = vmatpush3.bf16.msra.mxu1 %v961_v7  ;;  %v8758_v7 = vld [vmem:[#allocation3 + $0xc0] sm:$0xff]   ;;  %v8770_v19 = vld [vmem:[#allocation3 + $0xf0] sm:$0xff]   ;;  %v8771_v20 = vld [vmem:[#allocation3 + $0xf8] sm:$0xff]  }
 0x274   : > { %v962_v24 = vpack.c.bf16 %v953_v22, %v952_v21  ;;  %v8774_v21 = vld [vmem:[#allocation3 + $0x100] sm:$0xff]   ;;  %v8775_v22 = vld [vmem:[#allocation3 + $0x108] sm:$0xff]  }
 0x276   : > { %8065 = vmatprep.subr.bf16.mxu0 %v962_v24  ;;  %8203 = vmatprep.subr.bf16.mxu1 %v962_v24 }
 0x277   : > { %8066 = vmatpush3.bf16.msra.mxu0 %v962_v24  ;;  %8211 = vmatpush3.bf16.msra.mxu1 %v962_v24  ;;  %v2091_v24 = vld [vmem:[#allocation2 + $0x230] sm:$0xff] }
 0x278   : > { %8067 = vmatprep.subr.bf16.mxu0 %v963_v23  ;;  %8204 = vmatprep.subr.bf16.mxu1 %v963_v23 }
 0x27b   : > { %8068 = vmatpush3.bf16.msra.mxu0 %v963_v23  ;;  %8212 = vmatpush3.bf16.msra.mxu1 %v963_v23  ;;  %v2023_v23 = vld [vmem:[#allocation2 + $0x10] sm:$0xff] }
 0x27e   : > { %8070 = vmatmul.mubr.bf16.vlgmr.msra.gmra.mrb[8].mxu0 %v8713_v25  ;;  %8138 = vmatmul.mubr.bf16.vlgmr.msra.gmra.mrb[16].mxu1 %v8717_v26  ;;  %v2021_v25 = vld [vmem:[#allocation2] sm:$0xff] }
 0x27f   : > { %8073 = vmatprep.mubr.bf16.mxu0 %v8714_v27  ;;  %8141 = vmatprep.mubr.bf16.mxu1 %v8720_v28  ;;  %v2089_v26 = vld [vmem:[#allocation2 + $0x220] sm:$0xff]  ;;  %v2024_v28 = vld [vmem:[#allocation2 + $0x18] sm:$0xff] }
 0x286   : > { %8074 = vmatmul.mubr.bf16.gmra.mrb[12].mxu0 %v8715_v29  ;;  %8142 = vmatmul.mubr.bf16.gmra.mrb[20].mxu1 %v8721_v30  ;;  %v2092_v30 = vld [vmem:[#allocation2 + $0x238] sm:$0xff] }
 0x287   : > { %8077 = vmatprep.mubr.bf16.mxu0 %v8718_v31  ;;  %8145 = vmatprep.mubr.bf16.mxu1 %v8724_v32 }
 0x28e   : > { %8078 = vmatmul.mubr.bf16.gmra.mrb[16].mxu0 %v8719_v33  ;;  %8146 = vmatmul.mubr.bf16.gmra.mrb[24].mxu1 %v8725_v34  ;;  %v2022_v33 = vld [vmem:[#allocation2 + $0x8] sm:$0xff] }
 0x28f   : > { %8081 = vmatprep.mubr.bf16.mxu0 %v8722_v35  ;;  %8149 = vmatprep.mubr.bf16.mxu1 %v8728_v36  ;;  %v2090_v36 = vld [vmem:[#allocation2 + $0x228] sm:$0xff] }
 0x296   : > { %8082 = vmatmul.mubr.bf16.gmra.mrb[20].mxu0 %v8723_v37  ;;  %8150 = vmatmul.mubr.bf16.gmra.mrb[28].mxu1 %v8729_v38 }
 0x297   : > { %8085 = vmatprep.mubr.bf16.mxu0 %v8726_v39  ;;  %8153 = vmatprep.mubr.bf16.mxu1 %v8732_v40 }
 0x29e   : > { %8086 = vmatmul.mubr.bf16.gmra.mrb[24].mxu0 %v8727_v41  ;;  %8154 = vmatmul.mubr.bf16.gmra.mrb[32].mxu1 %v8733_v42 }
 0x29f   : > { %8089 = vmatprep.mubr.bf16.mxu0 %v8730_v43  ;;  %8157 = vmatprep.mubr.bf16.mxu1 %v8736_v44 }
 0x2a6   : > { %8090 = vmatmul.mubr.bf16.gmra.mrb[28].mxu0 %v8731_v45  ;;  %8158 = vmatmul.mubr.bf16.gmra.mrb[36].mxu1 %v8737_v46 }
 0x2a7   : > { %8093 = vmatprep.mubr.bf16.mxu0 %v8734_v47  ;;  %8161 = vmatprep.mubr.bf16.mxu1 %v8740_v48  ;;  %v2027_v47 = vld [vmem:[#allocation2 + $0x30] sm:$0xff] }
 0x2a8   : > { %v2095_v48 = vld [vmem:[#allocation2 + $0x250] sm:$0xff] }
 0x2ae   : > { %8094 = vmatmul.mubr.bf16.gmra.mrb[32].mxu0 %v8735_v49  ;;  %8162 = vmatmul.mubr.bf16.gmra.mrb[40].mxu1 %v8741_v50  ;;  %v2025_v49 = vld [vmem:[#allocation2 + $0x20] sm:$0xff] }
 0x2af   : > { %8097 = vmatprep.mubr.bf16.mxu0 %v8738_v51  ;;  %8165 = vmatprep.mubr.bf16.mxu1 %v8744_v52  ;;  %v2093_v50 = vld [vmem:[#allocation2 + $0x240] sm:$0xff]  ;;  %v2028_v52 = vld [vmem:[#allocation2 + $0x38] sm:$0xff] }
 0x2b6   : > { %8098 = vmatmul.mubr.bf16.gmra.mrb[36].mxu0 %v8739_v53  ;;  %8166 = vmatmul.mubr.bf16.gmra.mrb[44].mxu1 %v8745_v54  ;;  %v2096_v54 = vld [vmem:[#allocation2 + $0x258] sm:$0xff] }
 0x2b7   : > { %8101 = vmatprep.mubr.bf16.mxu0 %v8742_v55  ;;  %8169 = vmatprep.mubr.bf16.mxu1 %v8748_v56 }
 0x2be   : > { %8102 = vmatmul.mubr.bf16.gmra.mrb[40].mxu0 %v8743_v57  ;;  %8170 = vmatmul.mubr.bf16.gmra.mrb[48].mxu1 %v8749_v58  ;;  %v2026_v57 = vld [vmem:[#allocation2 + $0x28] sm:$0xff] }
 0x2bf   : > { %8105 = vmatprep.mubr.bf16.mxu0 %v8746_v59  ;;  %8173 = vmatprep.mubr.bf16.mxu1 %v8752_v60  ;;  %v2094_v60 = vld [vmem:[#allocation2 + $0x248] sm:$0xff] }
 0x2c6   : > { %8106 = vmatmul.mubr.bf16.gmra.mrb[44].mxu0 %v8747_v61  ;;  %8174 = vmatmul.mubr.bf16.gmra.mrb[52].mxu1 %v8753_v62 }
 0x2c7   : > { %8109 = vmatprep.mubr.bf16.mxu0 %v8750_v63  ;;  %8177 = vmatprep.mubr.bf16.mxu1 %v8756_v0 }
 0x2ce   : > { %8110 = vmatmul.mubr.bf16.gmra.mrb[48].mxu0 %v8751_v1  ;;  %8178 = vmatmul.mubr.bf16.gmra.mrb[56].mxu1 %v8757_v2 }
 0x2cf   : > { %8113 = vmatprep.mubr.bf16.mxu0 %v8754_v3  ;;  %8181 = vmatprep.mubr.bf16.mxu1 %v8760_v4 }
 0x2d6   : > { %8114 = vmatmul.mubr.bf16.gmra.mrb[52].mxu0 %v8755_v5  ;;  %8182 = vmatmul.mubr.bf16.gmra.mrb[60].mxu1 %v8761_v6 }
 0x2d7   : > { %8117 = vmatprep.mubr.bf16.mxu0 %v8758_v7  ;;  %8185 = vmatprep.mubr.bf16.mxu1 %v8764_v8  ;;  %v2031_v7 = vld [vmem:[#allocation2 + $0x50] sm:$0xff] }
 0x2d8   : > { %v2099_v8 = vld [vmem:[#allocation2 + $0x270] sm:$0xff] }
 0x2de   : > { %8118 = vmatmul.mubr.bf16.gmra.mrb[56].mxu0 %v8759_v9  ;;  %8186 = vmatmul.mubr.bf16.gmra.mrb[64].mxu1 %v8765_v10  ;;  %v2029_v9 = vld [vmem:[#allocation2 + $0x40] sm:$0xff] }
 0x2df   : > { %8121 = vmatprep.mubr.bf16.mxu0 %v8762_v11  ;;  %8189 = vmatprep.mubr.bf16.mxu1 %v8768_v12  ;;  %v2097_v10 = vld [vmem:[#allocation2 + $0x260] sm:$0xff]  ;;  %v2032_v12 = vld [vmem:[#allocation2 + $0x58] sm:$0xff] }
 0x2e6   : > { %8122 = vmatmul.mubr.bf16.gmra.mrb[60].mxu0 %v8763_v13  ;;  %8190 = vmatmul.mubr.bf16.gmra.mrb[68].mxu1 %v8769_v14  ;;  %v2100_v14 = vld [vmem:[#allocation2 + $0x278] sm:$0xff] }
 0x2e7   : > { %8125 = vmatprep.mubr.bf16.mxu0 %v8766_v15  ;;  %8193 = vmatprep.mubr.bf16.mxu1 %v8772_v16 }
 0x2ee   : > { %8126 = vmatmul.mubr.bf16.gmra.mrb[64].mxu0 %v8767_v17  ;;  %8194 = vmatmul.mubr.bf16.gmra.mrb[72].mxu1 %v8773_v18  ;;  %v2030_v17 = vld [vmem:[#allocation2 + $0x48] sm:$0xff] }
 0x2ef   : > { %8129 = vmatprep.mubr.bf16.mxu0 %v8770_v19 }
 0x2f6   : > { %8130 = vmatmul.mubr.bf16.gmra.mrb[68].mxu0 %v8771_v20  ;;  %v2098_v20 = vld [vmem:[#allocation2 + $0x268] sm:$0xff] }
 0x2f7   : > { %8133 = vmatprep.mubr.bf16.mxu0 %v8774_v21 }
 0x2fe   : > { %8134 = vmatmul.mubr.bf16.gmra.mrb[72].mxu0 %v8775_v22 }
 0x351   : > { %v8071_v27 = vpop.f32.mrb[8].mxu0  ;;  %v8139_v29 = vpop.f32.mrb[16].mxu1 }
 0x352   : > { %v2151_v31 = vmax.f32 %v2023_v23, %v8071_v27  ;;  %v1510_v32 = vpop.f32.mrb[9].mxu0  ;;  %v2219_v34 = vmax.f32 %v2091_v24, %v8139_v29  ;;  %v1782_v35 = vpop.f32.mrb[17].mxu1 }
 0x353   : > { %v2149_v37 = vmax.f32 %v2021_v25, %v1510_v32  ;;  %v8072_v38 = vpop.f32.mrb[10].mxu0  ;;  %v2217_v39 = vmax.f32 %v2089_v26, %v1782_v35  ;;  %v8140_v40 = vpop.f32.mrb[18].mxu1  ;;  %v2103_v32 = vld [vmem:[#allocation2 + $0x290] sm:$0xff] }
 0x354   : > { %2279 = vst [vmem:[#allocation2 + $0x10] sm:$0xff] %v2151_v31  ;;  %v2152_v41 = vmax.f32 %v2024_v28, %v8072_v38  ;;  %v1513_v42 = vpop.f32.mrb[11].mxu0  ;;  %2347 = vst [vmem:[#allocation2 + $0x230] sm:$0xff] %v2219_v34  ;;  %v2220_v43 = vmax.f32 %v2092_v30, %v8140_v40  ;;  %v1785_v44 = vpop.f32.mrb[19].mxu1  ;;  %v2035_v31 = vld [vmem:[#allocation2 + $0x70] sm:$0xff]  ;;  %v2101_v34 = vld [vmem:[#allocation2 + $0x280] sm:$0xff] }
 0x355   : > { %2277 = vst [vmem:[#allocation2] sm:$0xff] %v2149_v37  ;;  %v2150_v45 = vmax.f32 %v2022_v33, %v1513_v42  ;;  %2345 = vst [vmem:[#allocation2 + $0x220] sm:$0xff] %v2217_v39  ;;  %v2218_v46 = vmax.f32 %v2090_v36, %v1785_v44  ;;  %v2033_v33 = vld [vmem:[#allocation2 + $0x60] sm:$0xff]  ;;  %v2036_v36 = vld [vmem:[#allocation2 + $0x78] sm:$0xff] }
 0x356   : > { %2280 = vst [vmem:[#allocation2 + $0x18] sm:$0xff] %v2152_v41  ;;  %2348 = vst [vmem:[#allocation2 + $0x238] sm:$0xff] %v2220_v43  ;;  %v2104_v38 = vld [vmem:[#allocation2 + $0x298] sm:$0xff]  ;;  %v2034_v41 = vld [vmem:[#allocation2 + $0x68] sm:$0xff] }
 0x357   : > { %2278 = vst [vmem:[#allocation2 + $0x8] sm:$0xff] %v2150_v45  ;;  %2346 = vst [vmem:[#allocation2 + $0x228] sm:$0xff] %v2218_v46  ;;  %v2102_v44 = vld [vmem:[#allocation2 + $0x288] sm:$0xff] }
 0x359   : > { %v8075_v51 = vpop.f32.mrb[12].mxu0  ;;  %v8143_v53 = vpop.f32.mrb[20].mxu1 }
 0x35a   : > { %v2155_v55 = vmax.f32 %v2027_v47, %v8075_v51  ;;  %v1526_v56 = vpop.f32.mrb[13].mxu0  ;;  %v2223_v58 = vmax.f32 %v2095_v48, %v8143_v53  ;;  %v1798_v59 = vpop.f32.mrb[21].mxu1 }
 0x35b   : > { %v2153_v61 = vmax.f32 %v2025_v49, %v1526_v56  ;;  %v8076_v62 = vpop.f32.mrb[14].mxu0  ;;  %v2221_v63 = vmax.f32 %v2093_v50, %v1798_v59  ;;  %v8144_v0 = vpop.f32.mrb[22].mxu1  ;;  %v2107_v56 = vld [vmem:[#allocation2 + $0x2b0] sm:$0xff] }
 0x35c   : > { %2283 = vst [vmem:[#allocation2 + $0x30] sm:$0xff] %v2155_v55  ;;  %v2156_v1 = vmax.f32 %v2028_v52, %v8076_v62  ;;  %v1529_v2 = vpop.f32.mrb[15].mxu0  ;;  %2351 = vst [vmem:[#allocation2 + $0x250] sm:$0xff] %v2223_v58  ;;  %v2224_v3 = vmax.f32 %v2096_v54, %v8144_v0  ;;  %v1801_v4 = vpop.f32.mrb[23].mxu1  ;;  %v2039_v55 = vld [vmem:[#allocation2 + $0x90] sm:$0xff]  ;;  %v2105_v58 = vld [vmem:[#allocation2 + $0x2a0] sm:$0xff] }
 0x35d   : > { %2281 = vst [vmem:[#allocation2 + $0x20] sm:$0xff] %v2153_v61  ;;  %v2154_v5 = vmax.f32 %v2026_v57, %v1529_v2  ;;  %2349 = vst [vmem:[#allocation2 + $0x240] sm:$0xff] %v2221_v63  ;;  %v2222_v6 = vmax.f32 %v2094_v60, %v1801_v4  ;;  %v2037_v57 = vld [vmem:[#allocation2 + $0x80] sm:$0xff]  ;;  %v2040_v60 = vld [vmem:[#allocation2 + $0x98] sm:$0xff] }
 0x35e   : > { %2284 = vst [vmem:[#allocation2 + $0x38] sm:$0xff] %v2156_v1  ;;  %2352 = vst [vmem:[#allocation2 + $0x258] sm:$0xff] %v2224_v3  ;;  %v2108_v62 = vld [vmem:[#allocation2 + $0x2b8] sm:$0xff]  ;;  %v2038_v1 = vld [vmem:[#allocation2 + $0x88] sm:$0xff] }
 0x35f   : > { %2282 = vst [vmem:[#allocation2 + $0x28] sm:$0xff] %v2154_v5  ;;  %2350 = vst [vmem:[#allocation2 + $0x248] sm:$0xff] %v2222_v6  ;;  %v2106_v4 = vld [vmem:[#allocation2 + $0x2a8] sm:$0xff] }
 0x361   : > { %v8079_v11 = vpop.f32.mrb[16].mxu0  ;;  %v8147_v13 = vpop.f32.mrb[24].mxu1 }
 0x362   : > { %v2159_v15 = vmax.f32 %v2031_v7, %v8079_v11  ;;  %v1542_v16 = vpop.f32.mrb[17].mxu0  ;;  %v2227_v18 = vmax.f32 %v2099_v8, %v8147_v13  ;;  %v1814_v19 = vpop.f32.mrb[25].mxu1 }
 0x363   : > { %v2157_v21 = vmax.f32 %v2029_v9, %v1542_v16  ;;  %v8080_v22 = vpop.f32.mrb[18].mxu0  ;;  %v2225_v23 = vmax.f32 %v2097_v10, %v1814_v19  ;;  %v8148_v24 = vpop.f32.mrb[26].mxu1  ;;  %v2111_v16 = vld [vmem:[#allocation2 + $0x2d0] sm:$0xff] }
 0x364   : > { %2287 = vst [vmem:[#allocation2 + $0x50] sm:$0xff] %v2159_v15  ;;  %v2160_v25 = vmax.f32 %v2032_v12, %v8080_v22  ;;  %v1545_v26 = vpop.f32.mrb[19].mxu0  ;;  %2355 = vst [vmem:[#allocation2 + $0x270] sm:$0xff] %v2227_v18  ;;  %v2228_v27 = vmax.f32 %v2100_v14, %v8148_v24  ;;  %v1817_v28 = vpop.f32.mrb[27].mxu1  ;;  %v2043_v15 = vld [vmem:[#allocation2 + $0xb0] sm:$0xff]  ;;  %v2109_v18 = vld [vmem:[#allocation2 + $0x2c0] sm:$0xff] }
 0x365   : > { %2285 = vst [vmem:[#allocation2 + $0x40] sm:$0xff] %v2157_v21  ;;  %v2158_v29 = vmax.f32 %v2030_v17, %v1545_v26  ;;  %2353 = vst [vmem:[#allocation2 + $0x260] sm:$0xff] %v2225_v23  ;;  %v2226_v30 = vmax.f32 %v2098_v20, %v1817_v28  ;;  %v2041_v17 = vld [vmem:[#allocation2 + $0xa0] sm:$0xff]  ;;  %v2044_v20 = vld [vmem:[#allocation2 + $0xb8] sm:$0xff] }
 0x366   : > { %2288 = vst [vmem:[#allocation2 + $0x58] sm:$0xff] %v2160_v25  ;;  %2356 = vst [vmem:[#allocation2 + $0x278] sm:$0xff] %v2228_v27  ;;  %v2112_v22 = vld [vmem:[#allocation2 + $0x2d8] sm:$0xff]  ;;  %v2042_v25 = vld [vmem:[#allocation2 + $0xa8] sm:$0xff] }
 0x367   : > { %2286 = vst [vmem:[#allocation2 + $0x48] sm:$0xff] %v2158_v29  ;;  %2354 = vst [vmem:[#allocation2 + $0x268] sm:$0xff] %v2226_v30  ;;  %v2110_v28 = vld [vmem:[#allocation2 + $0x2c8] sm:$0xff] }
 0x369   : > { %v8083_v35 = vpop.f32.mrb[20].mxu0  ;;  %v8151_v37 = vpop.f32.mrb[28].mxu1 }
 0x36a   : > { %v2163_v39 = vmax.f32 %v2035_v31, %v8083_v35  ;;  %v1558_v40 = vpop.f32.mrb[21].mxu0  ;;  %v2231_v42 = vmax.f32 %v2103_v32, %v8151_v37  ;;  %v1830_v43 = vpop.f32.mrb[29].mxu1 }
 0x36b   : > { %v2161_v45 = vmax.f32 %v2033_v33, %v1558_v40  ;;  %v8084_v46 = vpop.f32.mrb[22].mxu0  ;;  %v2229_v47 = vmax.f32 %v2101_v34, %v1830_v43  ;;  %v8152_v48 = vpop.f32.mrb[30].mxu1  ;;  %v2115_v40 = vld [vmem:[#allocation2 + $0x2f0] sm:$0xff] }
 0x36c   : > { %2291 = vst [vmem:[#allocation2 + $0x70] sm:$0xff] %v2163_v39  ;;  %v2164_v49 = vmax.f32 %v2036_v36, %v8084_v46  ;;  %v1561_v50 = vpop.f32.mrb[23].mxu0  ;;  %2359 = vst [vmem:[#allocation2 + $0x290] sm:$0xff] %v2231_v42  ;;  %v2232_v51 = vmax.f32 %v2104_v38, %v8152_v48  ;;  %v1833_v52 = vpop.f32.mrb[31].mxu1  ;;  %v2047_v39 = vld [vmem:[#allocation2 + $0xd0] sm:$0xff]  ;;  %v2113_v42 = vld [vmem:[#allocation2 + $0x2e0] sm:$0xff] }
 0x36d   : > { %2289 = vst [vmem:[#allocation2 + $0x60] sm:$0xff] %v2161_v45  ;;  %v2162_v53 = vmax.f32 %v2034_v41, %v1561_v50  ;;  %2357 = vst [vmem:[#allocation2 + $0x280] sm:$0xff] %v2229_v47  ;;  %v2230_v54 = vmax.f32 %v2102_v44, %v1833_v52  ;;  %v2045_v41 = vld [vmem:[#allocation2 + $0xc0] sm:$0xff]  ;;  %v2048_v44 = vld [vmem:[#allocation2 + $0xd8] sm:$0xff] }
 0x36e   : > { %2292 = vst [vmem:[#allocation2 + $0x78] sm:$0xff] %v2164_v49  ;;  %2360 = vst [vmem:[#allocation2 + $0x298] sm:$0xff] %v2232_v51  ;;  %v2116_v46 = vld [vmem:[#allocation2 + $0x2f8] sm:$0xff]  ;;  %v2046_v49 = vld [vmem:[#allocation2 + $0xc8] sm:$0xff] }
 0x36f   : > { %2290 = vst [vmem:[#allocation2 + $0x68] sm:$0xff] %v2162_v53  ;;  %2358 = vst [vmem:[#allocation2 + $0x288] sm:$0xff] %v2230_v54  ;;  %v2114_v52 = vld [vmem:[#allocation2 + $0x2e8] sm:$0xff] }
 0x371   : > { %v8087_v59 = vpop.f32.mrb[24].mxu0  ;;  %v8155_v61 = vpop.f32.mrb[32].mxu1 }
 0x372   : > { %v2167_v63 = vmax.f32 %v2039_v55, %v8087_v59  ;;  %v1574_v0 = vpop.f32.mrb[25].mxu0  ;;  %v2235_v2 = vmax.f32 %v2107_v56, %v8155_v61  ;;  %v1846_v3 = vpop.f32.mrb[33].mxu1 }
 0x373   : > { %v2165_v5 = vmax.f32 %v2037_v57, %v1574_v0  ;;  %v8088_v6 = vpop.f32.mrb[26].mxu0  ;;  %v2233_v7 = vmax.f32 %v2105_v58, %v1846_v3  ;;  %v8156_v8 = vpop.f32.mrb[34].mxu1  ;;  %v2119_v0 = vld [vmem:[#allocation2 + $0x310] sm:$0xff] }
 0x374   : > { %2295 = vst [vmem:[#allocation2 + $0x90] sm:$0xff] %v2167_v63  ;;  %v2168_v9 = vmax.f32 %v2040_v60, %v8088_v6  ;;  %v1577_v10 = vpop.f32.mrb[27].mxu0  ;;  %2363 = vst [vmem:[#allocation2 + $0x2b0] sm:$0xff] %v2235_v2  ;;  %v2236_v11 = vmax.f32 %v2108_v62, %v8156_v8  ;;  %v1849_v12 = vpop.f32.mrb[35].mxu1  ;;  %v2051_v63 = vld [vmem:[#allocation2 + $0xf0] sm:$0xff]  ;;  %v2117_v2 = vld [vmem:[#allocation2 + $0x300] sm:$0xff] }
 0x375   : > { %2293 = vst [vmem:[#allocation2 + $0x80] sm:$0xff] %v2165_v5  ;;  %v2166_v13 = vmax.f32 %v2038_v1, %v1577_v10  ;;  %2361 = vst [vmem:[#allocation2 + $0x2a0] sm:$0xff] %v2233_v7  ;;  %v2234_v14 = vmax.f32 %v2106_v4, %v1849_v12  ;;  %v2049_v1 = vld [vmem:[#allocation2 + $0xe0] sm:$0xff]  ;;  %v2052_v4 = vld [vmem:[#allocation2 + $0xf8] sm:$0xff] }
 0x376   : > { %2296 = vst [vmem:[#allocation2 + $0x98] sm:$0xff] %v2168_v9  ;;  %2364 = vst [vmem:[#allocation2 + $0x2b8] sm:$0xff] %v2236_v11  ;;  %v2120_v6 = vld [vmem:[#allocation2 + $0x318] sm:$0xff]  ;;  %v2050_v9 = vld [vmem:[#allocation2 + $0xe8] sm:$0xff] }
 0x377   : > { %2294 = vst [vmem:[#allocation2 + $0x88] sm:$0xff] %v2166_v13  ;;  %2362 = vst [vmem:[#allocation2 + $0x2a8] sm:$0xff] %v2234_v14  ;;  %v2118_v12 = vld [vmem:[#allocation2 + $0x308] sm:$0xff] }
 0x379   : > { %v8091_v19 = vpop.f32.mrb[28].mxu0  ;;  %v8159_v21 = vpop.f32.mrb[36].mxu1 }
 0x37a   : > { %v2171_v23 = vmax.f32 %v2043_v15, %v8091_v19  ;;  %v1590_v24 = vpop.f32.mrb[29].mxu0  ;;  %v2239_v26 = vmax.f32 %v2111_v16, %v8159_v21  ;;  %v1862_v27 = vpop.f32.mrb[37].mxu1 }
 0x37b   : > { %v2169_v29 = vmax.f32 %v2041_v17, %v1590_v24  ;;  %v8092_v30 = vpop.f32.mrb[30].mxu0  ;;  %v2237_v31 = vmax.f32 %v2109_v18, %v1862_v27  ;;  %v8160_v32 = vpop.f32.mrb[38].mxu1  ;;  %v2123_v24 = vld [vmem:[#allocation2 + $0x330] sm:$0xff] }
 0x37c   : > { %2299 = vst [vmem:[#allocation2 + $0xb0] sm:$0xff] %v2171_v23  ;;  %v2172_v33 = vmax.f32 %v2044_v20, %v8092_v30  ;;  %v1593_v34 = vpop.f32.mrb[31].mxu0  ;;  %2367 = vst [vmem:[#allocation2 + $0x2d0] sm:$0xff] %v2239_v26  ;;  %v2240_v35 = vmax.f32 %v2112_v22, %v8160_v32  ;;  %v1865_v36 = vpop.f32.mrb[39].mxu1  ;;  %v2055_v23 = vld [vmem:[#allocation2 + $0x110] sm:$0xff]  ;;  %v2121_v26 = vld [vmem:[#allocation2 + $0x320] sm:$0xff] }
 0x37d   : > { %2297 = vst [vmem:[#allocation2 + $0xa0] sm:$0xff] %v2169_v29  ;;  %v2170_v37 = vmax.f32 %v2042_v25, %v1593_v34  ;;  %2365 = vst [vmem:[#allocation2 + $0x2c0] sm:$0xff] %v2237_v31  ;;  %v2238_v38 = vmax.f32 %v2110_v28, %v1865_v36  ;;  %v2053_v25 = vld [vmem:[#allocation2 + $0x100] sm:$0xff]  ;;  %v2056_v28 = vld [vmem:[#allocation2 + $0x118] sm:$0xff] }
 0x37e   : > { %2300 = vst [vmem:[#allocation2 + $0xb8] sm:$0xff] %v2172_v33  ;;  %2368 = vst [vmem:[#allocation2 + $0x2d8] sm:$0xff] %v2240_v35  ;;  %v2124_v30 = vld [vmem:[#allocation2 + $0x338] sm:$0xff]  ;;  %v2054_v33 = vld [vmem:[#allocation2 + $0x108] sm:$0xff] }
 0x37f   : > { %2298 = vst [vmem:[#allocation2 + $0xa8] sm:$0xff] %v2170_v37  ;;  %2366 = vst [vmem:[#allocation2 + $0x2c8] sm:$0xff] %v2238_v38  ;;  %v2122_v36 = vld [vmem:[#allocation2 + $0x328] sm:$0xff] }
 0x381   : > { %v8095_v43 = vpop.f32.mrb[32].mxu0  ;;  %v8163_v45 = vpop.f32.mrb[40].mxu1 }
 0x382   : > { %v2175_v47 = vmax.f32 %v2047_v39, %v8095_v43  ;;  %v1606_v48 = vpop.f32.mrb[33].mxu0  ;;  %v2243_v50 = vmax.f32 %v2115_v40, %v8163_v45  ;;  %v1878_v51 = vpop.f32.mrb[41].mxu1 }
 0x383   : > { %v2173_v53 = vmax.f32 %v2045_v41, %v1606_v48  ;;  %v8096_v54 = vpop.f32.mrb[34].mxu0  ;;  %v2241_v55 = vmax.f32 %v2113_v42, %v1878_v51  ;;  %v8164_v56 = vpop.f32.mrb[42].mxu1  ;;  %v2127_v48 = vld [vmem:[#allocation2 + $0x350] sm:$0xff] }
 0x384   : > { %2303 = vst [vmem:[#allocation2 + $0xd0] sm:$0xff] %v2175_v47  ;;  %v2176_v57 = vmax.f32 %v2048_v44, %v8096_v54  ;;  %v1609_v58 = vpop.f32.mrb[35].mxu0  ;;  %2371 = vst [vmem:[#allocation2 + $0x2f0] sm:$0xff] %v2243_v50  ;;  %v2244_v59 = vmax.f32 %v2116_v46, %v8164_v56  ;;  %v1881_v60 = vpop.f32.mrb[43].mxu1  ;;  %v2059_v47 = vld [vmem:[#allocation2 + $0x130] sm:$0xff]  ;;  %v2125_v50 = vld [vmem:[#allocation2 + $0x340] sm:$0xff] }
 0x385   : > { %2301 = vst [vmem:[#allocation2 + $0xc0] sm:$0xff] %v2173_v53  ;;  %v2174_v61 = vmax.f32 %v2046_v49, %v1609_v58  ;;  %2369 = vst [vmem:[#allocation2 + $0x2e0] sm:$0xff] %v2241_v55  ;;  %v2242_v62 = vmax.f32 %v2114_v52, %v1881_v60  ;;  %v2057_v49 = vld [vmem:[#allocation2 + $0x120] sm:$0xff]  ;;  %v2060_v52 = vld [vmem:[#allocation2 + $0x138] sm:$0xff] }
 0x386   : > { %2304 = vst [vmem:[#allocation2 + $0xd8] sm:$0xff] %v2176_v57  ;;  %2372 = vst [vmem:[#allocation2 + $0x2f8] sm:$0xff] %v2244_v59  ;;  %v2128_v54 = vld [vmem:[#allocation2 + $0x358] sm:$0xff]  ;;  %v2058_v57 = vld [vmem:[#allocation2 + $0x128] sm:$0xff] }
 0x387   : > { %2302 = vst [vmem:[#allocation2 + $0xc8] sm:$0xff] %v2174_v61  ;;  %2370 = vst [vmem:[#allocation2 + $0x2e8] sm:$0xff] %v2242_v62  ;;  %v2126_v60 = vld [vmem:[#allocation2 + $0x348] sm:$0xff] }
 0x389   : > { %v8099_v3 = vpop.f32.mrb[36].mxu0  ;;  %v8167_v5 = vpop.f32.mrb[44].mxu1 }
 0x38a   : > { %v2179_v7 = vmax.f32 %v2051_v63, %v8099_v3  ;;  %v1622_v8 = vpop.f32.mrb[37].mxu0  ;;  %v2247_v10 = vmax.f32 %v2119_v0, %v8167_v5  ;;  %v1894_v11 = vpop.f32.mrb[45].mxu1 }
 0x38b   : > { %v2177_v13 = vmax.f32 %v2049_v1, %v1622_v8  ;;  %v8100_v14 = vpop.f32.mrb[38].mxu0  ;;  %v2245_v15 = vmax.f32 %v2117_v2, %v1894_v11  ;;  %v8168_v16 = vpop.f32.mrb[46].mxu1  ;;  %v2131_v8 = vld [vmem:[#allocation2 + $0x370] sm:$0xff] }
 0x38c   : > { %2307 = vst [vmem:[#allocation2 + $0xf0] sm:$0xff] %v2179_v7  ;;  %v2180_v17 = vmax.f32 %v2052_v4, %v8100_v14  ;;  %v1625_v18 = vpop.f32.mrb[39].mxu0  ;;  %2375 = vst [vmem:[#allocation2 + $0x310] sm:$0xff] %v2247_v10  ;;  %v2248_v19 = vmax.f32 %v2120_v6, %v8168_v16  ;;  %v1897_v20 = vpop.f32.mrb[47].mxu1  ;;  %v2063_v7 = vld [vmem:[#allocation2 + $0x150] sm:$0xff]  ;;  %v2129_v10 = vld [vmem:[#allocation2 + $0x360] sm:$0xff] }
 0x38d   : > { %2305 = vst [vmem:[#allocation2 + $0xe0] sm:$0xff] %v2177_v13  ;;  %v2178_v21 = vmax.f32 %v2050_v9, %v1625_v18  ;;  %2373 = vst [vmem:[#allocation2 + $0x300] sm:$0xff] %v2245_v15  ;;  %v2246_v22 = vmax.f32 %v2118_v12, %v1897_v20  ;;  %v2061_v9 = vld [vmem:[#allocation2 + $0x140] sm:$0xff]  ;;  %v2064_v12 = vld [vmem:[#allocation2 + $0x158] sm:$0xff] }
 0x38e   : > { %2308 = vst [vmem:[#allocation2 + $0xf8] sm:$0xff] %v2180_v17  ;;  %2376 = vst [vmem:[#allocation2 + $0x318] sm:$0xff] %v2248_v19  ;;  %v2132_v14 = vld [vmem:[#allocation2 + $0x378] sm:$0xff]  ;;  %v2062_v17 = vld [vmem:[#allocation2 + $0x148] sm:$0xff] }
 0x38f   : > { %2306 = vst [vmem:[#allocation2 + $0xe8] sm:$0xff] %v2178_v21  ;;  %2374 = vst [vmem:[#allocation2 + $0x308] sm:$0xff] %v2246_v22  ;;  %v2130_v20 = vld [vmem:[#allocation2 + $0x368] sm:$0xff] }
 0x391   : > { %v8103_v27 = vpop.f32.mrb[40].mxu0  ;;  %v8171_v29 = vpop.f32.mrb[48].mxu1 }
 0x392   : > { %v2183_v31 = vmax.f32 %v2055_v23, %v8103_v27  ;;  %v1638_v32 = vpop.f32.mrb[41].mxu0  ;;  %v2251_v34 = vmax.f32 %v2123_v24, %v8171_v29  ;;  %v1910_v35 = vpop.f32.mrb[49].mxu1 }
 0x393   : > { %v2181_v37 = vmax.f32 %v2053_v25, %v1638_v32  ;;  %v8104_v38 = vpop.f32.mrb[42].mxu0  ;;  %v2249_v39 = vmax.f32 %v2121_v26, %v1910_v35  ;;  %v8172_v40 = vpop.f32.mrb[50].mxu1  ;;  %v2135_v32 = vld [vmem:[#allocation2 + $0x390] sm:$0xff] }
 0x394   : > { %2311 = vst [vmem:[#allocation2 + $0x110] sm:$0xff] %v2183_v31  ;;  %v2184_v41 = vmax.f32 %v2056_v28, %v8104_v38  ;;  %v1641_v42 = vpop.f32.mrb[43].mxu0  ;;  %2379 = vst [vmem:[#allocation2 + $0x330] sm:$0xff] %v2251_v34  ;;  %v2252_v43 = vmax.f32 %v2124_v30, %v8172_v40  ;;  %v1913_v44 = vpop.f32.mrb[51].mxu1  ;;  %v2067_v31 = vld [vmem:[#allocation2 + $0x170] sm:$0xff]  ;;  %v2133_v34 = vld [vmem:[#allocation2 + $0x380] sm:$0xff] }
 0x395   : > { %2309 = vst [vmem:[#allocation2 + $0x100] sm:$0xff] %v2181_v37  ;;  %v2182_v45 = vmax.f32 %v2054_v33, %v1641_v42  ;;  %2377 = vst [vmem:[#allocation2 + $0x320] sm:$0xff] %v2249_v39  ;;  %v2250_v46 = vmax.f32 %v2122_v36, %v1913_v44  ;;  %v2065_v33 = vld [vmem:[#allocation2 + $0x160] sm:$0xff]  ;;  %v2068_v36 = vld [vmem:[#allocation2 + $0x178] sm:$0xff] }
 0x396   : > { %2312 = vst [vmem:[#allocation2 + $0x118] sm:$0xff] %v2184_v41  ;;  %2380 = vst [vmem:[#allocation2 + $0x338] sm:$0xff] %v2252_v43  ;;  %v2136_v38 = vld [vmem:[#allocation2 + $0x398] sm:$0xff]  ;;  %v2066_v41 = vld [vmem:[#allocation2 + $0x168] sm:$0xff] }
 0x397   : > { %2310 = vst [vmem:[#allocation2 + $0x108] sm:$0xff] %v2182_v45  ;;  %2378 = vst [vmem:[#allocation2 + $0x328] sm:$0xff] %v2250_v46  ;;  %v2134_v44 = vld [vmem:[#allocation2 + $0x388] sm:$0xff] }
 0x399   : > { %v8107_v51 = vpop.f32.mrb[44].mxu0  ;;  %v8175_v53 = vpop.f32.mrb[52].mxu1 }
 0x39a   : > { %v2187_v55 = vmax.f32 %v2059_v47, %v8107_v51  ;;  %v1654_v56 = vpop.f32.mrb[45].mxu0  ;;  %v2255_v58 = vmax.f32 %v2127_v48, %v8175_v53  ;;  %v1926_v59 = vpop.f32.mrb[53].mxu1 }
 0x39b   : > { %v2185_v61 = vmax.f32 %v2057_v49, %v1654_v56  ;;  %v8108_v62 = vpop.f32.mrb[46].mxu0  ;;  %v2253_v63 = vmax.f32 %v2125_v50, %v1926_v59  ;;  %v8176_v0 = vpop.f32.mrb[54].mxu1  ;;  %v2139_v56 = vld [vmem:[#allocation2 + $0x3b0] sm:$0xff] }
 0x39c   : > { %2315 = vst [vmem:[#allocation2 + $0x130] sm:$0xff] %v2187_v55  ;;  %v2188_v1 = vmax.f32 %v2060_v52, %v8108_v62  ;;  %v1657_v2 = vpop.f32.mrb[47].mxu0  ;;  %2383 = vst [vmem:[#allocation2 + $0x350] sm:$0xff] %v2255_v58  ;;  %v2256_v3 = vmax.f32 %v2128_v54, %v8176_v0  ;;  %v1929_v4 = vpop.f32.mrb[55].mxu1  ;;  %v2071_v55 = vld [vmem:[#allocation2 + $0x190] sm:$0xff]  ;;  %v2137_v58 = vld [vmem:[#allocation2 + $0x3a0] sm:$0xff] }
 0x39d   : > { %2313 = vst [vmem:[#allocation2 + $0x120] sm:$0xff] %v2185_v61  ;;  %v2186_v5 = vmax.f32 %v2058_v57, %v1657_v2  ;;  %2381 = vst [vmem:[#allocation2 + $0x340] sm:$0xff] %v2253_v63  ;;  %v2254_v6 = vmax.f32 %v2126_v60, %v1929_v4  ;;  %v2069_v57 = vld [vmem:[#allocation2 + $0x180] sm:$0xff]  ;;  %v2072_v60 = vld [vmem:[#allocation2 + $0x198] sm:$0xff] }
 0x39e   : > { %2316 = vst [vmem:[#allocation2 + $0x138] sm:$0xff] %v2188_v1  ;;  %2384 = vst [vmem:[#allocation2 + $0x358] sm:$0xff] %v2256_v3  ;;  %v2140_v62 = vld [vmem:[#allocation2 + $0x3b8] sm:$0xff]  ;;  %v2070_v1 = vld [vmem:[#allocation2 + $0x188] sm:$0xff] }
 0x39f   : > { %2314 = vst [vmem:[#allocation2 + $0x128] sm:$0xff] %v2186_v5  ;;  %2382 = vst [vmem:[#allocation2 + $0x348] sm:$0xff] %v2254_v6  ;;  %v2138_v4 = vld [vmem:[#allocation2 + $0x3a8] sm:$0xff] }
 0x3a1   : > { %v8111_v11 = vpop.f32.mrb[48].mxu0  ;;  %v8179_v13 = vpop.f32.mrb[56].mxu1 }
 0x3a2   : > { %v2191_v15 = vmax.f32 %v2063_v7, %v8111_v11  ;;  %v1670_v16 = vpop.f32.mrb[49].mxu0  ;;  %v2259_v18 = vmax.f32 %v2131_v8, %v8179_v13  ;;  %v1942_v19 = vpop.f32.mrb[57].mxu1 }
 0x3a3   : > { %v2189_v21 = vmax.f32 %v2061_v9, %v1670_v16  ;;  %v8112_v22 = vpop.f32.mrb[50].mxu0  ;;  %v2257_v23 = vmax.f32 %v2129_v10, %v1942_v19  ;;  %v8180_v24 = vpop.f32.mrb[58].mxu1  ;;  %v2143_v16 = vld [vmem:[#allocation2 + $0x3d0] sm:$0xff] }
 0x3a4   : > { %2319 = vst [vmem:[#allocation2 + $0x150] sm:$0xff] %v2191_v15  ;;  %v2192_v25 = vmax.f32 %v2064_v12, %v8112_v22  ;;  %v1673_v26 = vpop.f32.mrb[51].mxu0  ;;  %2387 = vst [vmem:[#allocation2 + $0x370] sm:$0xff] %v2259_v18  ;;  %v2260_v27 = vmax.f32 %v2132_v14, %v8180_v24  ;;  %v1945_v28 = vpop.f32.mrb[59].mxu1  ;;  %v2075_v15 = vld [vmem:[#allocation2 + $0x1b0] sm:$0xff]  ;;  %v2141_v18 = vld [vmem:[#allocation2 + $0x3c0] sm:$0xff] }
 0x3a5   : > { %2317 = vst [vmem:[#allocation2 + $0x140] sm:$0xff] %v2189_v21  ;;  %v2190_v29 = vmax.f32 %v2062_v17, %v1673_v26  ;;  %2385 = vst [vmem:[#allocation2 + $0x360] sm:$0xff] %v2257_v23  ;;  %v2258_v30 = vmax.f32 %v2130_v20, %v1945_v28  ;;  %v2073_v17 = vld [vmem:[#allocation2 + $0x1a0] sm:$0xff]  ;;  %v2076_v20 = vld [vmem:[#allocation2 + $0x1b8] sm:$0xff] }
 0x3a6   : > { %2320 = vst [vmem:[#allocation2 + $0x158] sm:$0xff] %v2192_v25  ;;  %2388 = vst [vmem:[#allocation2 + $0x378] sm:$0xff] %v2260_v27  ;;  %v2144_v22 = vld [vmem:[#allocation2 + $0x3d8] sm:$0xff]  ;;  %v2074_v25 = vld [vmem:[#allocation2 + $0x1a8] sm:$0xff] }
 0x3a7   : > { %2318 = vst [vmem:[#allocation2 + $0x148] sm:$0xff] %v2190_v29  ;;  %2386 = vst [vmem:[#allocation2 + $0x368] sm:$0xff] %v2258_v30  ;;  %v2142_v28 = vld [vmem:[#allocation2 + $0x3c8] sm:$0xff] }
 0x3a9   : > { %v8115_v35 = vpop.f32.mrb[52].mxu0  ;;  %v8183_v37 = vpop.f32.mrb[60].mxu1 }
 0x3aa   : > { %v2195_v39 = vmax.f32 %v2067_v31, %v8115_v35  ;;  %v1686_v40 = vpop.f32.mrb[53].mxu0  ;;  %v2263_v42 = vmax.f32 %v2135_v32, %v8183_v37  ;;  %v1958_v43 = vpop.f32.mrb[61].mxu1 }
 0x3ab   : > { %v2193_v45 = vmax.f32 %v2065_v33, %v1686_v40  ;;  %v8116_v46 = vpop.f32.mrb[54].mxu0  ;;  %v2261_v47 = vmax.f32 %v2133_v34, %v1958_v43  ;;  %v8184_v48 = vpop.f32.mrb[62].mxu1  ;;  %v2147_v40 = vld [vmem:[#allocation2 + $0x3f0] sm:$0xff] }
 0x3ac   : > { %2323 = vst [vmem:[#allocation2 + $0x170] sm:$0xff] %v2195_v39  ;;  %v2196_v49 = vmax.f32 %v2068_v36, %v8116_v46  ;;  %v1689_v50 = vpop.f32.mrb[55].mxu0  ;;  %2391 = vst [vmem:[#allocation2 + $0x390] sm:$0xff] %v2263_v42  ;;  %v2264_v51 = vmax.f32 %v2136_v38, %v8184_v48  ;;  %v1961_v52 = vpop.f32.mrb[63].mxu1  ;;  %v2079_v39 = vld [vmem:[#allocation2 + $0x1d0] sm:$0xff]  ;;  %v2145_v42 = vld [vmem:[#allocation2 + $0x3e0] sm:$0xff] }
 0x3ad   : > { %2321 = vst [vmem:[#allocation2 + $0x160] sm:$0xff] %v2193_v45  ;;  %v2194_v53 = vmax.f32 %v2066_v41, %v1689_v50  ;;  %2389 = vst [vmem:[#allocation2 + $0x380] sm:$0xff] %v2261_v47  ;;  %v2262_v54 = vmax.f32 %v2134_v44, %v1961_v52  ;;  %v2077_v41 = vld [vmem:[#allocation2 + $0x1c0] sm:$0xff]  ;;  %v2080_v44 = vld [vmem:[#allocation2 + $0x1d8] sm:$0xff] }
 0x3ae   : > { %2324 = vst [vmem:[#allocation2 + $0x178] sm:$0xff] %v2196_v49  ;;  %2392 = vst [vmem:[#allocation2 + $0x398] sm:$0xff] %v2264_v51  ;;  %v2148_v46 = vld [vmem:[#allocation2 + $0x3f8] sm:$0xff]  ;;  %v2078_v49 = vld [vmem:[#allocation2 + $0x1c8] sm:$0xff] }
 0x3af   : > { %2322 = vst [vmem:[#allocation2 + $0x168] sm:$0xff] %v2194_v53  ;;  %2390 = vst [vmem:[#allocation2 + $0x388] sm:$0xff] %v2262_v54  ;;  %v2146_v52 = vld [vmem:[#allocation2 + $0x3e8] sm:$0xff] }
 0x3b1   : > { %v8119_v59 = vpop.f32.mrb[56].mxu0  ;;  %v8187_v61 = vpop.f32.mrb[64].mxu1 }
 0x3b2   : > { %v2199_v63 = vmax.f32 %v2071_v55, %v8119_v59  ;;  %v1702_v0 = vpop.f32.mrb[57].mxu0  ;;  %v2267_v2 = vmax.f32 %v2139_v56, %v8187_v61  ;;  %v1974_v3 = vpop.f32.mrb[65].mxu1 }
 0x3b3   : > { %v2197_v5 = vmax.f32 %v2069_v57, %v1702_v0  ;;  %v8120_v6 = vpop.f32.mrb[58].mxu0  ;;  %v2265_v7 = vmax.f32 %v2137_v58, %v1974_v3  ;;  %v8188_v8 = vpop.f32.mrb[66].mxu1  ;;  %v2081_v0 = vld [vmem:[#allocation2 + $0x1e0] sm:$0xff] }
 0x3b4   : > { %2327 = vst [vmem:[#allocation2 + $0x190] sm:$0xff] %v2199_v63  ;;  %v2200_v9 = vmax.f32 %v2072_v60, %v8120_v6  ;;  %v1705_v10 = vpop.f32.mrb[59].mxu0  ;;  %2395 = vst [vmem:[#allocation2 + $0x3b0] sm:$0xff] %v2267_v2  ;;  %v2268_v11 = vmax.f32 %v2140_v62, %v8188_v8  ;;  %v1977_v12 = vpop.f32.mrb[67].mxu1  ;;  %v2083_v63 = vld [vmem:[#allocation2 + $0x1f0] sm:$0xff]  ;;  %v2084_v2 = vld [vmem:[#allocation2 + $0x1f8] sm:$0xff] }
 0x3b5   : > { %2325 = vst [vmem:[#allocation2 + $0x180] sm:$0xff] %v2197_v5  ;;  %v2198_v13 = vmax.f32 %v2070_v1, %v1705_v10  ;;  %2393 = vst [vmem:[#allocation2 + $0x3a0] sm:$0xff] %v2265_v7  ;;  %v2266_v14 = vmax.f32 %v2138_v4, %v1977_v12  ;;  %v2082_v5 = vld [vmem:[#allocation2 + $0x1e8] sm:$0xff]  ;;  %v2085_v12 = vld [vmem:[#allocation2 + $0x200] sm:$0xff] }
 0x3b6   : > { %2328 = vst [vmem:[#allocation2 + $0x198] sm:$0xff] %v2200_v9  ;;  %2396 = vst [vmem:[#allocation2 + $0x3b8] sm:$0xff] %v2268_v11  ;;  %v2087_v11 = vld [vmem:[#allocation2 + $0x210] sm:$0xff] }
 0x3b7   : > { %2326 = vst [vmem:[#allocation2 + $0x188] sm:$0xff] %v2198_v13  ;;  %2394 = vst [vmem:[#allocation2 + $0x3a8] sm:$0xff] %v2266_v14  ;;  %v2088_v14 = vld [vmem:[#allocation2 + $0x218] sm:$0xff] }
 0x3b9   : > { %v8123_v19 = vpop.f32.mrb[60].mxu0  ;;  %v8191_v21 = vpop.f32.mrb[68].mxu1 }
 0x3ba   : > { %v2203_v23 = vmax.f32 %v2075_v15, %v8123_v19  ;;  %v1718_v24 = vpop.f32.mrb[61].mxu0  ;;  %v2271_v26 = vmax.f32 %v2143_v16, %v8191_v21  ;;  %v1990_v27 = vpop.f32.mrb[69].mxu1 }
 0x3bb   : > { %v2201_v29 = vmax.f32 %v2073_v17, %v1718_v24  ;;  %v8124_v30 = vpop.f32.mrb[62].mxu0  ;;  %v2269_v31 = vmax.f32 %v2141_v18, %v1990_v27  ;;  %v8192_v32 = vpop.f32.mrb[70].mxu1  ;;  %v2086_v17 = vld [vmem:[#allocation2 + $0x208] sm:$0xff] }
 0x3bc   : > { %2331 = vst [vmem:[#allocation2 + $0x1b0] sm:$0xff] %v2203_v23  ;;  %v2204_v33 = vmax.f32 %v2076_v20, %v8124_v30  ;;  %v1721_v34 = vpop.f32.mrb[63].mxu0  ;;  %2399 = vst [vmem:[#allocation2 + $0x3d0] sm:$0xff] %v2271_v26  ;;  %v2272_v35 = vmax.f32 %v2144_v22, %v8192_v32  ;;  %v1993_v36 = vpop.f32.mrb[71].mxu1 }
 0x3bd   : > { %2329 = vst [vmem:[#allocation2 + $0x1a0] sm:$0xff] %v2201_v29  ;;  %v2202_v37 = vmax.f32 %v2074_v25, %v1721_v34  ;;  %2397 = vst [vmem:[#allocation2 + $0x3c0] sm:$0xff] %v2269_v31  ;;  %v2270_v38 = vmax.f32 %v2142_v28, %v1993_v36 }
 0x3be   : > { %2332 = vst [vmem:[#allocation2 + $0x1b8] sm:$0xff] %v2204_v33  ;;  %2400 = vst [vmem:[#allocation2 + $0x3d8] sm:$0xff] %v2272_v35 }
 0x3bf   : > { %2330 = vst [vmem:[#allocation2 + $0x1a8] sm:$0xff] %v2202_v37  ;;  %2398 = vst [vmem:[#allocation2 + $0x3c8] sm:$0xff] %v2270_v38 }
 0x3c1   : > { %v8127_v43 = vpop.f32.mrb[64].mxu0  ;;  %v8195_v45 = vpop.f32.mrb[72].mxu1 }
 0x3c2   : > { %v2207_v47 = vmax.f32 %v2079_v39, %v8127_v43  ;;  %v1734_v48 = vpop.f32.mrb[65].mxu0  ;;  %v2275_v50 = vmax.f32 %v2147_v40, %v8195_v45  ;;  %v2006_v51 = vpop.f32.mrb[73].mxu1 }
 0x3c3   : > { %v2205_v53 = vmax.f32 %v2077_v41, %v1734_v48  ;;  %v8128_v54 = vpop.f32.mrb[66].mxu0  ;;  %v2273_v55 = vmax.f32 %v2145_v42, %v2006_v51  ;;  %v8196_v56 = vpop.f32.mrb[74].mxu1 }
 0x3c4   : > { %2335 = vst [vmem:[#allocation2 + $0x1d0] sm:$0xff] %v2207_v47  ;;  %v2208_v57 = vmax.f32 %v2080_v44, %v8128_v54  ;;  %v1737_v58 = vpop.f32.mrb[67].mxu0  ;;  %2403 = vst [vmem:[#allocation2 + $0x3f0] sm:$0xff] %v2275_v50  ;;  %v2276_v59 = vmax.f32 %v2148_v46, %v8196_v56  ;;  %v2009_v60 = vpop.f32.mrb[75].mxu1 }
 0x3c5   : > { %2333 = vst [vmem:[#allocation2 + $0x1c0] sm:$0xff] %v2205_v53  ;;  %v2206_v61 = vmax.f32 %v2078_v49, %v1737_v58  ;;  %2401 = vst [vmem:[#allocation2 + $0x3e0] sm:$0xff] %v2273_v55  ;;  %v2274_v62 = vmax.f32 %v2146_v52, %v2009_v60 }
 0x3c6   : > { %2336 = vst [vmem:[#allocation2 + $0x1d8] sm:$0xff] %v2208_v57  ;;  %2404 = vst [vmem:[#allocation2 + $0x3f8] sm:$0xff] %v2276_v59 }
 0x3c7   : > { %2334 = vst [vmem:[#allocation2 + $0x1c8] sm:$0xff] %v2206_v61  ;;  %2402 = vst [vmem:[#allocation2 + $0x3e8] sm:$0xff] %v2274_v62 }
 0x3c9   : > { %v8131_v1 = vpop.f32.mrb[68].mxu0 }
 0x3ca   : > { %v2211_v3 = vmax.f32 %v2083_v63, %v8131_v1  ;;  %v1750_v4 = vpop.f32.mrb[69].mxu0 }
 0x3cb   : > { %v2209_v6 = vmax.f32 %v2081_v0, %v1750_v4  ;;  %v8132_v7 = vpop.f32.mrb[70].mxu0 }
 0x3cc   : > { %2339 = vst [vmem:[#allocation2 + $0x1f0] sm:$0xff] %v2211_v3  ;;  %v2212_v8 = vmax.f32 %v2084_v2, %v8132_v7  ;;  %v1753_v9 = vpop.f32.mrb[71].mxu0 }
 0x3cd   : > { %2337 = vst [vmem:[#allocation2 + $0x1e0] sm:$0xff] %v2209_v6  ;;  %v2210_v10 = vmax.f32 %v2082_v5, %v1753_v9 }
 0x3ce   : > { %2340 = vst [vmem:[#allocation2 + $0x1f8] sm:$0xff] %v2212_v8 }
 0x3cf   : > { %2338 = vst [vmem:[#allocation2 + $0x1e8] sm:$0xff] %v2210_v10 }
 0x3d1   : > { %v8135_v13 = vpop.f32.mrb[72].mxu0  ;;  %2408 = sbr.rel (%p7302_p10) target bundleno = 2712 (0xa98), region = 68 }
 0x3d2   : > { %v2215_v15 = vmax.f32 %v2087_v11, %v8135_v13  ;;  %v1766_v16 = vpop.f32.mrb[73].mxu0 }
 0x3d3   : > { %v2213_v18 = vmax.f32 %v2085_v12, %v1766_v16  ;;  %v8136_v19 = vpop.f32.mrb[74].mxu0 }
 0x3d4   : > { %2343 = vst [vmem:[#allocation2 + $0x210] sm:$0xff] %v2215_v15  ;;  %v2216_v20 = vmax.f32 %v2088_v14, %v8136_v19  ;;  %v1769_v21 = vpop.f32.mrb[75].mxu0 }
 0x3d5   : > { %2341 = vst [vmem:[#allocation2 + $0x200] sm:$0xff] %v2213_v18  ;;  %v2214_v22 = vmax.f32 %v2086_v17, %v1769_v21 }
 0x3d6   : > { %2344 = vst [vmem:[#allocation2 + $0x218] sm:$0xff] %v2216_v20 }
 0x3d7   : > { %2342 = vst [vmem:[#allocation2 + $0x208] sm:$0xff] %v2214_v22 }
 0x3d8   : > { %v2683_v23 = vld [vmem:[#allocation2 + $0x110] sm:$0xff]  ;;  %v2681_v24 = vld [vmem:[#allocation2 + $0x100] sm:$0xff]  ;;  %v2684_v25 = vld [vmem:[#allocation2 + $0x118] sm:$0xff]  ;;  %v9009_v37 = vmov 0   ;;  %vm7088_vm4 = vcmask 7168  }
 0x3d9   : > { %2845 = vmax.xlane.f32.xlu1 %v2683_v23  ;;  %2841 = vmax.xlane.f32.xlu0 %v2681_v24  ;;  %v2682_v26 = vld [vmem:[#allocation2 + $0x108] sm:$0xff]  ;;  %v2685_v28 = vld [vmem:[#allocation2 + $0x120] sm:$0xff]  ;;  %v2688_v29 = vld [vmem:[#allocation2 + $0x138] sm:$0xff] }
 0x3da   : > { %v2686_v27 = vld [vmem:[#allocation2 + $0x128] sm:$0xff]  ;;  %v2687_v30 = vld [vmem:[#allocation2 + $0x130] sm:$0xff]  ;;  %v2689_v32 = vld [vmem:[#allocation2 + $0x140] sm:$0xff]  ;;  %5178 = vmatprep.subr.bf16.mxu0 %v9009_v37  ;;  %4889 = vmatprep.subr.bf16.mxu1 %v9009_v37 }
 0x3db   : > { %v2690_v31 = vld [vmem:[#allocation2 + $0x148] sm:$0xff]  ;;  %v2692_v33 = vld [vmem:[#allocation2 + $0x158] sm:$0xff]  ;;  %v2691_v34 = vld [vmem:[#allocation2 + $0x150] sm:$0xff] }
 0x3dc   : > { %v2694_v35 = vld [vmem:[#allocation2 + $0x168] sm:$0xff]  ;;  %v2693_v36 = vld [vmem:[#allocation2 + $0x160] sm:$0xff]  ;;  %v2696_v38 = vld [vmem:[#allocation2 + $0x178] sm:$0xff] }
 0x3dd   : > { %2847 = vmax.xlane.f32.xlu1 %v2684_v25  ;;  %2843 = vmax.xlane.f32.xlu0 %v2682_v26  ;;  %v2695_v39 = vld [vmem:[#allocation2 + $0x170] sm:$0xff]  ;;  %v2698_v40 = vld [vmem:[#allocation2 + $0x188] sm:$0xff]  ;;  %v2697_v41 = vld [vmem:[#allocation2 + $0x180] sm:$0xff] }
 0x3de   : > { %v2700_v42 = vld [vmem:[#allocation2 + $0x198] sm:$0xff]  ;;  %v2699_v43 = vld [vmem:[#allocation2 + $0x190] sm:$0xff]  ;;  %v2702_v44 = vld [vmem:[#allocation2 + $0x1a8] sm:$0xff] }
 0x3df   : > { %v2701_v45 = vld [vmem:[#allocation2 + $0x1a0] sm:$0xff]  ;;  %v2704_v46 = vld [vmem:[#allocation2 + $0x1b8] sm:$0xff]  ;;  %v2703_v47 = vld [vmem:[#allocation2 + $0x1b0] sm:$0xff] }
 0x3e0   : > { %v2706_v48 = vld [vmem:[#allocation2 + $0x1c8] sm:$0xff]  ;;  %v2705_v49 = vld [vmem:[#allocation2 + $0x1c0] sm:$0xff]  ;;  %v2708_v50 = vld [vmem:[#allocation2 + $0x1d8] sm:$0xff] }
 0x3e1   : > { %2851 = vmax.xlane.f32.xlu1 %v2686_v27  ;;  %2849 = vmax.xlane.f32.xlu0 %v2685_v28  ;;  %v2707_v51 = vld [vmem:[#allocation2 + $0x1d0] sm:$0xff]  ;;  %v2710_v52 = vld [vmem:[#allocation2 + $0x1e8] sm:$0xff]  ;;  %v2709_v53 = vld [vmem:[#allocation2 + $0x1e0] sm:$0xff] }
 0x3e2   : > { %v2712_v54 = vld [vmem:[#allocation2 + $0x1f8] sm:$0xff]  ;;  %v2711_v55 = vld [vmem:[#allocation2 + $0x1f0] sm:$0xff]  ;;  %v2714_v56 = vld [vmem:[#allocation2 + $0x208] sm:$0xff] }
 0x3e3   : > { %v2713_v57 = vld [vmem:[#allocation2 + $0x200] sm:$0xff]  ;;  %v2716_v58 = vld [vmem:[#allocation2 + $0x218] sm:$0xff]  ;;  %v2715_v59 = vld [vmem:[#allocation2 + $0x210] sm:$0xff] }
 0x3e4   : > { %v2718_v60 = vld [vmem:[#allocation2 + $0x228] sm:$0xff]  ;;  %v2717_v61 = vld [vmem:[#allocation2 + $0x220] sm:$0xff]  ;;  %v2720_v62 = vld [vmem:[#allocation2 + $0x238] sm:$0xff] }
 0x3e5   : > { %2855 = vmax.xlane.f32.xlu1 %v2688_v29  ;;  %2853 = vmax.xlane.f32.xlu0 %v2687_v30  ;;  %v2719_v63 = vld [vmem:[#allocation2 + $0x230] sm:$0xff]  ;;  %v2722_v0 = vld [vmem:[#allocation2 + $0x248] sm:$0xff]  ;;  %v2721_v1 = vld [vmem:[#allocation2 + $0x240] sm:$0xff] }
 0x3e6   : > { %v2724_v2 = vld [vmem:[#allocation2 + $0x258] sm:$0xff]  ;;  %v2723_v3 = vld [vmem:[#allocation2 + $0x250] sm:$0xff]  ;;  %v9428_v4 = vld [vmem:[%s11536_s4 + $0x8] sm:$0xff] }
 0x3e7   : > { %v9433_v5 = vld [vmem:[%s11536_s4 + $0x28] sm:$0xff]  ;;  %v2726_v6 = vld [vmem:[#allocation2 + $0x268] sm:$0xff]  ;;  %v2728_v10 = vld [vmem:[#allocation2 + $0x278] sm:$0xff] }
 0x3e8   : > { %v2725_v7 = vld [vmem:[#allocation2 + $0x260] sm:$0xff]  ;;  %v7306_v8 = vcombine.high %v9428_v4, %v9433_v5  ;;  %v7305_v9 = vcombine.low %v9428_v4, %v9433_v5  ;;  %v2727_v11 = vld [vmem:[#allocation2 + $0x270] sm:$0xff]  ;;  %v2730_v12 = vld [vmem:[#allocation2 + $0x288] sm:$0xff] }
 0x3e9   : > { %2859 = vmax.xlane.f32.xlu1 %v2690_v31  ;;  %2857 = vmax.xlane.f32.xlu0 %v2689_v32  ;;  %v2729_v13 = vld [vmem:[#allocation2 + $0x280] sm:$0xff]  ;;  %v2732_v14 = vld [vmem:[#allocation2 + $0x298] sm:$0xff]  ;;  %v2731_v15 = vld [vmem:[#allocation2 + $0x290] sm:$0xff] }
 0x3ea   : > { %5210 = vmatprep.mubr.bf16.mxu0 %v7306_v8  ;;  %v2734_v16 = vld [vmem:[#allocation2 + $0x2a8] sm:$0xff]  ;;  %v2733_v17 = vld [vmem:[#allocation2 + $0x2a0] sm:$0xff]  ;;  %v2736_v18 = vld [vmem:[#allocation2 + $0x2b8] sm:$0xff] }
 0x3eb   : > { %v2735_v19 = vld [vmem:[#allocation2 + $0x2b0] sm:$0xff]  ;;  %v2738_v20 = vld [vmem:[#allocation2 + $0x2c8] sm:$0xff]  ;;  %v2737_v21 = vld [vmem:[#allocation2 + $0x2c0] sm:$0xff] }
 0x3ec   : > { %v2740_v22 = vld [vmem:[#allocation2 + $0x2d8] sm:$0xff]  ;;  %v2739_v23 = vld [vmem:[#allocation2 + $0x2d0] sm:$0xff]  ;;  %v2742_v24 = vld [vmem:[#allocation2 + $0x2e8] sm:$0xff] }
 0x3ed   : > { %2863 = vmax.xlane.f32.xlu1 %v2692_v33  ;;  %2861 = vmax.xlane.f32.xlu0 %v2691_v34  ;;  %v2741_v25 = vld [vmem:[#allocation2 + $0x2e0] sm:$0xff]  ;;  %v2744_v26 = vld [vmem:[#allocation2 + $0x2f8] sm:$0xff]  ;;  %v2743_v27 = vld [vmem:[#allocation2 + $0x2f0] sm:$0xff] }
 0x3ee   : > { %v2650_v28 = vld [vmem:[#allocation2 + $0x8] sm:$0xff]  ;;  %v2649_v29 = vld [vmem:[#allocation2] sm:$0xff]  ;;  %v2652_v30 = vld [vmem:[#allocation2 + $0x18] sm:$0xff] }
 0x3ef   : > { %v2651_v31 = vld [vmem:[#allocation2 + $0x10] sm:$0xff]  ;;  %v2654_v32 = vld [vmem:[#allocation2 + $0x28] sm:$0xff]  ;;  %v2653_v33 = vld [vmem:[#allocation2 + $0x20] sm:$0xff] }
 0x3f0   : > { %v2656_v34 = vld [vmem:[#allocation2 + $0x38] sm:$0xff]  ;;  %v3310_v4 = vld [vmem:[%s11536_s4 + $0xa8] sm:$0xff] }
 0x3f1   : > { %2867 = vmax.xlane.f32.xlu1 %v2694_v35  ;;  %2865 = vmax.xlane.f32.xlu0 %v2693_v36  ;;  %v2655_v35 = vld [vmem:[#allocation2 + $0x30] sm:$0xff]  ;;  %v2482_v5 = vld [vmem:[%s11539_s7 + $0x308] sm:$0xff] }
 0x3f5   : > { %2871 = vmax.xlane.f32.xlu1 %v2696_v38  ;;  %2869 = vmax.xlane.f32.xlu0 %v2695_v39  ;;  %v2441_v39 = vld [vmem:[%s11539_s7 + $0x1c0] sm:$0xff] }
 0x3f9   : > { %2875 = vmax.xlane.f32.xlu1 %v2698_v40  ;;  %2873 = vmax.xlane.f32.xlu0 %v2697_v41  ;;  %v2658_v40 = vld [vmem:[#allocation2 + $0x48] sm:$0xff]  ;;  %v2657_v41 = vld [vmem:[#allocation2 + $0x40] sm:$0xff] }
 0x3fd   : > { %2879 = vmax.xlane.f32.xlu1 %v2700_v42  ;;  %2877 = vmax.xlane.f32.xlu0 %v2699_v43  ;;  %v2442_v42 = vld [vmem:[%s11539_s7 + $0x1c8] sm:$0xff]  ;;  %v2443_v43 = vld [vmem:[%s11539_s7 + $0x1d0] sm:$0xff] }
 0x401   : > { %2883 = vmax.xlane.f32.xlu1 %v2702_v44  ;;  %2881 = vmax.xlane.f32.xlu0 %v2701_v45  ;;  %v2444_v45 = vld [vmem:[%s11539_s7 + $0x1d8] sm:$0xff] }
 0x405   : > { %2887 = vmax.xlane.f32.xlu1 %v2704_v46  ;;  %2885 = vmax.xlane.f32.xlu0 %v2703_v47 }
 0x409   : > { %2891 = vmax.xlane.f32.xlu1 %v2706_v48  ;;  %2889 = vmax.xlane.f32.xlu0 %v2705_v49  ;;  %v2660_v48 = vld [vmem:[#allocation2 + $0x58] sm:$0xff]  ;;  %v2659_v49 = vld [vmem:[#allocation2 + $0x50] sm:$0xff] }
 0x40d   : > { %2895 = vmax.xlane.f32.xlu1 %v2708_v50  ;;  %2893 = vmax.xlane.f32.xlu0 %v2707_v51 }
 0x411   : > { %2899 = vmax.xlane.f32.xlu1 %v2710_v52  ;;  %2897 = vmax.xlane.f32.xlu0 %v2709_v53  ;;  %v2446_v53 = vld [vmem:[%s11539_s7 + $0x1e8] sm:$0xff] }
 0x415   : > { %2903 = vmax.xlane.f32.xlu1 %v2712_v54  ;;  %2901 = vmax.xlane.f32.xlu0 %v2711_v55  ;;  %v2445_v54 = vld [vmem:[%s11539_s7 + $0x1e0] sm:$0xff] }
 0x419   : > { %2907 = vmax.xlane.f32.xlu1 %v2714_v56  ;;  %2905 = vmax.xlane.f32.xlu0 %v2713_v57 }
 0x41d   : > { %2911 = vmax.xlane.f32.xlu1 %v2716_v58  ;;  %2909 = vmax.xlane.f32.xlu0 %v2715_v59  ;;  %v2662_v59 = vld [vmem:[#allocation2 + $0x68] sm:$0xff] }
 0x421   : > { %2915 = vmax.xlane.f32.xlu1 %v2718_v60  ;;  %2913 = vmax.xlane.f32.xlu0 %v2717_v61  ;;  %v2661_v60 = vld [vmem:[#allocation2 + $0x60] sm:$0xff] }
 0x425   : > { %2919 = vmax.xlane.f32.xlu1 %v2720_v62  ;;  %2917 = vmax.xlane.f32.xlu0 %v2719_v63 }
 0x429   : > { %2923 = vmax.xlane.f32.xlu1 %v2722_v0  ;;  %2921 = vmax.xlane.f32.xlu0 %v2721_v1 }
 0x42d   : > { %2927 = vmax.xlane.f32.xlu1 %v2724_v2  ;;  %2925 = vmax.xlane.f32.xlu0 %v2723_v3  ;;  %v2448_v2 = vld [vmem:[%s11539_s7 + $0x1f8] sm:$0xff]  ;;  %v2447_v3 = vld [vmem:[%s11539_s7 + $0x1f0] sm:$0xff] }
 0x431   : > { %2931 = vmax.xlane.f32.xlu1 %v2726_v6  ;;  %2929 = vmax.xlane.f32.xlu0 %v2725_v7 }
 0x435   : > { %2935 = vmax.xlane.f32.xlu1 %v2728_v10  ;;  %2933 = vmax.xlane.f32.xlu0 %v2727_v11  ;;  %v2664_v11 = vld [vmem:[#allocation2 + $0x78] sm:$0xff] }
 0x439   : > { %2939 = vmax.xlane.f32.xlu1 %v2730_v12  ;;  %2937 = vmax.xlane.f32.xlu0 %v2729_v13  ;;  %v2663_v12 = vld [vmem:[#allocation2 + $0x70] sm:$0xff] }
 0x43d   : > { %2943 = vmax.xlane.f32.xlu1 %v2732_v14  ;;  %2941 = vmax.xlane.f32.xlu0 %v2731_v15 }
 0x441   : > { %2947 = vmax.xlane.f32.xlu1 %v2734_v16  ;;  %2945 = vmax.xlane.f32.xlu0 %v2733_v17  ;;  %v2450_v16 = vld [vmem:[%s11539_s7 + $0x208] sm:$0xff]  ;;  %v2449_v17 = vld [vmem:[%s11539_s7 + $0x200] sm:$0xff] }
 0x445   : > { %2951 = vmax.xlane.f32.xlu1 %v2736_v18  ;;  %2949 = vmax.xlane.f32.xlu0 %v2735_v19 }
 0x449   : > { %2955 = vmax.xlane.f32.xlu1 %v2738_v20  ;;  %2953 = vmax.xlane.f32.xlu0 %v2737_v21 }
 0x44d   : > { %2959 = vmax.xlane.f32.xlu1 %v2740_v22  ;;  %2957 = vmax.xlane.f32.xlu0 %v2739_v23  ;;  %v2666_v22 = vld [vmem:[#allocation2 + $0x88] sm:$0xff]  ;;  %v2665_v23 = vld [vmem:[#allocation2 + $0x80] sm:$0xff] }
 0x451   : > { %2963 = vmax.xlane.f32.xlu1 %v2742_v24  ;;  %2961 = vmax.xlane.f32.xlu0 %v2741_v25 }
 0x455   : > { %2967 = vmax.xlane.f32.xlu1 %v2744_v26  ;;  %2965 = vmax.xlane.f32.xlu0 %v2743_v27  ;;  %v2452_v27 = vld [vmem:[%s11539_s7 + $0x218] sm:$0xff] }
 0x459   : > { %2779 = vmax.xlane.f32.xlu1 %v2650_v28  ;;  %2777 = vmax.xlane.f32.xlu0 %v2649_v29  ;;  %v2451_v28 = vld [vmem:[%s11539_s7 + $0x210] sm:$0xff] }
 0x45d   : > { %2783 = vmax.xlane.f32.xlu1 %v2652_v30  ;;  %2781 = vmax.xlane.f32.xlu0 %v2651_v31 }
 0x461   : > { %2787 = vmax.xlane.f32.xlu1 %v2654_v32  ;;  %2785 = vmax.xlane.f32.xlu0 %v2653_v33  ;;  %v2668_v33 = vld [vmem:[#allocation2 + $0x98] sm:$0xff] }
 0x465   : > { %2791 = vmax.xlane.f32.xlu1 %v2656_v34  ;;  %2789 = vmax.xlane.f32.xlu0 %v2655_v35  ;;  %v2667_v34 = vld [vmem:[#allocation2 + $0x90] sm:$0xff] }
 0x466   : > { %v2846_v36 = vpop.xlane.xlu1 %2845  ;;  %v2842_v38 = vpop.xlane.xlu0 %2841 }
 0x467   : > { %v3065_v44 = vadd.f32 %v2842_v38, %v2441_v39  ;;  %v3067_v51 = vadd.f32 %v2846_v36, %v2443_v43  ;;  %v2454_v39 = vld [vmem:[%s11539_s7 + $0x228] sm:$0xff] }
 0x469   : > { %2795 = vmax.xlane.f32.xlu1 %v2658_v40  ;;  %2793 = vmax.xlane.f32.xlu0 %v2657_v41  ;;  %v3193_v55 = vmax.f32 %v3065_v44, 0.0  ;;  %v3195_v0 = vmax.f32 %v3067_v51, 0.0  ;;  %v2453_v40 = vld [vmem:[%s11539_s7 + $0x220] sm:$0xff]  ;;  %v2455_v51 = vld [vmem:[%s11539_s7 + $0x230] sm:$0xff] }
 0x46a   : > { %v2848_v46 = vpop.xlane.xlu1 %2847  ;;  %v2844_v47 = vpop.xlane.xlu0 %2843 }
 0x46b   : > { %v3066_v50 = vadd.f32 %v2844_v47, %v2442_v42  ;;  %v3068_v52 = vadd.f32 %v2848_v46, %v2444_v45  ;;  %v2670_v45 = vld [vmem:[#allocation2 + $0xa8] sm:$0xff]  ;;  %v2669_v46 = vld [vmem:[#allocation2 + $0xa0] sm:$0xff] }
 0x46d   : > { %v3194_v56 = vmax.f32 %v3066_v50, 0.0  ;;  %2799 = vmax.xlane.f32.xlu1 %v2660_v48  ;;  %2797 = vmax.xlane.f32.xlu0 %v2659_v49  ;;  %v3196_v1 = vmax.f32 %v3068_v52, 0.0  ;;  %v2456_v50 = vld [vmem:[%s11539_s7 + $0x238] sm:$0xff] }
 0x46e   : > { %v2852_v57 = vpop.xlane.xlu1 %2851  ;;  %v2850_v58 = vpop.xlane.xlu0 %2849 }
 0x46f   : > { %v3070_v61 = vadd.f32 %v2852_v57, %v2446_v53  ;;  %v3069_v62 = vadd.f32 %v2850_v58, %v2445_v54  ;;  %v9457_v63 = vpack.c.bf16 %v3194_v56, %v3193_v55  ;;  %v9467_v15 = vpack.c.bf16 %v3196_v1, %v3195_v0  ;;  %v2672_v56 = vld [vmem:[#allocation2 + $0xb8] sm:$0xff]  ;;  %v2671_v57 = vld [vmem:[#allocation2 + $0xb0] sm:$0xff] }
 0x471   : > { %2803 = vmax.xlane.f32.xlu1 %v2662_v59  ;;  %2801 = vmax.xlane.f32.xlu0 %v2661_v60  ;;  %v3198_v6 = vmax.f32 %v3070_v61, 0.0  ;;  %v3197_v7 = vmax.f32 %v3069_v62, 0.0  ;;  %v2458_v61 = vld [vmem:[%s11539_s7 + $0x248] sm:$0xff]  ;;  %v2457_v62 = vld [vmem:[%s11539_s7 + $0x240] sm:$0xff] }
 0x472   : > { %5179 = vmatpush1.bf16.msra.mxu0 %v9457_v63  ;;  %v2856_v8 = vpop.xlane.xlu1 %2855  ;;  %v2854_v10 = vpop.xlane.xlu0 %2853 }
 0x473   : > { %v3072_v13 = vadd.f32 %v2856_v8, %v2448_v2  ;;  %v3071_v14 = vadd.f32 %v2854_v10, %v2447_v3  ;;  %5180 = vmatprep.subr.bf16.mxu0 %v9009_v37  ;;  %v9476_v24 = vpack.c.bf16 %v3198_v6, %v3197_v7  ;;  %v2674_v6 = vld [vmem:[#allocation2 + $0xc8] sm:$0xff]  ;;  %v2673_v7 = vld [vmem:[#allocation2 + $0xc0] sm:$0xff] }
 0x475   : > { %2807 = vmax.xlane.f32.xlu1 %v2664_v11  ;;  %2805 = vmax.xlane.f32.xlu0 %v2663_v12  ;;  %v3200_v18 = vmax.f32 %v3072_v13, 0.0  ;;  %v3199_v19 = vmax.f32 %v3071_v14, 0.0  ;;  %v2460_v12 = vld [vmem:[%s11539_s7 + $0x258] sm:$0xff]  ;;  %v2459_v13 = vld [vmem:[%s11539_s7 + $0x250] sm:$0xff] }
 0x476   : > { %5181 = vmatpush1.bf16.msra.mxu0 %v9467_v15  ;;  %v2860_v20 = vpop.xlane.xlu1 %2859  ;;  %v2858_v21 = vpop.xlane.xlu0 %2857 }
 0x477   : > { %v3074_v25 = vadd.f32 %v2860_v20, %v2450_v16  ;;  %v3073_v26 = vadd.f32 %v2858_v21, %v2449_v17  ;;  %5182 = vmatprep.subr.bf16.mxu0 %v9009_v37  ;;  %v9486_v35 = vpack.c.bf16 %v3200_v18, %v3199_v19  ;;  %v2676_v19 = vld [vmem:[#allocation2 + $0xd8] sm:$0xff]  ;;  %v2675_v20 = vld [vmem:[#allocation2 + $0xd0] sm:$0xff] }
 0x479   : > { %2811 = vmax.xlane.f32.xlu1 %v2666_v22  ;;  %2809 = vmax.xlane.f32.xlu0 %v2665_v23  ;;  %v3202_v29 = vmax.f32 %v3074_v25, 0.0  ;;  %v3201_v30 = vmax.f32 %v3073_v26, 0.0  ;;  %v2462_v25 = vld [vmem:[%s11539_s7 + $0x268] sm:$0xff]  ;;  %v2461_v26 = vld [vmem:[%s11539_s7 + $0x260] sm:$0xff] }
 0x47a   : > { %5183 = vmatpush1.bf16.msra.mxu0 %v9476_v24  ;;  %v2864_v31 = vpop.xlane.xlu1 %2863  ;;  %v2862_v32 = vpop.xlane.xlu0 %2861 }
 0x47b   : > { %v3076_v36 = vadd.f32 %v2864_v31, %v2452_v27  ;;  %v3075_v38 = vadd.f32 %v2862_v32, %v2451_v28  ;;  %5184 = vmatprep.subr.bf16.mxu0 %v9009_v37  ;;  %v9496_v47 = vpack.c.bf16 %v3202_v29, %v3201_v30  ;;  %v2678_v31 = vld [vmem:[#allocation2 + $0xe8] sm:$0xff]  ;;  %v2677_v32 = vld [vmem:[#allocation2 + $0xe0] sm:$0xff] }
 0x47d   : > { %2815 = vmax.xlane.f32.xlu1 %v2668_v33  ;;  %2813 = vmax.xlane.f32.xlu0 %v2667_v34  ;;  %v3204_v41 = vmax.f32 %v3076_v36, 0.0  ;;  %v3203_v42 = vmax.f32 %v3075_v38, 0.0  ;;  %v2464_v38 = vld [vmem:[%s11539_s7 + $0x278] sm:$0xff] }
 0x47e   : > { %5185 = vmatpush1.bf16.msra.mxu0 %v9486_v35  ;;  %v2868_v43 = vpop.xlane.xlu1 %2867  ;;  %v2866_v44 = vpop.xlane.xlu0 %2865 }
 0x47f   : > { %v3078_v48 = vadd.f32 %v2868_v43, %v2454_v39  ;;  %v3077_v49 = vadd.f32 %v2866_v44, %v2453_v40  ;;  %5186 = vmatprep.subr.bf16.mxu0 %v9009_v37  ;;  %v9506_v58 = vpack.c.bf16 %v3204_v41, %v3203_v42  ;;  %v2463_v39 = vld [vmem:[%s11539_s7 + $0x270] sm:$0xff]  ;;  %v2680_v44 = vld [vmem:[#allocation2 + $0xf8] sm:$0xff] }
 0x481   : > { %2819 = vmax.xlane.f32.xlu1 %v2670_v45  ;;  %2817 = vmax.xlane.f32.xlu0 %v2669_v46  ;;  %v3206_v52 = vmax.f32 %v3078_v48, 0.0  ;;  %v3205_v53 = vmax.f32 %v3077_v49, 0.0  ;;  %v2679_v45 = vld [vmem:[#allocation2 + $0xf0] sm:$0xff] }
 0x482   : > { %5187 = vmatpush1.bf16.msra.mxu0 %v9496_v47  ;;  %v2872_v54 = vpop.xlane.xlu1 %2871  ;;  %v2870_v55 = vpop.xlane.xlu0 %2869 }
 0x483   : > { %v3080_v59 = vadd.f32 %v2872_v54, %v2456_v50  ;;  %v3079_v60 = vadd.f32 %v2870_v55, %v2455_v51  ;;  %5188 = vmatprep.subr.bf16.mxu0 %v9009_v37  ;;  %v9516_v8 = vpack.c.bf16 %v3206_v52, %v3205_v53  ;;  %v2466_v50 = vld [vmem:[%s11539_s7 + $0x288] sm:$0xff]  ;;  %v2465_v51 = vld [vmem:[%s11539_s7 + $0x280] sm:$0xff] }
 0x485   : > { %2823 = vmax.xlane.f32.xlu1 %v2672_v56  ;;  %2821 = vmax.xlane.f32.xlu0 %v2671_v57  ;;  %v3208_v0 = vmax.f32 %v3080_v59, 0.0  ;;  %v3207_v1 = vmax.f32 %v3079_v60, 0.0  ;;  %v2746_v57 = vld [vmem:[#allocation2 + $0x308] sm:$0xff]  ;;  %v2745_v59 = vld [vmem:[#allocation2 + $0x300] sm:$0xff] }
 0x486   : > { %5189 = vmatpush1.bf16.msra.mxu0 %v9506_v58  ;;  %v2876_v2 = vpop.xlane.xlu1 %2875  ;;  %v2874_v3 = vpop.xlane.xlu0 %2873 }
 0x487   : > { %v3082_v10 = vadd.f32 %v2876_v2, %v2458_v61  ;;  %v3081_v11 = vadd.f32 %v2874_v3, %v2457_v62  ;;  %5190 = vmatprep.subr.bf16.mxu0 %v9009_v37  ;;  %v9526_v21 = vpack.c.bf16 %v3208_v0, %v3207_v1  ;;  %v2468_v62 = vld [vmem:[%s11539_s7 + $0x298] sm:$0xff]  ;;  %v2467_v0 = vld [vmem:[%s11539_s7 + $0x290] sm:$0xff] }
 0x489   : > { %2827 = vmax.xlane.f32.xlu1 %v2674_v6  ;;  %2825 = vmax.xlane.f32.xlu0 %v2673_v7  ;;  %v3210_v14 = vmax.f32 %v3082_v10, 0.0  ;;  %v3209_v16 = vmax.f32 %v3081_v11, 0.0  ;;  %v2748_v10 = vld [vmem:[#allocation2 + $0x318] sm:$0xff]  ;;  %v2747_v11 = vld [vmem:[#allocation2 + $0x310] sm:$0xff] }
 0x48a   : > { %5191 = vmatpush1.bf16.msra.mxu0 %v9516_v8  ;;  %v2880_v17 = vpop.xlane.xlu1 %2879  ;;  %v2878_v18 = vpop.xlane.xlu0 %2877 }
 0x48b   : > { %v3084_v22 = vadd.f32 %v2880_v17, %v2460_v12  ;;  %v3083_v23 = vadd.f32 %v2878_v18, %v2459_v13  ;;  %5192 = vmatprep.subr.bf16.mxu0 %v9009_v37  ;;  %v9536_v33 = vpack.c.bf16 %v3210_v14, %v3209_v16  ;;  %v2470_v14 = vld [vmem:[%s11539_s7 + $0x2a8] sm:$0xff]  ;;  %v2469_v16 = vld [vmem:[%s11539_s7 + $0x2a0] sm:$0xff] }
 0x48d   : > { %2831 = vmax.xlane.f32.xlu1 %v2676_v19  ;;  %2829 = vmax.xlane.f32.xlu0 %v2675_v20  ;;  %v3212_v27 = vmax.f32 %v3084_v22, 0.0  ;;  %v3211_v28 = vmax.f32 %v3083_v23, 0.0 }
 0x48e   : > { %5193 = vmatpush1.bf16.msra.mxu0 %v9526_v21  ;;  %v2884_v29 = vpop.xlane.xlu1 %2883  ;;  %v2882_v30 = vpop.xlane.xlu0 %2881 }
 0x48f   : > { %v3086_v34 = vadd.f32 %v2884_v29, %v2462_v25  ;;  %v3085_v36 = vadd.f32 %v2882_v30, %v2461_v26  ;;  %5194 = vmatprep.subr.bf16.mxu0 %v9009_v37  ;;  %v9546_v46 = vpack.c.bf16 %v3212_v27, %v3211_v28  ;;  %v2472_v26 = vld [vmem:[%s11539_s7 + $0x2b8] sm:$0xff]  ;;  %v2471_v27 = vld [vmem:[%s11539_s7 + $0x2b0] sm:$0xff] }
 0x491   : > { %2835 = vmax.xlane.f32.xlu1 %v2678_v31  ;;  %2833 = vmax.xlane.f32.xlu0 %v2677_v32  ;;  %v3214_v40 = vmax.f32 %v3086_v34, 0.0  ;;  %v3213_v41 = vmax.f32 %v3085_v36, 0.0 }
 0x492   : > { %5195 = vmatpush1.bf16.msra.mxu0 %v9536_v33  ;;  %v2888_v42 = vpop.xlane.xlu1 %2887  ;;  %v2886_v43 = vpop.xlane.xlu0 %2885 }
 0x493   : > { %v3088_v48 = vadd.f32 %v2888_v42, %v2464_v38  ;;  %v3087_v49 = vadd.f32 %v2886_v43, %v2463_v39  ;;  %5196 = vmatprep.subr.bf16.mxu0 %v9009_v37  ;;  %v9556_v56 = vpack.c.bf16 %v3214_v40, %v3213_v41  ;;  %v2750_v38 = vld [vmem:[#allocation2 + $0x328] sm:$0xff]  ;;  %v2749_v39 = vld [vmem:[#allocation2 + $0x320] sm:$0xff]  ;;  %v2473_v41 = vld [vmem:[%s11539_s7 + $0x2c0] sm:$0xff] }
 0x494   : > { %v2474_v40 = vld [vmem:[%s11539_s7 + $0x2c8] sm:$0xff] }
 0x495   : > { %2839 = vmax.xlane.f32.xlu1 %v2680_v44  ;;  %2837 = vmax.xlane.f32.xlu0 %v2679_v45  ;;  %v3216_v52 = vmax.f32 %v3088_v48, 0.0  ;;  %v3215_v53 = vmax.f32 %v3087_v49, 0.0 }
 0x496   : > { %5197 = vmatpush1.bf16.msra.mxu0 %v9546_v46  ;;  %v2892_v54 = vpop.xlane.xlu1 %2891  ;;  %v2890_v55 = vpop.xlane.xlu0 %2889 }
 0x497   : > { %v3090_v60 = vadd.f32 %v2892_v54, %v2466_v50  ;;  %v3089_v61 = vadd.f32 %v2890_v55, %v2465_v51  ;;  %5198 = vmatprep.subr.bf16.mxu0 %v9009_v37  ;;  %v9566_v7 = vpack.c.bf16 %v3216_v52, %v3215_v53  ;;  %v2476_v51 = vld [vmem:[%s11539_s7 + $0x2d8] sm:$0xff]  ;;  %v2475_v52 = vld [vmem:[%s11539_s7 + $0x2d0] sm:$0xff]  ;;  %v9610_v54 = vld [vmem:[%s11536_s4] sm:$0xff] }
 0x498   : > { %v9615_v55 = vld [vmem:[%s11536_s4 + $0x20] sm:$0xff] }
 0x499   : > { %2971 = vmax.xlane.f32.xlu1 %v2746_v57  ;;  %2969 = vmax.xlane.f32.xlu0 %v2745_v59  ;;  %v3218_v1 = vmax.f32 %v3090_v60, 0.0  ;;  %v3217_v2 = vmax.f32 %v3089_v61, 0.0 }
 0x49a   : > { %5199 = vmatpush1.bf16.msra.mxu0 %v9556_v56  ;;  %v2896_v3 = vpop.xlane.xlu1 %2895  ;;  %v2894_v6 = vpop.xlane.xlu0 %2893 }
 0x49b   : > { %v3092_v12 = vadd.f32 %v2896_v3, %v2468_v62  ;;  %v3091_v13 = vadd.f32 %v2894_v6, %v2467_v0  ;;  %5200 = vmatprep.subr.bf16.mxu0 %v9009_v37  ;;  %v9576_v22 = vpack.c.bf16 %v3218_v1, %v3217_v2  ;;  %v7303_v62 = vcombine.low %v9610_v54, %v9615_v55  ;;  %v3298_v3 = vld [vmem:[%s11536_s4 + $0x48] sm:$0xff] }
 0x49c   : > { %v7304_v0 = vcombine.high %v9610_v54, %v9615_v55  ;;  %v3302_v6 = vld [vmem:[%s11536_s4 + $0x68] sm:$0xff]  ;;  %v2772_v55 = vld [vmem:[#allocation2 + $0x3d8] sm:$0xff] }
 0x49d   : > { %2975 = vmax.xlane.f32.xlu1 %v2748_v10  ;;  %2973 = vmax.xlane.f32.xlu0 %v2747_v11  ;;  %v3220_v17 = vmax.f32 %v3092_v12, 0.0  ;;  %v3219_v18 = vmax.f32 %v3091_v13, 0.0  ;;  %v2478_v10 = vld [vmem:[%s11539_s7 + $0x2e8] sm:$0xff]  ;;  %v2477_v11 = vld [vmem:[%s11539_s7 + $0x2e0] sm:$0xff] }
 0x49e   : > { %5201 = vmatpush1.bf16.msra.mxu0 %v9566_v7  ;;  %v2900_v19 = vpop.xlane.xlu1 %2899  ;;  %v2898_v20 = vpop.xlane.xlu0 %2897  ;;  %4921 = vmatprep.mubr.bf16.mxu1 %v7304_v0 }
 0x49f   : > { %v3094_v23 = vadd.f32 %v2900_v19, %v2470_v14  ;;  %v3093_v25 = vadd.f32 %v2898_v20, %v2469_v16  ;;  %5202 = vmatprep.subr.bf16.mxu0 %v9009_v37  ;;  %v9586_v32 = vpack.c.bf16 %v3220_v17, %v3219_v18  ;;  %v7314_v18 = vcombine.high %v3298_v3, %v3302_v6 }
 0x4a1   : > { %v3222_v28 = vmax.f32 %v3094_v23, 0.0  ;;  %v3221_v29 = vmax.f32 %v3093_v25, 0.0  ;;  %2979 = vmax.xlane.f32.xlu1 %v2750_v38  ;;  %2977 = vmax.xlane.f32.xlu0 %v2749_v39  ;;  %v2480_v23 = vld [vmem:[%s11539_s7 + $0x2f8] sm:$0xff]  ;;  %v2479_v25 = vld [vmem:[%s11539_s7 + $0x2f0] sm:$0xff]  ;;  %v3306_v39 = vld [vmem:[%s11536_s4 + $0x88] sm:$0xff] }
 0x4a2   : > { %5203 = vmatpush1.bf16.msra.mxu0 %v9576_v22  ;;  %v2904_v30 = vpop.xlane.xlu1 %2903  ;;  %v2902_v31 = vpop.xlane.xlu0 %2901 }
 0x4a3   : > { %v3096_v34 = vadd.f32 %v2904_v30, %v2472_v26  ;;  %v3095_v36 = vadd.f32 %v2902_v31, %v2471_v27  ;;  %5204 = vmatprep.subr.bf16.mxu0 %v9009_v37  ;;  %v9596_v48 = vpack.c.bf16 %v3222_v28, %v3221_v29  ;;  %v2752_v26 = vld [vmem:[#allocation2 + $0x338] sm:$0xff]  ;;  %v2751_v27 = vld [vmem:[#allocation2 + $0x330] sm:$0xff] }
 0x4a5   : > { %v3224_v42 = vmax.f32 %v3096_v34, 0.0  ;;  %v3223_v43 = vmax.f32 %v3095_v36, 0.0  ;;  %2983 = vmax.xlane.f32.xlu1 %v2752_v26  ;;  %2981 = vmax.xlane.f32.xlu0 %v2751_v27  ;;  %v2488_v26 = vld [vmem:[%s11539_s7 + $0x338] sm:$0xff]  ;;  %v2487_v27 = vld [vmem:[%s11539_s7 + $0x330] sm:$0xff] }
 0x4a6   : > { %5205 = vmatpush1.bf16.msra.mxu0 %v9586_v32  ;;  %v2908_v44 = vpop.xlane.xlu1 %2907  ;;  %v2906_v45 = vpop.xlane.xlu0 %2905 }
 0x4a7   : > { %v3098_v49 = vadd.f32 %v2908_v44, %v2474_v40  ;;  %v3097_v50 = vadd.f32 %v2906_v45, %v2473_v41  ;;  %5206 = vmatprep.subr.bf16.mxu0 %v9009_v37  ;;  %v9605_v53 = vpack.c.bf16 %v3224_v42, %v3223_v43  ;;  %v7313_v40 = vcombine.low %v3298_v3, %v3302_v6  ;;  %v3314_v6 = vld [vmem:[%s11536_s4 + $0xc8] sm:$0xff] }
 0x4a9   : > { %v3226_v57 = vmax.f32 %v3098_v49, 0.0  ;;  %v3225_v59 = vmax.f32 %v3097_v50, 0.0  ;;  %v7322_v49 = vcombine.high %v3306_v39, %v3310_v4 }
 0x4aa   : > { %5207 = vmatpush1.bf16.msra.mxu0 %v9596_v48  ;;  %v2912_v60 = vpop.xlane.xlu1 %2911  ;;  %v2910_v61 = vpop.xlane.xlu0 %2909 }
 0x4ab   : > { %v3100_v1 = vadd.f32 %v2912_v60, %v2476_v51  ;;  %v3099_v2 = vadd.f32 %v2910_v61, %v2475_v52  ;;  %5208 = vmatprep.subr.bf16.mxu0 %v9009_v37  ;;  %v3577_v12 = vpack.c.bf16 %v3226_v57, %v3225_v59  ;;  %v2484_v52 = vld [vmem:[%s11539_s7 + $0x318] sm:$0xff]  ;;  %v2483_v57 = vld [vmem:[%s11539_s7 + $0x310] sm:$0xff] }
 0x4ad   : > { %v3228_v13 = vmax.f32 %v3100_v1, 0.0  ;;  %v3227_v14 = vmax.f32 %v3099_v2, 0.0 }
 0x4ae   : > { %5209 = vmatpush1.bf16.msra.mxu0 %v9605_v53  ;;  %v2916_v16 = vpop.xlane.xlu1 %2915  ;;  %v2914_v17 = vpop.xlane.xlu0 %2913 }
 0x4af   : > { %v3102_v19 = vadd.f32 %v2916_v16, %v2478_v10  ;;  %v3101_v20 = vadd.f32 %v2914_v17, %v2477_v11  ;;  %5467 = vmatprep.subr.bf16.mxu0 %v9009_v37  ;;  %v3578_v28 = vpack.c.bf16 %v3228_v13, %v3227_v14  ;;  %v3318_v10 = vld [vmem:[%s11536_s4 + $0xe8] sm:$0xff]  ;;  %v7321_v13 = vcombine.low %v3306_v39, %v3310_v4 }
 0x4b0   : > { %v2486_v11 = vld [vmem:[%s11539_s7 + $0x328] sm:$0xff] }
 0x4b1   : > { %5211 = vmatmul.mubr.bf16.vlgmr.msra.gmra.mrb[0].mxu0 %v7305_v9  ;;  %v3230_v29 = vmax.f32 %v3102_v19, 0.0  ;;  %v3229_v30 = vmax.f32 %v3101_v20, 0.0  ;;  %v2481_v9 = vld [vmem:[%s11539_s7 + $0x300] sm:$0xff]  ;;  %v7330_v20 = vcombine.high %v3314_v6, %v3318_v10 }
 0x4b2   : > { %v2920_v31 = vpop.xlane.xlu1 %2919  ;;  %v2918_v34 = vpop.xlane.xlu0 %2917  ;;  %5218 = vmatprep.mubr.bf16.mxu0 %v7314_v18  ;;  %5468 = vmatpush1.bf16.msra.mxu0 %v3577_v12  ;;  %v2485_v12 = vld [vmem:[%s11539_s7 + $0x320] sm:$0xff] }
 0x4b3   : > { %v3104_v36 = vadd.f32 %v2920_v31, %v2480_v23  ;;  %v3103_v38 = vadd.f32 %v2918_v34, %v2479_v25  ;;  %5469 = vmatprep.subr.bf16.mxu0 %v9009_v37  ;;  %v3579_v41 = vpack.c.bf16 %v3230_v29, %v3229_v30  ;;  %v2753_v29 = vld [vmem:[#allocation2 + $0x340] sm:$0xff] }
 0x4b4   : > { %2985 = vmax.xlane.f32.xlu0 %v2753_v29  ;;  %v2495_v29 = vld [vmem:[%s11539_s7 + $0x370] sm:$0xff] }
 0x4b5   : > { %v3232_v42 = vmax.f32 %v3104_v36, 0.0  ;;  %v3231_v43 = vmax.f32 %v3103_v38, 0.0 }
 0x4b6   : > { %v2924_v44 = vpop.xlane.xlu1 %2923  ;;  %v2922_v45 = vpop.xlane.xlu0 %2921  ;;  %5470 = vmatpush1.bf16.msra.mxu0 %v3578_v28  ;;  %v2754_v28 = vld [vmem:[#allocation2 + $0x348] sm:$0xff] }
 0x4b7   : > { %v3106_v50 = vadd.f32 %v2924_v44, %v2482_v5  ;;  %v3105_v51 = vadd.f32 %v2922_v45, %v2481_v9  ;;  %5471 = vmatprep.subr.bf16.mxu0 %v9009_v37  ;;  %v3580_v59 = vpack.c.bf16 %v3232_v42, %v3231_v43  ;;  %v3322_v5 = vld [vmem:[%s11536_s4 + $0x108] sm:$0xff]  ;;  %2987 = vmax.xlane.f32.xlu1 %v2754_v28  ;;  %v2496_v28 = vld [vmem:[%s11539_s7 + $0x378] sm:$0xff] }
 0x4b8   : > { %v3326_v9 = vld [vmem:[%s11536_s4 + $0x128] sm:$0xff]  ;;  %v7329_v42 = vcombine.low %v3314_v6, %v3318_v10 }
 0x4b9   : > { %5219 = vmatmul.mubr.bf16.gmra.mrb[4].mxu0 %v7313_v40  ;;  %v3234_v60 = vmax.f32 %v3106_v50, 0.0  ;;  %v3233_v61 = vmax.f32 %v3105_v51, 0.0  ;;  %v2490_v40 = vld [vmem:[%s11539_s7 + $0x348] sm:$0xff]  ;;  %v7338_v51 = vcombine.high %v3322_v5, %v3326_v9 }
 0x4ba   : > { %v2928_v0 = vpop.xlane.xlu1 %2927  ;;  %v2926_v1 = vpop.xlane.xlu0 %2925  ;;  %5226 = vmatprep.mubr.bf16.mxu0 %v7322_v49  ;;  %5472 = vmatpush1.bf16.msra.mxu0 %v3579_v41  ;;  %v2489_v41 = vld [vmem:[%s11539_s7 + $0x340] sm:$0xff] }
 0x4bb   : > { %v3108_v2 = vadd.f32 %v2928_v0, %v2484_v52  ;;  %v3107_v3 = vadd.f32 %v2926_v1, %v2483_v57  ;;  %5473 = vmatprep.subr.bf16.mxu0 %v9009_v37  ;;  %v3581_v14 = vpack.c.bf16 %v3234_v60, %v3233_v61  ;;  %v2491_v60 = vld [vmem:[%s11539_s7 + $0x350] sm:$0xff] }
 0x4bd   : > { %v3236_v16 = vmax.f32 %v3108_v2, 0.0  ;;  %v3235_v17 = vmax.f32 %v3107_v3, 0.0 }
 0x4be   : > { %v2932_v18 = vpop.xlane.xlu1 %2931  ;;  %v2930_v19 = vpop.xlane.xlu0 %2929  ;;  %5474 = vmatpush1.bf16.msra.mxu0 %v3580_v59  ;;  %v2492_v59 = vld [vmem:[%s11539_s7 + $0x358] sm:$0xff] }
 0x4bf   : > { %v3110_v23 = vadd.f32 %v2932_v18, %v2486_v11  ;;  %v3109_v25 = vadd.f32 %v2930_v19, %v2485_v12  ;;  %5475 = vmatprep.subr.bf16.mxu0 %v9009_v37  ;;  %v3582_v30 = vpack.c.bf16 %v3236_v16, %v3235_v17  ;;  %v3330_v11 = vld [vmem:[%s11536_s4 + $0x148] sm:$0xff]  ;;  %v7337_v16 = vcombine.low %v3322_v5, %v3326_v9 }
 0x4c0   : > { %v3334_v12 = vld [vmem:[%s11536_s4 + $0x168] sm:$0xff] }
 0x4c1   : > { %5227 = vmatmul.mubr.bf16.gmra.mrb[8].mxu0 %v7321_v13  ;;  %v3238_v31 = vmax.f32 %v3110_v23, 0.0  ;;  %v3237_v34 = vmax.f32 %v3109_v25, 0.0  ;;  %v2494_v13 = vld [vmem:[%s11539_s7 + $0x368] sm:$0xff]  ;;  %v7346_v25 = vcombine.high %v3330_v11, %v3334_v12 }
 0x4c2   : > { %v2936_v36 = vpop.xlane.xlu1 %2935  ;;  %v2934_v38 = vpop.xlane.xlu0 %2933  ;;  %5234 = vmatprep.mubr.bf16.mxu0 %v7330_v20  ;;  %5476 = vmatpush1.bf16.msra.mxu0 %v3581_v14  ;;  %v2493_v14 = vld [vmem:[%s11539_s7 + $0x360] sm:$0xff] }
 0x4c3   : > { %v3112_v39 = vadd.f32 %v2936_v36, %v2488_v26  ;;  %v3111_v4 = vadd.f32 %v2934_v38, %v2487_v27  ;;  %5477 = vmatprep.subr.bf16.mxu0 %v9009_v37  ;;  %v3583_v43 = vpack.c.bf16 %v3238_v31, %v3237_v34  ;;  %v2755_v31 = vld [vmem:[#allocation2 + $0x350] sm:$0xff] }
 0x4c4   : > { %2989 = vmax.xlane.f32.xlu0 %v2755_v31  ;;  %v2503_v31 = vld [vmem:[%s11539_s7 + $0x3b0] sm:$0xff] }
 0x4c5   : > { %v3240_v44 = vmax.f32 %v3112_v39, 0.0  ;;  %v3239_v45 = vmax.f32 %v3111_v4, 0.0 }
 0x4c6   : > { %v2940_v49 = vpop.xlane.xlu1 %2939  ;;  %v2938_v50 = vpop.xlane.xlu0 %2937  ;;  %5478 = vmatpush1.bf16.msra.mxu0 %v3582_v30  ;;  %v2756_v30 = vld [vmem:[#allocation2 + $0x358] sm:$0xff] }
 0x4c7   : > { %v3114_v52 = vadd.f32 %v2940_v49, %v2490_v40  ;;  %v3113_v57 = vadd.f32 %v2938_v50, %v2489_v41  ;;  %5479 = vmatprep.subr.bf16.mxu0 %v9009_v37  ;;  %v3584_v61 = vpack.c.bf16 %v3240_v44, %v3239_v45  ;;  %v3338_v40 = vld [vmem:[%s11536_s4 + $0x188] sm:$0xff]  ;;  %2991 = vmax.xlane.f32.xlu1 %v2756_v30  ;;  %v2504_v30 = vld [vmem:[%s11539_s7 + $0x3b8] sm:$0xff] }
 0x4c8   : > { %v3342_v41 = vld [vmem:[%s11536_s4 + $0x1a8] sm:$0xff]  ;;  %v7345_v44 = vcombine.low %v3330_v11, %v3334_v12 }
 0x4c9   : > { %5235 = vmatmul.mubr.bf16.gmra.mrb[12].mxu0 %v7329_v42  ;;  %v3242_v0 = vmax.f32 %v3114_v52, 0.0  ;;  %v3241_v1 = vmax.f32 %v3113_v57, 0.0  ;;  %v2498_v42 = vld [vmem:[%s11539_s7 + $0x388] sm:$0xff]  ;;  %v7354_v57 = vcombine.high %v3338_v40, %v3342_v41 }
 0x4ca   : > { %v2944_v2 = vpop.xlane.xlu1 %2943  ;;  %v2942_v3 = vpop.xlane.xlu0 %2941  ;;  %5242 = vmatprep.mubr.bf16.mxu0 %v7338_v51  ;;  %5480 = vmatpush1.bf16.msra.mxu0 %v3583_v43  ;;  %v2497_v43 = vld [vmem:[%s11539_s7 + $0x380] sm:$0xff] }
 0x4cb   : > { %v3116_v6 = vadd.f32 %v2944_v2, %v2492_v59  ;;  %v3115_v10 = vadd.f32 %v2942_v3, %v2491_v60  ;;  %5481 = vmatprep.subr.bf16.mxu0 %v9009_v37  ;;  %v3585_v17 = vpack.c.bf16 %v3242_v0, %v3241_v1  ;;  %v2499_v0 = vld [vmem:[%s11539_s7 + $0x390] sm:$0xff] }
 0x4cd   : > { %v3244_v18 = vmax.f32 %v3116_v6, 0.0  ;;  %v3243_v19 = vmax.f32 %v3115_v10, 0.0 }
 0x4ce   : > { %v2948_v20 = vpop.xlane.xlu1 %2947  ;;  %v2946_v23 = vpop.xlane.xlu0 %2945  ;;  %5482 = vmatpush1.bf16.msra.mxu0 %v3584_v61  ;;  %v2500_v61 = vld [vmem:[%s11539_s7 + $0x398] sm:$0xff] }
 0x4cf   : > { %v3118_v26 = vadd.f32 %v2948_v20, %v2494_v13  ;;  %v3117_v27 = vadd.f32 %v2946_v23, %v2493_v14  ;;  %5483 = vmatprep.subr.bf16.mxu0 %v9009_v37  ;;  %v3586_v34 = vpack.c.bf16 %v3244_v18, %v3243_v19  ;;  %v3346_v13 = vld [vmem:[%s11536_s4 + $0x1c8] sm:$0xff]  ;;  %v7353_v18 = vcombine.low %v3338_v40, %v3342_v41 }
 0x4d0   : > { %v3350_v14 = vld [vmem:[%s11536_s4 + $0x1e8] sm:$0xff] }
 0x4d1   : > { %5243 = vmatmul.mubr.bf16.gmra.mrb[16].mxu0 %v7337_v16  ;;  %v3246_v36 = vmax.f32 %v3118_v26, 0.0  ;;  %v3245_v38 = vmax.f32 %v3117_v27, 0.0  ;;  %v2502_v16 = vld [vmem:[%s11539_s7 + $0x3a8] sm:$0xff]  ;;  %v7362_v27 = vcombine.high %v3346_v13, %v3350_v14 }
 0x4d2   : > { %v2952_v39 = vpop.xlane.xlu1 %2951  ;;  %v2950_v4 = vpop.xlane.xlu0 %2949  ;;  %5250 = vmatprep.mubr.bf16.mxu0 %v7346_v25  ;;  %5484 = vmatpush1.bf16.msra.mxu0 %v3585_v17  ;;  %v2501_v17 = vld [vmem:[%s11539_s7 + $0x3a0] sm:$0xff] }
 0x4d3   : > { %v3120_v5 = vadd.f32 %v2952_v39, %v2496_v28  ;;  %v3119_v9 = vadd.f32 %v2950_v4, %v2495_v29  ;;  %5485 = vmatprep.subr.bf16.mxu0 %v9009_v37  ;;  %v3587_v45 = vpack.c.bf16 %v3246_v36, %v3245_v38  ;;  %v2757_v36 = vld [vmem:[#allocation2 + $0x360] sm:$0xff] }
 0x4d4   : > { %2993 = vmax.xlane.f32.xlu0 %v2757_v36  ;;  %v2416_v36 = vld [vmem:[%s11539_s7 + $0xf8] sm:$0xff] }
 0x4d5   : > { %v3248_v49 = vmax.f32 %v3120_v5, 0.0  ;;  %v3247_v50 = vmax.f32 %v3119_v9, 0.0 }
 0x4d6   : > { %v2956_v51 = vpop.xlane.xlu1 %2955  ;;  %v2954_v52 = vpop.xlane.xlu0 %2953  ;;  %5486 = vmatpush1.bf16.msra.mxu0 %v3586_v34  ;;  %v2758_v34 = vld [vmem:[#allocation2 + $0x368] sm:$0xff] }
 0x4d7   : > { %v3122_v59 = vadd.f32 %v2956_v51, %v2498_v42  ;;  %v3121_v60 = vadd.f32 %v2954_v52, %v2497_v43  ;;  %5487 = vmatprep.subr.bf16.mxu0 %v9009_v37  ;;  %v3588_v1 = vpack.c.bf16 %v3248_v49, %v3247_v50  ;;  %v3354_v42 = vld [vmem:[%s11536_s4 + $0x208] sm:$0xff]  ;;  %2995 = vmax.xlane.f32.xlu1 %v2758_v34 }
 0x4d8   : > { %v3358_v43 = vld [vmem:[%s11536_s4 + $0x228] sm:$0xff]  ;;  %v7361_v49 = vcombine.low %v3346_v13, %v3350_v14 }
 0x4d9   : > { %5251 = vmatmul.mubr.bf16.gmra.mrb[20].mxu0 %v7345_v44  ;;  %v3250_v2 = vmax.f32 %v3122_v59, 0.0  ;;  %v3249_v3 = vmax.f32 %v3121_v60, 0.0  ;;  %v2410_v44 = vld [vmem:[%s11539_s7 + $0xc8] sm:$0xff]  ;;  %v7370_v60 = vcombine.high %v3354_v42, %v3358_v43 }
 0x4da   : > { %v2960_v6 = vpop.xlane.xlu1 %2959  ;;  %v2958_v10 = vpop.xlane.xlu0 %2957  ;;  %5258 = vmatprep.mubr.bf16.mxu0 %v7354_v57  ;;  %5488 = vmatpush1.bf16.msra.mxu0 %v3587_v45  ;;  %v2409_v45 = vld [vmem:[%s11539_s7 + $0xc0] sm:$0xff] }
 0x4db   : > { %v3124_v11 = vadd.f32 %v2960_v6, %v2500_v61  ;;  %v3123_v12 = vadd.f32 %v2958_v10, %v2499_v0  ;;  %5489 = vmatprep.subr.bf16.mxu0 %v9009_v37  ;;  %v3589_v19 = vpack.c.bf16 %v3250_v2, %v3249_v3  ;;  %v2411_v2 = vld [vmem:[%s11539_s7 + $0xd0] sm:$0xff] }
 0x4dd   : > { %v3252_v20 = vmax.f32 %v3124_v11, 0.0  ;;  %v3251_v23 = vmax.f32 %v3123_v12, 0.0 }
 0x4de   : > { %v2964_v25 = vpop.xlane.xlu1 %2963  ;;  %v2962_v26 = vpop.xlane.xlu0 %2961  ;;  %5490 = vmatpush1.bf16.msra.mxu0 %v3588_v1  ;;  %v2412_v1 = vld [vmem:[%s11539_s7 + $0xd8] sm:$0xff] }
 0x4df   : > { %v3126_v28 = vadd.f32 %v2964_v25, %v2502_v16  ;;  %v3125_v29 = vadd.f32 %v2962_v26, %v2501_v17  ;;  %5491 = vmatprep.subr.bf16.mxu0 %v9009_v37  ;;  %v3590_v38 = vpack.c.bf16 %v3252_v20, %v3251_v23  ;;  %v3362_v17 = vld [vmem:[%s11536_s4 + $0x248] sm:$0xff]  ;;  %v2413_v20 = vld [vmem:[%s11539_s7 + $0xe0] sm:$0xff]  ;;  %v7369_v26 = vcombine.low %v3354_v42, %v3358_v43 }
 0x4e1   : > { %5259 = vmatmul.mubr.bf16.gmra.mrb[24].mxu0 %v7353_v18  ;;  %v3254_v39 = vmax.f32 %v3126_v28, 0.0  ;;  %v3253_v4 = vmax.f32 %v3125_v29, 0.0  ;;  %v3366_v18 = vld [vmem:[%s11536_s4 + $0x268] sm:$0xff] }
 0x4e2   : > { %v2968_v5 = vpop.xlane.xlu1 %2967  ;;  %v2966_v9 = vpop.xlane.xlu0 %2965  ;;  %5266 = vmatprep.mubr.bf16.mxu0 %v7362_v27  ;;  %5492 = vmatpush1.bf16.msra.mxu0 %v3589_v19  ;;  %v2414_v19 = vld [vmem:[%s11539_s7 + $0xe8] sm:$0xff]  ;;  %v7378_v29 = vcombine.high %v3362_v17, %v3366_v18 }
 0x4e3   : > { %v3128_v40 = vadd.f32 %v2968_v5, %v2504_v30  ;;  %v3127_v41 = vadd.f32 %v2966_v9, %v2503_v31  ;;  %5493 = vmatprep.subr.bf16.mxu0 %v9009_v37  ;;  %v3591_v50 = vpack.c.bf16 %v3254_v39, %v3253_v4  ;;  %v2760_v5 = vld [vmem:[#allocation2 + $0x378] sm:$0xff]  ;;  %v2759_v9 = vld [vmem:[#allocation2 + $0x370] sm:$0xff] }
 0x4e4   : > { %2999 = vmax.xlane.f32.xlu1 %v2760_v5  ;;  %2997 = vmax.xlane.f32.xlu0 %v2759_v9 }
 0x4e5   : > { %v3256_v51 = vmax.f32 %v3128_v40, 0.0  ;;  %v3255_v52 = vmax.f32 %v3127_v41, 0.0 }
 0x4e6   : > { %v2780_v57 = vpop.xlane.xlu1 %2779  ;;  %v2778_v59 = vpop.xlane.xlu0 %2777  ;;  %5494 = vmatpush1.bf16.msra.mxu0 %v3590_v38  ;;  %v2415_v38 = vld [vmem:[%s11539_s7 + $0xf0] sm:$0xff] }
 0x4e7   : > { %v3034_v61 = vadd.f32 %v2780_v57, %v2410_v44  ;;  %v3033_v0 = vadd.f32 %v2778_v59, %v2409_v45  ;;  %5495 = vmatprep.subr.bf16.mxu0 %v9009_v37  ;;  %v3592_v10 = vpack.c.bf16 %v3256_v51, %v3255_v52  ;;  %v3370_v45 = vld [vmem:[%s11536_s4 + $0x288] sm:$0xff]  ;;  %v2417_v51 = vld [vmem:[%s11539_s7 + $0x100] sm:$0xff]  ;;  %v7377_v59 = vcombine.low %v3362_v17, %v3366_v18 }
 0x4e9   : > { %v3162_v3 = vmax.f32 %v3034_v61, 0.0  ;;  %v3161_v6 = vmax.f32 %v3033_v0, 0.0  ;;  %5267 = vmatmul.mubr.bf16.gmra.mrb[28].mxu0 %v7361_v49  ;;  %v3374_v49 = vld [vmem:[%s11536_s4 + $0x2a8] sm:$0xff] }
 0x4ea   : > { %v2784_v11 = vpop.xlane.xlu1 %2783  ;;  %v2782_v12 = vpop.xlane.xlu0 %2781  ;;  %5274 = vmatprep.mubr.bf16.mxu0 %v7370_v60  ;;  %5496 = vmatpush1.bf16.msra.mxu0 %v3591_v50  ;;  %v2418_v50 = vld [vmem:[%s11539_s7 + $0x108] sm:$0xff]  ;;  %v7386_v0 = vcombine.high %v3370_v45, %v3374_v49 }
 0x4eb   : > { %v3036_v13 = vadd.f32 %v2784_v11, %v2412_v1  ;;  %v3035_v14 = vadd.f32 %v2782_v12, %v2411_v2  ;;  %v3545_v16 = vpack.c.bf16 %v3162_v3, %v3161_v6  ;;  %5497 = vmatprep.subr.bf16.mxu0 %v9009_v37  ;;  %v2420_v6 = vld [vmem:[%s11539_s7 + $0x118] sm:$0xff] }
 0x4ed   : > { %v3164_v23 = vmax.f32 %v3036_v13, 0.0  ;;  %v3163_v25 = vmax.f32 %v3035_v14, 0.0  ;;  %4890 = vmatpush1.bf16.msra.mxu1 %v3545_v16 }
 0x4ee   : > { %v2788_v27 = vpop.xlane.xlu1 %2787  ;;  %v2786_v28 = vpop.xlane.xlu0 %2785  ;;  %4891 = vmatprep.subr.bf16.mxu1 %v9009_v37  ;;  %5498 = vmatpush1.bf16.msra.mxu0 %v3592_v10  ;;  %v2419_v10 = vld [vmem:[%s11539_s7 + $0x110] sm:$0xff] }
 0x4ef   : > { %v3546_v30 = vpack.c.bf16 %v3164_v23, %v3163_v25  ;;  %v3038_v31 = vadd.f32 %v2788_v27, %v2414_v19  ;;  %v3037_v34 = vadd.f32 %v2786_v28, %v2413_v20  ;;  %5756 = vmatprep.subr.bf16.mxu0 %v9009_v37  ;;  %v3378_v19 = vld [vmem:[%s11536_s4 + $0x2c8] sm:$0xff]  ;;  %v2421_v25 = vld [vmem:[%s11539_s7 + $0x120] sm:$0xff]  ;;  %v7385_v28 = vcombine.low %v3370_v45, %v3374_v49 }
 0x4f0   : > { %v3382_v20 = vld [vmem:[%s11536_s4 + $0x2e8] sm:$0xff] }
 0x4f1   : > { %v3166_v39 = vmax.f32 %v3038_v31, 0.0  ;;  %v3165_v4 = vmax.f32 %v3037_v34, 0.0  ;;  %5275 = vmatmul.mubr.bf16.gmra.mrb[32].mxu0 %v7369_v26  ;;  %4892 = vmatpush1.bf16.msra.mxu1 %v3546_v30  ;;  %v2422_v23 = vld [vmem:[%s11539_s7 + $0x128] sm:$0xff]  ;;  %v7394_v31 = vcombine.high %v3378_v19, %v3382_v20 }
 0x4f2   : > { %v2792_v40 = vpop.xlane.xlu1 %2791  ;;  %v2790_v41 = vpop.xlane.xlu0 %2789  ;;  %4893 = vmatprep.subr.bf16.mxu1 %v9009_v37  ;;  %5282 = vmatprep.mubr.bf16.mxu0 %v7378_v29 }
 0x4f3   : > { %v3547_v42 = vpack.c.bf16 %v3166_v39, %v3165_v4  ;;  %v3040_v43 = vadd.f32 %v2792_v40, %v2416_v36  ;;  %v3039_v44 = vadd.f32 %v2790_v41, %v2415_v38  ;;  %v2424_v39 = vld [vmem:[%s11539_s7 + $0x138] sm:$0xff]  ;;  %v2423_v4 = vld [vmem:[%s11539_s7 + $0x130] sm:$0xff]  ;;  %v2761_v41 = vld [vmem:[#allocation2 + $0x380] sm:$0xff] }
 0x4f4   : > { %v2762_v40 = vld [vmem:[#allocation2 + $0x388] sm:$0xff]  ;;  %3001 = vmax.xlane.f32.xlu0 %v2761_v41 }
 0x4f5   : > { %v3168_v52 = vmax.f32 %v3040_v43, 0.0  ;;  %v3167_v57 = vmax.f32 %v3039_v44, 0.0  ;;  %4894 = vmatpush1.bf16.msra.mxu1 %v3547_v42  ;;  %3003 = vmax.xlane.f32.xlu1 %v2762_v40 }
 0x4f6   : > { %v2796_v60 = vpop.xlane.xlu1 %2795  ;;  %v2794_v61 = vpop.xlane.xlu0 %2793  ;;  %4895 = vmatprep.subr.bf16.mxu1 %v9009_v37 }
 0x4f7   : > { %v3548_v1 = vpack.c.bf16 %v3168_v52, %v3167_v57  ;;  %v3042_v2 = vadd.f32 %v2796_v60, %v2418_v50  ;;  %v3041_v3 = vadd.f32 %v2794_v61, %v2417_v51  ;;  %v3386_v50 = vld [vmem:[%s11536_s4 + $0x308] sm:$0xff]  ;;  %v2425_v57 = vld [vmem:[%s11539_s7 + $0x140] sm:$0xff]  ;;  %v7393_v61 = vcombine.low %v3378_v19, %v3382_v20 }
 0x4f8   : > { %v3390_v51 = vld [vmem:[%s11536_s4 + $0x328] sm:$0xff] }
 0x4f9   : > { %v3170_v11 = vmax.f32 %v3042_v2, 0.0  ;;  %v3169_v12 = vmax.f32 %v3041_v3, 0.0  ;;  %5283 = vmatmul.mubr.bf16.gmra.mrb[36].mxu0 %v7377_v59  ;;  %4896 = vmatpush1.bf16.msra.mxu1 %v3548_v1  ;;  %v2426_v52 = vld [vmem:[%s11539_s7 + $0x148] sm:$0xff]  ;;  %v7402_v2 = vcombine.high %v3386_v50, %v3390_v51 }
 0x4fa   : > { %v2800_v13 = vpop.xlane.xlu1 %2799  ;;  %v2798_v14 = vpop.xlane.xlu0 %2797  ;;  %4897 = vmatprep.subr.bf16.mxu1 %v9009_v37  ;;  %5290 = vmatprep.mubr.bf16.mxu0 %v7386_v0 }
 0x4fb   : > { %v3549_v16 = vpack.c.bf16 %v3170_v11, %v3169_v12  ;;  %v3044_v17 = vadd.f32 %v2800_v13, %v2420_v6  ;;  %v3043_v18 = vadd.f32 %v2798_v14, %v2419_v10  ;;  %v2428_v11 = vld [vmem:[%s11539_s7 + $0x158] sm:$0xff]  ;;  %v2427_v12 = vld [vmem:[%s11539_s7 + $0x150] sm:$0xff] }
 0x4fd   : > { %v3172_v26 = vmax.f32 %v3044_v17, 0.0  ;;  %v3171_v27 = vmax.f32 %v3043_v18, 0.0  ;;  %4898 = vmatpush1.bf16.msra.mxu1 %v3549_v16 }
 0x4fe   : > { %v2804_v29 = vpop.xlane.xlu1 %2803  ;;  %v2802_v30 = vpop.xlane.xlu0 %2801  ;;  %4899 = vmatprep.subr.bf16.mxu1 %v9009_v37 }
 0x4ff   : > { %v3550_v34 = vpack.c.bf16 %v3172_v26, %v3171_v27  ;;  %v3046_v36 = vadd.f32 %v2804_v29, %v2422_v23  ;;  %v3045_v38 = vadd.f32 %v2802_v30, %v2421_v25  ;;  %v3394_v23 = vld [vmem:[%s11536_s4 + $0x348] sm:$0xff]  ;;  %v2429_v27 = vld [vmem:[%s11539_s7 + $0x160] sm:$0xff]  ;;  %v7401_v30 = vcombine.low %v3386_v50, %v3390_v51 }
 0x500   : > { %v3398_v25 = vld [vmem:[%s11536_s4 + $0x368] sm:$0xff] }
 0x501   : > { %v3174_v5 = vmax.f32 %v3046_v36, 0.0  ;;  %v3173_v9 = vmax.f32 %v3045_v38, 0.0  ;;  %5291 = vmatmul.mubr.bf16.gmra.mrb[40].mxu0 %v7385_v28  ;;  %4900 = vmatpush1.bf16.msra.mxu1 %v3550_v34  ;;  %v2430_v26 = vld [vmem:[%s11539_s7 + $0x168] sm:$0xff]  ;;  %v7410_v36 = vcombine.high %v3394_v23, %v3398_v25 }
 0x502   : > { %v2808_v42 = vpop.xlane.xlu1 %2807  ;;  %v2806_v43 = vpop.xlane.xlu0 %2805  ;;  %4901 = vmatprep.subr.bf16.mxu1 %v9009_v37  ;;  %5298 = vmatprep.mubr.bf16.mxu0 %v7394_v31 }
 0x503   : > { %v3551_v44 = vpack.c.bf16 %v3174_v5, %v3173_v9  ;;  %v3048_v45 = vadd.f32 %v2808_v42, %v2424_v39  ;;  %v3047_v49 = vadd.f32 %v2806_v43, %v2423_v4  ;;  %v2432_v5 = vld [vmem:[%s11539_s7 + $0x178] sm:$0xff]  ;;  %v2431_v9 = vld [vmem:[%s11539_s7 + $0x170] sm:$0xff]  ;;  %v2764_v42 = vld [vmem:[#allocation2 + $0x398] sm:$0xff] }
 0x504   : > { %v2763_v43 = vld [vmem:[#allocation2 + $0x390] sm:$0xff]  ;;  %3007 = vmax.xlane.f32.xlu1 %v2764_v42 }
 0x505   : > { %v3176_v59 = vmax.f32 %v3048_v45, 0.0  ;;  %v3175_v60 = vmax.f32 %v3047_v49, 0.0  ;;  %4902 = vmatpush1.bf16.msra.mxu1 %v3551_v44  ;;  %3005 = vmax.xlane.f32.xlu0 %v2763_v43 }
 0x506   : > { %v2812_v0 = vpop.xlane.xlu1 %2811  ;;  %v2810_v1 = vpop.xlane.xlu0 %2809  ;;  %4903 = vmatprep.subr.bf16.mxu1 %v9009_v37 }
 0x507   : > { %v3552_v3 = vpack.c.bf16 %v3176_v59, %v3175_v60  ;;  %v3050_v6 = vadd.f32 %v2812_v0, %v2426_v52  ;;  %v3049_v10 = vadd.f32 %v2810_v1, %v2425_v57  ;;  %v3402_v52 = vld [vmem:[%s11536_s4 + $0x388] sm:$0xff]  ;;  %v2433_v60 = vld [vmem:[%s11539_s7 + $0x180] sm:$0xff]  ;;  %v7409_v1 = vcombine.low %v3394_v23, %v3398_v25 }
 0x508   : > { %v3406_v57 = vld [vmem:[%s11536_s4 + $0x3a8] sm:$0xff] }
 0x509   : > { %v3178_v13 = vmax.f32 %v3050_v6, 0.0  ;;  %v3177_v14 = vmax.f32 %v3049_v10, 0.0  ;;  %5299 = vmatmul.mubr.bf16.gmra.mrb[44].mxu0 %v7393_v61  ;;  %4904 = vmatpush1.bf16.msra.mxu1 %v3552_v3  ;;  %v2434_v59 = vld [vmem:[%s11539_s7 + $0x188] sm:$0xff]  ;;  %v7418_v6 = vcombine.high %v3402_v52, %v3406_v57 }
 0x50a   : > { %v2816_v16 = vpop.xlane.xlu1 %2815  ;;  %v2814_v17 = vpop.xlane.xlu0 %2813  ;;  %4905 = vmatprep.subr.bf16.mxu1 %v9009_v37  ;;  %5306 = vmatprep.mubr.bf16.mxu0 %v7402_v2 }
 0x50b   : > { %v3553_v18 = vpack.c.bf16 %v3178_v13, %v3177_v14  ;;  %v3052_v19 = vadd.f32 %v2816_v16, %v2428_v11  ;;  %v3051_v20 = vadd.f32 %v2814_v17, %v2427_v12  ;;  %v2436_v13 = vld [vmem:[%s11539_s7 + $0x198] sm:$0xff]  ;;  %v2435_v14 = vld [vmem:[%s11539_s7 + $0x190] sm:$0xff] }
 0x50d   : > { %v3180_v28 = vmax.f32 %v3052_v19, 0.0  ;;  %v3179_v29 = vmax.f32 %v3051_v20, 0.0  ;;  %4906 = vmatpush1.bf16.msra.mxu1 %v3553_v18 }
 0x50e   : > { %v2820_v31 = vpop.xlane.xlu1 %2819  ;;  %v2818_v34 = vpop.xlane.xlu0 %2817  ;;  %4907 = vmatprep.subr.bf16.mxu1 %v9009_v37 }
 0x50f   : > { %v3554_v38 = vpack.c.bf16 %v3180_v28, %v3179_v29  ;;  %v3054_v39 = vadd.f32 %v2820_v31, %v2430_v26  ;;  %v3053_v4 = vadd.f32 %v2818_v34, %v2429_v27  ;;  %v3410_v26 = vld [vmem:[%s11536_s4 + $0x3c8] sm:$0xff]  ;;  %v2437_v29 = vld [vmem:[%s11539_s7 + $0x1a0] sm:$0xff]  ;;  %v7417_v34 = vcombine.low %v3402_v52, %v3406_v57 }
 0x510   : > { %v3414_v27 = vld [vmem:[%s11536_s4 + $0x3e8] sm:$0xff] }
 0x511   : > { %v3182_v40 = vmax.f32 %v3054_v39, 0.0  ;;  %v3181_v41 = vmax.f32 %v3053_v4, 0.0  ;;  %5307 = vmatmul.mubr.bf16.gmra.mrb[48].mxu0 %v7401_v30  ;;  %4908 = vmatpush1.bf16.msra.mxu1 %v3554_v38  ;;  %v2438_v28 = vld [vmem:[%s11539_s7 + $0x1a8] sm:$0xff]  ;;  %v7426_v39 = vcombine.high %v3410_v26, %v3414_v27 }
 0x512   : > { %v2824_v44 = vpop.xlane.xlu1 %2823  ;;  %v2822_v45 = vpop.xlane.xlu0 %2821  ;;  %4909 = vmatprep.subr.bf16.mxu1 %v9009_v37  ;;  %5314 = vmatprep.mubr.bf16.mxu0 %v7410_v36 }
 0x513   : > { %v3555_v49 = vpack.c.bf16 %v3182_v40, %v3181_v41  ;;  %v3056_v50 = vadd.f32 %v2824_v44, %v2432_v5  ;;  %v3055_v51 = vadd.f32 %v2822_v45, %v2431_v9  ;;  %v2440_v40 = vld [vmem:[%s11539_s7 + $0x1b8] sm:$0xff]  ;;  %v2439_v41 = vld [vmem:[%s11539_s7 + $0x1b0] sm:$0xff]  ;;  %v2765_v45 = vld [vmem:[#allocation2 + $0x3a0] sm:$0xff] }
 0x514   : > { %v2766_v44 = vld [vmem:[#allocation2 + $0x3a8] sm:$0xff]  ;;  %3009 = vmax.xlane.f32.xlu0 %v2765_v45 }
 0x515   : > { %v3184_v61 = vmax.f32 %v3056_v50, 0.0  ;;  %v3183_v0 = vmax.f32 %v3055_v51, 0.0  ;;  %4910 = vmatpush1.bf16.msra.mxu1 %v3555_v49  ;;  %3011 = vmax.xlane.f32.xlu1 %v2766_v44 }
 0x516   : > { %v2828_v2 = vpop.xlane.xlu1 %2827  ;;  %v2826_v3 = vpop.xlane.xlu0 %2825  ;;  %4911 = vmatprep.subr.bf16.mxu1 %v9009_v37 }
 0x517   : > { %v3556_v10 = vpack.c.bf16 %v3184_v61, %v3183_v0  ;;  %v3058_v11 = vadd.f32 %v2828_v2, %v2434_v59  ;;  %v3057_v12 = vadd.f32 %v2826_v3, %v2433_v60  ;;  %v3418_v59 = vld [vmem:[%s11536_s4 + $0x408] sm:$0xff]  ;;  %v3297_v3 = vld [vmem:[%s11536_s4 + $0x40] sm:$0xff] }
 0x518   : > { %v3422_v60 = vld [vmem:[%s11536_s4 + $0x428] sm:$0xff] }
 0x519   : > { %v3186_v16 = vmax.f32 %v3058_v11, 0.0  ;;  %v3185_v17 = vmax.f32 %v3057_v12, 0.0  ;;  %5315 = vmatmul.mubr.bf16.gmra.mrb[52].mxu0 %v7409_v1  ;;  %4912 = vmatpush1.bf16.msra.mxu1 %v3556_v10  ;;  %v7425_v1 = vcombine.low %v3410_v26, %v3414_v27  ;;  %v7434_v2 = vcombine.high %v3418_v59, %v3422_v60  ;;  %v2768_v12 = vld [vmem:[#allocation2 + $0x3b8] sm:$0xff]  ;;  %v3434_v26 = vld [vmem:[%s11536_s4 + $0x488] sm:$0xff] }
 0x51a   : > { %v2832_v18 = vpop.xlane.xlu1 %2831  ;;  %v2830_v19 = vpop.xlane.xlu0 %2829  ;;  %4913 = vmatprep.subr.bf16.mxu1 %v9009_v37  ;;  %5322 = vmatprep.mubr.bf16.mxu0 %v7418_v6  ;;  %v3301_v6 = vld [vmem:[%s11536_s4 + $0x60] sm:$0xff]  ;;  %v3438_v27 = vld [vmem:[%s11536_s4 + $0x4a8] sm:$0xff] }
 0x51b   : > { %v3557_v20 = vpack.c.bf16 %v3186_v16, %v3185_v17  ;;  %v3060_v23 = vadd.f32 %v2832_v18, %v2436_v13  ;;  %v3059_v25 = vadd.f32 %v2830_v19, %v2435_v14  ;;  %v7312_v11 = vcombine.high %v3297_v3, %v3301_v6  ;;  %v2767_v13 = vld [vmem:[#allocation2 + $0x3b0] sm:$0xff]  ;;  %v3426_v14 = vld [vmem:[%s11536_s4 + $0x448] sm:$0xff]  ;;  %3015 = vmax.xlane.f32.xlu1 %v2768_v12  ;;  %v2770_v17 = vld [vmem:[#allocation2 + $0x3c8] sm:$0xff] }
 0x51c   : > { %v3430_v16 = vld [vmem:[%s11536_s4 + $0x468] sm:$0xff]  ;;  %3013 = vmax.xlane.f32.xlu0 %v2767_v13  ;;  %v7433_v19 = vcombine.low %v3418_v59, %v3422_v60  ;;  %v7311_v54 = vcombine.low %v3297_v3, %v3301_v6  ;;  %v3329_v60 = vld [vmem:[%s11536_s4 + $0x140] sm:$0xff]  ;;  %v3299_v12 = vld [vmem:[%s11536_s4 + $0x50] sm:$0xff] }
 0x51d   : > { %v3188_v30 = vmax.f32 %v3060_v23, 0.0  ;;  %v3187_v31 = vmax.f32 %v3059_v25, 0.0  ;;  %4914 = vmatpush1.bf16.msra.mxu1 %v3557_v20  ;;  %v2769_v18 = vld [vmem:[#allocation2 + $0x3c0] sm:$0xff]  ;;  %v7442_v20 = vcombine.high %v3426_v14, %v3430_v16  ;;  %v3305_v23 = vld [vmem:[%s11536_s4 + $0x80] sm:$0xff]  ;;  %v3303_v13 = vld [vmem:[%s11536_s4 + $0x70] sm:$0xff] }
 0x51e   : > { %v2836_v36 = vpop.xlane.xlu1 %2835  ;;  %v2834_v38 = vpop.xlane.xlu0 %2833  ;;  %4915 = vmatprep.subr.bf16.mxu1 %v9009_v37  ;;  %v3309_v25 = vld [vmem:[%s11536_s4 + $0xa0] sm:$0xff] }
 0x51f   : > { %v3558_v4 = vpack.c.bf16 %v3188_v30, %v3187_v31  ;;  %v3062_v5 = vadd.f32 %v2836_v36, %v2438_v28  ;;  %v3061_v9 = vadd.f32 %v2834_v38, %v2437_v29  ;;  %3019 = vmax.xlane.f32.xlu1 %v2770_v17  ;;  %v2774_v28 = vld [vmem:[#allocation2 + $0x3e8] sm:$0xff]  ;;  %v2773_v29 = vld [vmem:[#allocation2 + $0x3e0] sm:$0xff]  ;;  %v7450_v30 = vcombine.high %v3434_v26, %v3438_v27  ;;  %v3313_v31 = vld [vmem:[%s11536_s4 + $0xc0] sm:$0xff] }
 0x520   : > { %3017 = vmax.xlane.f32.xlu0 %v2769_v18  ;;  %v7319_v36 = vcombine.low %v3305_v23, %v3309_v25  ;;  %v2776_v38 = vld [vmem:[#allocation2 + $0x3f8] sm:$0xff] }
 0x521   : > { %v3190_v42 = vmax.f32 %v3062_v5, 0.0  ;;  %v3189_v43 = vmax.f32 %v3061_v9, 0.0  ;;  %5323 = vmatmul.mubr.bf16.gmra.mrb[56].mxu0 %v7417_v34  ;;  %4916 = vmatpush1.bf16.msra.mxu1 %v3558_v4  ;;  %v3317_v34 = vld [vmem:[%s11536_s4 + $0xe0] sm:$0xff]  ;;  %v3442_v4 = vld [vmem:[%s11536_s4 + $0x4c8] sm:$0xff] }
 0x522   : > { %v2840_v49 = vpop.xlane.xlu1 %2839  ;;  %v2838_v50 = vpop.xlane.xlu0 %2837  ;;  %4917 = vmatprep.subr.bf16.mxu1 %v9009_v37  ;;  %5330 = vmatprep.mubr.bf16.mxu0 %v7426_v39  ;;  %v2775_v39 = vld [vmem:[#allocation2 + $0x3f0] sm:$0xff]  ;;  %v3446_v5 = vld [vmem:[%s11536_s4 + $0x4e8] sm:$0xff]  ;;  %v7327_v44 = vcombine.low %v3313_v31, %v3317_v34 }
 0x523   : > { %v3559_v51 = vpack.c.bf16 %v3190_v42, %v3189_v43  ;;  %v3064_v52 = vadd.f32 %v2840_v49, %v2440_v40  ;;  %v3063_v57 = vadd.f32 %v2838_v50, %v2439_v41  ;;  %3023 = vmax.xlane.f32.xlu1 %v2772_v55  ;;  %v7458_v41 = vcombine.high %v3442_v4, %v3446_v5  ;;  %v3321_v42 = vld [vmem:[%s11536_s4 + $0x100] sm:$0xff]  ;;  %v3291_v50 = vld [vmem:[%s11536_s4 + $0x10] sm:$0xff] }
 0x524   : > { %v3325_v43 = vld [vmem:[%s11536_s4 + $0x120] sm:$0xff] }
 0x525   : > { %v3192_v61 = vmax.f32 %v3064_v52, 0.0  ;;  %v3191_v0 = vmax.f32 %v3063_v57, 0.0  ;;  %4918 = vmatpush1.bf16.msra.mxu1 %v3559_v51  ;;  %v7336_v45 = vcombine.high %v3321_v42, %v3325_v43  ;;  %v3295_v51 = vld [vmem:[%s11536_s4 + $0x30] sm:$0xff]  ;;  %v2506_v52 = vld [vmem:[%s11539_s7 + $0x3c8] sm:$0xff]  ;;  %v7457_v57 = vcombine.low %v3442_v4, %v3446_v5  ;;  %v3341_v55 = vld [vmem:[%s11536_s4 + $0x1a0] sm:$0xff] }
 0x526   : > { %4919 = vmatprep.subr.bf16.mxu1 %v9009_v37  ;;  %v2972_v9 = vpop.xlane.xlu1 %2971  ;;  %v2970_v40 = vpop.xlane.xlu0 %2969  ;;  %v7308_v59 = vcombine.high %v3291_v50, %v3295_v51  ;;  %v7335_v3 = vcombine.low %v3321_v42, %v3325_v43 }
 0x527   : > { %v3560_v10 = vpack.c.bf16 %v3192_v61, %v3191_v0  ;;  %3027 = vmax.xlane.f32.xlu1 %v2774_v28  ;;  %v3333_v61 = vld [vmem:[%s11536_s4 + $0x160] sm:$0xff]  ;;  %v3130_v0 = vadd.f32 %v2972_v9, %v2506_v52  ;;  %v2514_v9 = vld [vmem:[%s11539_s7 + $0x408] sm:$0xff] }
 0x529   : > { %5331 = vmatmul.mubr.bf16.gmra.mrb[60].mxu0 %v7425_v1  ;;  %4920 = vmatpush1.bf16.msra.mxu1 %v3560_v10 }
 0x52a   : > { %8213 = vmatprep.subr.bf16.mxu1 %v9009_v37  ;;  %5338 = vmatprep.mubr.bf16.mxu0 %v7434_v2  ;;  %v2974_v49 = vpop.xlane.xlu0 %2973  ;;  %v2508_v2 = vld [vmem:[%s11539_s7 + $0x3d8] sm:$0xff] }
 0x52b   : > { %3031 = vmax.xlane.f32.xlu1 %v2776_v38  ;;  %v3311_v38 = vld [vmem:[%s11536_s4 + $0xb0] sm:$0xff] }
 0x52c   : > { %4922 = vmatmul.mubr.bf16.vlgmr.msra.gmra.mrb[0].mxu1 %v7303_v62  ;;  %v2771_v62 = vld [vmem:[#allocation2 + $0x3d0] sm:$0xff] }
 0x52d   : > { %8229 = vmatpush1.bf16.msra.mxu1 %v9457_v63  ;;  %4929 = vmatprep.mubr.bf16.mxu1 %v7312_v11  ;;  %v7320_v63 = vcombine.high %v3305_v23, %v3309_v25  ;;  %v7344_v11 = vcombine.high %v3329_v60, %v3333_v61  ;;  %v7316_v23 = vcombine.high %v3299_v12, %v3303_v13 }
 0x52e   : > { %8214 = vmatprep.subr.bf16.mxu1 %v9009_v37  ;;  %3021 = vmax.xlane.f32.xlu0 %v2771_v62  ;;  %v2978_v10 = vpop.xlane.xlu0 %2977 }
 0x531   : > { %5339 = vmatmul.mubr.bf16.gmra.mrb[64].mxu0 %v7433_v19  ;;  %8230 = vmatpush1.bf16.msra.mxu1 %v9467_v15  ;;  %v7441_v15 = vcombine.low %v3426_v14, %v3430_v16  ;;  %v3258_v14 = vmax.f32 %v3130_v0, 0.0  ;;  %v2509_v19 = vld [vmem:[%s11539_s7 + $0x3e0] sm:$0xff] }
 0x532   : > { %8215 = vmatprep.subr.bf16.mxu1 %v9009_v37  ;;  %5346 = vmatprep.mubr.bf16.mxu0 %v7442_v20  ;;  %v7307_v20 = vcombine.low %v3291_v50, %v3295_v51 }
 0x533   : > { %3025 = vmax.xlane.f32.xlu0 %v2773_v29  ;;  %v7343_v29 = vcombine.low %v3329_v60, %v3333_v61 }
 0x534   : > { %4930 = vmatmul.mubr.bf16.gmra.mrb[4].mxu1 %v7311_v54  ;;  %v3133_v54 = vadd.f32 %v2978_v10, %v2509_v19 }
 0x535   : > { %8231 = vmatpush1.bf16.msra.mxu1 %v9476_v24  ;;  %4937 = vmatprep.mubr.bf16.mxu1 %v7320_v63  ;;  %v7328_v24 = vcombine.high %v3313_v31, %v3317_v34  ;;  %v3337_v63 = vld [vmem:[%s11536_s4 + $0x180] sm:$0xff] }
 0x536   : > { %8216 = vmatprep.subr.bf16.mxu1 %v9009_v37  ;;  %v7352_v31 = vcombine.high %v3337_v63, %v3341_v55 }
 0x537   : > { %3029 = vmax.xlane.f32.xlu0 %v2775_v39 }
 0x539   : > { %5347 = vmatmul.mubr.bf16.gmra.mrb[68].mxu0 %v7441_v15  ;;  %8232 = vmatpush1.bf16.msra.mxu1 %v9486_v35  ;;  %v7449_v35 = vcombine.low %v3434_v26, %v3438_v27  ;;  %v2982_v26 = vpop.xlane.xlu0 %2981  ;;  %v2512_v15 = vld [vmem:[%s11539_s7 + $0x3f8] sm:$0xff] }
 0x53a   : > { %8217 = vmatprep.subr.bf16.mxu1 %v9009_v37  ;;  %5354 = vmatprep.mubr.bf16.mxu0 %v7450_v30  ;;  %v2511_v30 = vld [vmem:[%s11539_s7 + $0x3f0] sm:$0xff] }
 0x53b   : > { %v3135_v5 = vadd.f32 %v2982_v26, %v2511_v30 }
 0x53c   : > { %4938 = vmatmul.mubr.bf16.gmra.mrb[8].mxu1 %v7319_v36  ;;  %v3261_v36 = vmax.f32 %v3133_v54, 0.0 }
 0x53d   : > { %8233 = vmatpush1.bf16.msra.mxu1 %v9496_v47  ;;  %4945 = vmatprep.mubr.bf16.mxu1 %v7328_v24  ;;  %v2976_v47 = vpop.xlane.xlu1 %2975  ;;  %v3307_v24 = vld [vmem:[%s11536_s4 + $0x90] sm:$0xff] }
 0x53e   : > { %8218 = vmatprep.subr.bf16.mxu1 %v9009_v37  ;;  %v3132_v17 = vadd.f32 %v2976_v47, %v2508_v2  ;;  %v7324_v42 = vcombine.high %v3307_v24, %v3311_v38  ;;  %v3357_v2 = vld [vmem:[%s11536_s4 + $0x220] sm:$0xff] }
 0x540   : > { %v3260_v28 = vmax.f32 %v3132_v17, 0.0  ;;  %v3327_v17 = vld [vmem:[%s11536_s4 + $0x130] sm:$0xff] }
 0x541   : > { %5355 = vmatmul.mubr.bf16.gmra.mrb[72].mxu0 %v7449_v35  ;;  %8234 = vmatpush1.bf16.msra.mxu1 %v9506_v58  ;;  %v2505_v58 = vld [vmem:[%s11539_s7 + $0x3c0] sm:$0xff]  ;;  %v2980_v6 = vpop.xlane.xlu1 %2979 }
 0x542   : > { %8219 = vmatprep.subr.bf16.mxu1 %v9009_v37  ;;  %5362 = vmatprep.mubr.bf16.mxu0 %v7458_v41  ;;  %v3129_v1 = vadd.f32 %v2970_v40, %v2505_v58  ;;  %v2986_v40 = vpop.xlane.xlu0 %2985  ;;  %v2513_v35 = vld [vmem:[%s11539_s7 + $0x400] sm:$0xff]  ;;  %v7315_v41 = vcombine.low %v3299_v12, %v3303_v13  ;;  %v3315_v58 = vld [vmem:[%s11536_s4 + $0xd0] sm:$0xff] }
 0x543   : > { %v3137_v51 = vadd.f32 %v2986_v40, %v2513_v35  ;;  %v3381_v40 = vld [vmem:[%s11536_s4 + $0x2e0] sm:$0xff] }
 0x544   : > { %4946 = vmatmul.mubr.bf16.gmra.mrb[12].mxu1 %v7327_v44  ;;  %v3257_v16 = vmax.f32 %v3129_v1, 0.0  ;;  %v3345_v44 = vld [vmem:[%s11536_s4 + $0x1c0] sm:$0xff] }
 0x545   : > { %8235 = vmatpush1.bf16.msra.mxu1 %v9516_v8  ;;  %4953 = vmatprep.mubr.bf16.mxu1 %v7336_v45  ;;  %v2507_v8 = vld [vmem:[%s11539_s7 + $0x3d0] sm:$0xff]  ;;  %v2984_v62 = vpop.xlane.xlu1 %2983  ;;  %v3349_v45 = vld [vmem:[%s11536_s4 + $0x1e0] sm:$0xff]  ;;  %v3265_v61 = vmax.f32 %v3137_v51, 0.0  ;;  %v2520_v51 = vld [vmem:[%s11539_s7 + $0x438] sm:$0xff] }
 0x546   : > { %8220 = vmatprep.subr.bf16.mxu1 %v9009_v37  ;;  %v3131_v18 = vadd.f32 %v2974_v49, %v2507_v8  ;;  %v3593_v27 = vpack.c.bf16 %v3258_v14, %v3257_v16  ;;  %v3136_v4 = vadd.f32 %v2984_v62, %v2512_v15  ;;  %v3263_v49 = vmax.f32 %v3135_v5, 0.0  ;;  %v3353_v1 = vld [vmem:[%s11536_s4 + $0x200] sm:$0xff]  ;;  %v2516_v8 = vld [vmem:[%s11539_s7 + $0x418] sm:$0xff]  ;;  %v3323_v16 = vld [vmem:[%s11536_s4 + $0x110] sm:$0xff] }
 0x547   : > { %v7360_v52 = vcombine.high %v3345_v44, %v3349_v45  ;;  %v7340_v19 = vcombine.high %v3323_v16, %v3327_v17  ;;  %v7367_v54 = vcombine.low %v3353_v1, %v3357_v2  ;;  %v7339_v62 = vcombine.low %v3323_v16, %v3327_v17  ;;  %v3401_v17 = vld [vmem:[%s11536_s4 + $0x380] sm:$0xff] }
 0x548   : > { %v3264_v47 = vmax.f32 %v3136_v4, 0.0 }
 0x549   : > { %5363 = vmatmul.mubr.bf16.gmra.mrb[76].mxu0 %v7457_v57  ;;  %8236 = vmatpush1.bf16.msra.mxu1 %v9526_v21  ;;  %v2510_v21 = vld [vmem:[%s11539_s7 + $0x3e8] sm:$0xff]  ;;  %v3319_v57 = vld [vmem:[%s11536_s4 + $0xf0] sm:$0xff] }
 0x54a   : > { %8221 = vmatprep.subr.bf16.mxu1 %v9009_v37  ;;  %5499 = vmatprep.mubr.bf16.mxu0 %v7308_v59  ;;  %v3134_v25 = vadd.f32 %v2980_v6, %v2510_v21  ;;  %v3596_v59 = vpack.c.bf16 %v3264_v47, %v3263_v49  ;;  %v7332_v0 = vcombine.high %v3315_v58, %v3319_v57  ;;  %v3385_v47 = vld [vmem:[%s11536_s4 + $0x300] sm:$0xff] }
 0x54b   : > { %v7359_v6 = vcombine.low %v3345_v44, %v3349_v45  ;;  %v3351_v44 = vld [vmem:[%s11536_s4 + $0x1f0] sm:$0xff] }
 0x54c   : > { %4954 = vmatmul.mubr.bf16.gmra.mrb[16].mxu1 %v7335_v3  ;;  %v3262_v34 = vmax.f32 %v3134_v25, 0.0 }
 0x54d   : > { %8237 = vmatpush1.bf16.msra.mxu1 %v9536_v33  ;;  %4961 = vmatprep.mubr.bf16.mxu1 %v7344_v11  ;;  %v3259_v33 = vmax.f32 %v3131_v18, 0.0  ;;  %v7368_v11 = vcombine.high %v3353_v1, %v3357_v2 }
 0x54e   : > { %8222 = vmatprep.subr.bf16.mxu1 %v9009_v37  ;;  %v3595_v43 = vpack.c.bf16 %v3262_v34, %v3261_v36 }
 0x54f   : > { %v3594_v39 = vpack.c.bf16 %v3260_v28, %v3259_v33  ;;  %v2518_v28 = vld [vmem:[%s11539_s7 + $0x428] sm:$0xff]  ;;  %v2517_v33 = vld [vmem:[%s11539_s7 + $0x420] sm:$0xff] }
 0x551   : > { %5500 = vmatmul.mubr.bf16.vlgmr.msra.gmra.mrb[0].mxu0 %v7307_v20  ;;  %8238 = vmatpush1.bf16.msra.mxu1 %v9546_v46  ;;  %v2988_v46 = vpop.xlane.xlu1 %2987  ;;  %v2990_v13 = vpop.xlane.xlu0 %2989  ;;  %v3361_v20 = vld [vmem:[%s11536_s4 + $0x240] sm:$0xff] }
 0x552   : > { %8223 = vmatprep.subr.bf16.mxu1 %v9009_v37  ;;  %5507 = vmatprep.mubr.bf16.mxu0 %v7316_v23  ;;  %v3138_v50 = vadd.f32 %v2988_v46, %v2514_v9  ;;  %v3365_v23 = vld [vmem:[%s11536_s4 + $0x260] sm:$0xff] }
 0x553   : > { %5757 = vmatpush1.bf16.msra.mxu0 %v3593_v27  ;;  %v3373_v27 = vld [vmem:[%s11536_s4 + $0x2a0] sm:$0xff] }
 0x554   : > { %5758 = vmatprep.subr.bf16.mxu0 %v9009_v37  ;;  %4962 = vmatmul.mubr.bf16.gmra.mrb[20].mxu1 %v7343_v29  ;;  %v3266_v60 = vmax.f32 %v3138_v50, 0.0  ;;  %v7375_v29 = vcombine.low %v3361_v20, %v3365_v23  ;;  %v3377_v9 = vld [vmem:[%s11536_s4 + $0x2c0] sm:$0xff] }
 0x555   : > { %8239 = vmatpush1.bf16.msra.mxu1 %v9556_v56  ;;  %4969 = vmatprep.mubr.bf16.mxu1 %v7352_v31  ;;  %v7351_v56 = vcombine.low %v3337_v63, %v3341_v55  ;;  %v2992_v10 = vpop.xlane.xlu1 %2991  ;;  %v3331_v63 = vld [vmem:[%s11536_s4 + $0x150] sm:$0xff]  ;;  %v3389_v50 = vld [vmem:[%s11536_s4 + $0x320] sm:$0xff] }
 0x556   : > { %8224 = vmatprep.subr.bf16.mxu1 %v9009_v37  ;;  %v3597_v3 = vpack.c.bf16 %v3266_v60, %v3265_v61  ;;  %v3140_v12 = vadd.f32 %v2992_v10, %v2516_v8  ;;  %v3335_v55 = vld [vmem:[%s11536_s4 + $0x170] sm:$0xff]  ;;  %v3397_v10 = vld [vmem:[%s11536_s4 + $0x360] sm:$0xff] }
 0x557   : > { %5759 = vmatpush1.bf16.msra.mxu0 %v3594_v39  ;;  %v7348_v26 = vcombine.high %v3331_v63, %v3335_v55  ;;  %v7347_v5 = vcombine.low %v3331_v63, %v3335_v55  ;;  %v3371_v55 = vld [vmem:[%s11536_s4 + $0x290] sm:$0xff] }
 0x558   : > { %5760 = vmatprep.subr.bf16.mxu0 %v9009_v37  ;;  %v3268_v18 = vmax.f32 %v3140_v12, 0.0 }
 0x559   : > { %5508 = vmatmul.mubr.bf16.gmra.mrb[4].mxu0 %v7315_v41  ;;  %8240 = vmatpush1.bf16.msra.mxu1 %v9566_v7  ;;  %v7323_v7 = vcombine.low %v3307_v24, %v3311_v38  ;;  %v3339_v24 = vld [vmem:[%s11536_s4 + $0x190] sm:$0xff] }
 0x55a   : > { %8225 = vmatprep.subr.bf16.mxu1 %v9009_v37  ;;  %5515 = vmatprep.mubr.bf16.mxu0 %v7324_v42  ;;  %v3343_v38 = vld [vmem:[%s11536_s4 + $0x1b0] sm:$0xff]  ;;  %v7392_v42 = vcombine.high %v3377_v9, %v3381_v40 }
 0x55b   : > { %5761 = vmatpush1.bf16.msra.mxu0 %v3595_v43  ;;  %v7356_v46 = vcombine.high %v3339_v24, %v3343_v38  ;;  %v3347_v43 = vld [vmem:[%s11536_s4 + $0x1d0] sm:$0xff]  ;;  %v7355_v45 = vcombine.low %v3339_v24, %v3343_v38  ;;  %v3417_v38 = vld [vmem:[%s11536_s4 + $0x400] sm:$0xff] }
 0x55c   : > { %4970 = vmatmul.mubr.bf16.gmra.mrb[24].mxu1 %v7351_v56  ;;  %5762 = vmatprep.subr.bf16.mxu0 %v9009_v37  ;;  %v7364_v49 = vcombine.high %v3347_v43, %v3351_v44  ;;  %v2519_v56 = vld [vmem:[%s11539_s7 + $0x430] sm:$0xff]  ;;  %v7363_v8 = vcombine.low %v3347_v43, %v3351_v44 }
 0x55d   : > { %8241 = vmatpush1.bf16.msra.mxu1 %v9576_v22  ;;  %4977 = vmatprep.mubr.bf16.mxu1 %v7360_v52  ;;  %v2515_v22 = vld [vmem:[%s11539_s7 + $0x410] sm:$0xff]  ;;  %v7391_v52 = vcombine.low %v3377_v9, %v3381_v40 }
 0x55e   : > { %8226 = vmatprep.subr.bf16.mxu1 %v9009_v37  ;;  %v3139_v14 = vadd.f32 %v2990_v13, %v2515_v22  ;;  %v3363_v13 = vld [vmem:[%s11536_s4 + $0x250] sm:$0xff] }
 0x55f   : > { %5763 = vmatpush1.bf16.msra.mxu0 %v3596_v59  ;;  %v7400_v59 = vcombine.high %v3385_v47, %v3389_v50  ;;  %v3387_v44 = vld [vmem:[%s11536_s4 + $0x310] sm:$0xff] }
 0x560   : > { %5764 = vmatprep.subr.bf16.mxu0 %v9009_v37  ;;  %v3267_v21 = vmax.f32 %v3139_v14, 0.0  ;;  %v3367_v14 = vld [vmem:[%s11536_s4 + $0x270] sm:$0xff] }
 0x561   : > { %5516 = vmatmul.mubr.bf16.gmra.mrb[8].mxu0 %v7323_v7  ;;  %8242 = vmatpush1.bf16.msra.mxu1 %v9586_v32  ;;  %v7331_v32 = vcombine.low %v3315_v58, %v3319_v57  ;;  %v2994_v34 = vpop.xlane.xlu0 %2993  ;;  %v3355_v7 = vld [vmem:[%s11536_s4 + $0x210] sm:$0xff] }
 0x562   : > { %8227 = vmatprep.subr.bf16.mxu1 %v9009_v37  ;;  %5523 = vmatprep.mubr.bf16.mxu0 %v7332_v0  ;;  %v3598_v25 = vpack.c.bf16 %v3268_v18, %v3267_v21  ;;  %v3141_v36 = vadd.f32 %v2994_v34, %v2517_v33  ;;  %v3359_v0 = vld [vmem:[%s11536_s4 + $0x230] sm:$0xff]  ;;  %v7380_v18 = vcombine.high %v3363_v13, %v3367_v14  ;;  %v3405_v21 = vld [vmem:[%s11536_s4 + $0x3a0] sm:$0xff] }
 0x563   : > { %5765 = vmatpush1.bf16.msra.mxu0 %v3597_v3  ;;  %v7372_v22 = vcombine.high %v3355_v7, %v3359_v0  ;;  %v7371_v16 = vcombine.low %v3355_v7, %v3359_v0  ;;  %v3379_v34 = vld [vmem:[%s11536_s4 + $0x2d0] sm:$0xff]  ;;  %v3433_v0 = vld [vmem:[%s11536_s4 + $0x480] sm:$0xff] }
 0x564   : > { %4978 = vmatmul.mubr.bf16.gmra.mrb[28].mxu1 %v7359_v6  ;;  %5766 = vmatprep.subr.bf16.mxu0 %v9009_v37  ;;  %v2996_v15 = vpop.xlane.xlu1 %2995  ;;  %v3269_v4 = vmax.f32 %v3141_v36, 0.0  ;;  %v3393_v6 = vld [vmem:[%s11536_s4 + $0x340] sm:$0xff]  ;;  %v3383_v36 = vld [vmem:[%s11536_s4 + $0x2f0] sm:$0xff] }
 0x565   : > { %8243 = vmatpush1.bf16.msra.mxu1 %v9596_v48  ;;  %4985 = vmatprep.mubr.bf16.mxu1 %v7368_v11  ;;  %v7376_v48 = vcombine.high %v3361_v20, %v3365_v23  ;;  %v3142_v31 = vadd.f32 %v2996_v15, %v2518_v28  ;;  %v7399_v11 = vcombine.low %v3385_v47, %v3389_v50  ;;  %v3413_v15 = vld [vmem:[%s11536_s4 + $0x3e0] sm:$0xff] }
 0x566   : > { %8228 = vmatprep.subr.bf16.mxu1 %v9009_v37  ;;  %v7408_v12 = vcombine.high %v3393_v6, %v3397_v10  ;;  %v7407_v20 = vcombine.low %v3393_v6, %v3397_v10  ;;  %v7395_v50 = vcombine.low %v3379_v34, %v3383_v36 }
 0x567   : > { %5767 = vmatpush1.bf16.msra.mxu0 %v3598_v25  ;;  %v3270_v39 = vmax.f32 %v3142_v31, 0.0 }
 0x568   : > { %5768 = vmatprep.subr.bf16.mxu0 %v9009_v37 }
 0x569   : > { %5524 = vmatmul.mubr.bf16.gmra.mrb[12].mxu0 %v7331_v32  ;;  %8244 = vmatpush1.bf16.msra.mxu1 %v9605_v53  ;;  %v3369_v53 = vld [vmem:[%s11536_s4 + $0x280] sm:$0xff]  ;;  %v3599_v35 = vpack.c.bf16 %v3270_v39, %v3269_v4  ;;  %v2522_v32 = vld [vmem:[%s11539_s7 + $0x448] sm:$0xff]  ;;  %v7396_v39 = vcombine.high %v3379_v34, %v3383_v36 }
 0x56a   : > { %5531 = vmatprep.mubr.bf16.mxu0 %v7340_v19  ;;  %v7384_v30 = vcombine.high %v3369_v53, %v3373_v27  ;;  %v7383_v41 = vcombine.low %v3369_v53, %v3373_v27  ;;  %v2521_v19 = vld [vmem:[%s11539_s7 + $0x440] sm:$0xff]  ;;  %v7379_v27 = vcombine.low %v3363_v13, %v3367_v14  ;;  %v3403_v14 = vld [vmem:[%s11536_s4 + $0x390] sm:$0xff] }
 0x56b   : > { %5769 = vmatpush1.bf16.msra.mxu0 %v3599_v35  ;;  %v3421_v4 = vld [vmem:[%s11536_s4 + $0x420] sm:$0xff] }
 0x56c   : > { %4986 = vmatmul.mubr.bf16.gmra.mrb[32].mxu1 %v7367_v54  ;;  %5770 = vmatprep.subr.bf16.mxu0 %v9009_v37  ;;  %v7416_v54 = vcombine.high %v3401_v17, %v3405_v21 }
 0x56d   : > { %4993 = vmatprep.mubr.bf16.mxu1 %v7376_v48 }
 0x571   : > { %5532 = vmatmul.mubr.bf16.gmra.mrb[16].mxu0 %v7339_v62  ;;  %v3000_v58 = vpop.xlane.xlu1 %2999  ;;  %v2998_v57 = vpop.xlane.xlu0 %2997  ;;  %v3375_v62 = vld [vmem:[%s11536_s4 + $0x2b0] sm:$0xff] }
 0x572   : > { %5539 = vmatprep.mubr.bf16.mxu0 %v7348_v26  ;;  %v3144_v60 = vadd.f32 %v3000_v58, %v2520_v51  ;;  %v3143_v61 = vadd.f32 %v2998_v57, %v2519_v56  ;;  %v7388_v33 = vcombine.high %v3371_v55, %v3375_v62  ;;  %v7387_v24 = vcombine.low %v3371_v55, %v3375_v62  ;;  %v3429_v58 = vld [vmem:[%s11536_s4 + $0x460] sm:$0xff] }
 0x573   : > { %v7431_v57 = vcombine.low %v3417_v38, %v3421_v4 }
 0x574   : > { %4994 = vmatmul.mubr.bf16.gmra.mrb[36].mxu1 %v7375_v29  ;;  %v3272_v1 = vmax.f32 %v3144_v60, 0.0  ;;  %v3271_v2 = vmax.f32 %v3143_v61, 0.0  ;;  %v3409_v29 = vld [vmem:[%s11536_s4 + $0x3c0] sm:$0xff]  ;;  %v3395_v60 = vld [vmem:[%s11536_s4 + $0x350] sm:$0xff] }
 0x575   : > { %5001 = vmatprep.mubr.bf16.mxu1 %v7384_v30  ;;  %v7415_v30 = vcombine.low %v3401_v17, %v3405_v21  ;;  %v7424_v31 = vcombine.high %v3409_v29, %v3413_v15  ;;  %v7423_v9 = vcombine.low %v3409_v29, %v3413_v15  ;;  %v3399_v61 = vld [vmem:[%s11536_s4 + $0x370] sm:$0xff] }
 0x576   : > { %v3600_v3 = vpack.c.bf16 %v3272_v1, %v3271_v2  ;;  %v7412_v1 = vcombine.high %v3395_v60, %v3399_v61  ;;  %v3437_v2 = vld [vmem:[%s11536_s4 + $0x4a0] sm:$0xff]  ;;  %v7411_v21 = vcombine.low %v3395_v60, %v3399_v61  ;;  %v3415_v29 = vld [vmem:[%s11536_s4 + $0x3f0] sm:$0xff] }
 0x578   : > { %5771 = vmatpush1.bf16.msra.mxu0 %v3600_v3  ;;  %v2525_v3 = vld [vmem:[%s11539_s7 + $0x460] sm:$0xff] }
 0x579   : > { %5540 = vmatmul.mubr.bf16.gmra.mrb[20].mxu0 %v7347_v5  ;;  %5772 = vmatprep.subr.bf16.mxu0 %v9009_v37  ;;  %v2524_v5 = vld [vmem:[%s11539_s7 + $0x458] sm:$0xff] }
 0x57a   : > { %5547 = vmatprep.mubr.bf16.mxu0 %v7356_v46  ;;  %v2523_v46 = vld [vmem:[%s11539_s7 + $0x450] sm:$0xff] }
 0x57c   : > { %5002 = vmatmul.mubr.bf16.gmra.mrb[40].mxu1 %v7383_v41  ;;  %v7432_v41 = vcombine.high %v3417_v38, %v3421_v4 }
 0x57d   : > { %5009 = vmatprep.mubr.bf16.mxu1 %v7392_v42 }
 0x581   : > { %5548 = vmatmul.mubr.bf16.gmra.mrb[24].mxu0 %v7355_v45  ;;  %v3002_v25 = vpop.xlane.xlu0 %3001  ;;  %v3391_v45 = vld [vmem:[%s11536_s4 + $0x330] sm:$0xff] }
 0x582   : > { %5555 = vmatprep.mubr.bf16.mxu0 %v7364_v49  ;;  %v3004_v23 = vpop.xlane.xlu1 %3003  ;;  %v3145_v63 = vadd.f32 %v3002_v25, %v2521_v19  ;;  %v7404_v56 = vcombine.high %v3387_v44, %v3391_v45  ;;  %v7403_v7 = vcombine.low %v3387_v44, %v3391_v45  ;;  %v2528_v25 = vld [vmem:[%s11539_s7 + $0x478] sm:$0xff] }
 0x583   : > { %v3146_v48 = vadd.f32 %v3004_v23, %v2522_v32  ;;  %v3441_v32 = vld [vmem:[%s11536_s4 + $0x4c0] sm:$0xff] }
 0x584   : > { %5010 = vmatmul.mubr.bf16.gmra.mrb[44].mxu1 %v7391_v52  ;;  %v3273_v53 = vmax.f32 %v3145_v63, 0.0  ;;  %v3425_v52 = vld [vmem:[%s11536_s4 + $0x440] sm:$0xff] }
 0x585   : > { %5017 = vmatprep.mubr.bf16.mxu1 %v7400_v59  ;;  %v3274_v26 = vmax.f32 %v3146_v48, 0.0  ;;  %v7440_v59 = vcombine.high %v3425_v52, %v3429_v58  ;;  %v3445_v23 = vld [vmem:[%s11536_s4 + $0x4e0] sm:$0xff]  ;;  %v7447_v48 = vcombine.low %v3433_v0, %v3437_v2 }
 0x586   : > { %v7456_v62 = vcombine.high %v3441_v32, %v3445_v23 }
 0x587   : > { %v3601_v28 = vpack.c.bf16 %v3274_v26, %v3273_v53 }
 0x589   : > { %5556 = vmatmul.mubr.bf16.gmra.mrb[28].mxu0 %v7363_v8  ;;  %v2526_v8 = vld [vmem:[%s11539_s7 + $0x468] sm:$0xff] }
 0x58a   : > { %5563 = vmatprep.mubr.bf16.mxu0 %v7372_v22  ;;  %5773 = vmatpush1.bf16.msra.mxu0 %v3601_v28  ;;  %v7439_v22 = vcombine.low %v3425_v52, %v3429_v58  ;;  %v2529_v28 = vld [vmem:[%s11539_s7 + $0x480] sm:$0xff]  ;;  %v3419_v52 = vld [vmem:[%s11536_s4 + $0x410] sm:$0xff] }
 0x58b   : > { %5774 = vmatprep.subr.bf16.mxu0 %v9009_v37  ;;  %v3423_v58 = vld [vmem:[%s11536_s4 + $0x430] sm:$0xff] }
 0x58c   : > { %5018 = vmatmul.mubr.bf16.gmra.mrb[48].mxu1 %v7399_v11  ;;  %v7448_v11 = vcombine.high %v3433_v0, %v3437_v2  ;;  %v3457_v0 = vld [vmem:[%s11536_s4 + $0x540] sm:$0xff] }
 0x58d   : > { %5025 = vmatprep.mubr.bf16.mxu1 %v7408_v12 }
 0x591   : > { %5564 = vmatmul.mubr.bf16.gmra.mrb[32].mxu0 %v7371_v16  ;;  %v3008_v40 = vpop.xlane.xlu1 %3007  ;;  %v3407_v16 = vld [vmem:[%s11536_s4 + $0x3b0] sm:$0xff] }
 0x592   : > { %5571 = vmatprep.mubr.bf16.mxu0 %v7380_v18  ;;  %v3006_v35 = vpop.xlane.xlu0 %3005  ;;  %v3148_v42 = vadd.f32 %v3008_v40, %v2524_v5  ;;  %v7419_v36 = vcombine.low %v3403_v14, %v3407_v16  ;;  %v2531_v40 = vld [vmem:[%s11539_s7 + $0x490] sm:$0xff] }
 0x593   : > { %v3147_v43 = vadd.f32 %v3006_v35, %v2523_v46  ;;  %v3453_v46 = vld [vmem:[%s11536_s4 + $0x520] sm:$0xff] }
 0x594   : > { %5026 = vmatmul.mubr.bf16.gmra.mrb[52].mxu1 %v7407_v20  ;;  %v3276_v47 = vmax.f32 %v3148_v42, 0.0  ;;  %v7420_v20 = vcombine.high %v3403_v14, %v3407_v16  ;;  %v7455_v42 = vcombine.low %v3441_v32, %v3445_v23 }
 0x595   : > { %5033 = vmatprep.mubr.bf16.mxu1 %v7416_v54  ;;  %v3275_v49 = vmax.f32 %v3147_v43, 0.0  ;;  %v2527_v54 = vld [vmem:[%s11539_s7 + $0x470] sm:$0xff] }
 0x597   : > { %v3602_v51 = vpack.c.bf16 %v3276_v47, %v3275_v49 }
 0x599   : > { %5572 = vmatmul.mubr.bf16.gmra.mrb[36].mxu0 %v7379_v27  ;;  %v2530_v27 = vld [vmem:[%s11539_s7 + $0x488] sm:$0xff] }
 0x59a   : > { %5579 = vmatprep.mubr.bf16.mxu0 %v7388_v33  ;;  %5775 = vmatpush1.bf16.msra.mxu0 %v3602_v51  ;;  %v3411_v33 = vld [vmem:[%s11536_s4 + $0x3d0] sm:$0xff]  ;;  %v2534_v51 = vld [vmem:[%s11539_s7 + $0x4a8] sm:$0xff] }
 0x59b   : > { %5776 = vmatprep.subr.bf16.mxu0 %v9009_v37  ;;  %v7428_v5 = vcombine.high %v3411_v33, %v3415_v29 }
 0x59c   : > { %5034 = vmatmul.mubr.bf16.gmra.mrb[56].mxu1 %v7415_v30 }
 0x59d   : > { %5041 = vmatprep.mubr.bf16.mxu1 %v7424_v31 }
 0x5a1   : > { %5580 = vmatmul.mubr.bf16.gmra.mrb[40].mxu0 %v7387_v24  ;;  %v3010_v10 = vpop.xlane.xlu0 %3009  ;;  %v3449_v24 = vld [vmem:[%s11536_s4 + $0x500] sm:$0xff] }
 0x5a2   : > { %5587 = vmatprep.mubr.bf16.mxu0 %v7396_v39  ;;  %v3012_v6 = vpop.xlane.xlu1 %3011  ;;  %v3149_v13 = vadd.f32 %v3010_v10, %v2525_v3  ;;  %v7464_v45 = vcombine.high %v3449_v24, %v3453_v46  ;;  %v7436_v3 = vcombine.high %v3419_v52, %v3423_v58  ;;  %v2535_v10 = vld [vmem:[%s11539_s7 + $0x4b0] sm:$0xff] }
 0x5a3   : > { %v3150_v12 = vadd.f32 %v3012_v6, %v2526_v8  ;;  %v2536_v6 = vld [vmem:[%s11539_s7 + $0x4b8] sm:$0xff] }
 0x5a4   : > { %5042 = vmatmul.mubr.bf16.gmra.mrb[60].mxu1 %v7423_v9  ;;  %v3277_v18 = vmax.f32 %v3149_v13, 0.0  ;;  %v2532_v9 = vld [vmem:[%s11539_s7 + $0x498] sm:$0xff]  ;;  %v7463_v13 = vcombine.low %v3449_v24, %v3453_v46 }
 0x5a5   : > { %5049 = vmatprep.mubr.bf16.mxu1 %v7432_v41  ;;  %v3278_v17 = vmax.f32 %v3150_v12, 0.0 }
 0x5a7   : > { %v3603_v19 = vpack.c.bf16 %v3278_v17, %v3277_v18 }
 0x5a8   : > { %v3016_v63 = vpop.xlane.xlu1 %3015 }
 0x5a9   : > { %5588 = vmatmul.mubr.bf16.gmra.mrb[44].mxu0 %v7395_v50  ;;  %v3014_v55 = vpop.xlane.xlu0 %3013  ;;  %v3152_v26 = vadd.f32 %v3016_v63, %v2528_v25 }
 0x5aa   : > { %5595 = vmatprep.mubr.bf16.mxu0 %v7404_v56  ;;  %5777 = vmatpush1.bf16.msra.mxu0 %v3603_v19  ;;  %v3151_v53 = vadd.f32 %v3014_v55, %v2527_v54  ;;  %v2533_v56 = vld [vmem:[%s11539_s7 + $0x4a0] sm:$0xff]  ;;  %v3427_v19 = vld [vmem:[%s11536_s4 + $0x450] sm:$0xff]  ;;  %v7435_v54 = vcombine.low %v3419_v52, %v3423_v58 }
 0x5ab   : > { %5778 = vmatprep.subr.bf16.mxu0 %v9009_v37  ;;  %v3280_v15 = vmax.f32 %v3152_v26, 0.0  ;;  %v3465_v55 = vld [vmem:[%s11536_s4 + $0x580] sm:$0xff] }
 0x5ac   : > { %5050 = vmatmul.mubr.bf16.gmra.mrb[64].mxu1 %v7431_v57  ;;  %v3279_v30 = vmax.f32 %v3151_v53, 0.0  ;;  %v3020_v31 = vpop.xlane.xlu1 %3019  ;;  %v3501_v52 = vld [vmem:[%s11536_s4 + $0x6a0] sm:$0xff] }
 0x5ad   : > { %5057 = vmatprep.mubr.bf16.mxu1 %v7440_v59  ;;  %v3018_v34 = vpop.xlane.xlu0 %3017  ;;  %v3154_v39 = vadd.f32 %v3020_v31, %v2530_v27  ;;  %v3439_v27 = vld [vmem:[%s11536_s4 + $0x4b0] sm:$0xff] }
 0x5ae   : > { %v3604_v38 = vpack.c.bf16 %v3280_v15, %v3279_v30  ;;  %v3153_v4 = vadd.f32 %v3018_v34, %v2529_v28  ;;  %v3477_v15 = vld [vmem:[%s11536_s4 + $0x5e0] sm:$0xff]  ;;  %v3443_v34 = vld [vmem:[%s11536_s4 + $0x4d0] sm:$0xff] }
 0x5af   : > { %v3282_v35 = vmax.f32 %v3154_v39, 0.0  ;;  %v3481_v39 = vld [vmem:[%s11536_s4 + $0x600] sm:$0xff] }
 0x5b0   : > { %v3281_v41 = vmax.f32 %v3153_v4, 0.0  ;;  %5779 = vmatpush1.bf16.msra.mxu0 %v3604_v38  ;;  %v3024_v43 = vpop.xlane.xlu1 %3023  ;;  %v3485_v4 = vld [vmem:[%s11536_s4 + $0x620] sm:$0xff] }
 0x5b1   : > { %5596 = vmatmul.mubr.bf16.gmra.mrb[48].mxu0 %v7403_v7  ;;  %5780 = vmatprep.subr.bf16.mxu0 %v9009_v37  ;;  %v3156_v49 = vadd.f32 %v3024_v43, %v2532_v9  ;;  %v7427_v7 = vcombine.low %v3411_v33, %v3415_v29  ;;  %v3473_v29 = vld [vmem:[%s11536_s4 + $0x5c0] sm:$0xff]  ;;  %v7496_v46 = vcombine.high %v3481_v39, %v3485_v4  ;;  %v3451_v9 = vld [vmem:[%s11536_s4 + $0x510] sm:$0xff] }
 0x5b2   : > { %5603 = vmatprep.mubr.bf16.mxu0 %v7412_v1  ;;  %v3605_v47 = vpack.c.bf16 %v3282_v35, %v3281_v41  ;;  %v7488_v31 = vcombine.high %v3473_v29, %v3477_v15  ;;  %v3493_v43 = vld [vmem:[%s11536_s4 + $0x660] sm:$0xff] }
 0x5b3   : > { %v3284_v57 = vmax.f32 %v3156_v49, 0.0  ;;  %v3463_v49 = vld [vmem:[%s11536_s4 + $0x570] sm:$0xff] }
 0x5b4   : > { %5058 = vmatmul.mubr.bf16.gmra.mrb[68].mxu1 %v7439_v22  ;;  %5781 = vmatpush1.bf16.msra.mxu0 %v3605_v47  ;;  %v3028_v60 = vpop.xlane.xlu1 %3027  ;;  %v3461_v22 = vld [vmem:[%s11536_s4 + $0x560] sm:$0xff]  ;;  %v3459_v47 = vld [vmem:[%s11536_s4 + $0x550] sm:$0xff] }
 0x5b5   : > { %5065 = vmatprep.mubr.bf16.mxu1 %v7448_v11  ;;  %5782 = vmatprep.subr.bf16.mxu0 %v9009_v37  ;;  %v3158_v2 = vadd.f32 %v3028_v60, %v2534_v51  ;;  %v7472_v17 = vcombine.high %v3457_v0, %v3461_v22  ;;  %v7471_v26 = vcombine.low %v3457_v0, %v3461_v22  ;;  %v3471_v60 = vld [vmem:[%s11536_s4 + $0x5b0] sm:$0xff]  ;;  %v3505_v0 = vld [vmem:[%s11536_s4 + $0x6c0] sm:$0xff] }
 0x5b6   : > { %v7476_v51 = vcombine.high %v3459_v47, %v3463_v49  ;;  %v3479_v22 = vld [vmem:[%s11536_s4 + $0x5f0] sm:$0xff] }
 0x5b7   : > { %v3286_v11 = vmax.f32 %v3158_v2, 0.0 }
 0x5b8   : > { %v3032_v14 = vpop.xlane.xlu1 %3031 }
 0x5b9   : > { %5604 = vmatmul.mubr.bf16.gmra.mrb[52].mxu0 %v7411_v21  ;;  %v3160_v21 = vadd.f32 %v3032_v14, %v2536_v6 }
 0x5ba   : > { %5611 = vmatprep.mubr.bf16.mxu0 %v7420_v20  ;;  %v3431_v20 = vld [vmem:[%s11536_s4 + $0x470] sm:$0xff] }
 0x5bb   : > { %v3022_v44 = vpop.xlane.xlu0 %3021  ;;  %v3288_v23 = vmax.f32 %v3160_v21, 0.0  ;;  %v7444_v63 = vcombine.high %v3427_v19, %v3431_v20  ;;  %v7443_v28 = vcombine.low %v3427_v19, %v3431_v20  ;;  %v3525_v19 = vld [vmem:[%s11536_s4 + $0x760] sm:$0xff] }
 0x5bc   : > { %5066 = vmatmul.mubr.bf16.gmra.mrb[72].mxu1 %v7447_v48  ;;  %v3155_v50 = vadd.f32 %v3022_v44, %v2531_v40  ;;  %v3455_v40 = vld [vmem:[%s11536_s4 + $0x530] sm:$0xff]  ;;  %v7495_v44 = vcombine.low %v3481_v39, %v3485_v4  ;;  %v3450_v39 = vld [vmem:[%s11536_s4 + $0x508] sm:$0xff] }
 0x5bd   : > { %5073 = vmatprep.mubr.bf16.mxu1 %v7456_v62  ;;  %v3469_v62 = vld [vmem:[%s11536_s4 + $0x5a0] sm:$0xff]  ;;  %v7468_v41 = vcombine.high %v3451_v9, %v3455_v40  ;;  %v3454_v4 = vld [vmem:[%s11536_s4 + $0x528] sm:$0xff] }
 0x5be   : > { %v3283_v59 = vmax.f32 %v3155_v50, 0.0  ;;  %v7480_v53 = vcombine.high %v3465_v55, %v3469_v62  ;;  %v7479_v30 = vcombine.low %v3465_v55, %v3469_v62  ;;  %v7467_v50 = vcombine.low %v3451_v9, %v3455_v40  ;;  %v3529_v55 = vld [vmem:[%s11536_s4 + $0x780] sm:$0xff]  ;;  %v3515_v9 = vld [vmem:[%s11536_s4 + $0x710] sm:$0xff] }
 0x5bf   : > { %v3533_v62 = vld [vmem:[%s11536_s4 + $0x7a0] sm:$0xff]  ;;  %v3519_v40 = vld [vmem:[%s11536_s4 + $0x730] sm:$0xff] }
 0x5c0   : > { %v3026_v61 = vpop.xlane.xlu0 %3025  ;;  %v3606_v1 = vpack.c.bf16 %v3284_v57, %v3283_v59  ;;  %v3467_v59 = vld [vmem:[%s11536_s4 + $0x590] sm:$0xff] }
 0x5c1   : > { %5612 = vmatmul.mubr.bf16.gmra.mrb[56].mxu0 %v7419_v36  ;;  %v3157_v8 = vadd.f32 %v3026_v61, %v2533_v56  ;;  %v3447_v36 = vld [vmem:[%s11536_s4 + $0x4f0] sm:$0xff]  ;;  %v3497_v56 = vld [vmem:[%s11536_s4 + $0x680] sm:$0xff]  ;;  %v7475_v61 = vcombine.low %v3459_v47, %v3463_v49  ;;  %v7483_v6 = vcombine.low %v3467_v59, %v3471_v60 }
 0x5c2   : > { %5619 = vmatprep.mubr.bf16.mxu0 %v7428_v5  ;;  %5783 = vmatpush1.bf16.msra.mxu0 %v3606_v1  ;;  %v7460_v38 = vcombine.high %v3443_v34, %v3447_v36  ;;  %v7487_v5 = vcombine.low %v3473_v29, %v3477_v15  ;;  %v7459_v35 = vcombine.low %v3443_v34, %v3447_v36  ;;  %v3509_v1 = vld [vmem:[%s11536_s4 + $0x6e0] sm:$0xff]  ;;  %v3507_v34 = vld [vmem:[%s11536_s4 + $0x6d0] sm:$0xff] }
 0x5c3   : > { %v3285_v12 = vmax.f32 %v3157_v8, 0.0  ;;  %5784 = vmatprep.subr.bf16.mxu0 %v9009_v37  ;;  %v7512_v57 = vcombine.high %v3497_v56, %v3501_v52  ;;  %v7511_v2 = vcombine.low %v3497_v56, %v3501_v52  ;;  %v7520_v8 = vcombine.high %v3505_v0, %v3509_v1  ;;  %v3537_v29 = vld [vmem:[%s11536_s4 + $0x7c0] sm:$0xff]  ;;  %v3511_v36 = vld [vmem:[%s11536_s4 + $0x6f0] sm:$0xff]  ;;  %v3466_v56 = vld [vmem:[%s11536_s4 + $0x588] sm:$0xff] }
 0x5c4   : > { %5074 = vmatmul.mubr.bf16.gmra.mrb[76].mxu1 %v7455_v42  ;;  %v3030_v16 = vpop.xlane.xlu0 %3029  ;;  %v3489_v42 = vld [vmem:[%s11536_s4 + $0x640] sm:$0xff]  ;;  %v3523_v47 = vld [vmem:[%s11536_s4 + $0x750] sm:$0xff]  ;;  %v3470_v52 = vld [vmem:[%s11536_s4 + $0x5a8] sm:$0xff] }
 0x5c5   : > { %5081 = vmatprep.mubr.bf16.mxu1 %v7464_v45  ;;  %v3607_v18 = vpack.c.bf16 %v3286_v11, %v3285_v12  ;;  %v3159_v32 = vadd.f32 %v3030_v16, %v2535_v10  ;;  %v7504_v45 = vcombine.high %v3489_v42, %v3493_v43  ;;  %v7503_v58 = vcombine.low %v3489_v42, %v3493_v43  ;;  %v3513_v11 = vld [vmem:[%s11536_s4 + $0x700] sm:$0xff]  ;;  %v3483_v16 = vld [vmem:[%s11536_s4 + $0x610] sm:$0xff]  ;;  %v3458_v42 = vld [vmem:[%s11536_s4 + $0x548] sm:$0xff] }
 0x5c6   : > { %v3517_v12 = vld [vmem:[%s11536_s4 + $0x720] sm:$0xff]  ;;  %v3462_v43 = vld [vmem:[%s11536_s4 + $0x568] sm:$0xff]  ;;  %v3527_v49 = vld [vmem:[%s11536_s4 + $0x770] sm:$0xff] }
 0x5c7   : > { %v3287_v25 = vmax.f32 %v3159_v32, 0.0  ;;  %5785 = vmatpush1.bf16.msra.mxu0 %v3607_v18  ;;  %v7528_v14 = vcombine.high %v3513_v11, %v3517_v12  ;;  %v3521_v32 = vld [vmem:[%s11536_s4 + $0x740] sm:$0xff]  ;;  %v7527_v20 = vcombine.low %v3513_v11, %v3517_v12 }
 0x5c8   : > { %5786 = vmatprep.subr.bf16.mxu0 %v9009_v37  ;;  %v3435_v37 = vld [vmem:[%s11536_s4 + $0x490] sm:$0xff]  ;;  %v3541_v15 = vld [vmem:[%s11536_s4 + $0x7e0] sm:$0xff] }
 0x5c9   : > { %5620 = vmatmul.mubr.bf16.gmra.mrb[60].mxu0 %v7427_v7  ;;  %v3608_v48 = vpack.c.bf16 %v3288_v23, %v3287_v25  ;;  %v7452_v33 = vcombine.high %v3435_v37, %v3439_v27  ;;  %v7451_v24 = vcombine.low %v3435_v37, %v3439_v27  ;;  %v7484_v7 = vcombine.high %v3467_v59, %v3471_v60  ;;  %v3491_v25 = vld [vmem:[%s11536_s4 + $0x650] sm:$0xff] }
 0x5ca   : > { %5627 = vmatprep.mubr.bf16.mxu0 %v7436_v3  ;;  %v3475_v3 = vld [vmem:[%s11536_s4 + $0x5d0] sm:$0xff]  ;;  %v7536_v23 = vcombine.high %v3521_v32, %v3525_v19 }
 0x5cb   : > { %5787 = vmatpush1.bf16.msra.mxu0 %v3608_v48  ;;  %v7492_v10 = vcombine.high %v3475_v3, %v3479_v22  ;;  %v7491_v18 = vcombine.low %v3475_v3, %v3479_v22  ;;  %v3499_v37 = vld [vmem:[%s11536_s4 + $0x690] sm:$0xff] }
 0x5cc   : > { %5082 = vmatmul.mubr.bf16.gmra.mrb[80].mxu1 %v7463_v13  ;;  %v7519_v13 = vcombine.low %v3505_v0, %v3509_v1  ;;  %v3503_v27 = vld [vmem:[%s11536_s4 + $0x6b0] sm:$0xff]  ;;  %v3474_v0 = vld [vmem:[%s11536_s4 + $0x5c8] sm:$0xff] }
 0x5cd   : > { %5089 = vmatprep.mubr.bf16.mxu1 %v7472_v17  ;;  %v3487_v17 = vld [vmem:[%s11536_s4 + $0x630] sm:$0xff]  ;;  %v3478_v1 = vld [vmem:[%s11536_s4 + $0x5e8] sm:$0xff] }
 0x5ce   : > { %v7500_v21 = vcombine.high %v3483_v16, %v3487_v17  ;;  %v7499_v48 = vcombine.low %v3483_v16, %v3487_v17  ;;  %v3531_v59 = vld [vmem:[%s11536_s4 + $0x790] sm:$0xff]  ;;  %v3482_v16 = vld [vmem:[%s11536_s4 + $0x608] sm:$0xff] }
 0x5cf   : > { %v3535_v60 = vld [vmem:[%s11536_s4 + $0x7b0] sm:$0xff]  ;;  %v3486_v17 = vld [vmem:[%s11536_s4 + $0x628] sm:$0xff] }
 0x5d1   : > { %5628 = vmatmul.mubr.bf16.gmra.mrb[64].mxu0 %v7435_v54  ;;  %v3495_v54 = vld [vmem:[%s11536_s4 + $0x670] sm:$0xff] }
 0x5d2   : > { %5635 = vmatprep.mubr.bf16.mxu0 %v7444_v63  ;;  %v7508_v63 = vcombine.high %v3491_v25, %v3495_v54 }
 0x5d4   : > { %5090 = vmatmul.mubr.bf16.gmra.mrb[84].mxu1 %v7471_v26  ;;  %v7535_v26 = vcombine.low %v3521_v32, %v3525_v19 }
 0x5d5   : > { %5097 = vmatprep.mubr.bf16.mxu1 %v7480_v53  ;;  %v7544_v53 = vcombine.high %v3529_v55, %v3533_v62 }
 0x5d9   : > { %5636 = vmatmul.mubr.bf16.gmra.mrb[68].mxu0 %v7443_v28  ;;  %v7507_v28 = vcombine.low %v3491_v25, %v3495_v54 }
 0x5da   : > { %5643 = vmatprep.mubr.bf16.mxu0 %v7452_v33  ;;  %v7516_v33 = vcombine.high %v3499_v37, %v3503_v27 }
 0x5dc   : > { %5098 = vmatmul.mubr.bf16.gmra.mrb[88].mxu1 %v7479_v30  ;;  %v7543_v30 = vcombine.low %v3529_v55, %v3533_v62  ;;  %v3490_v55 = vld [vmem:[%s11536_s4 + $0x648] sm:$0xff] }
 0x5dd   : > { %5105 = vmatprep.mubr.bf16.mxu1 %v7488_v31  ;;  %v7552_v31 = vcombine.high %v3537_v29, %v3541_v15  ;;  %v3494_v62 = vld [vmem:[%s11536_s4 + $0x668] sm:$0xff] }
 0x5e1   : > { %5644 = vmatmul.mubr.bf16.gmra.mrb[72].mxu0 %v7451_v24  ;;  %v7515_v24 = vcombine.low %v3499_v37, %v3503_v27 }
 0x5e2   : > { %5651 = vmatprep.mubr.bf16.mxu0 %v7460_v38  ;;  %v7524_v38 = vcombine.high %v3507_v34, %v3511_v36 }
 0x5e4   : > { %5106 = vmatmul.mubr.bf16.gmra.mrb[92].mxu1 %v7487_v5  ;;  %v7551_v5 = vcombine.low %v3537_v29, %v3541_v15 }
 0x5e5   : > { %5113 = vmatprep.mubr.bf16.mxu1 %v7496_v46  ;;  %v7466_v46 = vcombine.high %v3450_v39, %v3454_v4 }
 0x5e9   : > { %5652 = vmatmul.mubr.bf16.gmra.mrb[76].mxu0 %v7459_v35  ;;  %v7523_v35 = vcombine.low %v3507_v34, %v3511_v36  ;;  %v3498_v34 = vld [vmem:[%s11536_s4 + $0x688] sm:$0xff] }
 0x5ea   : > { %5659 = vmatprep.mubr.bf16.mxu0 %v7468_v41  ;;  %v7532_v41 = vcombine.high %v3515_v9, %v3519_v40  ;;  %v3502_v36 = vld [vmem:[%s11536_s4 + $0x6a8] sm:$0xff] }
 0x5ec   : > { %5114 = vmatmul.mubr.bf16.gmra.mrb[96].mxu1 %v7495_v44  ;;  %v7465_v44 = vcombine.low %v3450_v39, %v3454_v4 }
 0x5ed   : > { %5121 = vmatprep.mubr.bf16.mxu1 %v7504_v45  ;;  %v7474_v45 = vcombine.high %v3458_v42, %v3462_v43 }
 0x5f1   : > { %5660 = vmatmul.mubr.bf16.gmra.mrb[80].mxu0 %v7467_v50  ;;  %v7531_v50 = vcombine.low %v3515_v9, %v3519_v40 }
 0x5f2   : > { %5667 = vmatprep.mubr.bf16.mxu0 %v7476_v51  ;;  %v7540_v51 = vcombine.high %v3523_v47, %v3527_v49 }
 0x5f4   : > { %5122 = vmatmul.mubr.bf16.gmra.mrb[100].mxu1 %v7503_v58  ;;  %v7473_v58 = vcombine.low %v3458_v42, %v3462_v43  ;;  %v3506_v42 = vld [vmem:[%s11536_s4 + $0x6c8] sm:$0xff] }
 0x5f5   : > { %5129 = vmatprep.mubr.bf16.mxu1 %v7512_v57  ;;  %v7482_v57 = vcombine.high %v3466_v56, %v3470_v52  ;;  %v3510_v43 = vld [vmem:[%s11536_s4 + $0x6e8] sm:$0xff] }
 0x5f9   : > { %5668 = vmatmul.mubr.bf16.gmra.mrb[84].mxu0 %v7475_v61  ;;  %v7539_v61 = vcombine.low %v3523_v47, %v3527_v49 }
 0x5fa   : > { %5675 = vmatprep.mubr.bf16.mxu0 %v7484_v7  ;;  %v7548_v7 = vcombine.high %v3531_v59, %v3535_v60 }
 0x5fc   : > { %5130 = vmatmul.mubr.bf16.gmra.mrb[104].mxu1 %v7511_v2  ;;  %v7481_v2 = vcombine.low %v3466_v56, %v3470_v52 }
 0x5fd   : > { %5137 = vmatprep.mubr.bf16.mxu1 %v7520_v8  ;;  %v7490_v8 = vcombine.high %v3474_v0, %v3478_v1 }
 0x5ff   : > { %v10495_v3 = vpop.f32.mrb[0].mxu1 }
 0x600   : > { %v4925_v22 = vpop.f32.mrb[1].mxu1 }
 0x601   : > { %5676 = vmatmul.mubr.bf16.gmra.mrb[88].mxu0 %v7483_v6  ;;  %v3539_v6 = vld [vmem:[%s11536_s4 + $0x7d0] sm:$0xff]  ;;  %v10503_v11 = vpop.f32.mrb[2].mxu1 }
 0x602   : > { %5683 = vmatprep.mubr.bf16.mxu0 %v7492_v10  ;;  %v3543_v10 = vld [vmem:[%s11536_s4 + $0x7f0] sm:$0xff]  ;;  %v4928_v12 = vpop.f32.mrb[3].mxu1 }
 0x604   : > { %5138 = vmatmul.mubr.bf16.gmra.mrb[108].mxu1 %v7519_v13  ;;  %v7547_v13 = vcombine.low %v3531_v59, %v3535_v60  ;;  %v3514_v59 = vld [vmem:[%s11536_s4 + $0x708] sm:$0xff] }
 0x605   : > { %5145 = vmatprep.mubr.bf16.mxu1 %v7528_v14  ;;  %v7556_v14 = vcombine.high %v3539_v6, %v3543_v10  ;;  %v3518_v60 = vld [vmem:[%s11536_s4 + $0x728] sm:$0xff] }
 0x607   : > { %v10511_v32 = vpop.f32.mrb[4].mxu1 }
 0x608   : > { %v4933_v19 = vpop.f32.mrb[5].mxu1 }
 0x609   : > { %5684 = vmatmul.mubr.bf16.gmra.mrb[92].mxu0 %v7491_v18  ;;  %v7489_v18 = vcombine.low %v3474_v0, %v3478_v1  ;;  %v10519_v25 = vpop.f32.mrb[6].mxu1  ;;  %v3332_v19 = vld [vmem:[%s11536_s4 + $0x158] sm:$0xff] }
 0x60a   : > { %5691 = vmatprep.mubr.bf16.mxu0 %v7500_v21  ;;  %v7498_v21 = vcombine.high %v3482_v16, %v3486_v17  ;;  %v4936_v54 = vpop.f32.mrb[7].mxu1 }
 0x60c   : > { %5146 = vmatmul.mubr.bf16.gmra.mrb[112].mxu1 %v7527_v20  ;;  %v3292_v20 = vld [vmem:[%s11536_s4 + $0x18] sm:$0xff] }
 0x60d   : > { %5153 = vmatprep.mubr.bf16.mxu1 %v7536_v23  ;;  %v3296_v23 = vld [vmem:[%s11536_s4 + $0x38] sm:$0xff] }
 0x60f   : > { %v10527_v37 = vpop.f32.mrb[8].mxu1 }
 0x610   : > { %v4941_v27 = vpop.f32.mrb[9].mxu1 }
 0x611   : > { %5692 = vmatmul.mubr.bf16.gmra.mrb[96].mxu0 %v7499_v48  ;;  %v7555_v48 = vcombine.low %v3539_v6, %v3543_v10  ;;  %v10535_v29 = vpop.f32.mrb[10].mxu1 }
 0x612   : > { %5699 = vmatprep.mubr.bf16.mxu0 %v7508_v63  ;;  %v7310_v63 = vcombine.high %v3292_v20, %v3296_v23  ;;  %v4944_v15 = vpop.f32.mrb[11].mxu1 }
 0x613   : > { %v3344_v15 = vld [vmem:[%s11536_s4 + $0x1b8] sm:$0xff] }
 0x614   : > { %5154 = vmatmul.mubr.bf16.gmra.mrb[116].mxu1 %v7535_v26  ;;  %v7497_v26 = vcombine.low %v3482_v16, %v3486_v17  ;;  %v7529_v16 = vcombine.low %v3514_v59, %v3518_v60 }
 0x615   : > { %5161 = vmatprep.mubr.bf16.mxu1 %v7544_v53  ;;  %v7506_v53 = vcombine.high %v3490_v55, %v3494_v62 }
 0x617   : > { %v10543_v39 = vpop.f32.mrb[12].mxu1 }
 0x618   : > { %v4949_v4 = vpop.f32.mrb[13].mxu1 }
 0x619   : > { %5700 = vmatmul.mubr.bf16.gmra.mrb[100].mxu0 %v7507_v28  ;;  %v3300_v28 = vld [vmem:[%s11536_s4 + $0x58] sm:$0xff]  ;;  %v10551_v9 = vpop.f32.mrb[14].mxu1 }
 0x61a   : > { %5707 = vmatprep.mubr.bf16.mxu0 %v7516_v33  ;;  %v3304_v33 = vld [vmem:[%s11536_s4 + $0x78] sm:$0xff]  ;;  %v4952_v40 = vpop.f32.mrb[15].mxu1 }
 0x61c   : > { %5162 = vmatmul.mubr.bf16.gmra.mrb[120].mxu1 %v7543_v30  ;;  %v7309_v30 = vcombine.low %v3292_v20, %v3296_v23  ;;  %v3336_v20 = vld [vmem:[%s11536_s4 + $0x178] sm:$0xff] }
 0x61d   : > { %5169 = vmatprep.mubr.bf16.mxu1 %v7552_v31  ;;  %v7318_v31 = vcombine.high %v3300_v28, %v3304_v33 }
 0x61f   : > { %v10559_v47 = vpop.f32.mrb[16].mxu1 }
 0x620   : > { %v4957_v49 = vpop.f32.mrb[17].mxu1 }
 0x621   : > { %5708 = vmatmul.mubr.bf16.gmra.mrb[104].mxu0 %v7515_v24  ;;  %v7505_v24 = vcombine.low %v3490_v55, %v3494_v62  ;;  %v10567_v56 = vpop.f32.mrb[18].mxu1  ;;  %v3530_v55 = vld [vmem:[%s11536_s4 + $0x788] sm:$0xff] }
 0x622   : > { %5715 = vmatprep.mubr.bf16.mxu0 %v7524_v38  ;;  %v7514_v38 = vcombine.high %v3498_v34, %v3502_v36  ;;  %v4960_v52 = vpop.f32.mrb[19].mxu1  ;;  %v3534_v62 = vld [vmem:[%s11536_s4 + $0x7a8] sm:$0xff] }
 0x623   : > { %v7545_v4 = vcombine.low %v3530_v55, %v3534_v62  ;;  %v3356_v52 = vld [vmem:[%s11536_s4 + $0x218] sm:$0xff] }
 0x624   : > { %5170 = vmatmul.mubr.bf16.gmra.mrb[124].mxu1 %v7551_v5  ;;  %v3308_v5 = vld [vmem:[%s11536_s4 + $0x98] sm:$0xff] }
 0x625   : > { %5370 = vmatprep.mubr.bf16.mxu1 %v7466_v46  ;;  %v3312_v46 = vld [vmem:[%s11536_s4 + $0xb8] sm:$0xff] }
 0x627   : > { %v10575_v0 = vpop.f32.mrb[20].mxu1 }
 0x628   : > { %v4965_v1 = vpop.f32.mrb[21].mxu1 }
 0x629   : > { %5716 = vmatmul.mubr.bf16.gmra.mrb[108].mxu0 %v7523_v35  ;;  %v7317_v35 = vcombine.low %v3300_v28, %v3304_v33  ;;  %v10583_v22 = vpop.f32.mrb[22].mxu1  ;;  %v3340_v33 = vld [vmem:[%s11536_s4 + $0x198] sm:$0xff] }
 0x62a   : > { %5723 = vmatprep.mubr.bf16.mxu0 %v7532_v41  ;;  %v7326_v41 = vcombine.high %v3308_v5, %v3312_v46  ;;  %v4968_v6 = vpop.f32.mrb[23].mxu1 }
 0x62c   : > { %5371 = vmatmul.mubr.bf16.vlgmr.msra.gmra.mrb[80].mxu1 %v7465_v44  ;;  %v7513_v44 = vcombine.low %v3498_v34, %v3502_v36  ;;  %v7349_v34 = vcombine.low %v3332_v19, %v3336_v20  ;;  %v7358_v36 = vcombine.high %v3340_v33, %v3344_v15 }
 0x62d   : > { %5378 = vmatprep.mubr.bf16.mxu1 %v7474_v45  ;;  %v7522_v45 = vcombine.high %v3506_v42, %v3510_v43 }
 0x631   : > { %5724 = vmatmul.mubr.bf16.gmra.mrb[112].mxu0 %v7531_v50  ;;  %v3316_v50 = vld [vmem:[%s11536_s4 + $0xd8] sm:$0xff] }
 0x632   : > { %5731 = vmatprep.mubr.bf16.mxu0 %v7540_v51  ;;  %v3320_v51 = vld [vmem:[%s11536_s4 + $0xf8] sm:$0xff] }
 0x633   : > { %v7333_v10 = vcombine.low %v3316_v50, %v3320_v51 }
 0x634   : > { %5379 = vmatmul.mubr.bf16.gmra.mrb[84].mxu1 %v7473_v58  ;;  %v7325_v58 = vcombine.low %v3308_v5, %v3312_v46 }
 0x635   : > { %5386 = vmatprep.mubr.bf16.mxu1 %v7482_v57  ;;  %v7334_v57 = vcombine.high %v3316_v50, %v3320_v51 }
 0x639   : > { %5732 = vmatmul.mubr.bf16.gmra.mrb[116].mxu0 %v7539_v61  ;;  %v7521_v61 = vcombine.low %v3506_v42, %v3510_v43 }
 0x63a   : > { %5739 = vmatprep.mubr.bf16.mxu0 %v7548_v7  ;;  %v7530_v7 = vcombine.high %v3514_v59, %v3518_v60 }
 0x63c   : > { %5387 = vmatmul.mubr.bf16.gmra.mrb[88].mxu1 %v7481_v2  ;;  %v3324_v2 = vld [vmem:[%s11536_s4 + $0x118] sm:$0xff] }
 0x63d   : > { %5394 = vmatprep.mubr.bf16.mxu1 %v7490_v8  ;;  %v3328_v8 = vld [vmem:[%s11536_s4 + $0x138] sm:$0xff] }
 0x63e   : > { %v7342_v12 = vcombine.high %v3324_v2, %v3328_v8 }
 0x641   : > { %5740 = vmatmul.mubr.bf16.gmra.mrb[120].mxu0 %v7547_v13  ;;  %v3522_v13 = vld [vmem:[%s11536_s4 + $0x748] sm:$0xff] }
 0x642   : > { %5747 = vmatprep.mubr.bf16.mxu0 %v7556_v14  ;;  %v3526_v14 = vld [vmem:[%s11536_s4 + $0x768] sm:$0xff] }
 0x643   : > { %v7538_v17 = vcombine.high %v3522_v13, %v3526_v14 }
 0x644   : > { %5395 = vmatmul.mubr.bf16.gmra.mrb[92].mxu1 %v7489_v18  ;;  %v10591_v18 = vpop.f32.mrb[24].mxu1 }
 0x645   : > { %5402 = vmatprep.mubr.bf16.mxu1 %v7498_v21  ;;  %v4973_v21 = vpop.f32.mrb[25].mxu1 }
 0x646   : > { %v10599_v23 = vpop.f32.mrb[26].mxu1  ;;  %v3376_v21 = vld [vmem:[%s11536_s4 + $0x2b8] sm:$0xff] }
 0x647   : > { %v4976_v54 = vpop.f32.mrb[27].mxu1 }
 0x648   : > { %v10607_v27 = vpop.f32.mrb[28].mxu1 }
 0x649   : > { %5748 = vmatmul.mubr.bf16.gmra.mrb[124].mxu0 %v7555_v48  ;;  %v7341_v48 = vcombine.low %v3324_v2, %v3328_v8  ;;  %v4981_v28 = vpop.f32.mrb[29].mxu1  ;;  %v3364_v2 = vld [vmem:[%s11536_s4 + $0x258] sm:$0xff] }
 0x64a   : > { %5788 = vmatprep.mubr.bf16.mxu0 %v7310_v63  ;;  %v7350_v63 = vcombine.high %v3332_v19, %v3336_v20  ;;  %v3368_v8 = vld [vmem:[%s11536_s4 + $0x278] sm:$0xff] }
 0x64b   : > { %v7381_v54 = vcombine.low %v3364_v2, %v3368_v8 }
 0x64c   : > { %5403 = vmatmul.mubr.bf16.gmra.mrb[96].mxu1 %v7497_v26  ;;  %v7537_v26 = vcombine.low %v3522_v13, %v3526_v14  ;;  %v7382_v13 = vcombine.high %v3364_v2, %v3368_v8 }
 0x64d   : > { %5410 = vmatprep.mubr.bf16.mxu1 %v7506_v53  ;;  %v7546_v53 = vcombine.high %v3530_v55, %v3534_v62  ;;  %v3380_v62 = vld [vmem:[%s11536_s4 + $0x2d8] sm:$0xff] }
 0x651   : > { %5789 = vmatmul.mubr.bf16.vlgmr.msra.gmra.mrb[0].mxu0 %v7309_v30  ;;  %v10615_v30 = vpop.f32.mrb[30].mxu1 }
 0x652   : > { %5796 = vmatprep.mubr.bf16.mxu0 %v7318_v31  ;;  %v4984_v31 = vpop.f32.mrb[31].mxu1 }
 0x653   : > { %v10623_v46 = vpop.f32.mrb[32].mxu1  ;;  %v3388_v31 = vld [vmem:[%s11536_s4 + $0x318] sm:$0xff] }
 0x654   : > { %5411 = vmatmul.mubr.bf16.gmra.mrb[100].mxu1 %v7505_v24  ;;  %v3538_v24 = vld [vmem:[%s11536_s4 + $0x7c8] sm:$0xff]  ;;  %v4989_v40 = vpop.f32.mrb[33].mxu1 }
 0x655   : > { %5418 = vmatprep.mubr.bf16.mxu1 %v7514_v38  ;;  %v3542_v38 = vld [vmem:[%s11536_s4 + $0x7e8] sm:$0xff]  ;;  %v10631_v42 = vpop.f32.mrb[34].mxu1 }
 0x656   : > { %v7554_v5 = vcombine.high %v3538_v24, %v3542_v38  ;;  %v4992_v43 = vpop.f32.mrb[35].mxu1  ;;  %v7553_v49 = vcombine.low %v3538_v24, %v3542_v38 }
 0x657   : > { %v10633_v50 = vpop.f32.mrb[36].mxu1 }
 0x658   : > { %v4997_v51 = vpop.f32.mrb[37].mxu1 }
 0x659   : > { %5797 = vmatmul.mubr.bf16.gmra.mrb[4].mxu0 %v7317_v35  ;;  %v3348_v35 = vld [vmem:[%s11536_s4 + $0x1d8] sm:$0xff] }
 0x65a   : > { %5804 = vmatprep.mubr.bf16.mxu0 %v7326_v41  ;;  %v3352_v41 = vld [vmem:[%s11536_s4 + $0x1f8] sm:$0xff] }
 0x65b   : > { %v7365_v60 = vcombine.low %v3348_v35, %v3352_v41 }
 0x65c   : > { %5419 = vmatmul.mubr.bf16.gmra.mrb[104].mxu1 %v7513_v44  ;;  %v7357_v44 = vcombine.low %v3340_v33, %v3344_v15 }
 0x65d   : > { %5426 = vmatprep.mubr.bf16.mxu1 %v7522_v45  ;;  %v7366_v45 = vcombine.high %v3348_v35, %v3352_v41  ;;  %v3396_v35 = vld [vmem:[%s11536_s4 + $0x358] sm:$0xff] }
 0x65e   : > { %v3400_v41 = vld [vmem:[%s11536_s4 + $0x378] sm:$0xff] }
 0x661   : > { %5805 = vmatmul.mubr.bf16.gmra.mrb[8].mxu0 %v7325_v58  ;;  %v3360_v58 = vld [vmem:[%s11536_s4 + $0x238] sm:$0xff] }
 0x662   : > { %5812 = vmatprep.mubr.bf16.mxu0 %v7334_v57  ;;  %v10641_v57 = vpop.f32.mrb[38].mxu1 }
 0x663   : > { %v5000_v59 = vpop.f32.mrb[39].mxu1 }
 0x664   : > { %5427 = vmatmul.mubr.bf16.gmra.mrb[108].mxu1 %v7521_v61  ;;  %v7374_v61 = vcombine.high %v3356_v52, %v3360_v58  ;;  %v3408_v59 = vld [vmem:[%s11536_s4 + $0x3b8] sm:$0xff] }
 0x665   : > { %5434 = vmatprep.mubr.bf16.mxu1 %v7530_v7  ;;  %v10643_v7 = vpop.f32.mrb[40].mxu1 }
 0x666   : > { %v5005_v1 = vpop.f32.mrb[41].mxu1 }
 0x667   : > { %v10651_v6 = vpop.f32.mrb[42].mxu1 }
 0x669   : > { %5813 = vmatmul.mubr.bf16.gmra.mrb[12].mxu0 %v7333_v10  ;;  %v5008_v10 = vpop.f32.mrb[43].mxu1 }
 0x66a   : > { %5820 = vmatprep.mubr.bf16.mxu0 %v7342_v12  ;;  %v7373_v12 = vcombine.low %v3356_v52, %v3360_v58  ;;  %v10653_v14 = vpop.f32.mrb[44].mxu1  ;;  %v3404_v58 = vld [vmem:[%s11536_s4 + $0x398] sm:$0xff] }
 0x66c   : > { %5435 = vmatmul.mubr.bf16.gmra.mrb[112].mxu1 %v7529_v16  ;;  %v5013_v16 = vpop.f32.mrb[45].mxu1 }
 0x66d   : > { %5442 = vmatprep.mubr.bf16.mxu1 %v7538_v17  ;;  %v3372_v17 = vld [vmem:[%s11536_s4 + $0x298] sm:$0xff]  ;;  %v10661_v19 = vpop.f32.mrb[46].mxu1  ;;  %v7421_v16 = vcombine.low %v3404_v58, %v3408_v59 }
 0x66e   : > { %v5016_v20 = vpop.f32.mrb[47].mxu1  ;;  %v7389_v33 = vcombine.low %v3372_v17, %v3376_v21 }
 0x671   : > { %5821 = vmatmul.mubr.bf16.gmra.mrb[16].mxu0 %v7341_v48  ;;  %v7390_v48 = vcombine.high %v3372_v17, %v3376_v21 }
 0x672   : > { %5828 = vmatprep.mubr.bf16.mxu0 %v7350_v63  ;;  %v10663_v63 = vpop.f32.mrb[48].mxu1 }
 0x673   : > { %v5021_v55 = vpop.f32.mrb[49].mxu1 }
 0x674   : > { %5443 = vmatmul.mubr.bf16.gmra.mrb[116].mxu1 %v7537_v26  ;;  %v3384_v26 = vld [vmem:[%s11536_s4 + $0x2f8] sm:$0xff] }
 0x675   : > { %5450 = vmatprep.mubr.bf16.mxu1 %v7546_v53  ;;  %v10671_v53 = vpop.f32.mrb[50].mxu1  ;;  %v7398_v15 = vcombine.high %v3380_v62, %v3384_v26  ;;  %v3420_v55 = vld [vmem:[%s11536_s4 + $0x418] sm:$0xff] }
 0x676   : > { %v5024_v28 = vpop.f32.mrb[51].mxu1 }
 0x677   : > { %v10679_v38 = vpop.f32.mrb[52].mxu1 }
 0x679   : > { %5829 = vmatmul.mubr.bf16.gmra.mrb[20].mxu0 %v7349_v34  ;;  %v3392_v34 = vld [vmem:[%s11536_s4 + $0x338] sm:$0xff] }
 0x67a   : > { %5836 = vmatprep.mubr.bf16.mxu0 %v7358_v36  ;;  %v7397_v36 = vcombine.low %v3380_v62, %v3384_v26  ;;  %v7406_v24 = vcombine.high %v3388_v31, %v3392_v34  ;;  %v7405_v43 = vcombine.low %v3388_v31, %v3392_v34  ;;  %v3424_v62 = vld [vmem:[%s11536_s4 + $0x438] sm:$0xff] }
 0x67b   : > { %v7438_v28 = vcombine.high %v3420_v55, %v3424_v62 }
 0x67c   : > { %5451 = vmatmul.mubr.bf16.gmra.mrb[120].mxu1 %v7545_v4  ;;  %v5029_v4 = vpop.f32.mrb[53].mxu1 }
 0x67d   : > { %5458 = vmatprep.mubr.bf16.mxu1 %v7554_v5  ;;  %v10681_v5 = vpop.f32.mrb[54].mxu1  ;;  %v7437_v4 = vcombine.low %v3420_v55, %v3424_v62 }
 0x67e   : > { %v5032_v40 = vpop.f32.mrb[55].mxu1 }
 0x681   : > { %5837 = vmatmul.mubr.bf16.gmra.mrb[24].mxu0 %v7357_v44  ;;  %v7414_v44 = vcombine.high %v3396_v35, %v3400_v41 }
 0x682   : > { %5844 = vmatprep.mubr.bf16.mxu0 %v7366_v45  ;;  %v10689_v45 = vpop.f32.mrb[56].mxu1 }
 0x684   : > { %5459 = vmatmul.mubr.bf16.gmra.mrb[124].mxu1 %v7553_v49  ;;  %v5037_v49 = vpop.f32.mrb[57].mxu1 }
 0x685   : > { %v10691_v51 = vpop.f32.mrb[58].mxu1  ;;  %v3436_v49 = vld [vmem:[%s11536_s4 + $0x498] sm:$0xff] }
 0x686   : > { %v5040_v52 = vpop.f32.mrb[59].mxu1 }
 0x687   : > { %v10699_v1 = vpop.f32.mrb[60].mxu1  ;;  %v3440_v52 = vld [vmem:[%s11536_s4 + $0x4b8] sm:$0xff] }
 0x688   : > { %v5045_v2 = vpop.f32.mrb[61].mxu1 }
 0x689   : > { %5845 = vmatmul.mubr.bf16.gmra.mrb[28].mxu0 %v7365_v60  ;;  %v7413_v60 = vcombine.low %v3396_v35, %v3400_v41  ;;  %v10701_v8 = vpop.f32.mrb[62].mxu1 }
 0x68a   : > { %5852 = vmatprep.mubr.bf16.mxu0 %v7374_v61  ;;  %v7422_v61 = vcombine.high %v3404_v58, %v3408_v59  ;;  %v5048_v10 = vpop.f32.mrb[63].mxu1  ;;  %v7454_v59 = vcombine.high %v3436_v49, %v3440_v52 }
 0x68b   : > { %v10709_v21 = vpop.f32.mrb[64].mxu1 }
 0x68c   : > { %v5053_v20 = vpop.f32.mrb[65].mxu1 }
 0x68d   : > { %v3452_v20 = vld [vmem:[%s11536_s4 + $0x518] sm:$0xff] }
 0x691   : > { %5853 = vmatmul.mubr.bf16.gmra.mrb[32].mxu0 %v7373_v12  ;;  %v3412_v12 = vld [vmem:[%s11536_s4 + $0x3d8] sm:$0xff] }
 0x692   : > { %5860 = vmatprep.mubr.bf16.mxu0 %v7382_v13  ;;  %v3416_v13 = vld [vmem:[%s11536_s4 + $0x3f8] sm:$0xff] }
 0x693   : > { %v7430_v17 = vcombine.high %v3412_v12, %v3416_v13  ;;  %v7429_v26 = vcombine.low %v3412_v12, %v3416_v13  ;;  %v3444_v12 = vld [vmem:[%s11536_s4 + $0x4d8] sm:$0xff] }
 0x694   : > { %v3448_v13 = vld [vmem:[%s11536_s4 + $0x4f8] sm:$0xff] }
 0x695   : > { %v7461_v55 = vcombine.low %v3444_v12, %v3448_v13 }
 0x699   : > { %5861 = vmatmul.mubr.bf16.gmra.mrb[36].mxu0 %v7381_v54  ;;  %v10711_v54 = vpop.f32.mrb[66].mxu1 }
 0x69a   : > { %5868 = vmatprep.mubr.bf16.mxu0 %v7390_v48  ;;  %v5056_v48 = vpop.f32.mrb[67].mxu1 }
 0x69b   : > { %v3456_v48 = vld [vmem:[%s11536_s4 + $0x538] sm:$0xff] }
 0x69c   : > { %v7470_v62 = vcombine.high %v3452_v20, %v3456_v48 }
 0x6a1   : > { %5869 = vmatmul.mubr.bf16.gmra.mrb[40].mxu0 %v7389_v33  ;;  %v10719_v33 = vpop.f32.mrb[68].mxu1 }
 0x6a2   : > { %5876 = vmatprep.mubr.bf16.mxu0 %v7398_v15  ;;  %v5061_v15 = vpop.f32.mrb[69].mxu1 }
 0x6a3   : > { %v10721_v31 = vpop.f32.mrb[70].mxu1  ;;  %v7469_v15 = vcombine.low %v3452_v20, %v3456_v48 }
 0x6a4   : > { %v5064_v34 = vpop.f32.mrb[71].mxu1 }
 0x6a5   : > { %v10729_v35 = vpop.f32.mrb[72].mxu1 }
 0x6a6   : > { %v5069_v41 = vpop.f32.mrb[73].mxu1 }
 0x6a7   : > { %v3476_v41 = vld [vmem:[%s11536_s4 + $0x5d8] sm:$0xff] }
 0x6a9   : > { %5877 = vmatmul.mubr.bf16.gmra.mrb[44].mxu0 %v7397_v36  ;;  %v3428_v36 = vld [vmem:[%s11536_s4 + $0x458] sm:$0xff] }
 0x6aa   : > { %5884 = vmatprep.mubr.bf16.mxu0 %v7406_v24  ;;  %v3432_v24 = vld [vmem:[%s11536_s4 + $0x478] sm:$0xff] }
 0x6ab   : > { %v7446_v40 = vcombine.high %v3428_v36, %v3432_v24  ;;  %v7445_v58 = vcombine.low %v3428_v36, %v3432_v24  ;;  %v3468_v36 = vld [vmem:[%s11536_s4 + $0x598] sm:$0xff] }
 0x6ac   : > { %v3472_v24 = vld [vmem:[%s11536_s4 + $0x5b8] sm:$0xff] }
 0x6b1   : > { %5885 = vmatmul.mubr.bf16.gmra.mrb[48].mxu0 %v7405_v43  ;;  %v10731_v43 = vpop.f32.mrb[74].mxu1 }
 0x6b2   : > { %5892 = vmatprep.mubr.bf16.mxu0 %v7414_v44  ;;  %v5072_v44 = vpop.f32.mrb[75].mxu1 }
 0x6b3   : > { %v3480_v44 = vld [vmem:[%s11536_s4 + $0x5f8] sm:$0xff] }
 0x6b9   : > { %5893 = vmatmul.mubr.bf16.gmra.mrb[52].mxu0 %v7413_v60  ;;  %v10739_v60 = vpop.f32.mrb[76].mxu1 }
 0x6ba   : > { %5900 = vmatprep.mubr.bf16.mxu0 %v7422_v61  ;;  %v5077_v61 = vpop.f32.mrb[77].mxu1 }
 0x6bb   : > { %v10741_v2 = vpop.f32.mrb[78].mxu1 }
 0x6bc   : > { %v5080_v10 = vpop.f32.mrb[79].mxu1 }
 0x6c1   : > { %5901 = vmatmul.mubr.bf16.gmra.mrb[56].mxu0 %v7421_v16  ;;  %v7453_v16 = vcombine.low %v3436_v49, %v3440_v52  ;;  %v7485_v49 = vcombine.low %v3468_v36, %v3472_v24  ;;  %v7494_v52 = vcombine.high %v3476_v41, %v3480_v44 }
 0x6c2   : > { %5908 = vmatprep.mubr.bf16.mxu0 %v7430_v17  ;;  %v7462_v17 = vcombine.high %v3444_v12, %v3448_v13  ;;  %v3484_v12 = vld [vmem:[%s11536_s4 + $0x618] sm:$0xff] }
 0x6c3   : > { %v3488_v13 = vld [vmem:[%s11536_s4 + $0x638] sm:$0xff] }
 0x6c9   : > { %5909 = vmatmul.mubr.bf16.gmra.mrb[60].mxu0 %v7429_v26  ;;  %v3460_v26 = vld [vmem:[%s11536_s4 + $0x558] sm:$0xff] }
 0x6ca   : > { %5916 = vmatprep.mubr.bf16.mxu0 %v7438_v28  ;;  %v3464_v28 = vld [vmem:[%s11536_s4 + $0x578] sm:$0xff] }
 0x6cb   : > { %v7478_v34 = vcombine.high %v3460_v26, %v3464_v28 }
 0x6d1   : > { %5917 = vmatmul.mubr.bf16.gmra.mrb[64].mxu0 %v7437_v4  ;;  %v7477_v4 = vcombine.low %v3460_v26, %v3464_v28  ;;  %v3492_v26 = vld [vmem:[%s11536_s4 + $0x658] sm:$0xff] }
 0x6d2   : > { %5924 = vmatprep.mubr.bf16.mxu0 %v7446_v40  ;;  %v7486_v40 = vcombine.high %v3468_v36, %v3472_v24  ;;  %v3496_v28 = vld [vmem:[%s11536_s4 + $0x678] sm:$0xff] }
 0x6d9   : > { %5925 = vmatmul.mubr.bf16.gmra.mrb[68].mxu0 %v7445_v58 }
 0x6da   : > { %5932 = vmatprep.mubr.bf16.mxu0 %v7454_v59 }
 0x6e1   : > { %5933 = vmatmul.mubr.bf16.gmra.mrb[72].mxu0 %v7453_v16  ;;  %v7493_v16 = vcombine.low %v3476_v41, %v3480_v44  ;;  %v3500_v41 = vld [vmem:[%s11536_s4 + $0x698] sm:$0xff] }
 0x6e2   : > { %5940 = vmatprep.mubr.bf16.mxu0 %v7462_v17  ;;  %v7502_v17 = vcombine.high %v3484_v12, %v3488_v13  ;;  %v3504_v44 = vld [vmem:[%s11536_s4 + $0x6b8] sm:$0xff] }
 0x6e9   : > { %5941 = vmatmul.mubr.bf16.gmra.mrb[76].mxu0 %v7461_v55 }
 0x6ea   : > { %5948 = vmatprep.mubr.bf16.mxu0 %v7470_v62 }
 0x6f1   : > { %5949 = vmatmul.mubr.bf16.gmra.mrb[80].mxu0 %v7469_v15  ;;  %v7501_v15 = vcombine.low %v3484_v12, %v3488_v13 }
 0x6f2   : > { %5956 = vmatprep.mubr.bf16.mxu0 %v7478_v34  ;;  %v7510_v34 = vcombine.high %v3492_v26, %v3496_v28 }
 0x6f9   : > { %5957 = vmatmul.mubr.bf16.gmra.mrb[84].mxu0 %v7477_v4 }
 0x6fa   : > { %5964 = vmatprep.mubr.bf16.mxu0 %v7486_v40 }
 0x6ff   : > { %v10773_v58 = vpop.f32.mrb[80].mxu1 }
 0x700   : > { %v5374_v59 = vpop.f32.mrb[81].mxu1 }
 0x701   : > { %5965 = vmatmul.mubr.bf16.gmra.mrb[88].mxu0 %v7485_v49  ;;  %v10775_v61 = vpop.f32.mrb[82].mxu1  ;;  %v7509_v49 = vcombine.low %v3492_v26, %v3496_v28  ;;  %v2537_v28 = vld [vmem:[%s11539_s7 + $0x4c0] sm:$0xff] }
 0x702   : > { %5972 = vmatprep.mubr.bf16.mxu0 %v7494_v52  ;;  %v5377_v10 = vpop.f32.mrb[83].mxu1  ;;  %v7518_v52 = vcombine.high %v3500_v41, %v3504_v44 }
 0x707   : > { %v10783_v20 = vpop.f32.mrb[84].mxu1 }
 0x708   : > { %v5382_v48 = vpop.f32.mrb[85].mxu1 }
 0x709   : > { %5973 = vmatmul.mubr.bf16.gmra.mrb[92].mxu0 %v7493_v16  ;;  %v10785_v55 = vpop.f32.mrb[86].mxu1  ;;  %v3508_v16 = vld [vmem:[%s11536_s4 + $0x6d8] sm:$0xff]  ;;  %v7517_v48 = vcombine.low %v3500_v41, %v3504_v44 }
 0x70a   : > { %5980 = vmatprep.mubr.bf16.mxu0 %v7502_v17  ;;  %v5385_v62 = vpop.f32.mrb[87].mxu1  ;;  %v3512_v17 = vld [vmem:[%s11536_s4 + $0x6f8] sm:$0xff] }
 0x70b   : > { %v7526_v62 = vcombine.high %v3508_v16, %v3512_v17  ;;  %v3516_v41 = vld [vmem:[%s11536_s4 + $0x718] sm:$0xff] }
 0x70c   : > { %v3520_v44 = vld [vmem:[%s11536_s4 + $0x738] sm:$0xff] }
 0x70f   : > { %v10793_v36 = vpop.f32.mrb[88].mxu1 }
 0x710   : > { %11551 = vst [vmem:[#allocation11_spill] sm:$0xff] %v10793_v36  ;;  %v5390_v24 = vpop.f32.mrb[89].mxu1 }
 0x711   : > { %5981 = vmatmul.mubr.bf16.gmra.mrb[96].mxu0 %v7501_v15  ;;  %v10795_v4 = vpop.f32.mrb[90].mxu1  ;;  %v2538_v24 = vld [vmem:[%s11539_s7 + $0x4c8] sm:$0xff] }
 0x712   : > { %11552 = vst [vmem:[#allocation12_spill] sm:$0xff] %v10795_v4  ;;  %5988 = vmatprep.mubr.bf16.mxu0 %v7510_v34  ;;  %v5393_v40 = vpop.f32.mrb[91].mxu1 }
 0x717   : > { %v10803_v59 = vpop.f32.mrb[92].mxu1 }
 0x718   : > { %11553 = vst [vmem:[#allocation13_spill] sm:$0xff] %v10803_v59  ;;  %v5398_v10 = vpop.f32.mrb[93].mxu1 }
 0x719   : > { %5989 = vmatmul.mubr.bf16.gmra.mrb[100].mxu0 %v7509_v49  ;;  %v10805_v12 = vpop.f32.mrb[94].mxu1  ;;  %v4924_v49 = vadd.f32 %v10495_v3, %v2537_v28  ;;  %v2539_v28 = vld [vmem:[%s11539_s7 + $0x4d0] sm:$0xff] }
 0x71a   : > { %11554 = vst [vmem:[#allocation14_spill] sm:$0xff] %v10805_v12  ;;  %5996 = vmatprep.mubr.bf16.mxu0 %v7518_v52  ;;  %v5401_v13 = vpop.f32.mrb[95].mxu1 }
 0x71f   : > { %v10813_v26 = vpop.f32.mrb[96].mxu1 }
 0x720   : > { %11555 = vst [vmem:[#allocation15_spill] sm:$0xff] %v10813_v26  ;;  %v5406_v15 = vpop.f32.mrb[97].mxu1  ;;  %v7534_v26 = vcombine.high %v3516_v41, %v3520_v44 }
 0x721   : > { %5997 = vmatmul.mubr.bf16.gmra.mrb[104].mxu0 %v7517_v48  ;;  %v10818_v34 = vpop.f32.mrb[98].mxu1  ;;  %v4927_v48 = vadd.f32 %v10503_v11, %v2538_v24  ;;  %v7525_v15 = vcombine.low %v3508_v16, %v3512_v17  ;;  %v2540_v11 = vld [vmem:[%s11539_s7 + $0x4d8] sm:$0xff]  ;;  %v4932_v17 = vadd.f32 %v10511_v32, %v2539_v28  ;;  %v2541_v32 = vld [vmem:[%s11539_s7 + $0x4e0] sm:$0xff] }
 0x722   : > { %11556 = vst [vmem:[#allocation16_spill] sm:$0xff] %v10818_v34  ;;  %6004 = vmatprep.mubr.bf16.mxu0 %v7526_v62  ;;  %v5409_v40 = vpop.f32.mrb[99].mxu1  ;;  %v8778_v62 = vld [vmem:[#allocation5 + $0x4] ss:$16 sps:$4 sm:$0xff]  }
 0x723   : > { %6557 = vmatprep.mubr.bf16.mxu1 %v8778_v62 }
 0x724   : > { %v5790_v52 = vpop.f32.mrb[0].mxu0 }
 0x725   : > { %v8246_v10 = vadd.f32 %v5790_v52, %v4924_v49  ;;  %v5792_v13 = vpop.f32.mrb[1].mxu0 }
 0x726   : > { %v5793_v34 = vpop.f32.mrb[2].mxu0  ;;  %v4935_v13 = vadd.f32 %v10519_v25, %v2540_v11  ;;  %v2542_v25 = vld [vmem:[%s11539_s7 + $0x4e8] sm:$0xff]  ;;  %v4940_v11 = vadd.f32 %v10527_v37, %v2541_v32  ;;  %v2543_v37 = vld [vmem:[%s11539_s7 + $0x4f0] sm:$0xff] }
 0x727   : > { %v8248_v40 = vadd.f32 %v5793_v34, %v4927_v48  ;;  %v5795_v12 = vpop.f32.mrb[3].mxu0  ;;  %v10831_v3 = vpop.f32.mrb[100].mxu1  ;;  %v6045_v4 = vmax.f32 %v8246_v10, 0.0  ;;  %v3528_v34 = vld [vmem:[%s11536_s4 + $0x778] sm:$0xff]  ;;  %v7533_v48 = vcombine.low %v3516_v41, %v3520_v44 }
 0x728   : > { %v5414_v59 = vpop.f32.mrb[101].mxu1 }
 0x729   : > { %v6046_v36 = vmax.f32 %v8248_v40, 0.0  ;;  %6005 = vmatmul.mubr.bf16.gmra.mrb[108].mxu0 %v7525_v15  ;;  %v10836_v49 = vpop.f32.mrb[102].mxu1  ;;  %v3524_v59 = vld [vmem:[%s11536_s4 + $0x758] sm:$0xff] }
 0x72a   : > { %11557 = vst [vmem:[#allocation17_spill] sm:$0xff] %v10836_v49  ;;  %6012 = vmatprep.mubr.bf16.mxu0 %v7534_v26  ;;  %v5417_v16 = vpop.f32.mrb[103].mxu1  ;;  %v7542_v15 = vcombine.high %v3524_v59, %v3528_v34 }
 0x72b   : > { %v10841_v12 = vpack.c.bf16 %v6046_v36, %v6045_v4 }
 0x72c   : > { %v5798_v24 = vpop.f32.mrb[4].mxu0 }
 0x72d   : > { %v8250_v52 = vadd.f32 %v5798_v24, %v4932_v17  ;;  %v5800_v10 = vpop.f32.mrb[5].mxu0  ;;  %v3532_v17 = vld [vmem:[%s11536_s4 + $0x798] sm:$0xff] }
 0x72e   : > { %v5801_v26 = vpop.f32.mrb[6].mxu0  ;;  %v3536_v24 = vld [vmem:[%s11536_s4 + $0x7b8] sm:$0xff] }
 0x72f   : > { %v8252_v36 = vadd.f32 %v5801_v26, %v4935_v13  ;;  %v5803_v4 = vpop.f32.mrb[7].mxu0  ;;  %v10851_v62 = vpop.f32.mrb[104].mxu1  ;;  %v6047_v28 = vmax.f32 %v8250_v52, 0.0  ;;  %v7541_v26 = vcombine.low %v3524_v59, %v3528_v34 }
 0x730   : > { %v5422_v40 = vpop.f32.mrb[105].mxu1 }
 0x731   : > { %v6048_v16 = vmax.f32 %v8252_v36, 0.0  ;;  %6013 = vmatmul.mubr.bf16.gmra.mrb[112].mxu0 %v7533_v48  ;;  %v10856_v49 = vpop.f32.mrb[106].mxu1  ;;  %v4943_v48 = vadd.f32 %v10535_v29, %v2542_v25  ;;  %v7550_v36 = vcombine.high %v3532_v17, %v3536_v24  ;;  %v2544_v29 = vld [vmem:[%s11539_s7 + $0x4f8] sm:$0xff]  ;;  %v4948_v25 = vadd.f32 %v10543_v39, %v2543_v37  ;;  %v2545_v39 = vld [vmem:[%s11539_s7 + $0x500] sm:$0xff] }
 0x732   : > { %11558 = vst [vmem:[#allocation18_spill] sm:$0xff] %v10856_v49  ;;  %6020 = vmatprep.mubr.bf16.mxu0 %v7542_v15  ;;  %v5425_v41 = vpop.f32.mrb[107].mxu1 }
 0x733   : > { %v10861_v44 = vpack.c.bf16 %v6048_v16, %v6047_v28 }
 0x734   : > { %v5806_v52 = vpop.f32.mrb[8].mxu0 }
 0x735   : > { %v8254_v10 = vadd.f32 %v5806_v52, %v4940_v11  ;;  %v5808_v13 = vpop.f32.mrb[9].mxu0  ;;  %v3540_v11 = vld [vmem:[%s11536_s4 + $0x7d8] sm:$0xff] }
 0x736   : > { %v5809_v15 = vpop.f32.mrb[10].mxu0  ;;  %v3544_v52 = vld [vmem:[%s11536_s4 + $0x7f8] sm:$0xff] }
 0x737   : > { %v8256_v4 = vadd.f32 %v5809_v15, %v4943_v48  ;;  %v5811_v40 = vpop.f32.mrb[11].mxu0  ;;  %v10871_v28 = vpop.f32.mrb[108].mxu1  ;;  %v6049_v16 = vmax.f32 %v8254_v10, 0.0  ;;  %v7549_v15 = vcombine.low %v3532_v17, %v3536_v24 }
 0x738   : > { %v5430_v32 = vpop.f32.mrb[109].mxu1 }
 0x739   : > { %v6050_v41 = vmax.f32 %v8256_v4, 0.0  ;;  %6021 = vmatmul.mubr.bf16.gmra.mrb[116].mxu0 %v7541_v26  ;;  %v10876_v49 = vpop.f32.mrb[110].mxu1  ;;  %v4951_v26 = vadd.f32 %v10551_v9, %v2544_v29  ;;  %v7558_v4 = vcombine.high %v3540_v11, %v3544_v52  ;;  %v2546_v9 = vld [vmem:[%s11539_s7 + $0x508] sm:$0xff]  ;;  %v4956_v29 = vadd.f32 %v10559_v47, %v2545_v39 }
 0x73a   : > { %11559 = vst [vmem:[#allocation19_spill] sm:$0xff] %v10876_v49  ;;  %6028 = vmatprep.mubr.bf16.mxu0 %v7550_v36  ;;  %v5433_v59 = vpop.f32.mrb[111].mxu1 }
 0x73b   : > { %v10881_v34 = vpack.c.bf16 %v6050_v41, %v6049_v16 }
 0x73c   : > { %v5814_v10 = vpop.f32.mrb[12].mxu0 }
 0x73d   : > { %v8258_v13 = vadd.f32 %v5814_v10, %v4948_v25  ;;  %v5816_v48 = vpop.f32.mrb[13].mxu0 }
 0x73e   : > { %v5817_v36 = vpop.f32.mrb[14].mxu0 }
 0x73f   : > { %v8260_v40 = vadd.f32 %v5817_v36, %v4951_v26  ;;  %v5819_v32 = vpop.f32.mrb[15].mxu0  ;;  %v10891_v16 = vpop.f32.mrb[112].mxu1  ;;  %v6051_v41 = vmax.f32 %v8258_v13, 0.0  ;;  %v4959_v26 = vadd.f32 %v10567_v56, %v2546_v9  ;;  %v7557_v13 = vcombine.low %v3540_v11, %v3544_v52  ;;  %v2548_v56 = vld [vmem:[%s11539_s7 + $0x518] sm:$0xff] }
 0x740   : > { %v5438_v37 = vpop.f32.mrb[113].mxu1 }
 0x741   : > { %v6052_v59 = vmax.f32 %v8260_v40, 0.0  ;;  %6029 = vmatmul.mubr.bf16.gmra.mrb[120].mxu0 %v7549_v15  ;;  %v10896_v49 = vpop.f32.mrb[114].mxu1 }
 0x742   : > { %6036 = vmatprep.mubr.bf16.mxu0 %v7558_v4  ;;  %v5441_v17 = vpop.f32.mrb[115].mxu1  ;;  %v2547_v4 = vld [vmem:[%s11539_s7 + $0x510] sm:$0xff] }
 0x743   : > { %v10901_v24 = vpack.c.bf16 %v6052_v59, %v6051_v41  ;;  %v4964_v39 = vadd.f32 %v10575_v0, %v2547_v4  ;;  %v2550_v0 = vld [vmem:[%s11539_s7 + $0x528] sm:$0xff] }
 0x744   : > { %v5822_v25 = vpop.f32.mrb[16].mxu0 }
 0x745   : > { %v8262_v10 = vadd.f32 %v5822_v25, %v4956_v29  ;;  %v5824_v48 = vpop.f32.mrb[17].mxu0  ;;  %v4967_v25 = vadd.f32 %v10583_v22, %v2548_v56 }
 0x746   : > { %v5825_v36 = vpop.f32.mrb[18].mxu0 }
 0x747   : > { %v8264_v15 = vadd.f32 %v5825_v36, %v4959_v26  ;;  %v5827_v40 = vpop.f32.mrb[19].mxu0  ;;  %v10905_v32 = vpop.f32.mrb[116].mxu1  ;;  %v6053_v41 = vmax.f32 %v8262_v10, 0.0  ;;  %v2549_v36 = vld [vmem:[%s11539_s7 + $0x520] sm:$0xff] }
 0x748   : > { %v5446_v37 = vpop.f32.mrb[117].mxu1 }
 0x749   : > { %v6054_v59 = vmax.f32 %v8264_v15, 0.0  ;;  %6037 = vmatmul.mubr.bf16.gmra.mrb[124].mxu0 %v7557_v13  ;;  %v10910_v47 = vpop.f32.mrb[118].mxu1 }
 0x74a   : > { %v5449_v11 = vpop.f32.mrb[119].mxu1 }
 0x74b   : > { %v10915_v52 = vpack.c.bf16 %v6054_v59, %v6053_v41  ;;  %v4972_v59 = vadd.f32 %v10591_v18, %v2549_v36  ;;  %v2552_v18 = vld [vmem:[%s11539_s7 + $0x538] sm:$0xff] }
 0x74c   : > { %v5830_v9 = vpop.f32.mrb[20].mxu0 }
 0x74d   : > { %v8266_v17 = vadd.f32 %v5830_v9, %v4964_v39  ;;  %v5832_v29 = vpop.f32.mrb[21].mxu0  ;;  %v4975_v9 = vadd.f32 %v10599_v23, %v2550_v0 }
 0x74e   : > { %v5833_v48 = vpop.f32.mrb[22].mxu0 }
 0x74f   : > { %v8268_v10 = vadd.f32 %v5833_v48, %v4967_v25  ;;  %v5835_v26 = vpop.f32.mrb[23].mxu0  ;;  %v10919_v13 = vpop.f32.mrb[120].mxu1  ;;  %v6055_v40 = vmax.f32 %v8266_v17, 0.0 }
 0x750   : > { %v5454_v15 = vpop.f32.mrb[121].mxu1 }
 0x751   : > { %v6056_v37 = vmax.f32 %v8268_v10, 0.0  ;;  %v10924_v41 = vpop.f32.mrb[122].mxu1  ;;  %v2551_v10 = vld [vmem:[%s11539_s7 + $0x530] sm:$0xff] }
 0x752   : > { %v5457_v4 = vpop.f32.mrb[123].mxu1  ;;  %v4980_v0 = vadd.f32 %v10607_v27, %v2551_v10 }
 0x753   : > { %v10929_v22 = vpack.c.bf16 %v6056_v37, %v6055_v40 }
 0x754   : > { %v5838_v56 = vpop.f32.mrb[24].mxu0 }
 0x755   : > { %v8270_v11 = vadd.f32 %v5838_v56, %v4972_v59  ;;  %v5840_v39 = vpop.f32.mrb[25].mxu0 }
 0x756   : > { %v5841_v29 = vpop.f32.mrb[26].mxu0  ;;  %v4983_v39 = vadd.f32 %v10615_v30, %v2552_v18 }
 0x757   : > { %v8272_v25 = vadd.f32 %v5841_v29, %v4975_v9  ;;  %v5843_v17 = vpop.f32.mrb[27].mxu0  ;;  %v10933_v48 = vpop.f32.mrb[124].mxu1  ;;  %v6057_v15 = vmax.f32 %v8270_v11, 0.0 }
 0x758   : > { %v5462_v26 = vpop.f32.mrb[125].mxu1 }
 0x759   : > { %v6058_v40 = vmax.f32 %v8272_v25, 0.0  ;;  %v10938_v37 = vpop.f32.mrb[126].mxu1  ;;  %v2553_v25 = vld [vmem:[%s11539_s7 + $0x540] sm:$0xff] }
 0x75a   : > { %v5465_v36 = vpop.f32.mrb[127].mxu1  ;;  %v4988_v27 = vadd.f32 %v10623_v46, %v2553_v25  ;;  %v2556_v46 = vld [vmem:[%s11539_s7 + $0x558] sm:$0xff] }
 0x75b   : > { %v10943_v23 = vpack.c.bf16 %v6058_v40, %v6057_v15  ;;  %v2554_v15 = vld [vmem:[%s11539_s7 + $0x548] sm:$0xff] }
 0x75c   : > { %v5846_v4 = vpop.f32.mrb[28].mxu0  ;;  %v4991_v30 = vadd.f32 %v10631_v42, %v2554_v15  ;;  %v4999_v42 = vadd.f32 %v10641_v57, %v2556_v46 }
 0x75d   : > { %v8274_v59 = vadd.f32 %v5846_v4, %v4980_v0  ;;  %v5848_v56 = vpop.f32.mrb[29].mxu0 }
 0x75e   : > { %v5849_v9 = vpop.f32.mrb[30].mxu0 }
 0x75f   : > { %v8276_v29 = vadd.f32 %v5849_v9, %v4983_v39  ;;  %v5851_v11 = vpop.f32.mrb[31].mxu0  ;;  %v6059_v17 = vmax.f32 %v8274_v59, 0.0  ;;  %v2555_v59 = vld [vmem:[%s11539_s7 + $0x550] sm:$0xff] }
 0x761   : > { %v6060_v26 = vmax.f32 %v8276_v29, 0.0  ;;  %v4996_v29 = vadd.f32 %v10633_v50, %v2555_v59  ;;  %v2558_v50 = vld [vmem:[%s11539_s7 + $0x568] sm:$0xff] }
 0x763   : > { %v10954_v10 = vpack.c.bf16 %v6060_v26, %v6059_v17 }
 0x764   : > { %v5854_v40 = vpop.f32.mrb[32].mxu0 }
 0x765   : > { %v8278_v18 = vadd.f32 %v5854_v40, %v4988_v27  ;;  %v5856_v36 = vpop.f32.mrb[33].mxu0 }
 0x766   : > { %v5857_v0 = vpop.f32.mrb[34].mxu0 }
 0x767   : > { %v8280_v4 = vadd.f32 %v5857_v0, %v4991_v30  ;;  %v5859_v56 = vpop.f32.mrb[35].mxu0  ;;  %v6061_v39 = vmax.f32 %v8278_v18, 0.0  ;;  %v2557_v30 = vld [vmem:[%s11539_s7 + $0x560] sm:$0xff] }
 0x768   : > { %v5004_v57 = vadd.f32 %v10643_v7, %v2557_v30  ;;  %v5007_v56 = vadd.f32 %v10651_v6, %v2558_v50  ;;  %v2560_v7 = vld [vmem:[%s11539_s7 + $0x578] sm:$0xff] }
 0x769   : > { %v6062_v9 = vmax.f32 %v8280_v4, 0.0 }
 0x76b   : > { %v6181_v11 = vpack.c.bf16 %v6062_v9, %v6061_v39 }
 0x76c   : > { %v5862_v25 = vpop.f32.mrb[36].mxu0 }
 0x76d   : > { %v8282_v17 = vadd.f32 %v5862_v25, %v4996_v29  ;;  %v5864_v26 = vpop.f32.mrb[37].mxu0  ;;  %7731 = vmatprep.subr.bf16.mxu1 %v6181_v11  ;;  %v2559_v29 = vld [vmem:[%s11539_s7 + $0x570] sm:$0xff] }
 0x76e   : > { %v5865_v15 = vpop.f32.mrb[38].mxu0  ;;  %7732 = vmatpush3.bf16.msra.mxu1 %v10841_v12  ;;  %v5012_v6 = vadd.f32 %v10653_v14, %v2559_v29  ;;  %v5015_v26 = vadd.f32 %v10661_v19, %v2560_v7  ;;  %v2562_v14 = vld [vmem:[%s11539_s7 + $0x588] sm:$0xff] }
 0x76f   : > { %v8284_v27 = vadd.f32 %v5865_v15, %v4999_v42  ;;  %v5867_v40 = vpop.f32.mrb[39].mxu0  ;;  %v6063_v18 = vmax.f32 %v8282_v17, 0.0 }
 0x771   : > { %v6064_v36 = vmax.f32 %v8284_v27, 0.0 }
 0x773   : > { %v6182_v0 = vpack.c.bf16 %v6064_v36, %v6063_v18  ;;  %v2561_v18 = vld [vmem:[%s11539_s7 + $0x580] sm:$0xff] }
 0x774   : > { %v5870_v4 = vpop.f32.mrb[40].mxu0  ;;  %v5020_v19 = vadd.f32 %v10663_v63, %v2561_v18  ;;  %v2564_v63 = vld [vmem:[%s11539_s7 + $0x598] sm:$0xff] }
 0x775   : > { %v8286_v59 = vadd.f32 %v5870_v4, %v5004_v57  ;;  %v5872_v12 = vpop.f32.mrb[41].mxu0  ;;  %7733 = vmatprep.subr.bf16.mxu1 %v6182_v0  ;;  %v5023_v4 = vadd.f32 %v10671_v53, %v2562_v14  ;;  %v5031_v7 = vadd.f32 %v10681_v5, %v2564_v63 }
 0x776   : > { %v5873_v39 = vpop.f32.mrb[42].mxu0  ;;  %7734 = vmatpush3.bf16.msra.mxu1 %v10861_v44 }
 0x777   : > { %v8288_v9 = vadd.f32 %v5873_v39, %v5007_v56  ;;  %v5875_v46 = vpop.f32.mrb[43].mxu0  ;;  %v6065_v11 = vmax.f32 %v8286_v59, 0.0 }
 0x779   : > { %v6066_v25 = vmax.f32 %v8288_v9, 0.0  ;;  %v2563_v9 = vld [vmem:[%s11539_s7 + $0x590] sm:$0xff] }
 0x77a   : > { %v5028_v53 = vadd.f32 %v10679_v38, %v2563_v9  ;;  %v2566_v38 = vld [vmem:[%s11539_s7 + $0x5a8] sm:$0xff] }
 0x77b   : > { %v6183_v42 = vpack.c.bf16 %v6066_v25, %v6065_v11  ;;  %v5039_v18 = vadd.f32 %v10691_v51, %v2566_v38 }
 0x77c   : > { %v5878_v17 = vpop.f32.mrb[44].mxu0 }
 0x77d   : > { %v8290_v15 = vadd.f32 %v5878_v17, %v5012_v6  ;;  %v5880_v44 = vpop.f32.mrb[45].mxu0  ;;  %7735 = vmatprep.subr.bf16.mxu1 %v6183_v42 }
 0x77e   : > { %v5881_v27 = vpop.f32.mrb[46].mxu0  ;;  %7736 = vmatpush3.bf16.msra.mxu1 %v10881_v34 }
 0x77f   : > { %v8292_v40 = vadd.f32 %v5881_v27, %v5015_v26  ;;  %v5883_v30 = vpop.f32.mrb[47].mxu0  ;;  %v6067_v36 = vmax.f32 %v8290_v15, 0.0  ;;  %v2565_v15 = vld [vmem:[%s11539_s7 + $0x5a0] sm:$0xff] }
 0x780   : > { %v5036_v5 = vadd.f32 %v10689_v45, %v2565_v15  ;;  %v2568_v45 = vld [vmem:[%s11539_s7 + $0x5b8] sm:$0xff] }
 0x781   : > { %v6068_v50 = vmax.f32 %v8292_v40, 0.0 }
 0x783   : > { %v6184_v57 = vpack.c.bf16 %v6068_v50, %v6067_v36 }
 0x784   : > { %v5886_v0 = vpop.f32.mrb[48].mxu0 }
 0x785   : > { %v8294_v56 = vadd.f32 %v5886_v0, %v5020_v19  ;;  %v5888_v34 = vpop.f32.mrb[49].mxu0  ;;  %7737 = vmatprep.subr.bf16.mxu1 %v6184_v57  ;;  %v2567_v57 = vld [vmem:[%s11539_s7 + $0x5b0] sm:$0xff] }
 0x786   : > { %v5889_v59 = vpop.f32.mrb[50].mxu0  ;;  %7738 = vmatpush3.bf16.msra.mxu1 %v10901_v24  ;;  %v5044_v51 = vadd.f32 %v10699_v1, %v2567_v57  ;;  %v2570_v1 = vld [vmem:[%s11539_s7 + $0x5c8] sm:$0xff]  ;;  %v2573_v57 = vld [vmem:[%s11539_s7 + $0x5e0] sm:$0xff] }
 0x787   : > { %v8296_v12 = vadd.f32 %v5889_v59, %v5023_v4  ;;  %v5891_v39 = vpop.f32.mrb[51].mxu0  ;;  %v6069_v46 = vmax.f32 %v8294_v56, 0.0  ;;  %v5047_v59 = vadd.f32 %v10701_v8, %v2568_v45 }
 0x789   : > { %v6070_v29 = vmax.f32 %v8296_v12, 0.0 }
 0x78b   : > { %v6185_v11 = vpack.c.bf16 %v6070_v29, %v6069_v46  ;;  %v2569_v29 = vld [vmem:[%s11539_s7 + $0x5c0] sm:$0xff] }
 0x78c   : > { %v5894_v25 = vpop.f32.mrb[52].mxu0  ;;  %v5052_v8 = vadd.f32 %v10709_v21, %v2569_v29  ;;  %v2575_v29 = vld [vmem:[%s11539_s7 + $0x5f0] sm:$0xff] }
 0x78d   : > { %v8298_v6 = vadd.f32 %v5894_v25, %v5028_v53  ;;  %v5896_v24 = vpop.f32.mrb[53].mxu0  ;;  %7739 = vmatprep.subr.bf16.mxu1 %v6185_v11 }
 0x78e   : > { %v5897_v42 = vpop.f32.mrb[54].mxu0  ;;  %7740 = vmatpush3.bf16.msra.mxu1 %v10915_v52  ;;  %v8776_v24 = vld [vmem:[#allocation5] ss:$16 sps:$4 sm:$0xff]  }
 0x78f   : > { %v8300_v17 = vadd.f32 %v5897_v42, %v5031_v7  ;;  %v5899_v26 = vpop.f32.mrb[55].mxu0  ;;  %v6071_v44 = vmax.f32 %v8298_v6, 0.0  ;;  %v5055_v7 = vadd.f32 %v10711_v54, %v2570_v1  ;;  %v2572_v54 = vld [vmem:[%s11539_s7 + $0x5d8] sm:$0xff] }
 0x791   : > { %v6072_v27 = vmax.f32 %v8300_v17, 0.0  ;;  %v8779_v17 = vld [vmem:[#allocation5 + $0x24] ss:$16 sps:$4 sm:$0xff]  }
 0x793   : > { %v6186_v40 = vpack.c.bf16 %v6072_v27, %v6071_v44  ;;  %v2571_v44 = vld [vmem:[%s11539_s7 + $0x5d0] sm:$0xff] }
 0x794   : > { %v5902_v30 = vpop.f32.mrb[56].mxu0  ;;  %v5060_v38 = vadd.f32 %v10719_v33, %v2571_v44  ;;  %v2574_v33 = vld [vmem:[%s11539_s7 + $0x5e8] sm:$0xff] }
 0x795   : > { %v8302_v36 = vadd.f32 %v5902_v30, %v5036_v5  ;;  %v5904_v52 = vpop.f32.mrb[57].mxu0  ;;  %7741 = vmatprep.subr.bf16.mxu1 %v6186_v40  ;;  %v5063_v40 = vadd.f32 %v10721_v31, %v2572_v54  ;;  %v5068_v31 = vadd.f32 %v10729_v35, %v2573_v57  ;;  %v2576_v35 = vld [vmem:[%s11539_s7 + $0x5f8] sm:$0xff] }
 0x796   : > { %v5905_v50 = vpop.f32.mrb[58].mxu0  ;;  %7742 = vmatpush3.bf16.msra.mxu1 %v10929_v22 }
 0x797   : > { %v8304_v14 = vadd.f32 %v5905_v50, %v5039_v18  ;;  %v5907_v19 = vpop.f32.mrb[59].mxu0  ;;  %v6073_v0 = vmax.f32 %v8302_v36, 0.0  ;;  %v8781_v36 = vld [vmem:[#allocation5 + $0x20] ss:$16 sps:$4 sm:$0xff]   ;;  %v8782_v50 = vld [vmem:[#allocation5 + $0x44] ss:$16 sps:$4 sm:$0xff]  }
 0x799   : > { %v6074_v4 = vmax.f32 %v8304_v14, 0.0 }
 0x79b   : > { %v6187_v56 = vpack.c.bf16 %v6074_v4, %v6073_v0 }
 0x79c   : > { %v5910_v34 = vpop.f32.mrb[60].mxu0 }
 0x79d   : > { %v8306_v12 = vadd.f32 %v5910_v34, %v5044_v51  ;;  %v5912_v22 = vpop.f32.mrb[61].mxu0  ;;  %7743 = vmatprep.subr.bf16.mxu1 %v6187_v56  ;;  %v5071_v56 = vadd.f32 %v10731_v43, %v2574_v33  ;;  %v5076_v43 = vadd.f32 %v10739_v60, %v2575_v29  ;;  %v2578_v60 = vld [vmem:[%s11539_s7 + $0x608] sm:$0xff] }
 0x79e   : > { %v5913_v39 = vpop.f32.mrb[62].mxu0  ;;  %7744 = vmatpush3.bf16.msra.mxu1 %v10943_v23  ;;  %v8327_v54 = vadd.f32 %v10775_v61, %v2578_v60 }
 0x79f   : > { %v8308_v9 = vadd.f32 %v5913_v39, %v5047_v59  ;;  %v5915_v46 = vpop.f32.mrb[63].mxu0  ;;  %v6075_v63 = vmax.f32 %v8306_v12, 0.0  ;;  %v8784_v12 = vld [vmem:[#allocation5 + $0x40] ss:$16 sps:$4 sm:$0xff]   ;;  %v8785_v39 = vld [vmem:[#allocation5 + $0x64] ss:$16 sps:$4 sm:$0xff]  }
 0x7a1   : > { %v6076_v53 = vmax.f32 %v8308_v9, 0.0 }
 0x7a3   : > { %v6188_v11 = vpack.c.bf16 %v6076_v53, %v6075_v63 }
 0x7a4   : > { %v5918_v25 = vpop.f32.mrb[64].mxu0 }
 0x7a5   : > { %v8310_v6 = vadd.f32 %v5918_v25, %v5052_v8  ;;  %v5920_v23 = vpop.f32.mrb[65].mxu0  ;;  %7745 = vmatprep.subr.bf16.mxu1 %v6188_v11  ;;  %v5079_v11 = vadd.f32 %v10741_v2, %v2576_v35 }
 0x7a6   : > { %v5921_v42 = vpop.f32.mrb[66].mxu0  ;;  %7746 = vmatpush3.bf16.msra.mxu1 %v10954_v10 }
 0x7a7   : > { %v8312_v26 = vadd.f32 %v5921_v42, %v5055_v7  ;;  %v5923_v15 = vpop.f32.mrb[67].mxu0  ;;  %v6077_v27 = vmax.f32 %v8310_v6, 0.0  ;;  %v8787_v6 = vld [vmem:[#allocation5 + $0x60] ss:$16 sps:$4 sm:$0xff]  }
 0x7a9   : > { %v6078_v21 = vmax.f32 %v8312_v26, 0.0  ;;  %6558 = vmatmul.mubr.bf16.vlgmr.msra.gmra.mrb[128].mxu1 %v8776_v24  ;;  %v8788_v24 = vld [vmem:[#allocation5 + $0x84] ss:$16 sps:$4 sm:$0xff]   ;;  %v2577_v26 = vld [vmem:[%s11539_s7 + $0x600] sm:$0xff] }
 0x7aa   : > { %6565 = vmatprep.mubr.bf16.mxu1 %v8779_v17  ;;  %v8325_v2 = vadd.f32 %v10773_v58, %v2577_v26  ;;  %v2580_v58 = vld [vmem:[%s11539_s7 + $0x618] sm:$0xff] }
 0x7ab   : > { %v11036_v5 = vpack.c.bf16 %v6078_v21, %v6077_v27  ;;  %v2584_v26 = vld [vmem:[%s11539_s7 + $0x638] sm:$0xff] }
 0x7ac   : > { %v5926_v10 = vpop.f32.mrb[68].mxu0 }
 0x7ad   : > { %v8314_v30 = vadd.f32 %v5926_v10, %v5060_v38  ;;  %v5928_v18 = vpop.f32.mrb[69].mxu0 }
 0x7ae   : > { %v5929_v52 = vpop.f32.mrb[70].mxu0  ;;  %v8791_v18 = vld [vmem:[#allocation5 + $0xa4] ss:$16 sps:$4 sm:$0xff]  }
 0x7af   : > { %v8316_v14 = vadd.f32 %v5929_v52, %v5063_v40  ;;  %v5931_v19 = vpop.f32.mrb[71].mxu0  ;;  %v6079_v0 = vmax.f32 %v8314_v30, 0.0  ;;  %v8790_v40 = vld [vmem:[#allocation5 + $0x80] ss:$16 sps:$4 sm:$0xff]  }
 0x7b1   : > { %v6080_v4 = vmax.f32 %v8316_v14, 0.0  ;;  %6566 = vmatmul.mubr.bf16.gmra.mrb[132].mxu1 %v8781_v36 }
 0x7b2   : > { %6573 = vmatprep.mubr.bf16.mxu1 %v8782_v50  ;;  %v2579_v50 = vld [vmem:[%s11539_s7 + $0x610] sm:$0xff] }
 0x7b3   : > { %v11046_v45 = vpack.c.bf16 %v6080_v4, %v6079_v0  ;;  %v8329_v61 = vadd.f32 %v10783_v20, %v2579_v50  ;;  %v8331_v4 = vadd.f32 %v10785_v55, %v2580_v58  ;;  %v2582_v20 = vld [vmem:[%s11539_s7 + $0x628] sm:$0xff]  ;;  %v2585_v50 = vld [vmem:[%s11539_s7 + $0x640] sm:$0xff] }
 0x7b4   : > { %v5934_v51 = vpop.f32.mrb[72].mxu0  ;;  %v11560_v55 = vld [vmem:[#allocation11_spill] sm:$0xff] }
 0x7b5   : > { %v8318_v34 = vadd.f32 %v5934_v51, %v5068_v31  ;;  %v5936_v59 = vpop.f32.mrb[73].mxu0  ;;  %v8793_v51 = vld [vmem:[#allocation5 + $0xa0] ss:$16 sps:$4 sm:$0xff]  }
 0x7b6   : > { %v5937_v22 = vpop.f32.mrb[74].mxu0  ;;  %v2586_v58 = vld [vmem:[%s11539_s7 + $0x648] sm:$0xff] }
 0x7b7   : > { %v8320_v9 = vadd.f32 %v5937_v22, %v5071_v56  ;;  %v5939_v46 = vpop.f32.mrb[75].mxu0  ;;  %v6081_v63 = vmax.f32 %v8318_v34, 0.0  ;;  %v8794_v34 = vld [vmem:[#allocation5 + $0xc4] ss:$16 sps:$4 sm:$0xff]   ;;  %v2581_v22 = vld [vmem:[%s11539_s7 + $0x620] sm:$0xff] }
 0x7b8   : > { %v8333_v46 = vadd.f32 %v11560_v55, %v2581_v22  ;;  %v8803_v22 = vld [vmem:[#allocation5 + $0x124] ss:$16 sps:$4 sm:$0xff]  }
 0x7b9   : > { %v6082_v53 = vmax.f32 %v8320_v9, 0.0  ;;  %6574 = vmatmul.mubr.bf16.gmra.mrb[136].mxu1 %v8784_v12 }
 0x7ba   : > { %6581 = vmatprep.mubr.bf16.mxu1 %v8785_v39 }
 0x7bb   : > { %v11056_v1 = vpack.c.bf16 %v6082_v53, %v6081_v63  ;;  %v11561_v53 = vld [vmem:[#allocation12_spill] sm:$0xff] }
 0x7bc   : > { %v5942_v8 = vpop.f32.mrb[76].mxu0  ;;  %v8335_v35 = vadd.f32 %v11561_v53, %v2582_v20  ;;  %v2587_v20 = vld [vmem:[%s11539_s7 + $0x650] sm:$0xff] }
 0x7bd   : > { %v8322_v25 = vadd.f32 %v5942_v8, %v5076_v43  ;;  %v5944_v7 = vpop.f32.mrb[77].mxu0  ;;  %v8345_v53 = vadd.f32 %v10831_v3, %v2587_v20 }
 0x7be   : > { %v5945_v23 = vpop.f32.mrb[78].mxu0  ;;  %v8797_v7 = vld [vmem:[#allocation5 + $0xe4] ss:$16 sps:$4 sm:$0xff]  }
 0x7bf   : > { %v8324_v42 = vadd.f32 %v5945_v23, %v5079_v11  ;;  %v5947_v17 = vpop.f32.mrb[79].mxu0  ;;  %v6083_v15 = vmax.f32 %v8322_v25, 0.0  ;;  %v8796_v11 = vld [vmem:[#allocation5 + $0xc0] ss:$16 sps:$4 sm:$0xff]  }
 0x7c1   : > { %v6084_v44 = vmax.f32 %v8324_v42, 0.0  ;;  %6582 = vmatmul.mubr.bf16.gmra.mrb[140].mxu1 %v8787_v6 }
 0x7c2   : > { %6589 = vmatprep.mubr.bf16.mxu1 %v8788_v24  ;;  %v2583_v24 = vld [vmem:[%s11539_s7 + $0x630] sm:$0xff] }
 0x7c3   : > { %v11066_v27 = vpack.c.bf16 %v6084_v44, %v6083_v15  ;;  %v11562_v15 = vld [vmem:[#allocation13_spill] sm:$0xff] }
 0x7c4   : > { %v5950_v21 = vpop.f32.mrb[80].mxu0  ;;  %v8337_v44 = vadd.f32 %v11562_v15, %v2583_v24  ;;  %v8806_v24 = vld [vmem:[#allocation5 + $0x144] ss:$16 sps:$4 sm:$0xff]  }
 0x7c5   : > { %v8326_v38 = vadd.f32 %v8325_v2, %v5950_v21  ;;  %v5952_v10 = vpop.f32.mrb[81].mxu0  ;;  %v11563_v21 = vld [vmem:[#allocation14_spill] sm:$0xff] }
 0x7c6   : > { %v5953_v30 = vpop.f32.mrb[82].mxu0 }
 0x7c7   : > { %v8328_v36 = vadd.f32 %v8327_v54, %v5953_v30  ;;  %v5955_v52 = vpop.f32.mrb[83].mxu0  ;;  %v6085_v14 = vmax.f32 %v8326_v38, 0.0  ;;  %v8339_v54 = vadd.f32 %v11563_v21, %v2584_v26  ;;  %v2589_v26 = vld [vmem:[%s11539_s7 + $0x660] sm:$0xff] }
 0x7c9   : > { %v6086_v19 = vmax.f32 %v8328_v36, 0.0  ;;  %6590 = vmatmul.mubr.bf16.gmra.mrb[144].mxu1 %v8790_v40  ;;  %v8799_v40 = vld [vmem:[#allocation5 + $0xe0] ss:$16 sps:$4 sm:$0xff]  }
 0x7ca   : > { %6597 = vmatprep.mubr.bf16.mxu1 %v8791_v18  ;;  %v8800_v18 = vld [vmem:[#allocation5 + $0x104] ss:$16 sps:$4 sm:$0xff]  }
 0x7cb   : > { %v11076_v57 = vpack.c.bf16 %v6086_v19, %v6085_v14 }
 0x7cc   : > { %v5958_v0 = vpop.f32.mrb[84].mxu0 }
 0x7cd   : > { %v8330_v33 = vadd.f32 %v8329_v61, %v5958_v0  ;;  %v5960_v31 = vpop.f32.mrb[85].mxu0  ;;  %v11564_v61 = vld [vmem:[#allocation15_spill] sm:$0xff] }
 0x7ce   : > { %v5961_v56 = vpop.f32.mrb[86].mxu0  ;;  %v8341_v0 = vadd.f32 %v11564_v61, %v2585_v50  ;;  %v11565_v31 = vld [vmem:[#allocation16_spill] sm:$0xff] }
 0x7cf   : > { %v8332_v59 = vadd.f32 %v8331_v4, %v5961_v56  ;;  %v5963_v12 = vpop.f32.mrb[87].mxu0  ;;  %v6087_v39 = vmax.f32 %v8330_v33, 0.0 }
 0x7d1   : > { %v6088_v9 = vmax.f32 %v8332_v59, 0.0  ;;  %6598 = vmatmul.mubr.bf16.gmra.mrb[148].mxu1 %v8793_v51  ;;  %v8343_v51 = vadd.f32 %v11565_v31, %v2586_v58  ;;  %v8802_v59 = vld [vmem:[#allocation5 + $0x100] ss:$16 sps:$4 sm:$0xff]  }
 0x7d2   : > { %6605 = vmatprep.mubr.bf16.mxu1 %v8794_v34  ;;  %v2592_v58 = vld [vmem:[%s11539_s7 + $0x678] sm:$0xff] }
 0x7d3   : > { %v11086_v29 = vpack.c.bf16 %v6088_v9, %v6087_v39 }
 0x7d4   : > { %v5966_v63 = vpop.f32.mrb[88].mxu0 }
 0x7d5   : > { %v8334_v43 = vadd.f32 %v8333_v46, %v5966_v63  ;;  %v5968_v8 = vpop.f32.mrb[89].mxu0  ;;  %v2588_v63 = vld [vmem:[%s11539_s7 + $0x658] sm:$0xff] }
 0x7d6   : > { %v5969_v25 = vpop.f32.mrb[90].mxu0  ;;  %v11566_v8 = vld [vmem:[#allocation17_spill] sm:$0xff] }
 0x7d7   : > { %v8336_v6 = vadd.f32 %v8335_v35, %v5969_v25  ;;  %v5971_v23 = vpop.f32.mrb[91].mxu0  ;;  %v6089_v42 = vmax.f32 %v8334_v43, 0.0 }
 0x7d9   : > { %v6090_v17 = vmax.f32 %v8336_v6, 0.0  ;;  %6606 = vmatmul.mubr.bf16.gmra.mrb[152].mxu1 %v8796_v11  ;;  %v8347_v11 = vadd.f32 %v11566_v8, %v2588_v63  ;;  %v8805_v6 = vld [vmem:[#allocation5 + $0x120] ss:$16 sps:$4 sm:$0xff]  }
 0x7da   : > { %6613 = vmatprep.mubr.bf16.mxu1 %v8797_v7  ;;  %v8814_v8 = vld [vmem:[#allocation5 + $0x180] ss:$16 sps:$4 sm:$0xff]  }
 0x7db   : > { %v11096_v60 = vpack.c.bf16 %v6090_v17, %v6089_v42 }
 0x7dc   : > { %v5974_v2 = vpop.f32.mrb[92].mxu0 }
 0x7dd   : > { %v8338_v38 = vadd.f32 %v8337_v44, %v5974_v2  ;;  %v5976_v10 = vpop.f32.mrb[93].mxu0  ;;  %v2590_v44 = vld [vmem:[%s11539_s7 + $0x668] sm:$0xff]  ;;  %v8349_v2 = vadd.f32 %v10851_v62, %v2589_v26 }
 0x7de   : > { %v5977_v30 = vpop.f32.mrb[94].mxu0 }
 0x7df   : > { %v8340_v36 = vadd.f32 %v8339_v54, %v5977_v30  ;;  %v5979_v52 = vpop.f32.mrb[95].mxu0  ;;  %v6091_v14 = vmax.f32 %v8338_v38, 0.0  ;;  %v8808_v30 = vld [vmem:[#allocation5 + $0x140] ss:$16 sps:$4 sm:$0xff]  }
 0x7e1   : > { %v6092_v19 = vmax.f32 %v8340_v36, 0.0  ;;  %6614 = vmatmul.mubr.bf16.gmra.mrb[156].mxu1 %v8799_v40  ;;  %v8809_v36 = vld [vmem:[#allocation5 + $0x164] ss:$16 sps:$4 sm:$0xff]  }
 0x7e2   : > { %6621 = vmatprep.mubr.bf16.mxu1 %v8800_v18 }
 0x7e3   : > { %v11106_v4 = vpack.c.bf16 %v6092_v19, %v6091_v14  ;;  %v2591_v14 = vld [vmem:[%s11539_s7 + $0x670] sm:$0xff] }
 0x7e4   : > { %v5982_v33 = vpop.f32.mrb[96].mxu0  ;;  %v8353_v61 = vadd.f32 %v10871_v28, %v2591_v14 }
 0x7e5   : > { %v8342_v56 = vadd.f32 %v8341_v0, %v5982_v33  ;;  %v5984_v34 = vpop.f32.mrb[97].mxu0 }
 0x7e6   : > { %v5985_v12 = vpop.f32.mrb[98].mxu0  ;;  %v8811_v34 = vld [vmem:[#allocation5 + $0x160] ss:$16 sps:$4 sm:$0xff]  }
 0x7e7   : > { %v8344_v39 = vadd.f32 %v8343_v51, %v5985_v12  ;;  %v5987_v9 = vpop.f32.mrb[99].mxu0  ;;  %v6093_v55 = vmax.f32 %v8342_v56, 0.0  ;;  %v8812_v12 = vld [vmem:[#allocation5 + $0x184] ss:$16 sps:$4 sm:$0xff]  }
 0x7e8   : > { %v2593_v9 = vld [vmem:[%s11539_s7 + $0x680] sm:$0xff] }
 0x7e9   : > { %v6094_v46 = vmax.f32 %v8344_v39, 0.0  ;;  %6622 = vmatmul.mubr.bf16.gmra.mrb[160].mxu1 %v8802_v59 }
 0x7ea   : > { %6629 = vmatprep.mubr.bf16.mxu1 %v8803_v22 }
 0x7eb   : > { %v6197_v35 = vpack.c.bf16 %v6094_v46, %v6093_v55  ;;  %v2594_v55 = vld [vmem:[%s11539_s7 + $0x688] sm:$0xff]  ;;  %v8357_v46 = vadd.f32 %v10891_v16, %v2593_v9 }
 0x7ec   : > { %v5990_v43 = vpop.f32.mrb[100].mxu0 }
 0x7ed   : > { %v8346_v25 = vadd.f32 %v8345_v53, %v5990_v43  ;;  %v5992_v7 = vpop.f32.mrb[101].mxu0  ;;  %7843 = vmatprep.subr.bf16.mxu1 %v6197_v35 }
 0x7ee   : > { %v5993_v23 = vpop.f32.mrb[102].mxu0  ;;  %7844 = vmatpush3.bf16.msra.mxu1 %v11036_v5  ;;  %v11567_v5 = vld [vmem:[#allocation18_spill] sm:$0xff] }
 0x7ef   : > { %v8348_v42 = vadd.f32 %v8347_v11, %v5993_v23  ;;  %v5995_v17 = vpop.f32.mrb[103].mxu0  ;;  %v6095_v15 = vmax.f32 %v8346_v25, 0.0  ;;  %v8351_v38 = vadd.f32 %v11567_v5, %v2590_v44  ;;  %v8815_v25 = vld [vmem:[#allocation5 + $0x1a4] ss:$16 sps:$4 sm:$0xff]   ;;  %v2595_v23 = vld [vmem:[%s11539_s7 + $0x690] sm:$0xff] }
 0x7f0   : > { %v8817_v44 = vld [vmem:[#allocation5 + $0x1a0] ss:$16 sps:$4 sm:$0xff]  }
 0x7f1   : > { %v6096_v3 = vmax.f32 %v8348_v42, 0.0  ;;  %6630 = vmatmul.mubr.bf16.gmra.mrb[164].mxu1 %v8805_v6  ;;  %v8361_v42 = vadd.f32 %v10905_v32, %v2595_v23  ;;  %v8850_v23 = vld [vmem:[#allocation5 + $0x108] ss:$16 sps:$4 sm:$0xff]  }
 0x7f2   : > { %6637 = vmatprep.mubr.bf16.mxu1 %v8806_v24 }
 0x7f3   : > { %v6198_v21 = vpack.c.bf16 %v6096_v3, %v6095_v15 }
 0x7f4   : > { %v5998_v54 = vpop.f32.mrb[104].mxu0 }
 0x7f5   : > { %v8350_v10 = vadd.f32 %v8349_v2, %v5998_v54  ;;  %v6000_v40 = vpop.f32.mrb[105].mxu0  ;;  %7845 = vmatprep.subr.bf16.mxu1 %v6198_v21  ;;  %v8818_v21 = vld [vmem:[#allocation5 + $0x1c4] ss:$16 sps:$4 sm:$0xff]  }
 0x7f6   : > { %v6001_v18 = vpop.f32.mrb[106].mxu0  ;;  %7846 = vmatpush3.bf16.msra.mxu1 %v11046_v45  ;;  %v11568_v45 = vld [vmem:[#allocation19_spill] sm:$0xff] }
 0x7f7   : > { %v8352_v52 = vadd.f32 %v8351_v38, %v6001_v18  ;;  %v6003_v50 = vpop.f32.mrb[107].mxu0  ;;  %v6097_v19 = vmax.f32 %v8350_v10, 0.0  ;;  %v8355_v31 = vadd.f32 %v11568_v45, %v2592_v58  ;;  %v2597_v38 = vld [vmem:[%s11539_s7 + $0x6a0] sm:$0xff] }
 0x7f8   : > { %v8365_v40 = vadd.f32 %v10919_v13, %v2597_v38  ;;  %v8820_v50 = vld [vmem:[#allocation5 + $0x1c0] ss:$16 sps:$4 sm:$0xff]  }
 0x7f9   : > { %v6098_v62 = vmax.f32 %v8352_v52, 0.0  ;;  %6638 = vmatmul.mubr.bf16.gmra.mrb[168].mxu1 %v8808_v30 }
 0x7fa   : > { %6645 = vmatprep.mubr.bf16.mxu1 %v8809_v36 }
 0x7fb   : > { %v6199_v0 = vpack.c.bf16 %v6098_v62, %v6097_v19  ;;  %v8821_v19 = vld [vmem:[#allocation5 + $0x1e4] ss:$16 sps:$4 sm:$0xff]  }
 0x7fc   : > { %v6006_v33 = vpop.f32.mrb[108].mxu0 }
 0x7fd   : > { %v8354_v51 = vadd.f32 %v8353_v61, %v6006_v33  ;;  %v6008_v56 = vpop.f32.mrb[109].mxu0  ;;  %7847 = vmatprep.subr.bf16.mxu1 %v6199_v0  ;;  %v2599_v61 = vld [vmem:[%s11539_s7 + $0x6b0] sm:$0xff] }
 0x7fe   : > { %v6009_v59 = vpop.f32.mrb[110].mxu0  ;;  %7848 = vmatpush3.bf16.msra.mxu1 %v11056_v1  ;;  %v8359_v1 = vadd.f32 %v10896_v49, %v2594_v55  ;;  %v2596_v49 = vld [vmem:[%s11539_s7 + $0x698] sm:$0xff]  ;;  %v8369_v33 = vadd.f32 %v10933_v48, %v2599_v61  ;;  %v8824_v48 = vld [vmem:[#allocation5 + $0x8] ss:$16 sps:$4 sm:$0xff]  }
 0x7ff   : > { %v8356_v22 = vadd.f32 %v8355_v31, %v6009_v59  ;;  %v6011_v39 = vpop.f32.mrb[111].mxu0  ;;  %v6099_v20 = vmax.f32 %v8354_v51, 0.0  ;;  %v8829_v55 = vld [vmem:[#allocation5 + $0x28] ss:$16 sps:$4 sm:$0xff]  }
 0x801   : > { %v6100_v28 = vmax.f32 %v8356_v22, 0.0  ;;  %6646 = vmatmul.mubr.bf16.gmra.mrb[172].mxu1 %v8811_v34  ;;  %v8823_v34 = vld [vmem:[#allocation5 + $0x1e0] ss:$16 sps:$4 sm:$0xff]  }
 0x802   : > { %6653 = vmatprep.mubr.bf16.mxu1 %v8812_v12  ;;  %v8826_v12 = vld [vmem:[#allocation5 + $0xc] ss:$16 sps:$4 sm:$0xff]  }
 0x803   : > { %v6200_v63 = vpack.c.bf16 %v6100_v28, %v6099_v20 }
 0x804   : > { %v6014_v53 = vpop.f32.mrb[112].mxu0 }
 0x805   : > { %v8358_v35 = vadd.f32 %v8357_v46, %v6014_v53  ;;  %v6016_v43 = vpop.f32.mrb[113].mxu0  ;;  %7849 = vmatprep.subr.bf16.mxu1 %v6200_v63  ;;  %v8830_v46 = vld [vmem:[#allocation5 + $0x4c] ss:$16 sps:$4 sm:$0xff]   ;;  %v8835_v53 = vld [vmem:[#allocation5 + $0x68] ss:$16 sps:$4 sm:$0xff]  }
 0x806   : > { %v6017_v11 = vpop.f32.mrb[114].mxu0  ;;  %7850 = vmatpush3.bf16.msra.mxu1 %v11066_v27  ;;  %v8363_v27 = vadd.f32 %v10910_v47, %v2596_v49  ;;  %v2598_v47 = vld [vmem:[%s11539_s7 + $0x6a8] sm:$0xff]  ;;  %v8833_v63 = vld [vmem:[#allocation5 + $0x6c] ss:$16 sps:$4 sm:$0xff]  }
 0x807   : > { %v8360_v7 = vadd.f32 %v8359_v1, %v6017_v11  ;;  %v6019_v6 = vpop.f32.mrb[115].mxu0  ;;  %v6101_v24 = vmax.f32 %v8358_v35, 0.0  ;;  %v8836_v1 = vld [vmem:[#allocation5 + $0x8c] ss:$16 sps:$4 sm:$0xff]   ;;  %v8838_v35 = vld [vmem:[#allocation5 + $0x88] ss:$16 sps:$4 sm:$0xff]  }
 0x808   : > { %v8839_v43 = vld [vmem:[#allocation5 + $0xac] ss:$16 sps:$4 sm:$0xff]   ;;  %v8844_v11 = vld [vmem:[#allocation5 + $0xc8] ss:$16 sps:$4 sm:$0xff]  }
 0x809   : > { %v6102_v16 = vmax.f32 %v8360_v7, 0.0  ;;  %6654 = vmatmul.mubr.bf16.gmra.mrb[176].mxu1 %v8814_v8  ;;  %v8842_v8 = vld [vmem:[#allocation5 + $0xcc] ss:$16 sps:$4 sm:$0xff]   ;;  %v8847_v7 = vld [vmem:[#allocation5 + $0xe8] ss:$16 sps:$4 sm:$0xff]  }
 0x80a   : > { %6661 = vmatprep.mubr.bf16.mxu1 %v8815_v25  ;;  %v8845_v25 = vld [vmem:[#allocation5 + $0xec] ss:$16 sps:$4 sm:$0xff]  }
 0x80b   : > { %v6201_v17 = vpack.c.bf16 %v6102_v16, %v6101_v24  ;;  %v8848_v6 = vld [vmem:[#allocation5 + $0x10c] ss:$16 sps:$4 sm:$0xff]   ;;  %v8853_v16 = vld [vmem:[#allocation5 + $0x128] ss:$16 sps:$4 sm:$0xff]  }
 0x80c   : > { %v6022_v26 = vpop.f32.mrb[116].mxu0  ;;  %v8851_v24 = vld [vmem:[#allocation5 + $0x12c] ss:$16 sps:$4 sm:$0xff]  }
 0x80d   : > { %v8362_v15 = vadd.f32 %v8361_v42, %v6022_v26  ;;  %v6024_v3 = vpop.f32.mrb[117].mxu0  ;;  %7851 = vmatprep.subr.bf16.mxu1 %v6201_v17  ;;  %v8854_v49 = vld [vmem:[#allocation5 + $0x14c] ss:$16 sps:$4 sm:$0xff]   ;;  %v8856_v42 = vld [vmem:[#allocation5 + $0x148] ss:$16 sps:$4 sm:$0xff]  }
 0x80e   : > { %v6025_v2 = vpop.f32.mrb[118].mxu0  ;;  %7852 = vmatpush3.bf16.msra.mxu1 %v11076_v57  ;;  %v8367_v57 = vadd.f32 %v10924_v41, %v2598_v47  ;;  %v2600_v41 = vld [vmem:[%s11539_s7 + $0x6b8] sm:$0xff]  ;;  %v8857_v17 = vld [vmem:[#allocation5 + $0x16c] ss:$16 sps:$4 sm:$0xff]  }
 0x80f   : > { %v8364_v54 = vadd.f32 %v8363_v27, %v6025_v2  ;;  %v6027_v5 = vpop.f32.mrb[119].mxu0  ;;  %v6103_v10 = vmax.f32 %v8362_v15, 0.0  ;;  %v8859_v15 = vld [vmem:[#allocation5 + $0x168] ss:$16 sps:$4 sm:$0xff]   ;;  %v8860_v2 = vld [vmem:[#allocation5 + $0x18c] ss:$16 sps:$4 sm:$0xff]  }
 0x811   : > { %v6104_v32 = vmax.f32 %v8364_v54, 0.0  ;;  %6662 = vmatmul.mubr.bf16.gmra.mrb[180].mxu1 %v8817_v44 }
 0x812   : > { %6669 = vmatprep.mubr.bf16.mxu1 %v8818_v21 }
 0x813   : > { %v6202_v30 = vpack.c.bf16 %v6104_v32, %v6103_v10  ;;  %v8862_v10 = vld [vmem:[#allocation5 + $0x188] ss:$16 sps:$4 sm:$0xff]  }
 0x814   : > { %v6030_v18 = vpop.f32.mrb[120].mxu0 }
 0x815   : > { %v8366_v36 = vadd.f32 %v8365_v40, %v6030_v18  ;;  %v6032_v52 = vpop.f32.mrb[121].mxu0  ;;  %7853 = vmatprep.subr.bf16.mxu1 %v6202_v30  ;;  %v8863_v40 = vld [vmem:[#allocation5 + $0x1ac] ss:$16 sps:$4 sm:$0xff]  }
 0x816   : > { %v6033_v14 = vpop.f32.mrb[122].mxu0  ;;  %7854 = vmatpush3.bf16.msra.mxu1 %v11086_v29  ;;  %v8371_v29 = vadd.f32 %v10938_v37, %v2600_v41  ;;  %v8827_v37 = vld [vmem:[#allocation5 + $0x2c] ss:$16 sps:$4 sm:$0xff]   ;;  %v8865_v52 = vld [vmem:[#allocation5 + $0x1a8] ss:$16 sps:$4 sm:$0xff]  }
 0x817   : > { %v8368_v62 = vadd.f32 %v8367_v57, %v6033_v14  ;;  %v6035_v58 = vpop.f32.mrb[123].mxu0  ;;  %v6105_v0 = vmax.f32 %v8366_v36, 0.0 }
 0x819   : > { %v6106_v13 = vmax.f32 %v8368_v62, 0.0  ;;  %6670 = vmatmul.mubr.bf16.gmra.mrb[184].mxu1 %v8820_v50 }
 0x81a   : > { %6677 = vmatprep.mubr.bf16.mxu1 %v8821_v19  ;;  %v8866_v19 = vld [vmem:[#allocation5 + $0x1cc] ss:$16 sps:$4 sm:$0xff]  }
 0x81b   : > { %v6203_v45 = vpack.c.bf16 %v6106_v13, %v6105_v0  ;;  %v8868_v13 = vld [vmem:[#allocation5 + $0x1c8] ss:$16 sps:$4 sm:$0xff]  }
 0x81c   : > { %v6038_v31 = vpop.f32.mrb[124].mxu0 }
 0x81d   : > { %v8370_v51 = vadd.f32 %v8369_v33, %v6038_v31  ;;  %v6040_v56 = vpop.f32.mrb[125].mxu0  ;;  %7855 = vmatprep.subr.bf16.mxu1 %v6203_v45  ;;  %v8869_v45 = vld [vmem:[#allocation5 + $0x1ec] ss:$16 sps:$4 sm:$0xff]  }
 0x81e   : > { %v6041_v59 = vpop.f32.mrb[126].mxu0  ;;  %7856 = vmatpush3.bf16.msra.mxu1 %v11096_v60  ;;  %v8832_v60 = vld [vmem:[#allocation5 + $0x48] ss:$16 sps:$4 sm:$0xff]  }
 0x81f   : > { %v8372_v22 = vadd.f32 %v8371_v29, %v6041_v59  ;;  %v6043_v39 = vpop.f32.mrb[127].mxu0  ;;  %v6107_v9 = vmax.f32 %v8370_v51, 0.0 }
 0x821   : > { %v6108_v20 = vmax.f32 %v8372_v22, 0.0  ;;  %6678 = vmatmul.mubr.bf16.gmra.mrb[188].mxu1 %v8823_v34  ;;  %v8871_v34 = vld [vmem:[#allocation5 + $0x1e8] ss:$16 sps:$4 sm:$0xff]  }
 0x822   : > { %6718 = vmatprep.mubr.bf16.mxu1 %v8826_v12 }
 0x823   : > { %v6204_v28 = vpack.c.bf16 %v6108_v20, %v6107_v9 }
 0x825   : > { %7857 = vmatprep.subr.bf16.mxu1 %v6204_v28 }
 0x826   : > { %7858 = vmatpush3.bf16.msra.mxu1 %v11106_v4  ;;  %v8841_v4 = vld [vmem:[#allocation5 + $0xa8] ss:$16 sps:$4 sm:$0xff]  }
 0x829   : > { %6719 = vmatmul.mubr.bf16.vlgmr.msra.gmra.mrb[192].mxu1 %v8824_v48 }
 0x82a   : > { %6726 = vmatprep.mubr.bf16.mxu1 %v8827_v37 }
 0x831   : > { %6727 = vmatmul.mubr.bf16.gmra.mrb[196].mxu1 %v8829_v55 }
 0x832   : > { %6734 = vmatprep.mubr.bf16.mxu1 %v8830_v46 }
 0x839   : > { %6735 = vmatmul.mubr.bf16.gmra.mrb[200].mxu1 %v8832_v60 }
 0x83a   : > { %6742 = vmatprep.mubr.bf16.mxu1 %v8833_v63 }
 0x841   : > { %6743 = vmatmul.mubr.bf16.gmra.mrb[204].mxu1 %v8835_v53 }
 0x842   : > { %6750 = vmatprep.mubr.bf16.mxu1 %v8836_v1 }
 0x849   : > { %6751 = vmatmul.mubr.bf16.gmra.mrb[208].mxu1 %v8838_v35 }
 0x84a   : > { %6758 = vmatprep.mubr.bf16.mxu1 %v8839_v43 }
 0x851   : > { %6759 = vmatmul.mubr.bf16.gmra.mrb[212].mxu1 %v8841_v4 }
 0x852   : > { %6766 = vmatprep.mubr.bf16.mxu1 %v8842_v8 }
 0x859   : > { %6767 = vmatmul.mubr.bf16.gmra.mrb[216].mxu1 %v8844_v11 }
 0x85a   : > { %6774 = vmatprep.mubr.bf16.mxu1 %v8845_v25 }
 0x861   : > { %6775 = vmatmul.mubr.bf16.gmra.mrb[220].mxu1 %v8847_v7 }
 0x862   : > { %6782 = vmatprep.mubr.bf16.mxu1 %v8848_v6 }
 0x869   : > { %6783 = vmatmul.mubr.bf16.gmra.mrb[224].mxu1 %v8850_v23 }
 0x86a   : > { %6790 = vmatprep.mubr.bf16.mxu1 %v8851_v24 }
 0x871   : > { %6791 = vmatmul.mubr.bf16.gmra.mrb[228].mxu1 %v8853_v16 }
 0x872   : > { %6798 = vmatprep.mubr.bf16.mxu1 %v8854_v49 }
 0x879   : > { %6799 = vmatmul.mubr.bf16.gmra.mrb[232].mxu1 %v8856_v42 }
 0x87a   : > { %6806 = vmatprep.mubr.bf16.mxu1 %v8857_v17 }
 0x87c   : > { %v7747_v26 = vpop.f32.mrb[128].mxu1 }
 0x87d   : > { %v7748_v27 = vpop.f32.mrb[129].mxu1 }
 0x87e   : > { %v11173_v3 = vadd.f32 %v7748_v27, %v7747_v26  ;;  %v7750_v44 = vpop.f32.mrb[130].mxu1 }
 0x87f   : > { %v7751_v21 = vpop.f32.mrb[131].mxu1 }
 0x880   : > { %v11175_v54 = vadd.f32 %v7751_v21, %v7750_v44 }
 0x881   : > { %6807 = vmatmul.mubr.bf16.gmra.mrb[236].mxu1 %v8859_v15 }
 0x882   : > { %6814 = vmatprep.mubr.bf16.mxu1 %v8860_v2 }
 0x884   : > { %v7753_v5 = vpop.f32.mrb[132].mxu1 }
 0x885   : > { %v7754_v38 = vpop.f32.mrb[133].mxu1 }
 0x886   : > { %v11177_v32 = vadd.f32 %v7754_v38, %v7753_v5  ;;  %v7756_v47 = vpop.f32.mrb[134].mxu1 }
 0x887   : > { %v7757_v30 = vpop.f32.mrb[135].mxu1 }
 0x888   : > { %v11179_v18 = vadd.f32 %v7757_v30, %v7756_v47 }
 0x889   : > { %6815 = vmatmul.mubr.bf16.gmra.mrb[240].mxu1 %v8862_v10 }
 0x88a   : > { %6822 = vmatprep.mubr.bf16.mxu1 %v8863_v40 }
 0x88c   : > { %v7759_v57 = vpop.f32.mrb[136].mxu1 }
 0x88d   : > { %v7760_v36 = vpop.f32.mrb[137].mxu1 }
 0x88e   : > { %v11181_v50 = vadd.f32 %v7760_v36, %v7759_v57  ;;  %v7762_v14 = vpop.f32.mrb[138].mxu1 }
 0x88f   : > { %v7763_v62 = vpop.f32.mrb[139].mxu1 }
 0x890   : > { %v11183_v58 = vadd.f32 %v7763_v62, %v7762_v14 }
 0x891   : > { %6823 = vmatmul.mubr.bf16.gmra.mrb[244].mxu1 %v8865_v52 }
 0x892   : > { %6830 = vmatprep.mubr.bf16.mxu1 %v8866_v19 }
 0x894   : > { %v7765_v61 = vpop.f32.mrb[140].mxu1 }
 0x895   : > { %v7766_v0 = vpop.f32.mrb[141].mxu1 }
 0x896   : > { %v11185_v41 = vadd.f32 %v7766_v0, %v7765_v61  ;;  %v7768_v33 = vpop.f32.mrb[142].mxu1 }
 0x897   : > { %v7769_v31 = vpop.f32.mrb[143].mxu1 }
 0x898   : > { %v11187_v29 = vadd.f32 %v7769_v31, %v7768_v33 }
 0x899   : > { %6831 = vmatmul.mubr.bf16.gmra.mrb[248].mxu1 %v8868_v13 }
 0x89a   : > { %6838 = vmatprep.mubr.bf16.mxu1 %v8869_v45 }
 0x89c   : > { %v7771_v51 = vpop.f32.mrb[144].mxu1 }
 0x89d   : > { %v7772_v56 = vpop.f32.mrb[145].mxu1 }
 0x89e   : > { %v11189_v59 = vadd.f32 %v7772_v56, %v7771_v51  ;;  %v7774_v12 = vpop.f32.mrb[146].mxu1 }
 0x89f   : > { %v7775_v22 = vpop.f32.mrb[147].mxu1 }
 0x8a0   : > { %v11191_v39 = vadd.f32 %v7775_v22, %v7774_v12 }
 0x8a1   : > { %6839 = vmatmul.mubr.bf16.gmra.mrb[252].mxu1 %v8871_v34 }
 0x8a4   : > { %v7777_v9 = vpop.f32.mrb[148].mxu1 }
 0x8a5   : > { %v7778_v20 = vpop.f32.mrb[149].mxu1 }
 0x8a6   : > { %v11193_v28 = vadd.f32 %v7778_v20, %v7777_v9  ;;  %v7780_v48 = vpop.f32.mrb[150].mxu1 }
 0x8a7   : > { %v7781_v37 = vpop.f32.mrb[151].mxu1 }
 0x8a8   : > { %v11195_v55 = vadd.f32 %v7781_v37, %v7780_v48 }
 0x8ac   : > { %v7783_v46 = vpop.f32.mrb[152].mxu1 }
 0x8ad   : > { %v7784_v60 = vpop.f32.mrb[153].mxu1 }
 0x8ae   : > { %v11197_v63 = vadd.f32 %v7784_v60, %v7783_v46  ;;  %v7786_v53 = vpop.f32.mrb[154].mxu1 }
 0x8af   : > { %v7787_v1 = vpop.f32.mrb[155].mxu1 }
 0x8b0   : > { %v11199_v35 = vadd.f32 %v7787_v1, %v7786_v53 }
 0x8b4   : > { %v7789_v43 = vpop.f32.mrb[156].mxu1 }
 0x8b5   : > { %v7790_v4 = vpop.f32.mrb[157].mxu1 }
 0x8b6   : > { %v11201_v8 = vadd.f32 %v7790_v4, %v7789_v43  ;;  %v7792_v11 = vpop.f32.mrb[158].mxu1 }
 0x8b7   : > { %v7793_v25 = vpop.f32.mrb[159].mxu1 }
 0x8b8   : > { %v11203_v7 = vadd.f32 %v7793_v25, %v7792_v11 }
 0x8bc   : > { %v7795_v6 = vpop.f32.mrb[160].mxu1 }
 0x8bd   : > { %v7796_v23 = vpop.f32.mrb[161].mxu1 }
 0x8be   : > { %v11205_v24 = vadd.f32 %v7796_v23, %v7795_v6  ;;  %v7798_v16 = vpop.f32.mrb[162].mxu1  ;;  %v2601_v6 = vld [vmem:[%s11539_s7 + $0x6c0] sm:$0xff] }
 0x8bf   : > { %v7799_v49 = vpop.f32.mrb[163].mxu1 }
 0x8c0   : > { %v11207_v42 = vadd.f32 %v7799_v49, %v7798_v16  ;;  %v2602_v16 = vld [vmem:[%s11539_s7 + $0x6c8] sm:$0xff] }
 0x8c4   : > { %v7801_v17 = vpop.f32.mrb[164].mxu1 }
 0x8c5   : > { %v7802_v26 = vpop.f32.mrb[165].mxu1 }
 0x8c6   : > { %v11209_v27 = vadd.f32 %v7802_v26, %v7801_v17  ;;  %v7804_v15 = vpop.f32.mrb[166].mxu1  ;;  %v6560_v17 = vadd.f32 %v11173_v3, %v2601_v6 }
 0x8c7   : > { %v7805_v44 = vpop.f32.mrb[167].mxu1 }
 0x8c8   : > { %v11211_v2 = vadd.f32 %v7805_v44, %v7804_v15 }
 0x8cc   : > { %v7807_v21 = vpop.f32.mrb[168].mxu1 }
 0x8cd   : > { %v7808_v5 = vpop.f32.mrb[169].mxu1 }
 0x8ce   : > { %v11213_v38 = vadd.f32 %v7808_v5, %v7807_v21  ;;  %v7810_v10 = vpop.f32.mrb[170].mxu1  ;;  %v6563_v21 = vadd.f32 %v11175_v54, %v2602_v16 }
 0x8cf   : > { %v7811_v47 = vpop.f32.mrb[171].mxu1 }
 0x8d0   : > { %v11215_v40 = vadd.f32 %v7811_v47, %v7810_v10  ;;  %v8874_v47 = vld [vmem:[%s11538_s6 + $0x4] ss:$8 sps:$4 sm:$0xff]  }
 0x8d1   : > { %7023 = vmatprep.mubr.bf16.mxu1 %v8874_v47 }
 0x8d4   : > { %v7813_v30 = vpop.f32.mrb[172].mxu1 }
 0x8d5   : > { %v7814_v57 = vpop.f32.mrb[173].mxu1 }
 0x8d6   : > { %v11217_v36 = vadd.f32 %v7814_v57, %v7813_v30  ;;  %v7816_v52 = vpop.f32.mrb[174].mxu1  ;;  %v2603_v57 = vld [vmem:[%s11539_s7 + $0x6d0] sm:$0xff] }
 0x8d7   : > { %v7817_v14 = vpop.f32.mrb[175].mxu1 }
 0x8d8   : > { %v11219_v19 = vadd.f32 %v7817_v14, %v7816_v52 }
 0x8dc   : > { %v7819_v62 = vpop.f32.mrb[176].mxu1 }
 0x8dd   : > { %v7820_v61 = vpop.f32.mrb[177].mxu1 }
 0x8de   : > { %v11221_v0 = vadd.f32 %v7820_v61, %v7819_v62  ;;  %v7822_v13 = vpop.f32.mrb[178].mxu1  ;;  %v2604_v62 = vld [vmem:[%s11539_s7 + $0x6d8] sm:$0xff]  ;;  %v6568_v61 = vadd.f32 %v11177_v32, %v2603_v57  ;;  %v2606_v32 = vld [vmem:[%s11539_s7 + $0x6e8] sm:$0xff] }
 0x8df   : > { %v7823_v33 = vpop.f32.mrb[179].mxu1 }
 0x8e0   : > { %v11223_v45 = vadd.f32 %v7823_v33, %v7822_v13 }
 0x8e4   : > { %v7825_v31 = vpop.f32.mrb[180].mxu1 }
 0x8e5   : > { %v7826_v51 = vpop.f32.mrb[181].mxu1 }
 0x8e6   : > { %v11225_v56 = vadd.f32 %v7826_v51, %v7825_v31  ;;  %v7828_v34 = vpop.f32.mrb[182].mxu1 }
 0x8e7   : > { %v7829_v12 = vpop.f32.mrb[183].mxu1 }
 0x8e8   : > { %v11227_v22 = vadd.f32 %v7829_v12, %v7828_v34  ;;  %v6571_v34 = vadd.f32 %v11179_v18, %v2604_v62 }
 0x8ec   : > { %v7831_v9 = vpop.f32.mrb[184].mxu1 }
 0x8ed   : > { %v7832_v20 = vpop.f32.mrb[185].mxu1 }
 0x8ee   : > { %v11229_v48 = vadd.f32 %v7832_v20, %v7831_v9  ;;  %v7834_v37 = vpop.f32.mrb[186].mxu1 }
 0x8ef   : > { %v7835_v46 = vpop.f32.mrb[187].mxu1 }
 0x8f0   : > { %v11231_v60 = vadd.f32 %v7835_v46, %v7834_v37  ;;  %v2605_v37 = vld [vmem:[%s11539_s7 + $0x6e0] sm:$0xff] }
 0x8f4   : > { %v7837_v53 = vpop.f32.mrb[188].mxu1 }
 0x8f5   : > { %v7838_v1 = vpop.f32.mrb[189].mxu1 }
 0x8f6   : > { %v11233_v43 = vadd.f32 %v7838_v1, %v7837_v53  ;;  %v7840_v4 = vpop.f32.mrb[190].mxu1 }
 0x8f7   : > { %v7841_v11 = vpop.f32.mrb[191].mxu1 }
 0x8f8   : > { %v11235_v25 = vadd.f32 %v7841_v11, %v7840_v4  ;;  %v6576_v11 = vadd.f32 %v11181_v50, %v2605_v37  ;;  %v2608_v50 = vld [vmem:[%s11539_s7 + $0x6f8] sm:$0xff] }
 0x8fc   : > { %v7859_v23 = vpop.f32.mrb[192].mxu1 }
 0x8fd   : > { %v7860_v49 = vpop.f32.mrb[193].mxu1 }
 0x8fe   : > { %v7861_v26 = vadd.f32 %v7860_v49, %v7859_v23  ;;  %v7862_v15 = vpop.f32.mrb[194].mxu1  ;;  %v6579_v49 = vadd.f32 %v11183_v58, %v2606_v32 }
 0x8ff   : > { %v7863_v44 = vpop.f32.mrb[195].mxu1 }
 0x900   : > { %v6721_v5 = vadd.f32 %v7861_v26, %v6560_v17  ;;  %v7864_v10 = vadd.f32 %v7863_v44, %v7862_v15  ;;  %v2607_v44 = vld [vmem:[%s11539_s7 + $0x6f0] sm:$0xff] }
 0x902   : > { %v6724_v30 = vadd.f32 %v7864_v10, %v6563_v21  ;;  %v6847_v52 = vmax.f32 %v6721_v5, 0.0 }
 0x904   : > { %v6848_v14 = vmax.f32 %v6724_v30, 0.0  ;;  %v7865_v3 = vpop.f32.mrb[196].mxu1  ;;  %v6584_v30 = vadd.f32 %v11185_v41, %v2607_v44  ;;  %v2610_v41 = vld [vmem:[%s11539_s7 + $0x708] sm:$0xff] }
 0x905   : > { %v7866_v54 = vpop.f32.mrb[197].mxu1 }
 0x906   : > { %v11255_v13 = vpack.c.bf16 %v6848_v14, %v6847_v52  ;;  %v7867_v33 = vadd.f32 %v7866_v54, %v7865_v3  ;;  %v7868_v31 = vpop.f32.mrb[198].mxu1  ;;  %v6587_v3 = vadd.f32 %v11187_v29, %v2608_v50 }
 0x907   : > { %v7869_v51 = vpop.f32.mrb[199].mxu1 }
 0x908   : > { %v6729_v12 = vadd.f32 %v7867_v33, %v6568_v61  ;;  %v7870_v9 = vadd.f32 %v7869_v51, %v7868_v31  ;;  %v2609_v33 = vld [vmem:[%s11539_s7 + $0x700] sm:$0xff] }
 0x90a   : > { %v6732_v20 = vadd.f32 %v7870_v9, %v6571_v34  ;;  %v6849_v46 = vmax.f32 %v6729_v12, 0.0  ;;  %v6592_v9 = vadd.f32 %v11189_v59, %v2609_v33  ;;  %v2612_v59 = vld [vmem:[%s11539_s7 + $0x718] sm:$0xff] }
 0x90c   : > { %v6850_v53 = vmax.f32 %v6732_v20, 0.0  ;;  %v7871_v1 = vpop.f32.mrb[200].mxu1 }
 0x90d   : > { %v7872_v4 = vpop.f32.mrb[201].mxu1 }
 0x90e   : > { %v11265_v6 = vpack.c.bf16 %v6850_v53, %v6849_v46  ;;  %v7873_v18 = vadd.f32 %v7872_v4, %v7871_v1  ;;  %v7874_v23 = vpop.f32.mrb[202].mxu1  ;;  %v6595_v53 = vadd.f32 %v11191_v39, %v2610_v41  ;;  %v2615_v41 = vld [vmem:[%s11539_s7 + $0x730] sm:$0xff] }
 0x90f   : > { %v7875_v16 = vpop.f32.mrb[203].mxu1 }
 0x910   : > { %v6737_v17 = vadd.f32 %v7873_v18, %v6576_v11  ;;  %v7876_v26 = vadd.f32 %v7875_v16, %v7874_v23  ;;  %v2611_v11 = vld [vmem:[%s11539_s7 + $0x710] sm:$0xff] }
 0x912   : > { %v6740_v15 = vadd.f32 %v7876_v26, %v6579_v49  ;;  %v6851_v21 = vmax.f32 %v6737_v17, 0.0  ;;  %v6600_v17 = vadd.f32 %v11193_v28, %v2611_v11  ;;  %v2614_v28 = vld [vmem:[%s11539_s7 + $0x728] sm:$0xff] }
 0x913   : > { %v6611_v33 = vadd.f32 %v11199_v35, %v2614_v28 }
 0x914   : > { %v6852_v5 = vmax.f32 %v6740_v15, 0.0  ;;  %v7877_v10 = vpop.f32.mrb[204].mxu1 }
 0x915   : > { %v7878_v47 = vpop.f32.mrb[205].mxu1 }
 0x916   : > { %v11275_v57 = vpack.c.bf16 %v6852_v5, %v6851_v21  ;;  %v7879_v58 = vadd.f32 %v7878_v47, %v7877_v10  ;;  %v7880_v52 = vpop.f32.mrb[206].mxu1  ;;  %v6603_v21 = vadd.f32 %v11195_v55, %v2612_v59  ;;  %v2613_v47 = vld [vmem:[%s11539_s7 + $0x720] sm:$0xff] }
 0x917   : > { %v7881_v14 = vpop.f32.mrb[207].mxu1 }
 0x918   : > { %v6745_v62 = vadd.f32 %v7879_v58, %v6584_v30  ;;  %v7882_v54 = vadd.f32 %v7881_v14, %v7880_v52 }
 0x91a   : > { %v6748_v61 = vadd.f32 %v7882_v54, %v6587_v3  ;;  %v6853_v31 = vmax.f32 %v6745_v62, 0.0  ;;  %v6608_v3 = vadd.f32 %v11197_v63, %v2613_v47  ;;  %v2616_v63 = vld [vmem:[%s11539_s7 + $0x738] sm:$0xff] }
 0x91c   : > { %v6854_v51 = vmax.f32 %v6748_v61, 0.0  ;;  %v7883_v34 = vpop.f32.mrb[208].mxu1 }
 0x91d   : > { %v7884_v12 = vpop.f32.mrb[209].mxu1 }
 0x91e   : > { %v11285_v20 = vpack.c.bf16 %v6854_v51, %v6853_v31  ;;  %v7885_v29 = vadd.f32 %v7884_v12, %v7883_v34  ;;  %v7886_v37 = vpop.f32.mrb[210].mxu1 }
 0x91f   : > { %v7887_v46 = vpop.f32.mrb[211].mxu1 }
 0x920   : > { %v6753_v1 = vadd.f32 %v7885_v29, %v6592_v9  ;;  %v7888_v32 = vadd.f32 %v7887_v46, %v7886_v37  ;;  %v6616_v46 = vadd.f32 %v11201_v8, %v2615_v41  ;;  %v2618_v8 = vld [vmem:[%s11539_s7 + $0x748] sm:$0xff] }
 0x922   : > { %v6756_v4 = vadd.f32 %v7888_v32, %v6595_v53  ;;  %v6855_v18 = vmax.f32 %v6753_v1, 0.0 }
 0x924   : > { %v6856_v23 = vmax.f32 %v6756_v4, 0.0  ;;  %v7889_v16 = vpop.f32.mrb[212].mxu1  ;;  %v6619_v4 = vadd.f32 %v11203_v7, %v2616_v63 }
 0x925   : > { %v7890_v49 = vpop.f32.mrb[213].mxu1 }
 0x926   : > { %v11295_v26 = vpack.c.bf16 %v6856_v23, %v6855_v18  ;;  %v7891_v39 = vadd.f32 %v7890_v49, %v7889_v16  ;;  %v7892_v15 = vpop.f32.mrb[214].mxu1  ;;  %v2617_v16 = vld [vmem:[%s11539_s7 + $0x740] sm:$0xff] }
 0x927   : > { %v7893_v44 = vpop.f32.mrb[215].mxu1 }
 0x928   : > { %v6761_v5 = vadd.f32 %v7891_v39, %v6600_v17  ;;  %v7894_v10 = vadd.f32 %v7893_v44, %v7892_v15  ;;  %v6624_v15 = vadd.f32 %v11205_v24, %v2617_v16  ;;  %v2620_v24 = vld [vmem:[%s11539_s7 + $0x758] sm:$0xff] }
 0x92a   : > { %v6764_v50 = vadd.f32 %v7894_v10, %v6603_v21  ;;  %v6857_v30 = vmax.f32 %v6761_v5, 0.0  ;;  %v6627_v10 = vadd.f32 %v11207_v42, %v2618_v8 }
 0x92c   : > { %v6858_v58 = vmax.f32 %v6764_v50, 0.0  ;;  %v7895_v52 = vpop.f32.mrb[216].mxu1 }
 0x92d   : > { %v7896_v14 = vpop.f32.mrb[217].mxu1 }
 0x92e   : > { %v11305_v62 = vpack.c.bf16 %v6858_v58, %v6857_v30  ;;  %v7897_v55 = vadd.f32 %v7896_v14, %v7895_v52  ;;  %v7898_v54 = vpop.f32.mrb[218].mxu1  ;;  %v2619_v58 = vld [vmem:[%s11539_s7 + $0x750] sm:$0xff] }
 0x92f   : > { %v7899_v61 = vpop.f32.mrb[219].mxu1 }
 0x930   : > { %v6769_v31 = vadd.f32 %v7897_v55, %v6608_v3  ;;  %v7900_v51 = vadd.f32 %v7899_v61, %v7898_v54  ;;  %v6632_v55 = vadd.f32 %v11209_v27, %v2619_v58  ;;  %v2622_v27 = vld [vmem:[%s11539_s7 + $0x768] sm:$0xff] }
 0x932   : > { %v6772_v34 = vadd.f32 %v7900_v51, %v6611_v33  ;;  %v6859_v12 = vmax.f32 %v6769_v31, 0.0  ;;  %v6635_v31 = vadd.f32 %v11211_v2, %v2620_v24 }
 0x934   : > { %v6860_v9 = vmax.f32 %v6772_v34, 0.0  ;;  %v7901_v29 = vpop.f32.mrb[220].mxu1 }
 0x935   : > { %v7902_v37 = vpop.f32.mrb[221].mxu1 }
 0x936   : > { %v11315_v53 = vpack.c.bf16 %v6860_v9, %v6859_v12  ;;  %v7903_v35 = vadd.f32 %v7902_v37, %v7901_v29  ;;  %v7904_v1 = vpop.f32.mrb[222].mxu1  ;;  %v2621_v12 = vld [vmem:[%s11539_s7 + $0x760] sm:$0xff] }
 0x937   : > { %v7905_v32 = vpop.f32.mrb[223].mxu1  ;;  %v6640_v2 = vadd.f32 %v11213_v38, %v2621_v12  ;;  %v2624_v38 = vld [vmem:[%s11539_s7 + $0x778] sm:$0xff] }
 0x938   : > { %v6777_v11 = vadd.f32 %v7903_v35, %v6616_v46  ;;  %v7906_v18 = vadd.f32 %v7905_v32, %v7904_v1 }
 0x93a   : > { %v6780_v23 = vadd.f32 %v7906_v18, %v6619_v4  ;;  %v6861_v59 = vmax.f32 %v6777_v11, 0.0 }
 0x93c   : > { %v6862_v49 = vmax.f32 %v6780_v23, 0.0  ;;  %v7907_v17 = vpop.f32.mrb[224].mxu1  ;;  %v2623_v23 = vld [vmem:[%s11539_s7 + $0x770] sm:$0xff] }
 0x93d   : > { %v7908_v39 = vpop.f32.mrb[225].mxu1 }
 0x93e   : > { %v11325_v44 = vpack.c.bf16 %v6862_v49, %v6861_v59  ;;  %v7909_v7 = vadd.f32 %v7908_v39, %v7907_v17  ;;  %v7910_v21 = vpop.f32.mrb[226].mxu1 }
 0x93f   : > { %v7911_v5 = vpop.f32.mrb[227].mxu1 }
 0x940   : > { %v6785_v50 = vadd.f32 %v7909_v7, %v6624_v15  ;;  %v7912_v47 = vadd.f32 %v7911_v5, %v7910_v21 }
 0x942   : > { %v6788_v30 = vadd.f32 %v7912_v47, %v6627_v10  ;;  %v6863_v52 = vmax.f32 %v6785_v50, 0.0  ;;  %v2625_v50 = vld [vmem:[%s11539_s7 + $0x780] sm:$0xff] }
 0x944   : > { %v6864_v28 = vmax.f32 %v6788_v30, 0.0  ;;  %v7913_v14 = vpop.f32.mrb[228].mxu1 }
 0x945   : > { %v7914_v3 = vpop.f32.mrb[229].mxu1 }
 0x946   : > { %v7915_v54 = vadd.f32 %v7914_v3, %v7913_v14  ;;  %v7916_v61 = vpop.f32.mrb[230].mxu1  ;;  %v6903_v42 = vpack.c.bf16 %v6864_v28, %v6863_v52 }
 0x947   : > { %v7917_v33 = vpop.f32.mrb[231].mxu1 }
 0x948   : > { %v6793_v51 = vadd.f32 %v7915_v54, %v6632_v55  ;;  %v7918_v34 = vadd.f32 %v7917_v33, %v7916_v61  ;;  %7955 = vmatprep.subr.bf16.mxu1 %v6903_v42  ;;  %v2627_v42 = vld [vmem:[%s11539_s7 + $0x790] sm:$0xff] }
 0x949   : > { %7956 = vmatpush3.bf16.msra.mxu1 %v11255_v13  ;;  %v6643_v13 = vadd.f32 %v11215_v40, %v2622_v27  ;;  %v6648_v40 = vadd.f32 %v11217_v36, %v2623_v23  ;;  %v2626_v36 = vld [vmem:[%s11539_s7 + $0x788] sm:$0xff] }
 0x94a   : > { %v6796_v41 = vadd.f32 %v7918_v34, %v6635_v31  ;;  %v6865_v9 = vmax.f32 %v6793_v51, 0.0 }
 0x94c   : > { %v6866_v29 = vmax.f32 %v6796_v41, 0.0  ;;  %v7919_v63 = vpop.f32.mrb[232].mxu1 }
 0x94d   : > { %v7920_v37 = vpop.f32.mrb[233].mxu1 }
 0x94e   : > { %v7921_v46 = vadd.f32 %v7920_v37, %v7919_v63  ;;  %v7922_v35 = vpop.f32.mrb[234].mxu1  ;;  %v6904_v1 = vpack.c.bf16 %v6866_v29, %v6865_v9 }
 0x94f   : > { %v7923_v32 = vpop.f32.mrb[235].mxu1 }
 0x950   : > { %v6801_v4 = vadd.f32 %v7921_v46, %v6640_v2  ;;  %v7924_v11 = vadd.f32 %v7923_v32, %v7922_v35  ;;  %7957 = vmatprep.subr.bf16.mxu1 %v6904_v1  ;;  %v2629_v2 = vld [vmem:[%s11539_s7 + $0x7a0] sm:$0xff] }
 0x951   : > { %7958 = vmatpush3.bf16.msra.mxu1 %v11265_v6  ;;  %v6651_v6 = vadd.f32 %v11219_v19, %v2624_v38  ;;  %v6656_v19 = vadd.f32 %v11221_v0, %v2625_v50  ;;  %v2628_v0 = vld [vmem:[%s11539_s7 + $0x798] sm:$0xff] }
 0x952   : > { %v6804_v18 = vadd.f32 %v7924_v11, %v6643_v13  ;;  %v6867_v16 = vmax.f32 %v6801_v4, 0.0 }
 0x954   : > { %v6868_v59 = vmax.f32 %v6804_v18, 0.0  ;;  %v7925_v49 = vpop.f32.mrb[236].mxu1 }
 0x955   : > { %v7926_v17 = vpop.f32.mrb[237].mxu1 }
 0x956   : > { %v7927_v8 = vadd.f32 %v7926_v17, %v7925_v49  ;;  %v7928_v39 = vpop.f32.mrb[238].mxu1  ;;  %v6905_v15 = vpack.c.bf16 %v6868_v59, %v6867_v16  ;;  %v2631_v49 = vld [vmem:[%s11539_s7 + $0x7b0] sm:$0xff] }
 0x957   : > { %v7929_v7 = vpop.f32.mrb[239].mxu1 }
 0x958   : > { %v6809_v21 = vadd.f32 %v7927_v8, %v6648_v40  ;;  %v7930_v5 = vadd.f32 %v7929_v7, %v7928_v39  ;;  %7959 = vmatprep.subr.bf16.mxu1 %v6905_v15 }
 0x959   : > { %7960 = vmatpush3.bf16.msra.mxu1 %v11275_v57  ;;  %v6659_v57 = vadd.f32 %v11223_v45, %v2626_v36  ;;  %v6664_v45 = vadd.f32 %v11225_v56, %v2627_v42  ;;  %v2630_v56 = vld [vmem:[%s11539_s7 + $0x7a8] sm:$0xff]  ;;  %v8883_v36 = vld [vmem:[%s11538_s6 + $0x34] ss:$8 sps:$4 sm:$0xff]   ;;  %v2633_v42 = vld [vmem:[%s11539_s7 + $0x7c0] sm:$0xff] }
 0x95a   : > { %v6812_v10 = vadd.f32 %v7930_v5, %v6651_v6  ;;  %v6869_v47 = vmax.f32 %v6809_v21, 0.0 }
 0x95c   : > { %v6870_v30 = vmax.f32 %v6812_v10, 0.0  ;;  %v7931_v58 = vpop.f32.mrb[240].mxu1 }
 0x95d   : > { %v7932_v52 = vpop.f32.mrb[241].mxu1 }
 0x95e   : > { %v7933_v28 = vadd.f32 %v7932_v52, %v7931_v58  ;;  %v7934_v14 = vpop.f32.mrb[242].mxu1  ;;  %v6906_v24 = vpack.c.bf16 %v6870_v30, %v6869_v47  ;;  %v8880_v58 = vld [vmem:[%s11538_s6 + $0x24] ss:$8 sps:$4 sm:$0xff]   ;;  %v8881_v52 = vld [vmem:[%s11538_s6 + $0x30] ss:$8 sps:$4 sm:$0xff]  }
 0x95f   : > { %v7935_v3 = vpop.f32.mrb[243].mxu1 }
 0x960   : > { %v6817_v55 = vadd.f32 %v7933_v28, %v6656_v19  ;;  %v7936_v54 = vadd.f32 %v7935_v3, %v7934_v14  ;;  %7961 = vmatprep.subr.bf16.mxu1 %v6906_v24  ;;  %v8886_v19 = vld [vmem:[%s11538_s6 + $0x44] ss:$8 sps:$4 sm:$0xff]   ;;  %v8884_v28 = vld [vmem:[%s11538_s6 + $0x40] ss:$8 sps:$4 sm:$0xff]   ;;  %v8889_v14 = vld [vmem:[%s11538_s6 + $0x54] ss:$8 sps:$4 sm:$0xff]  }
 0x961   : > { %7962 = vmatpush3.bf16.msra.mxu1 %v11285_v20  ;;  %v6667_v20 = vadd.f32 %v11227_v22, %v2628_v0  ;;  %v6672_v22 = vadd.f32 %v11229_v48, %v2629_v2  ;;  %v2632_v48 = vld [vmem:[%s11539_s7 + $0x7b8] sm:$0xff]  ;;  %v8892_v3 = vld [vmem:[%s11538_s6 + $0x64] ss:$8 sps:$4 sm:$0xff]  }
 0x962   : > { %v6820_v61 = vadd.f32 %v7936_v54, %v6659_v57  ;;  %v6871_v33 = vmax.f32 %v6817_v55, 0.0  ;;  %v8887_v24 = vld [vmem:[%s11538_s6 + $0x50] ss:$8 sps:$4 sm:$0xff]   ;;  %v8890_v57 = vld [vmem:[%s11538_s6 + $0x60] ss:$8 sps:$4 sm:$0xff]  }
 0x963   : > { %v8895_v55 = vld [vmem:[%s11538_s6 + $0x74] ss:$8 sps:$4 sm:$0xff]   ;;  %v8893_v54 = vld [vmem:[%s11538_s6 + $0x70] ss:$8 sps:$4 sm:$0xff]   ;;  %v2634_v0 = vld [vmem:[%s11539_s7 + $0x7c8] sm:$0xff] }
 0x964   : > { %v6872_v31 = vmax.f32 %v6820_v61, 0.0  ;;  %v7937_v51 = vpop.f32.mrb[244].mxu1 }
 0x965   : > { %v7938_v34 = vpop.f32.mrb[245].mxu1 }
 0x966   : > { %v7939_v41 = vadd.f32 %v7938_v34, %v7937_v51  ;;  %v7940_v12 = vpop.f32.mrb[246].mxu1  ;;  %v6907_v9 = vpack.c.bf16 %v6872_v31, %v6871_v33 }
 0x967   : > { %v7941_v29 = vpop.f32.mrb[247].mxu1 }
 0x968   : > { %v6825_v63 = vadd.f32 %v7939_v41, %v6664_v45  ;;  %v7942_v27 = vadd.f32 %v7941_v29, %v7940_v12  ;;  %7963 = vmatprep.subr.bf16.mxu1 %v6907_v9  ;;  %v2635_v29 = vld [vmem:[%s11539_s7 + $0x7d0] sm:$0xff] }
 0x969   : > { %7964 = vmatpush3.bf16.msra.mxu1 %v11295_v26  ;;  %v6675_v26 = vadd.f32 %v11231_v60, %v2630_v56  ;;  %v6680_v60 = vadd.f32 %v11233_v43, %v2631_v49  ;;  %v8872_v43 = vld [vmem:[%s11538_s6] ss:$8 sps:$4 sm:$0xff]   ;;  %v2639_v49 = vld [vmem:[%s11539_s7 + $0x7f0] sm:$0xff] }
 0x96a   : > { %v6828_v37 = vadd.f32 %v7942_v27, %v6667_v20  ;;  %v6873_v46 = vmax.f32 %v6825_v63, 0.0 }
 0x96c   : > { %v6874_v35 = vmax.f32 %v6828_v37, 0.0  ;;  %v7943_v1 = vpop.f32.mrb[248].mxu1  ;;  %v2636_v37 = vld [vmem:[%s11539_s7 + $0x7d8] sm:$0xff] }
 0x96d   : > { %v7944_v32 = vpop.f32.mrb[249].mxu1 }
 0x96e   : > { %v7945_v13 = vadd.f32 %v7944_v32, %v7943_v1  ;;  %v7946_v4 = vpop.f32.mrb[250].mxu1  ;;  %v6908_v11 = vpack.c.bf16 %v6874_v35, %v6873_v46  ;;  %v2637_v32 = vld [vmem:[%s11539_s7 + $0x7e0] sm:$0xff] }
 0x96f   : > { %v7947_v18 = vpop.f32.mrb[251].mxu1 }
 0x970   : > { %v6833_v23 = vadd.f32 %v7945_v13, %v6672_v22  ;;  %v7948_v16 = vadd.f32 %v7947_v18, %v7946_v4  ;;  %7965 = vmatprep.subr.bf16.mxu1 %v6908_v11  ;;  %v2638_v11 = vld [vmem:[%s11539_s7 + $0x7e8] sm:$0xff] }
 0x971   : > { %7966 = vmatpush3.bf16.msra.mxu1 %v11305_v62  ;;  %v6683_v62 = vadd.f32 %v11235_v25, %v2632_v48  ;;  %v8877_v25 = vld [vmem:[%s11538_s6 + $0x14] ss:$8 sps:$4 sm:$0xff]  }
 0x972   : > { %v6836_v59 = vadd.f32 %v7948_v16, %v6675_v26  ;;  %v6875_v38 = vmax.f32 %v6833_v23, 0.0  ;;  %v2640_v48 = vld [vmem:[%s11539_s7 + $0x7f8] sm:$0xff] }
 0x974   : > { %v6876_v17 = vmax.f32 %v6836_v59, 0.0  ;;  %v7949_v40 = vpop.f32.mrb[252].mxu1 }
 0x975   : > { %v7950_v8 = vpop.f32.mrb[253].mxu1 }
 0x976   : > { %v7951_v39 = vadd.f32 %v7950_v8, %v7949_v40  ;;  %v7952_v15 = vpop.f32.mrb[254].mxu1  ;;  %v6909_v7 = vpack.c.bf16 %v6876_v17, %v6875_v38 }
 0x977   : > { %v7953_v6 = vpop.f32.mrb[255].mxu1 }
 0x978   : > { %v6841_v21 = vadd.f32 %v7951_v39, %v6680_v60  ;;  %v7954_v5 = vadd.f32 %v7953_v6, %v7952_v15  ;;  %7967 = vmatprep.subr.bf16.mxu1 %v6909_v7  ;;  %v2641_v6 = vld [vmem:[%s11539_s7 + $0x800] sm:$0xff] }
 0x979   : > { %7968 = vmatpush3.bf16.msra.mxu1 %v11315_v53  ;;  %v8875_v53 = vld [vmem:[%s11538_s6 + $0x10] ss:$8 sps:$4 sm:$0xff]  }
 0x97a   : > { %v6844_v10 = vadd.f32 %v7954_v5, %v6683_v62  ;;  %v6877_v50 = vmax.f32 %v6841_v21, 0.0 }
 0x97c   : > { %v6878_v47 = vmax.f32 %v6844_v10, 0.0  ;;  %v2642_v10 = vld [vmem:[%s11539_s7 + $0x808] sm:$0xff] }
 0x97e   : > { %v6910_v30 = vpack.c.bf16 %v6878_v47, %v6877_v50 }
 0x980   : > { %7969 = vmatprep.subr.bf16.mxu1 %v6910_v30 }
 0x981   : > { %7970 = vmatpush3.bf16.msra.mxu1 %v11325_v44  ;;  %v8878_v44 = vld [vmem:[%s11538_s6 + $0x20] ss:$8 sps:$4 sm:$0xff]  }
 0x984   : > { %7024 = vmatmul.mubr.bf16.vlgmr.msra.gmra.mrb[0].mxu1 %v8872_v43 }
 0x985   : > { %7031 = vmatprep.mubr.bf16.mxu1 %v8877_v25 }
 0x98c   : > { %7032 = vmatmul.mubr.bf16.gmra.mrb[4].mxu1 %v8875_v53  ;;  %v2643_v53 = vld [vmem:[%s11539_s7 + $0x810] sm:$0xff] }
 0x98d   : > { %7039 = vmatprep.mubr.bf16.mxu1 %v8880_v58 }
 0x994   : > { %7040 = vmatmul.mubr.bf16.gmra.mrb[8].mxu1 %v8878_v44 }
 0x995   : > { %7047 = vmatprep.mubr.bf16.mxu1 %v8883_v36 }
 0x99c   : > { %7048 = vmatmul.mubr.bf16.gmra.mrb[12].mxu1 %v8881_v52  ;;  %v2644_v52 = vld [vmem:[%s11539_s7 + $0x818] sm:$0xff] }
 0x99d   : > { %7055 = vmatprep.mubr.bf16.mxu1 %v8886_v19 }
 0x9a4   : > { %7056 = vmatmul.mubr.bf16.gmra.mrb[16].mxu1 %v8884_v28 }
 0x9a5   : > { %7063 = vmatprep.mubr.bf16.mxu1 %v8889_v14 }
 0x9ac   : > { %7064 = vmatmul.mubr.bf16.gmra.mrb[20].mxu1 %v8887_v24 }
 0x9ad   : > { %7071 = vmatprep.mubr.bf16.mxu1 %v8892_v3 }
 0x9b4   : > { %7072 = vmatmul.mubr.bf16.gmra.mrb[24].mxu1 %v8890_v57  ;;  %v2645_v57 = vld [vmem:[%s11539_s7 + $0x820] sm:$0xff] }
 0x9b5   : > { %7079 = vmatprep.mubr.bf16.mxu1 %v8895_v55 }
 0x9bc   : > { %7080 = vmatmul.mubr.bf16.gmra.mrb[28].mxu1 %v8893_v54 }
 0xa57   : > { %v7971_v61 = vpop.f32.mrb[0].mxu1 }
 0xa58   : > { %v7972_v33 = vpop.f32.mrb[1].mxu1 }
 0xa59   : > { %v7973_v31 = vadd.f32 %v7972_v33, %v7971_v61  ;;  %v7974_v51 = vpop.f32.mrb[2].mxu1 }
 0xa5a   : > { %v7975_v34 = vpop.f32.mrb[3].mxu1 }
 0xa5b   : > { %v7026_v45 = vadd.f32 %v7973_v31, %v2633_v42  ;;  %v7976_v41 = vadd.f32 %v7975_v34, %v7974_v51  ;;  %v2646_v42 = vld [vmem:[%s11539_s7 + $0x828] sm:$0xff] }
 0xa5d   : > { %7089 = vst.msk [vmem:[%s9165_s21] sm:$0xff] %vm7088_vm4, %v7026_v45  ;;  %v7029_v12 = vadd.f32 %v7976_v41, %v2634_v0  ;;  %v2647_v45 = vld [vmem:[%s11539_s7 + $0x830] sm:$0xff] }
 0xa5f   : > { %7090 = vst.msk [vmem:[%s9165_s21 + $0x8] sm:$0xff] %vm7088_vm4, %v7029_v12  ;;  %v7977_v9 = vpop.f32.mrb[4].mxu1 }
 0xa60   : > { %v7978_v20 = vpop.f32.mrb[5].mxu1 }
 0xa61   : > { %v7979_v63 = vadd.f32 %v7978_v20, %v7977_v9  ;;  %v7980_v27 = vpop.f32.mrb[6].mxu1 }
 0xa62   : > { %v7981_v2 = vpop.f32.mrb[7].mxu1 }
 0xa63   : > { %v7034_v46 = vadd.f32 %v7979_v63, %v2635_v29  ;;  %v7982_v35 = vadd.f32 %v7981_v2, %v7980_v27  ;;  %v2648_v29 = vld [vmem:[%s11539_s7 + $0x838] sm:$0xff] }
 0xa65   : > { %7091 = vst.msk [vmem:[%s9165_s21 + $0x10] sm:$0xff] %vm7088_vm4, %v7034_v46  ;;  %v7037_v1 = vadd.f32 %v7982_v35, %v2636_v37 }
 0xa67   : > { %7092 = vst.msk [vmem:[%s9165_s21 + $0x18] sm:$0xff] %vm7088_vm4, %v7037_v1  ;;  %v7983_v56 = vpop.f32.mrb[8].mxu1 }
 0xa68   : > { %v7984_v22 = vpop.f32.mrb[9].mxu1 }
 0xa69   : > { %v7985_v13 = vadd.f32 %v7984_v22, %v7983_v56  ;;  %v7986_v4 = vpop.f32.mrb[10].mxu1 }
 0xa6a   : > { %v7987_v18 = vpop.f32.mrb[11].mxu1 }
 0xa6b   : > { %v7042_v26 = vadd.f32 %v7985_v13, %v2637_v32  ;;  %v7988_v23 = vadd.f32 %v7987_v18, %v7986_v4 }
 0xa6d   : > { %7093 = vst.msk [vmem:[%s9165_s21 + $0x20] sm:$0xff] %vm7088_vm4, %v7042_v26  ;;  %v7045_v16 = vadd.f32 %v7988_v23, %v2638_v11 }
 0xa6f   : > { %7094 = vst.msk [vmem:[%s9165_s21 + $0x28] sm:$0xff] %vm7088_vm4, %v7045_v16  ;;  %v7989_v59 = vpop.f32.mrb[12].mxu1 }
 0xa70   : > { %v7990_v38 = vpop.f32.mrb[13].mxu1 }
 0xa71   : > { %v7991_v17 = vadd.f32 %v7990_v38, %v7989_v59  ;;  %v7992_v40 = vpop.f32.mrb[14].mxu1 }
 0xa72   : > { %v7993_v8 = vpop.f32.mrb[15].mxu1 }
 0xa73   : > { %v7050_v60 = vadd.f32 %v7991_v17, %v2639_v49  ;;  %v7994_v39 = vadd.f32 %v7993_v8, %v7992_v40 }
 0xa75   : > { %7095 = vst.msk [vmem:[%s9165_s21 + $0x30] sm:$0xff] %vm7088_vm4, %v7050_v60  ;;  %v7053_v15 = vadd.f32 %v7994_v39, %v2640_v48 }
 0xa77   : > { %7096 = vst.msk [vmem:[%s9165_s21 + $0x38] sm:$0xff] %vm7088_vm4, %v7053_v15  ;;  %v7995_v7 = vpop.f32.mrb[16].mxu1 }
 0xa78   : > { %v7996_v62 = vpop.f32.mrb[17].mxu1 }
 0xa79   : > { %v7997_v21 = vadd.f32 %v7996_v62, %v7995_v7  ;;  %v7998_v5 = vpop.f32.mrb[18].mxu1 }
 0xa7a   : > { %v7999_v50 = vpop.f32.mrb[19].mxu1 }
 0xa7b   : > { %v7058_v47 = vadd.f32 %v7997_v21, %v2641_v6  ;;  %v8000_v30 = vadd.f32 %v7999_v50, %v7998_v5 }
 0xa7d   : > { %7097 = vst.msk [vmem:[%s9165_s21 + $0x40] sm:$0xff] %vm7088_vm4, %v7058_v47  ;;  %v7061_v43 = vadd.f32 %v8000_v30, %v2642_v10 }
 0xa7f   : > { %7098 = vst.msk [vmem:[%s9165_s21 + $0x48] sm:$0xff] %vm7088_vm4, %v7061_v43  ;;  %v8001_v25 = vpop.f32.mrb[20].mxu1 }
 0xa80   : > { %v8002_v58 = vpop.f32.mrb[21].mxu1 }
 0xa81   : > { %v8003_v44 = vadd.f32 %v8002_v58, %v8001_v25  ;;  %v8004_v36 = vpop.f32.mrb[22].mxu1 }
 0xa82   : > { %v8005_v19 = vpop.f32.mrb[23].mxu1 }
 0xa83   : > { %v7066_v28 = vadd.f32 %v8003_v44, %v2643_v53  ;;  %v8006_v14 = vadd.f32 %v8005_v19, %v8004_v36 }
 0xa85   : > { %7099 = vst.msk [vmem:[%s9165_s21 + $0x50] sm:$0xff] %vm7088_vm4, %v7066_v28  ;;  %v7069_v24 = vadd.f32 %v8006_v14, %v2644_v52 }
 0xa87   : > { %7100 = vst.msk [vmem:[%s9165_s21 + $0x58] sm:$0xff] %vm7088_vm4, %v7069_v24  ;;  %v8007_v3 = vpop.f32.mrb[24].mxu1 }
 0xa88   : > { %v8008_v55 = vpop.f32.mrb[25].mxu1 }
 0xa89   : > { %v8009_v54 = vadd.f32 %v8008_v55, %v8007_v3  ;;  %v8010_v61 = vpop.f32.mrb[26].mxu1 }
 0xa8a   : > { %v8011_v33 = vpop.f32.mrb[27].mxu1 }
 0xa8b   : > { %v7074_v31 = vadd.f32 %v8009_v54, %v2645_v57  ;;  %v8012_v51 = vadd.f32 %v8011_v33, %v8010_v61 }
 0xa8d   : > { %7101 = vst.msk [vmem:[%s9165_s21 + $0x60] sm:$0xff] %vm7088_vm4, %v7074_v31  ;;  %v7077_v0 = vadd.f32 %v8012_v51, %v2646_v42 }
 0xa8f   : > { %7102 = vst.msk [vmem:[%s9165_s21 + $0x68] sm:$0xff] %vm7088_vm4, %v7077_v0  ;;  %v8013_v34 = vpop.f32.mrb[28].mxu1 }
 0xa90   : > { %v8014_v41 = vpop.f32.mrb[29].mxu1 }
 0xa91   : > { %v8015_v12 = vadd.f32 %v8014_v41, %v8013_v34  ;;  %v8016_v9 = vpop.f32.mrb[30].mxu1 }
 0xa92   : > { %v8017_v20 = vpop.f32.mrb[31].mxu1 }
 0xa93   : > { %v7082_v63 = vadd.f32 %v8015_v12, %v2647_v45  ;;  %v8018_v27 = vadd.f32 %v8017_v20, %v8016_v9 }
 0xa95   : > { %7103 = vst.msk [vmem:[%s9165_s21 + $0x70] sm:$0xff] %vm7088_vm4, %v7082_v63  ;;  %v7085_v37 = vadd.f32 %v8018_v27, %v2648_v29 }
 0xa97   : > { %7104 = vst.msk [vmem:[%s9165_s21 + $0x78] sm:$0xff] %vm7088_vm4, %v7085_v37 }
 0xa98 PF: > { %s20_s9 = sadd.s32 1, %s8998_s9   ;;  %s11569_s16 = sld [smem:[#allocation9_spill]] }
 0xa99   : > { %p17_p11 = scmp.ge.s32.totalorder %s20_s9, 6   ;;  %s11570_s26 = sld [smem:[#allocation10_spill]] }
 0xa9a   : > { %s11571_s27 = smov %s8990_s29  ;;  %s11572_s28 = smov %s8994_s30 }
 0xa9b   :  { %19 = sbr.rel (!%p17_p11) target bundleno = 4 (0x4), region = 99 }
 0xa9e   : > { %s11573_s29 = smov %s11569_s16 }
 0xa9f   : > { %s11574_s30 = smov %s11570_s26 }
 0xaa2   :  { %7126 = vsyncpa [#allocation4], 1 }
 0xaa3   :  { %7128 = vsyncpa [#allocation4 + $0x1], 1 }
 0xaa4   :  { %7129 = vsyncpa [#allocation6], 1 }

</bundles_post_ra>
